<compile_context>
chip_gen: v6e
topology: v6e:2x2x1
jax: 0.10.0
libtpu: 0.0.40
codegen_flags: <defaults>
</compile_context>

<pallas_src>
import jax
import jax.numpy as jnp
from jax import lax
from jax.experimental import pallas as pl
from jax.experimental.pallas import tpu as pltpu


def _round_up(x, m):
    return ((x + m - 1) // m) * m


def dssm_kernel(tok_ref, embed_ref,
                w1_ref, b1_ref, w2_ref, b2_ref, w3_ref, b3_ref,
                out_ref):
    Vp = embed_ref.shape[0]
    two_tb, S = tok_ref.shape
    tb = two_tb // 2
    cdt = embed_ref.dtype  # bf16 compute dtype for MXU operands

    # Bag-of-words counts for BOTH towers at once: (2tb, Vp) in bf16.
    # The iota is a single (1, 1, Vp) row; the compare broadcasts it, so the
    # only large intermediate is the bf16 compare/reduce tensor (half the f32
    # footprint).  bf16 counts are exact for S <= 256 (integer-valued sums).
    # NOTE: on v5e (no bf16 VALU) this reduce runs at f32 VPU rate anyway;
    # correctness is unaffected.
    vocab_iota = lax.broadcasted_iota(jnp.int32, (1, 1, Vp), 2)
    counts = jnp.sum((tok_ref[...][:, :, None] == vocab_iota).astype(cdt),
                     axis=1)                                            # (2tb, Vp)

    # embedding-bag sum == counts @ embedding table (duplicate tokens counted).
    # TODO(synk): for large vocabularies (V >~ 2K, esp. v7x's 64 MiB VMEM)
    # replace this whole-table-in-VMEM one-hot matmul with an HBM row gather
    # (embed in pl.ANY + manual double-buffered make_async_copy, tokens via
    # scalar prefetch) so VMEM and VPU cost become independent of V.
    x = jnp.dot(counts, embed_ref[...],
                preferred_element_type=jnp.float32)                     # (2tb, Ep)

    def dense_relu(h, w_ref, b_ref):
        y = jnp.dot(h.astype(w_ref.dtype), w_ref[...],
                    preferred_element_type=jnp.float32) + b_ref[...]
        return jnp.maximum(y, 0.0)

    # Shared tower — ONE pass over the stacked (a, b) activations.
    h = dense_relu(x, w1_ref, b1_ref)        # (2tb, 256)
    h = dense_relu(h, w2_ref, b2_ref)        # (2tb, 512)
    h = dense_relu(h, w3_ref, b3_ref)        # (2tb, Lp)

    a = h[:tb]
    b = h[tb:]
    out_ref[...] = jnp.abs(a - b) + a * b


def dssm_forward(a_tok, b_tok, params, *, batch_tile=512):
    B, S = a_tok.shape
    assert S <= 256, "bf16 bag-of-words counts are exact only for S <= 256"
    V, E = params["embed"].shape
    L = params["b3"].shape[-1]

    Ep = _round_up(E, 128)      # 100 -> 128: lane-dense K for the first matmul
    Lp = _round_up(L, 128)      # label dim -> 128: unmasked output stores
    Vp = _round_up(V, 128)      # vocab axis lane-dense for compare/reduce + K

    # Batch tile: multiple of 128 so 2*tb is a multiple of 256 (full MXU
    # M-passes on v6e/v7x) and the grid stays >= 2 for batches > batch_tile
    # (sharding across v7x's two TensorCores).  Default 512 keeps v5e's tighter
    # scoped-VMEM budget comfortable.
    tb = min(batch_tile, _round_up(B, 128))
    grid = pl.cdiv(B, tb)
    Bp = grid * tb

    f32, bf16 = jnp.float32, jnp.bfloat16

    # --- pad & cast parameters (weights bf16, biases f32) ---
    embed_p = jnp.zeros((Vp, Ep), bf16).at[:V, :E].set(params["embed"].astype(bf16))
    w1_p = jnp.zeros((Ep, 256), bf16).at[:E, :].set(params["w1"].astype(bf16))
    w2_p = params["w2"].astype(bf16)
    w3_p = jnp.zeros((512, Lp), bf16).at[:, :L].set(params["w3"].astype(bf16))
    b1_p = params["b1"].astype(f32)
    b2_p = params["b2"].astype(f32)
    b3_p = jnp.zeros((1, Lp), f32).at[:, :L].set(params["b3"].astype(f32))

    # --- pad & pre-stack tokens: one (grid*2*tb, S) array, tile i holds the
    # a-rows of tile i followed by its b-rows -> no in-kernel concat/reshape.
    # Padded rows use token id V: it hits only zero-padded embedding rows (or
    # nothing at all when Vp == V), so pad rows contribute exactly zero.
    pad_id = V
    a_p = jnp.full((Bp, S), pad_id, jnp.int32).at[:B].set(a_tok.astype(jnp.int32))
    b_p = jnp.full((Bp, S), pad_id, jnp.int32).at[:B].set(b_tok.astype(jnp.int32))
    tok = jnp.concatenate(
        [a_p.reshape(grid, tb, S), b_p.reshape(grid, tb, S)], axis=1
    ).reshape(grid * 2 * tb, S)

    tok_spec = pl.BlockSpec((2 * tb, S), lambda i: (i, 0))

    # TODO(synk): constant-index weight/table blocks are still double-buffered
    # by the pipeline; for big V on v7x, single-buffer them (pl.ANY + one-time
    # copy into VMEM scratch) to halve their resident footprint.
    def const(shape):
        return pl.BlockSpec(shape, lambda i: (0, 0))

    out_p = pl.pallas_call(
        dssm_kernel,
        out_shape=jax.ShapeDtypeStruct((Bp, Lp), f32),
        grid=(grid,),
        in_specs=[
            tok_spec,
            const((Vp, Ep)),
            const((Ep, 256)), const((1, 256)),
            const((256, 512)), const((1, 512)),
            const((512, Lp)), const((1, Lp)),
        ],
        out_specs=pl.BlockSpec((tb, Lp), lambda i: (i, 0)),
        compiler_params=pltpu.CompilerParams(
            dimension_semantics=("parallel",),
            vmem_limit_bytes=64 * 1024 * 1024),
    )(tok, embed_p, w1_p, b1_p, w2_p, b2_p, w3_p, b3_p)

    return out_p[:B, :L]


def ref_forward(a_tok, b_tok, p):
    """Pure-JAX f32 reference mirroring the PyTorch forward."""
    ea = p["embed"][a_tok].sum(axis=1)
    eb = p["embed"][b_tok].sum(axis=1)

    def tower(x):
        h = jnp.maximum(x @ p["w1"] + p["b1"], 0.0)
        h = jnp.maximum(h @ p["w2"] + p["b2"], 0.0)
        h = jnp.maximum(h @ p["w3"] + p["b3"], 0.0)
        return h

    a = tower(ea)
    b = tower(eb)
    return jnp.abs(a - b) + a * b


def init_params(embed_size, label_size, key):
    ks = jax.random.split(key, 7)
    scale = 0.05
    return {
        "embed": scale * jax.random.normal(ks[0], (embed_size, 100), jnp.float32),
        "w1": scale * jax.random.normal(ks[1], (100, 256), jnp.float32),
        "b1": scale * jax.random.normal(ks[2], (1, 256), jnp.float32),
        "w2": scale * jax.random.normal(ks[3], (256, 512), jnp.float32),
        "b2": scale * jax.random.normal(ks[4], (1, 512), jnp.float32),
        "w3": scale * jax.random.normal(ks[5], (512, label_size), jnp.float32),
        "b3": scale * jax.random.normal(ks[6], (1, label_size), jnp.float32),
    }


if __name__ == "__main__":
    embed_size = 64   # vocab size
    label_size = 8
    B, S = 4, 8

    key = jax.random.PRNGKey(0)
    k_tok_a, k_tok_b, k_par = jax.random.split(key, 3)
    a_tok = jax.random.randint(k_tok_a, (B, S), 0, embed_size, dtype=jnp.int32)
    b_tok = jax.random.randint(k_tok_b, (B, S), 0, embed_size, dtype=jnp.int32)
    params = init_params(embed_size, label_size, k_par)

    out = dssm_forward(a_tok, b_tok, params)
    jax.block_until_ready(out)

    ref = ref_forward(a_tok, b_tok, params)
    # Weights run in bf16 inside the kernel -> loosened tolerance vs f32 ref.
    if not jnp.allclose(out, ref, atol=1e-2, rtol=5e-2):
        max_err = jnp.max(jnp.abs(out - ref))
        raise AssertionError(
            f"Pallas kernel does not match JAX reference (max abs err {max_err})")

    print("KERNEL_OK")
</pallas_src>

<mosaic_0001>
module attributes {stable_mosaic.version = 11 : i64} {
  func.func @dssm_kernel(%arg0: i32, %arg1: memref<256x8xi32, #tpu.memory_space<vmem>>, %arg2: memref<128x128xbf16, #tpu.memory_space<vmem>>, %arg3: memref<128x256xbf16, #tpu.memory_space<vmem>>, %arg4: memref<1x256xf32, #tpu.memory_space<vmem>>, %arg5: memref<256x512xbf16, #tpu.memory_space<vmem>>, %arg6: memref<1x512xf32, #tpu.memory_space<vmem>>, %arg7: memref<512x128xbf16, #tpu.memory_space<vmem>>, %arg8: memref<1x128xf32, #tpu.memory_space<vmem>>, %arg9: memref<128x128xf32, #tpu.memory_space<vmem>>) attributes {dimension_semantics = [#tpu.dimension_semantics<parallel>], iteration_bounds = array<i64: 1>, scalar_prefetch = 0 : i64, scratch_operands = 0 : i64, tpu.core_type = #tpu.core_type<tc>, window_params = [{transform_indices = @transform_0, window_bounds = array<i64: 256, 8>}, {pipeline_mode = #tpu.pipeline_mode<synchronous>, transform_indices = @transform_1, window_bounds = array<i64: 128, 128>}, {pipeline_mode = #tpu.pipeline_mode<synchronous>, transform_indices = @transform_2, window_bounds = array<i64: 128, 256>}, {pipeline_mode = #tpu.pipeline_mode<synchronous>, transform_indices = @transform_3, window_bounds = array<i64: 1, 256>}, {pipeline_mode = #tpu.pipeline_mode<synchronous>, transform_indices = @transform_4, window_bounds = array<i64: 256, 512>}, {pipeline_mode = #tpu.pipeline_mode<synchronous>, transform_indices = @transform_5, window_bounds = array<i64: 1, 512>}, {pipeline_mode = #tpu.pipeline_mode<synchronous>, transform_indices = @transform_6, window_bounds = array<i64: 512, 128>}, {pipeline_mode = #tpu.pipeline_mode<synchronous>, transform_indices = @transform_7, window_bounds = array<i64: 1, 128>}, {transform_indices = @transform_8, window_bounds = array<i64: 128, 128>}]} {
    %0 = tpu.iota {dimensions = array<i32: 2>} : vector<1x1x128xi32>
    %c0 = arith.constant 0 : index
    %c0_0 = arith.constant 0 : index
    %1 = vector.load %arg1[%c0, %c0_0] : memref<256x8xi32, #tpu.memory_space<vmem>>, vector<256x8xi32>
    %2 = vector.shape_cast %1 : vector<256x8xi32> to vector<256x8x1xi32>
    %3 = vector.broadcast %2 : vector<256x8x1xi32> to vector<256x8x128xi32>
    %4 = vector.broadcast %0 : vector<1x1x128xi32> to vector<256x8x128xi32>
    %5 = arith.cmpi eq, %3, %4 : vector<256x8x128xi32>
    %6 = arith.extui %5 : vector<256x8x128xi1> to vector<256x8x128xi32>
    %7 = arith.sitofp %6 : vector<256x8x128xi32> to vector<256x8x128xf32>
    %8 = arith.truncf %7 : vector<256x8x128xf32> to vector<256x8x128xbf16>
    %9 = arith.extf %8 : vector<256x8x128xbf16> to vector<256x8x128xf32>
    %cst = arith.constant dense<0.000000e+00> : vector<256x128xf32>
    %10 = vector.multi_reduction <add>, %9, %cst [1] : vector<256x8x128xf32> to vector<256x128xf32>
    %11 = arith.truncf %10 : vector<256x128xf32> to vector<256x128xbf16>
    %c0_1 = arith.constant 0 : index
    %c0_2 = arith.constant 0 : index
    %12 = vector.load %arg2[%c0_1, %c0_2] : memref<128x128xbf16, #tpu.memory_space<vmem>>, vector<128x128xbf16>
    %cst_3 = arith.constant dense<0.000000e+00> : vector<256x128xf32>
    %13 = tpu.matmul %11, %12, %cst_3 {dimension_numbers = #tpu.dot_dimension_numbers<[1], [0], [0], [1], [0, 0, 1, 1], [], []>} : vector<256x128xbf16>, vector<128x128xbf16>, vector<256x128xf32> -> vector<256x128xf32>
    %14 = arith.truncf %13 : vector<256x128xf32> to vector<256x128xbf16>
    %c0_4 = arith.constant 0 : index
    %c0_5 = arith.constant 0 : index
    %15 = vector.load %arg3[%c0_4, %c0_5] : memref<128x256xbf16, #tpu.memory_space<vmem>>, vector<128x256xbf16>
    %cst_6 = arith.constant dense<0.000000e+00> : vector<256x256xf32>
    %16 = tpu.matmul %14, %15, %cst_6 {dimension_numbers = #tpu.dot_dimension_numbers<[1], [0], [0], [1], [0, 0, 1, 1], [], []>} : vector<256x128xbf16>, vector<128x256xbf16>, vector<256x256xf32> -> vector<256x256xf32>
    %c0_7 = arith.constant 0 : index
    %c0_8 = arith.constant 0 : index
    %17 = vector.load %arg4[%c0_7, %c0_8] : memref<1x256xf32, #tpu.memory_space<vmem>>, vector<1x256xf32>
    %18 = vector.broadcast %17 : vector<1x256xf32> to vector<256x256xf32>
    %19 = arith.addf %16, %18 : vector<256x256xf32>
    %cst_9 = arith.constant 0.000000e+00 : f32
    %20 = vector.broadcast %cst_9 : f32 to vector<256x256xf32>
    %21 = arith.maximumf %19, %20 : vector<256x256xf32>
    %22 = arith.truncf %21 : vector<256x256xf32> to vector<256x256xbf16>
    %c0_10 = arith.constant 0 : index
    %c0_11 = arith.constant 0 : index
    %23 = vector.load %arg5[%c0_10, %c0_11] : memref<256x512xbf16, #tpu.memory_space<vmem>>, vector<256x512xbf16>
    %cst_12 = arith.constant dense<0.000000e+00> : vector<256x512xf32>
    %24 = tpu.matmul %22, %23, %cst_12 {dimension_numbers = #tpu.dot_dimension_numbers<[1], [0], [0], [1], [0, 0, 1, 1], [], []>} : vector<256x256xbf16>, vector<256x512xbf16>, vector<256x512xf32> -> vector<256x512xf32>
    %c0_13 = arith.constant 0 : index
    %c0_14 = arith.constant 0 : index
    %25 = vector.load %arg6[%c0_13, %c0_14] : memref<1x512xf32, #tpu.memory_space<vmem>>, vector<1x512xf32>
    %26 = vector.broadcast %25 : vector<1x512xf32> to vector<256x512xf32>
    %27 = arith.addf %24, %26 : vector<256x512xf32>
    %cst_15 = arith.constant 0.000000e+00 : f32
    %28 = vector.broadcast %cst_15 : f32 to vector<256x512xf32>
    %29 = arith.maximumf %27, %28 : vector<256x512xf32>
    %30 = arith.truncf %29 : vector<256x512xf32> to vector<256x512xbf16>
    %c0_16 = arith.constant 0 : index
    %c0_17 = arith.constant 0 : index
    %31 = vector.load %arg7[%c0_16, %c0_17] : memref<512x128xbf16, #tpu.memory_space<vmem>>, vector<512x128xbf16>
    %cst_18 = arith.constant dense<0.000000e+00> : vector<256x128xf32>
    %32 = tpu.matmul %30, %31, %cst_18 {dimension_numbers = #tpu.dot_dimension_numbers<[1], [0], [0], [1], [0, 0, 1, 1], [], []>} : vector<256x512xbf16>, vector<512x128xbf16>, vector<256x128xf32> -> vector<256x128xf32>
    %c0_19 = arith.constant 0 : index
    %c0_20 = arith.constant 0 : index
    %33 = vector.load %arg8[%c0_19, %c0_20] : memref<1x128xf32, #tpu.memory_space<vmem>>, vector<1x128xf32>
    %34 = vector.broadcast %33 : vector<1x128xf32> to vector<256x128xf32>
    %35 = arith.addf %32, %34 : vector<256x128xf32>
    %cst_21 = arith.constant 0.000000e+00 : f32
    %36 = vector.broadcast %cst_21 : f32 to vector<256x128xf32>
    %37 = arith.maximumf %35, %36 : vector<256x128xf32>
    %38 = vector.extract_strided_slice %37 {offsets = [0, 0], sizes = [128, 128], strides = [1, 1]} : vector<256x128xf32> to vector<128x128xf32>
    %39 = vector.extract_strided_slice %37 {offsets = [128, 0], sizes = [128, 128], strides = [1, 1]} : vector<256x128xf32> to vector<128x128xf32>
    %40 = arith.subf %38, %39 : vector<128x128xf32>
    %41 = math.absf %40 : vector<128x128xf32>
    %42 = arith.mulf %38, %39 : vector<128x128xf32>
    %43 = arith.addf %41, %42 : vector<128x128xf32>
    %c0_22 = arith.constant 0 : index
    %c0_23 = arith.constant 0 : index
    %44 = vector.load %arg9[%c0_22, %c0_23] : memref<128x128xf32, #tpu.memory_space<vmem>>, vector<128x128xf32>
    tpu.vector_store %arg9[%c0_22, %c0_23], %43 {strides = array<i32>} : memref<128x128xf32, #tpu.memory_space<vmem>>, vector<128x128xf32>,
    return
  }
  func.func @transform_0(%arg0: i32) -> (i32, i32) {
    %c0_i32 = arith.constant 0 : i32
    %c0_i32_0 = arith.constant 0 : i32
    return %arg0, %c0_i32 : i32, i32
  }
  func.func @transform_1(%arg0: i32) -> (i32, i32) {
    %c0_i32 = arith.constant 0 : i32
    %c0_i32_0 = arith.constant 0 : i32
    %c0_i32_1 = arith.constant 0 : i32
    return %c0_i32, %c0_i32_0 : i32, i32
  }
  func.func @transform_2(%arg0: i32) -> (i32, i32) {
    %c0_i32 = arith.constant 0 : i32
    %c0_i32_0 = arith.constant 0 : i32
    %c0_i32_1 = arith.constant 0 : i32
    return %c0_i32, %c0_i32_0 : i32, i32
  }
  func.func @transform_3(%arg0: i32) -> (i32, i32) {
    %c0_i32 = arith.constant 0 : i32
    %c0_i32_0 = arith.constant 0 : i32
    %c0_i32_1 = arith.constant 0 : i32
    return %c0_i32, %c0_i32_0 : i32, i32
  }
  func.func @transform_4(%arg0: i32) -> (i32, i32) {
    %c0_i32 = arith.constant 0 : i32
    %c0_i32_0 = arith.constant 0 : i32
    %c0_i32_1 = arith.constant 0 : i32
    return %c0_i32, %c0_i32_0 : i32, i32
  }
  func.func @transform_5(%arg0: i32) -> (i32, i32) {
    %c0_i32 = arith.constant 0 : i32
    %c0_i32_0 = arith.constant 0 : i32
    %c0_i32_1 = arith.constant 0 : i32
    return %c0_i32, %c0_i32_0 : i32, i32
  }
  func.func @transform_6(%arg0: i32) -> (i32, i32) {
    %c0_i32 = arith.constant 0 : i32
    %c0_i32_0 = arith.constant 0 : i32
    %c0_i32_1 = arith.constant 0 : i32
    return %c0_i32, %c0_i32_0 : i32, i32
  }
  func.func @transform_7(%arg0: i32) -> (i32, i32) {
    %c0_i32 = arith.constant 0 : i32
    %c0_i32_0 = arith.constant 0 : i32
    %c0_i32_1 = arith.constant 0 : i32
    return %c0_i32, %c0_i32_0 : i32, i32
  }
  func.func @transform_8(%arg0: i32) -> (i32, i32) {
    %c0_i32 = arith.constant 0 : i32
    %c0_i32_0 = arith.constant 0 : i32
    return %arg0, %c0_i32 : i32, i32
  }
}

</mosaic_0001>

<bundles_post_ra>
// kernel: tpu_custom_call.1
= control target key start
LH: loop header
LB: loop body
LE: loop exit
PB: predicated region body
PF: predicated region fallthrough
CT: control target
= control target key end

     0   :  { %13 = vsyncpa [#allocation3], 0  ;;  %s12728_s0 = inlined_call_operand.vmem [shape: s32[256,8], index: 0, kind: input, shape index: {}]   ;;  %s12729_s1 = inlined_call_operand.hbm [shape: bf16[128,128], index: 1, kind: input, shape index: {}]   ;;  %s12730_s2 = inlined_call_operand.hbm [shape: bf16[128,256], index: 2, kind: input, shape index: {}]   ;;  %s12731_s3 = inlined_call_operand.vmem [shape: f32[1,256], index: 3, kind: input, shape index: {}]   ;;  %s12732_s4 = inlined_call_operand.hbm [shape: bf16[256,512], index: 4, kind: input, shape index: {}]   ;;  %s12733_s5 = inlined_call_operand.vmem [shape: f32[1,512], index: 5, kind: input, shape index: {}]   ;;  %s12734_s6 = inlined_call_operand.vmem [shape: bf16[512,128], index: 6, kind: input, shape index: {}]   ;;  %s12735_s7 = inlined_call_operand.vmem [shape: f32[1,128], index: 7, kind: input, shape index: {}]   ;;  %s12736_s8 = inlined_call_operand.hbm [shape: f32[128,128], index: 8, kind: output, shape index: {}]  }
   0x1   :  { %14 = vsyncpa [#allocation6], 0 }
   0x2   :  { %15 = vsyncpa [#allocation4], 0  ;;  %s9048_s27 = smov [#allocation5]  }
   0x3   :  { %s35_s28 = sshll.u32 %s9048_s27, 4  ;;  %s36_s28 = int_to_ptr.vmem [resolvable:$true] %s35_s28 }
   0x4   :  { %s8970_s29 = scalar_lea.vmem %s36_s28, 2048  ;;  %p8975_p1 = scmp.lt.s32.totalorder %s36_s28, %s36_s28 }
   0x5   :  { %p8971_p0 = scmp.ne.s32.totalorder %s36_s28, %s8970_s29  ;;  %p8976_p2 = scmp.lt.s32.totalorder %s8970_s29, %s8970_s29 }
   0x7   :  { %p8977_p3 = por %p8976_p2, %p8975_p1 }
   0x9   :  { %p8978_p4 = pnand %p8977_p3, %p8971_p0 }
   0xb   :  { %8981 = shalt.err (!%p8978_p4)
}
   0xc   :  { %s9049_s30 = smov 128   ;;  %s9050_s9 = smov 8  }
   0xd   :  { %41 = dma.hbm_to_vmem [thread:$0]  %s12730_s2, 2048, %s36_s28, [#allocation6], %s9049_s30, %s9049_s30, %s9050_s9  }
   0xe   :  { %s9051_s12 = smov [#allocation2]  }
   0xf   :  { %s23_s13 = sshll.u32 %s9051_s12, 4  ;;  %s24_s13 = int_to_ptr.vmem [resolvable:$true] %s23_s13 }
  0x10   :  { %s8990_s14 = scalar_lea.vmem %s24_s13, 1024  ;;  %p8995_p6 = scmp.lt.s32.totalorder %s24_s13, %s24_s13 }
  0x11   :  { %p8991_p5 = scmp.ne.s32.totalorder %s24_s13, %s8990_s14  ;;  %p8996_p7 = scmp.lt.s32.totalorder %s8990_s14, %s8990_s14 }
  0x13   :  { %p8997_p8 = por %p8996_p7, %p8995_p6 }
  0x15   :  { %p8998_p9 = pnand %p8997_p8, %p8991_p5 }
  0x17   :  { %9001 = shalt.err (!%p8998_p9)
}
  0x18   :  { %s9052_s15 = smov 64   ;;  %s9053_s16 = smov 4  }
  0x19   :  { %29 = dma.hbm_to_vmem [thread:$0]  %s12729_s1, 1024, %s24_s13, [#allocation3], %s9052_s15, %s9052_s15, %s9053_s16  }
  0x1a   :  { %s9054_s19 = smov [#allocation7]  }
  0x1b   :  { %s49_s20 = sshll.u32 %s9054_s19, 4  ;;  %s50_s20 = int_to_ptr.vmem [resolvable:$true] %s49_s20 }
  0x1c   :  { %s9010_s2 = scalar_lea.vmem %s50_s20, 8192  ;;  %p9015_p11 = scmp.lt.s32.totalorder %s50_s20, %s50_s20 }
  0x1d   :  { %p9011_p10 = scmp.ne.s32.totalorder %s50_s20, %s9010_s2  ;;  %p9016_p12 = scmp.lt.s32.totalorder %s9010_s2, %s9010_s2 }
  0x1f   :  { %p9017_p13 = por %p9016_p12, %p9015_p11 }
  0x21   :  { %p9018_p0 = pnand %p9017_p13, %p9011_p10 }
  0x23   :  { %9021 = shalt.err (!%p9018_p0)
}
  0x24   :  { %s9055_s21 = smov 256   ;;  %s9056_s22 = smov 16  }
  0x25   :  { %55 = dma.hbm_to_vmem [thread:$0]  %s12732_s4, 8192, %s50_s20, [#allocation6], %s9055_s21, %s9055_s21, %s9056_s22  }
  0x26   :  { %9042 = dma.done.wait [#allocation3], 1024  }
  0x27   :  { %9043 = vsyncadd [#allocation3], 4294966272 }
  0x28   :  { %9044 = dma.done.wait [#allocation6], 10240  }
  0x29   :  { %9045 = vsyncadd [#allocation6], 4294957056  ;;  %v72_v0 = vlaneseq  ;;  %v9125_v4 = vld [vmem:[%s12728_s0 + $0x8] sm:$0xff]  ;;  %v9130_v5 = vld [vmem:[%s12728_s0] sm:$0xff]  ;;  %vm5498_vm10 = vcmask 1041409  }
  0x2a   :  { %v9149_v13 = vld [vmem:[%s12728_s0 + $0x10] sm:$0xff]  ;;  %v9154_v14 = vld [vmem:[%s12728_s0 + $0x18] sm:$0xff]  ;;  %v9221_v48 = vld [vmem:[%s12728_s0 + $0x20] sm:$0xff] }
  0x2b   :  { %v107_v1 = vshrl.u32 %v72_v0, 7  ;;  %v8799_v44 = vld [vmem:[#allocation2 + $0x38] sm:$0xff]   ;;  %v8800_v47 = vld [vmem:[#allocation2 + $0x30] sm:$0xff]   ;;  %v8801_v51 = vld [vmem:[#allocation2 + $0x28] sm:$0xff]  }
  0x2c   :  { %8707 = vmatprep.subr.bf16.mxu0 %v8799_v44  ;;  %v9230_v52 = vld [vmem:[%s12728_s0 + $0x28] sm:$0xff]  ;;  %v8802_v55 = vld [vmem:[#allocation2 + $0x20] sm:$0xff]   ;;  %v8803_v58 = vld [vmem:[#allocation2 + $0x18] sm:$0xff]  }
  0x2d   :  { %v9118_v2 = vsub.s32 0, %v107_v1  ;;  %v9120_v3 = vsub.s32 1, %v107_v1  ;;  %v9140_v10 = vsub.s32 2, %v107_v1  ;;  %v9164_v19 = vsub.s32 3, %v107_v1  ;;  %8708 = vmatpush3.bf16.msra.mxu0 %v8799_v44  ;;  %v9243_v59 = vld [vmem:[%s12728_s0 + $0x30] sm:$0xff]  ;;  %v9252_v62 = vld [vmem:[%s12728_s0 + $0x38] sm:$0xff] }
  0x2e   :  { %v9174_v24 = vsub.s32 4, %v107_v1  ;;  %v9184_v29 = vsub.s32 5, %v107_v1  ;;  %v9190_v32 = vsub.s32 6, %v107_v1  ;;  %v9192_v33 = vsub.s32 7, %v107_v1  ;;  %8709 = vmatprep.subr.bf16.mxu0 %v8800_v47  ;;  %v8804_v63 = vld [vmem:[#allocation2 + $0x10] sm:$0xff]  }
  0x2f   :  { %v165_v6 = vrot.slane %v9125_v4, %v9118_v2  ;;  %v109_v7 = vrot.slane %v9130_v5, %v9118_v2  ;;  %v172_v8 = vrot.slane %v9125_v4, %v9120_v3  ;;  %v116_v9 = vrot.slane %v9130_v5, %v9120_v3  ;;  %v9324_v44 = vld [vmem:[%s12728_s0 + $0x50] sm:$0xff] }
  0x30   :  { %v179_v11 = vrot.slane %v9125_v4, %v9140_v10  ;;  %v123_v12 = vrot.slane %v9130_v5, %v9140_v10  ;;  %v228_v15 = vrot.slane %v9149_v13, %v9120_v3  ;;  %v221_v16 = vrot.slane %v9149_v13, %v9118_v2 }
  0x31   :  { %167 = vbcast.lane.b32.xlu1 %v165_v6, 256  ;;  %111 = vbcast.lane.b32.xlu0 %v109_v7, 256  ;;  %v284_v17 = vrot.slane %v9154_v14, %v9120_v3  ;;  %v277_v18 = vrot.slane %v9154_v14, %v9118_v2  ;;  %v186_v20 = vrot.slane %v9125_v4, %v9164_v19 }
  0x32   :  { %v130_v21 = vrot.slane %v9130_v5, %v9164_v19  ;;  %v291_v22 = vrot.slane %v9154_v14, %v9140_v10  ;;  %v235_v23 = vrot.slane %v9149_v13, %v9140_v10  ;;  %v193_v25 = vrot.slane %v9125_v4, %v9174_v24  ;;  %8710 = vmatpush3.bf16.msra.mxu0 %v8800_v47 }
  0x33   :  { %v137_v26 = vrot.slane %v9130_v5, %v9174_v24  ;;  %v298_v27 = vrot.slane %v9154_v14, %v9164_v19  ;;  %v242_v28 = vrot.slane %v9149_v13, %v9164_v19  ;;  %v200_v30 = vrot.slane %v9125_v4, %v9184_v29  ;;  %8711 = vmatprep.subr.bf16.mxu0 %v8801_v51 }
  0x34   :  { %v144_v31 = vrot.slane %v9130_v5, %v9184_v29  ;;  %v305_v34 = vrot.slane %v9154_v14, %v9174_v24  ;;  %v249_v35 = vrot.slane %v9149_v13, %v9174_v24  ;;  %v207_v36 = vrot.slane %v9125_v4, %v9190_v32 }
  0x35   :  { %174 = vbcast.lane.b32.xlu1 %v172_v8, 256  ;;  %118 = vbcast.lane.b32.xlu0 %v116_v9, 256  ;;  %v151_v37 = vrot.slane %v9130_v5, %v9190_v32  ;;  %v312_v38 = vrot.slane %v9154_v14, %v9184_v29  ;;  %v256_v39 = vrot.slane %v9149_v13, %v9184_v29 }
  0x36   :  { %v214_v40 = vrot.slane %v9125_v4, %v9192_v33  ;;  %v158_v41 = vrot.slane %v9130_v5, %v9192_v33  ;;  %v319_v42 = vrot.slane %v9154_v14, %v9190_v32  ;;  %v263_v43 = vrot.slane %v9149_v13, %v9190_v32  ;;  %8712 = vmatpush3.bf16.msra.mxu0 %v8801_v51  ;;  %v8805_v5 = vld [vmem:[#allocation2 + $0x8] sm:$0xff]   ;;  %v9335_v51 = vld [vmem:[%s12728_s0 + $0x58] sm:$0xff] }
  0x37   :  { %v326_v45 = vrot.slane %v9154_v14, %v9192_v33  ;;  %v270_v46 = vrot.slane %v9149_v13, %v9192_v33  ;;  %v340_v49 = vrot.slane %v9221_v48, %v9120_v3  ;;  %v333_v50 = vrot.slane %v9221_v48, %v9118_v2  ;;  %8713 = vmatprep.subr.bf16.mxu0 %v8802_v55 }
  0x38   :  { %v396_v53 = vrot.slane %v9230_v52, %v9120_v3  ;;  %v389_v54 = vrot.slane %v9230_v52, %v9118_v2  ;;  %v403_v56 = vrot.slane %v9230_v52, %v9140_v10  ;;  %v347_v57 = vrot.slane %v9221_v48, %v9140_v10 }
  0x39   :  { %181 = vbcast.lane.b32.xlu1 %v179_v11, 256  ;;  %125 = vbcast.lane.b32.xlu0 %v123_v12, 256  ;;  %v452_v60 = vrot.slane %v9243_v59, %v9120_v3  ;;  %v445_v61 = vrot.slane %v9243_v59, %v9118_v2  ;;  %v508_v1 = vrot.slane %v9252_v62, %v9120_v3 }
  0x3a   :  { %8714 = vmatpush3.bf16.msra.mxu0 %v8802_v55  ;;  %v501_v4 = vrot.slane %v9252_v62, %v9118_v2  ;;  %v410_v6 = vrot.slane %v9230_v52, %v9164_v19  ;;  %v354_v7 = vrot.slane %v9221_v48, %v9164_v19  ;;  %v515_v8 = vrot.slane %v9252_v62, %v9140_v10 }
  0x3b   :  { %8715 = vmatprep.subr.bf16.mxu0 %v8803_v58  ;;  %v459_v9 = vrot.slane %v9243_v59, %v9140_v10  ;;  %v417_v11 = vrot.slane %v9230_v52, %v9174_v24  ;;  %v361_v12 = vrot.slane %v9221_v48, %v9174_v24  ;;  %v522_v13 = vrot.slane %v9252_v62, %v9164_v19 }
  0x3c   :  { %v466_v14 = vrot.slane %v9243_v59, %v9164_v19 }
  0x3d   :  { %230 = vbcast.lane.b32.xlu1 %v228_v15, 256  ;;  %223 = vbcast.lane.b32.xlu0 %v221_v16, 256  ;;  %v424_v15 = vrot.slane %v9230_v52, %v9184_v29  ;;  %v368_v16 = vrot.slane %v9221_v48, %v9184_v29 }
  0x3e   :  { %8716 = vmatpush3.bf16.msra.mxu0 %v8803_v58 }
  0x3f   :  { %8717 = vmatprep.subr.bf16.mxu0 %v8804_v63 }
  0x41   :  { %286 = vbcast.lane.b32.xlu1 %v284_v17, 256  ;;  %279 = vbcast.lane.b32.xlu0 %v277_v18, 256  ;;  %v529_v17 = vrot.slane %v9252_v62, %v9174_v24  ;;  %v473_v18 = vrot.slane %v9243_v59, %v9174_v24 }
  0x42   :  { %8718 = vmatpush3.bf16.msra.mxu0 %v8804_v63 }
  0x43   :  { %8719 = vmatprep.subr.bf16.mxu0 %v8805_v5 }
  0x45   :  { %188 = vbcast.lane.b32.xlu1 %v186_v20, 256  ;;  %132 = vbcast.lane.b32.xlu0 %v130_v21, 256  ;;  %v431_v20 = vrot.slane %v9230_v52, %v9190_v32  ;;  %v375_v21 = vrot.slane %v9221_v48, %v9190_v32 }
  0x46   :  { %8720 = vmatpush3.bf16.msra.mxu0 %v8805_v5 }
  0x49   :  { %293 = vbcast.lane.b32.xlu1 %v291_v22, 256  ;;  %237 = vbcast.lane.b32.xlu0 %v235_v23, 256  ;;  %v536_v22 = vrot.slane %v9252_v62, %v9184_v29  ;;  %v480_v23 = vrot.slane %v9243_v59, %v9184_v29 }
  0x4d   :  { %195 = vbcast.lane.b32.xlu1 %v193_v25, 256  ;;  %139 = vbcast.lane.b32.xlu0 %v137_v26, 256  ;;  %v9291_v25 = vand.u32 127, %v72_v0  ;;  %v8806_v26 = vld [vmem:[#allocation2] sm:$0xff]   ;;  %v9307_v0 = vld [vmem:[%s12728_s0 + $0x48] sm:$0xff] }
  0x4e   :  { %8721 = vmatprep.subr.bf16.mxu0 %v8806_v26  ;;  %v634_v5 = vrot.slane %v9307_v0, %v9164_v19 }
  0x4f   :  { %8722 = vmatpush3.bf16.msra.mxu0 %v8806_v26 }
  0x51   :  { %300 = vbcast.lane.b32.xlu1 %v298_v27, 256  ;;  %244 = vbcast.lane.b32.xlu0 %v242_v28, 256  ;;  %v438_v27 = vrot.slane %v9230_v52, %v9192_v33  ;;  %v382_v28 = vrot.slane %v9221_v48, %v9192_v33 }
  0x55   :  { %202 = vbcast.lane.b32.xlu1 %v200_v30, 256  ;;  %146 = vbcast.lane.b32.xlu0 %v144_v31, 256 }
  0x59   :  { %307 = vbcast.lane.b32.xlu1 %v305_v34, 256  ;;  %251 = vbcast.lane.b32.xlu0 %v249_v35, 256  ;;  %v9300_v34 = vld [vmem:[%s12728_s0 + $0x40] sm:$0xff]  ;;  %v12737_v35 = vmov 0.0  }
  0x5a   :  { %v557_v48 = vrot.slane %v9300_v34, %v9118_v2 }
  0x5d   :  { %209 = vbcast.lane.b32.xlu1 %v207_v36, 256  ;;  %153 = vbcast.lane.b32.xlu0 %v151_v37, 256 }
  0x61   :  { %314 = vbcast.lane.b32.xlu1 %v312_v38, 256  ;;  %258 = vbcast.lane.b32.xlu0 %v256_v39, 256  ;;  %v543_v38 = vrot.slane %v9252_v62, %v9190_v32  ;;  %v487_v39 = vrot.slane %v9243_v59, %v9190_v32 }
  0x65   :  { %216 = vbcast.lane.b32.xlu1 %v214_v40, 256  ;;  %160 = vbcast.lane.b32.xlu0 %v158_v41, 256  ;;  %v550_v41 = vrot.slane %v9252_v62, %v9192_v33 }
  0x69   :  { %321 = vbcast.lane.b32.xlu1 %v319_v42, 256  ;;  %265 = vbcast.lane.b32.xlu0 %v263_v43, 256  ;;  %v494_v42 = vrot.slane %v9243_v59, %v9192_v33  ;;  %v564_v43 = vrot.slane %v9300_v34, %v9120_v3 }
  0x6d   :  { %328 = vbcast.lane.b32.xlu1 %v326_v45, 256  ;;  %272 = vbcast.lane.b32.xlu0 %v270_v46, 256 }
  0x71   :  { %342 = vbcast.lane.b32.xlu1 %v340_v49, 256  ;;  %335 = vbcast.lane.b32.xlu0 %v333_v50, 256  ;;  %v620_v49 = vrot.slane %v9307_v0, %v9120_v3  ;;  %v613_v50 = vrot.slane %v9307_v0, %v9118_v2 }
  0x75   :  { %398 = vbcast.lane.b32.xlu1 %v396_v53, 256  ;;  %391 = vbcast.lane.b32.xlu0 %v389_v54, 256  ;;  %v627_v53 = vrot.slane %v9307_v0, %v9140_v10 }
  0x79   :  { %405 = vbcast.lane.b32.xlu1 %v403_v56, 256  ;;  %349 = vbcast.lane.b32.xlu0 %v347_v57, 256  ;;  %v571_v56 = vrot.slane %v9300_v34, %v9140_v10  ;;  %v676_v57 = vrot.slane %v9324_v44, %v9120_v3 }
  0x7d   :  { %454 = vbcast.lane.b32.xlu1 %v452_v60, 256  ;;  %447 = vbcast.lane.b32.xlu0 %v445_v61, 256  ;;  %v669_v60 = vrot.slane %v9324_v44, %v9118_v2  ;;  %v732_v61 = vrot.slane %v9335_v51, %v9120_v3 }
  0x81   :  { %510 = vbcast.lane.b32.xlu1 %v508_v1, 256  ;;  %503 = vbcast.lane.b32.xlu0 %v501_v4, 256  ;;  %v725_v4 = vrot.slane %v9335_v51, %v9118_v2 }
  0x85   :  { %412 = vbcast.lane.b32.xlu1 %v410_v6, 256  ;;  %356 = vbcast.lane.b32.xlu0 %v354_v7, 256  ;;  %v578_v6 = vrot.slane %v9300_v34, %v9164_v19 }
  0x89   :  { %517 = vbcast.lane.b32.xlu1 %v515_v8, 256  ;;  %461 = vbcast.lane.b32.xlu0 %v459_v9, 256 }
  0x8d   :  { %419 = vbcast.lane.b32.xlu1 %v417_v11, 256  ;;  %363 = vbcast.lane.b32.xlu0 %v361_v12, 256  ;;  %v739_v11 = vrot.slane %v9335_v51, %v9140_v10  ;;  %v683_v12 = vrot.slane %v9324_v44, %v9140_v10 }
  0x91   :  { %524 = vbcast.lane.b32.xlu1 %v522_v13, 256  ;;  %468 = vbcast.lane.b32.xlu0 %v466_v14, 256  ;;  %v641_v13 = vrot.slane %v9307_v0, %v9174_v24  ;;  %v585_v14 = vrot.slane %v9300_v34, %v9174_v24 }
  0x95   :  { %426 = vbcast.lane.b32.xlu1 %v424_v15, 256  ;;  %370 = vbcast.lane.b32.xlu0 %v368_v16, 256  ;;  %v746_v15 = vrot.slane %v9335_v51, %v9164_v19  ;;  %v690_v16 = vrot.slane %v9324_v44, %v9164_v19 }
  0x99   :  { %531 = vbcast.lane.b32.xlu1 %v529_v17, 256  ;;  %475 = vbcast.lane.b32.xlu0 %v473_v18, 256 }
  0x9d   :  { %433 = vbcast.lane.b32.xlu1 %v431_v20, 256  ;;  %377 = vbcast.lane.b32.xlu0 %v375_v21, 256 }
  0xa1   :  { %538 = vbcast.lane.b32.xlu1 %v536_v22, 256  ;;  %482 = vbcast.lane.b32.xlu0 %v480_v23, 256  ;;  %v648_v23 = vrot.slane %v9307_v0, %v9184_v29 }
  0xa3   :  { %v168_v30 = vpop.permute.xlu1 %167  ;;  %v112_v31 = vpop.permute.xlu0 %111 }
  0xa4   :  { %vm1906_vm0 = vcmp.eq.s32.totalorder %v168_v30, %v9291_v25  ;;  %vm1898_vm1 = vcmp.eq.s32.totalorder %v112_v31, %v9291_v25 }
  0xa5   :  { %v8090_v36 = vsel %vm1906_vm0, 1.0, %v12737_v35  ;;  %v8082_v37 = vsel %vm1898_vm1, 1.0, %v12737_v35  ;;  %440 = vbcast.lane.b32.xlu1 %v438_v27, 256  ;;  %384 = vbcast.lane.b32.xlu0 %v382_v28, 256  ;;  %v592_v28 = vrot.slane %v9300_v34, %v9184_v29 }
  0xa6   :  { %v3226_v40 = vrot.slane %v8090_v36, 4  ;;  %v3178_v45 = vrot.slane %v8082_v37, 4 }
  0xa7   :  { %v175_v46 = vpop.permute.xlu1 %174  ;;  %v119_v47 = vpop.permute.xlu0 %118 }
  0xa8   :  { %v3227_v52 = vadd.f32 %v8090_v36, %v3226_v40  ;;  %vm1907_vm2 = vcmp.eq.s32.totalorder %v175_v46, %v9291_v25  ;;  %vm1899_vm3 = vcmp.eq.s32.totalorder %v119_v47, %v9291_v25  ;;  %v3179_v62 = vadd.f32 %v8082_v37, %v3178_v45 }
  0xa9   :  { %v8091_v54 = vsel %vm1907_vm2, 1.0, %v12737_v35  ;;  %v8083_v55 = vsel %vm1899_vm3, 1.0, %v12737_v35  ;;  %545 = vbcast.lane.b32.xlu1 %v543_v38, 256  ;;  %489 = vbcast.lane.b32.xlu0 %v487_v39, 256 }
  0xaa   :  { %v3232_v58 = vrot.slane %v8091_v54, 4  ;;  %v3184_v59 = vrot.slane %v8083_v55, 4  ;;  %v3228_v7 = vrot.slane %v3227_v52, 2  ;;  %v3180_v17 = vrot.slane %v3179_v62, 2 }
  0xab   :  { %v182_v63 = vpop.permute.xlu1 %181  ;;  %v126_v1 = vpop.permute.xlu0 %125 }
  0xac   :  { %v3233_v8 = vadd.f32 %v8091_v54, %v3232_v58  ;;  %v3185_v9 = vadd.f32 %v8083_v55, %v3184_v59  ;;  %vm1908_vm4 = vcmp.eq.s32.totalorder %v182_v63, %v9291_v25  ;;  %vm1900_vm5 = vcmp.eq.s32.totalorder %v126_v1, %v9291_v25  ;;  %v9408_v1 = vld [vmem:[%s12728_s0 + $0x60] sm:$0xff] }
  0xad   :  { %552 = vbcast.lane.b32.xlu1 %v550_v41, 256  ;;  %496 = vbcast.lane.b32.xlu0 %v494_v42, 256  ;;  %v8092_v20 = vsel %vm1908_vm4, 1.0, %v12737_v35  ;;  %v3229_v26 = vadd.f32 %v3228_v7, %v3227_v52  ;;  %v8084_v36 = vsel %vm1900_vm5, 1.0, %v12737_v35  ;;  %v3181_v41 = vadd.f32 %v3180_v17, %v3179_v62 }
  0xae   :  { %v3234_v18 = vrot.slane %v3233_v8, 2  ;;  %v3186_v27 = vrot.slane %v3185_v9, 2  ;;  %v3238_v31 = vrot.slane %v8092_v20, 4  ;;  %v3190_v52 = vrot.slane %v8084_v36, 4 }
  0xaf   :  { %v231_v21 = vpop.permute.xlu1 %230  ;;  %v224_v22 = vpop.permute.xlu0 %223  ;;  %v3230_v58 = vrot.slane %v3229_v26, 1 }
  0xb0   :  { %vm1915_vm6 = vcmp.eq.s32.totalorder %v231_v21, %v9291_v25  ;;  %vm1914_vm7 = vcmp.eq.s32.totalorder %v224_v22, %v9291_v25  ;;  %v3235_v42 = vadd.f32 %v3234_v18, %v3233_v8  ;;  %v3187_v59 = vadd.f32 %v3186_v27, %v3185_v9  ;;  %v9420_v22 = vld [vmem:[%s12728_s0 + $0x68] sm:$0xff] }
  0xb1   :  { %566 = vbcast.lane.b32.xlu1 %v564_v43, 256  ;;  %559 = vbcast.lane.b32.xlu0 %v557_v48, 256  ;;  %v8099_v45 = vsel %vm1915_vm6, 1.0, %v12737_v35  ;;  %v8098_v46 = vsel %vm1914_vm7, 1.0, %v12737_v35  ;;  %v3239_v48 = vadd.f32 %v8092_v20, %v3238_v31  ;;  %v3182_v9 = vrot.slane %v3181_v41, 1 }
  0xb2   :  { %v3280_v7 = vrot.slane %v8099_v45, 4  ;;  %v3274_v8 = vrot.slane %v8098_v46, 4  ;;  %v3191_v31 = vadd.f32 %v8084_v36, %v3190_v52  ;;  %v3188_v63 = vrot.slane %v3187_v59, 1 }
  0xb3   :  { %v287_v43 = vpop.permute.xlu1 %286  ;;  %v280_v47 = vpop.permute.xlu0 %279  ;;  %v3240_v27 = vrot.slane %v3239_v48, 2  ;;  %vm5500_vm6 = vcmask 1042434  }
  0xb4   :  { %vm1923_vm8 = vcmp.eq.s32.totalorder %v287_v43, %v9291_v25  ;;  %vm1922_vm9 = vcmp.eq.s32.totalorder %v280_v47, %v9291_v25  ;;  %v3281_v52 = vadd.f32 %v8099_v45, %v3280_v7  ;;  %v3275_v47 = vadd.f32 %v8098_v46, %v3274_v8  ;;  %v9444_v45 = vld [vmem:[%s12728_s0 + $0x70] sm:$0xff] }
  0xb5   :  { %622 = vbcast.lane.b32.xlu1 %v620_v49, 256  ;;  %615 = vbcast.lane.b32.xlu0 %v613_v50, 256  ;;  %v3236_v50 = vrot.slane %v3235_v42, 1  ;;  %v3231_v49 = vadd.f32 %v3230_v58, %v3229_v26  ;;  %v8107_v62 = vsel %vm1923_vm8, 1.0, %v12737_v35  ;;  %v3183_v58 = vadd.f32 %v3182_v9, %v3181_v41 }
  0xb6   :  { %v8106_v20 = vsel %vm1922_vm9, 1.0, %v12737_v35  ;;  %v3241_v46 = vadd.f32 %v3240_v27, %v3239_v48  ;;  %v3192_v7 = vrot.slane %v3191_v31, 2  ;;  %v3328_v8 = vrot.slane %v8107_v62, 4 }
  0xb7   :  { %v189_v17 = vpop.permute.xlu1 %188  ;;  %v133_v18 = vpop.permute.xlu0 %132  ;;  %v3237_v21 = vadd.f32 %v3236_v50, %v3235_v42  ;;  %v4722_v41 = vpack.c.bf16 %v3231_v49, %v3231_v49  ;;  %v3189_v42 = vadd.f32 %v3188_v63, %v3187_v59  ;;  %v3282_v9 = vrot.slane %v3281_v52, 2 }
  0xb8   :  { %vm1909_vm11 = vcmp.eq.s32.totalorder %v189_v17, %v9291_v25  ;;  %v3276_v48 = vrot.slane %v3275_v47, 2  ;;  %v3322_v50 = vrot.slane %v8106_v20, 4  ;;  %v4714_v26 = vpack.c.bf16 %v3183_v58, %v3183_v58 }
  0xb9   :  { %629 = vbcast.lane.b32.xlu1 %v627_v53, 256  ;;  %573 = vbcast.lane.b32.xlu0 %v571_v56, 256  ;;  %v4723_v49 = vpack.c.bf16 %v3237_v21, %v3237_v21  ;;  %vm1901_vm12 = vcmp.eq.s32.totalorder %v133_v18, %v9291_v25  ;;  %v3193_v43 = vadd.f32 %v3192_v7, %v3191_v31  ;;  %v5250_v54 = vunpack.c.l.b16 %v4722_v41 }
  0xba   :  { %v3329_v36 = vadd.f32 %v8107_v62, %v3328_v8  ;;  %v4715_v40 = vpack.c.bf16 %v3189_v42, %v3189_v42  ;;  %v3283_v21 = vadd.f32 %v3282_v9, %v3281_v52  ;;  %v3277_v58 = vadd.f32 %v3276_v48, %v3275_v47 }
  0xbb   :  { %v294_v53 = vpop.permute.xlu1 %293  ;;  %v238_v55 = vpop.permute.xlu0 %237  ;;  %v3323_v56 = vadd.f32 %v8106_v20, %v3322_v50  ;;  %v8085_v62 = vsel %vm1901_vm12, 1.0, %v12737_v35  ;;  %v5242_v17 = vunpack.c.l.b16 %v4714_v26  ;;  %v3194_v20 = vrot.slane %v3193_v43, 1 }
  0xbc   :  { %vm1924_vm13 = vcmp.eq.s32.totalorder %v294_v53, %v9291_v25  ;;  %vm1916_vm14 = vcmp.eq.s32.totalorder %v238_v55, %v9291_v25  ;;  %v3330_v47 = vrot.slane %v3329_v36, 2  ;;  %v3196_v41 = vrot.slane %v8085_v62, 4 }
  0xbd   :  { %678 = vbcast.lane.b32.xlu1 %v676_v57, 256  ;;  %671 = vbcast.lane.b32.xlu0 %v669_v60, 256  ;;  %v3242_v57 = vrot.slane %v3241_v46, 1  ;;  %v8093_v60 = vsel %vm1909_vm11, 1.0, %v12737_v35  ;;  %v8108_v53 = vsel %vm1924_vm13, 1.0, %v12737_v35  ;;  %v8100_v55 = vsel %vm1916_vm14, 1.0, %v12737_v35 }
  0xbe   :  { %v3244_v31 = vrot.slane %v8093_v60, 4  ;;  %v3334_v18 = vrot.slane %v8108_v53, 4  ;;  %v3286_v42 = vrot.slane %v8100_v55, 4  ;;  %v3284_v26 = vrot.slane %v3283_v21, 1 }
  0xbf   :  { %v196_v59 = vpop.permute.xlu1 %195  ;;  %v140_v63 = vpop.permute.xlu0 %139  ;;  %v3243_v52 = vadd.f32 %v3242_v57, %v3241_v46  ;;  %v3278_v9 = vrot.slane %v3277_v58, 1  ;;  %v3324_v48 = vrot.slane %v3323_v56, 2  ;;  %v3331_v38 = vadd.f32 %v3330_v47, %v3329_v36 }
  0xc0   :  { %vm1910_vm15 = vcmp.eq.s32.totalorder %v196_v59, %v9291_v25  ;;  %v3245_v46 = vadd.f32 %v8093_v60, %v3244_v31  ;;  %v3335_v50 = vadd.f32 %v8108_v53, %v3334_v18  ;;  %vm1902_vm0 = vcmp.eq.s32.totalorder %v140_v63, %v9291_v25 }
  0xc1   :  { %734 = vbcast.lane.b32.xlu1 %v732_v61, 256  ;;  %727 = vbcast.lane.b32.xlu0 %v725_v4, 256  ;;  %v5251_v61 = vunpack.c.l.b16 %v4723_v49  ;;  %v5243_v4 = vunpack.c.l.b16 %v4715_v40  ;;  %v8094_v49 = vsel %vm1910_vm15, 1.0, %v12737_v35  ;;  %v9490_v40 = vadd.f32 %v3194_v20, %v3193_v43 }
  0xc2   :  { %v3287_v39 = vadd.f32 %v8100_v55, %v3286_v42  ;;  %v3197_v37 = vadd.f32 %v8085_v62, %v3196_v41  ;;  %v3250_v30 = vrot.slane %v8094_v49, 4  ;;  %v3285_v60 = vadd.f32 %v3284_v26, %v3283_v21 }
  0xc3   :  { %v301_v7 = vpop.permute.xlu1 %300  ;;  %v9476_v8 = vpop.permute.xlu0 %244  ;;  %v9488_v27 = vsel %vm5498_vm10, %v5251_v61, %v5250_v54  ;;  %v9497_v63 = vsel %vm5498_vm10, %v5243_v4, %v5242_v17  ;;  %v9499_v31 = vadd.f32 %v3278_v9, %v3277_v58  ;;  %v3336_v54 = vrot.slane %v3335_v50, 2 }
  0xc4   :  { %v3325_v43 = vadd.f32 %v3324_v48, %v3323_v56  ;;  %v3246_v36 = vrot.slane %v3245_v46, 2  ;;  %vm1925_vm1 = vcmp.eq.s32.totalorder %v301_v7, %v9291_v25  ;;  %v4716_v21 = vpack.c.bf16 %v9490_v40, %v9490_v40 }
  0xc5   :  { %636 = vbcast.lane.b32.xlu1 %v634_v5, 256  ;;  %580 = vbcast.lane.b32.xlu0 %v578_v6, 256  ;;  %v4724_v5 = vpack.c.bf16 %v3243_v52, %v3243_v52  ;;  %v8086_v6 = vsel %vm1902_vm0, 1.0, %v12737_v35  ;;  %v3288_v58 = vrot.slane %v3287_v39, 2  ;;  %v8109_v17 = vsel %vm1925_vm1, 1.0, %v12737_v35 }
  0xc6   :  { %v3202_v62 = vrot.slane %v8086_v6, 4  ;;  %v3332_v61 = vrot.slane %v3331_v38, 1  ;;  %v3198_v52 = vrot.slane %v3197_v37, 2  ;;  %v3340_v56 = vrot.slane %v8109_v17, 4 }
  0xc7   :  { %v203_v57 = vpop.permute.xlu1 %202  ;;  %v147_v59 = vpop.permute.xlu0 %146  ;;  %v4731_v7 = vpack.c.bf16 %v3285_v60, %v3285_v60  ;;  %v4730_v20 = vpack.c.bf16 %v9499_v31, %v9499_v31  ;;  %v3337_v47 = vadd.f32 %v3336_v54, %v3335_v50  ;;  %vm1917_vm2 = vcmp.eq.s32.totalorder %v9476_v8, %v9291_v25 }
  0xc8   :  { %v3326_v41 = vrot.slane %v3325_v43, 1  ;;  %v3247_v18 = vadd.f32 %v3246_v36, %v3245_v46  ;;  %v3341_v42 = vadd.f32 %v8109_v17, %v3340_v56  ;;  %v8101_v9 = vsel %vm1917_vm2, 1.0, %v12737_v35 }
  0xc9   :  { %741 = vbcast.lane.b32.xlu1 %v739_v11, 256  ;;  %685 = vbcast.lane.b32.xlu0 %v683_v12, 256  ;;  %v9509_v11 = vunpack.c.l.b16 %v4724_v5  ;;  %v3251_v12 = vadd.f32 %v8094_v49, %v3250_v30  ;;  %v3203_v30 = vadd.f32 %v8086_v6, %v3202_v62  ;;  %vm1911_vm3 = vcmp.eq.s32.totalorder %v203_v57, %v9291_v25 }
  0xca   :  { %vm1903_vm4 = vcmp.eq.s32.totalorder %v147_v59, %v9291_v25  ;;  %v3333_v8 = vadd.f32 %v3332_v61, %v3331_v38  ;;  %v3199_v48 = vadd.f32 %v3198_v52, %v3197_v37  ;;  %v3342_v49 = vrot.slane %v3341_v42, 2 }
  0xcb   :  { %v9505_v53 = vpop.permute.xlu1 %307  ;;  %v9507_v55 = vpop.permute.xlu0 %251  ;;  %v3252_v50 = vrot.slane %v3251_v12, 2  ;;  %v3292_v46 = vrot.slane %v8101_v9, 4  ;;  %v8095_v5 = vsel %vm1911_vm3, 1.0, %v12737_v35  ;;  %v3327_v57 = vadd.f32 %v3326_v41, %v3325_v43 }
  0xcc   :  { %v3248_v59 = vrot.slane %v3247_v18, 1  ;;  %v3204_v38 = vrot.slane %v3203_v30, 2  ;;  %v3343_v37 = vadd.f32 %v3342_v49, %v3341_v42  ;;  %v3256_v54 = vrot.slane %v8095_v5, 4 }
  0xcd   :  { %643 = vbcast.lane.b32.xlu1 %v641_v13, 256  ;;  %587 = vbcast.lane.b32.xlu0 %v585_v14, 256  ;;  %v3289_v13 = vadd.f32 %v3288_v58, %v3287_v39  ;;  %v3338_v14 = vrot.slane %v3337_v47, 1  ;;  %v8087_v39 = vsel %vm1903_vm4, 1.0, %v12737_v35  ;;  %v5259_v62 = vunpack.c.l.b16 %v4731_v7 }
  0xce   :  { %v3208_v36 = vrot.slane %v8087_v39, 4  ;;  %v4739_v58 = vpack.c.bf16 %v3333_v8, %v3333_v8  ;;  %v3200_v17 = vrot.slane %v3199_v48, 1  ;;  %v3253_v61 = vadd.f32 %v3252_v50, %v3251_v12 }
  0xcf   :  { %v9524_v4 = vpop.permute.xlu1 %209  ;;  %v9526_v26 = vpop.permute.xlu0 %153  ;;  %v3290_v31 = vrot.slane %v3289_v13, 1  ;;  %v3257_v52 = vadd.f32 %v8095_v5, %v3256_v54  ;;  %v5258_v41 = vunpack.c.l.b16 %v4730_v20  ;;  %v4738_v42 = vpack.c.bf16 %v3327_v57, %v3327_v57 }
  0xd0   :  { %v3209_v56 = vadd.f32 %v8087_v39, %v3208_v36  ;;  %v3344_v49 = vrot.slane %v3343_v37, 1  ;;  %v3249_v12 = vadd.f32 %v3248_v59, %v3247_v18  ;;  %vm1926_vm5 = vcmp.eq.s32.totalorder %v9505_v53, %v9291_v25 }
  0xd1   :  { %748 = vbcast.lane.b32.xlu1 %v746_v15, 256  ;;  %692 = vbcast.lane.b32.xlu0 %v690_v16, 256  ;;  %v3293_v15 = vadd.f32 %v8101_v9, %v3292_v46  ;;  %v3339_v16 = vadd.f32 %v3338_v14, %v3337_v47  ;;  %v3205_v9 = vadd.f32 %v3204_v38, %v3203_v30  ;;  %v3258_v47 = vrot.slane %v3257_v52, 2 }
  0xd2   :  { %v3291_v50 = vadd.f32 %v3290_v31, %v3289_v13  ;;  %v3210_v14 = vrot.slane %v3209_v56, 2  ;;  %vm1918_vm7 = vcmp.eq.s32.totalorder %v9507_v55, %v9291_v25  ;;  %v9563_v20 = vunpack.c.l.b16 %v4716_v21 }
  0xd3   :  { %v9539_v6 = vpop.permute.xlu1 %314  ;;  %v9541_v60 = vpop.permute.xlu0 %258  ;;  %v3294_v43 = vrot.slane %v3293_v15, 2  ;;  %v5267_v18 = vunpack.c.l.b16 %v4739_v58  ;;  %v3201_v30 = vadd.f32 %v3200_v17, %v3199_v48  ;;  %v4740_v13 = vpack.c.bf16 %v3339_v16, %v3339_v16 }
  0xd4   :  { %v12740_v53 = vrot.slane %v9324_v44, %v9174_v24  ;;  %v5266_v5 = vunpack.c.l.b16 %v4738_v42  ;;  %v3206_v39 = vrot.slane %v3205_v9, 1  ;;  %v3345_v57 = vadd.f32 %v3344_v49, %v3343_v37 }
  0xd5   :  { %650 = vbcast.lane.b32.xlu1 %v648_v23, 256  ;;  %594 = vbcast.lane.b32.xlu0 %v592_v28, 256  ;;  %v3295_v46 = vadd.f32 %v3294_v43, %v3293_v15  ;;  %v3254_v23 = vrot.slane %v3253_v61, 1  ;;  %v12739_v28 = vrot.slane %v9335_v51, %v9174_v24  ;;  %v8110_v59 = vsel %vm1926_vm5, 1.0, %v12737_v35 }
  0xd6   :  { %v4725_v15 = vpack.c.bf16 %v3249_v12, %v3249_v12  ;;  %v4732_v40 = vpack.c.bf16 %v3291_v50, %v3291_v50  ;;  %v8102_v48 = vsel %vm1918_vm7, 1.0, %v12737_v35  ;;  %v5519_v54 = vsel %vm5498_vm10, %v5259_v62, %v5258_v41 }
  0xd7   :  { %v9549_v7 = vpop.permute.xlu1 %216  ;;  %v9551_v8 = vpop.permute.xlu0 %160  ;;  %v3296_v21 = vrot.slane %v3295_v46, 1  ;;  %v3255_v36 = vadd.f32 %v3254_v23, %v3253_v61  ;;  %v3259_v58 = vadd.f32 %v3258_v47, %v3257_v52  ;;  %v3211_v17 = vadd.f32 %v3210_v14, %v3209_v56 }
  0xd8   :  { %v12741_v37 = vrot.slane %v9307_v0, %v9190_v32  ;;  %v4717_v16 = vpack.c.bf16 %v3201_v30, %v3201_v30  ;;  %v5268_v43 = vunpack.c.l.b16 %v4740_v13  ;;  %vm5502_vm8 = vcmask 1043459  }
  0xd9   :  { %755 = vbcast.lane.b32.xlu1 %v12739_v28, 256  ;;  %699 = vbcast.lane.b32.xlu0 %v12740_v53, 256  ;;  %v3346_v42 = vrot.slane %v8110_v59, 4  ;;  %vm1912_vm9 = vcmp.eq.s32.totalorder %v9524_v4, %v9291_v25  ;;  %v12742_v55 = vrot.slane %v9300_v34, %v9190_v32  ;;  %v5526_v62 = vsel %vm5498_vm10, %v5267_v18, %v5266_v5 }
  0xda   :  { %v3207_v61 = vadd.f32 %v3206_v39, %v3205_v9  ;;  %v4741_v52 = vpack.c.bf16 %v3345_v57, %v3345_v57  ;;  %v3298_v56 = vrot.slane %v8102_v48, 4  ;;  %v9589_v49 = vunpack.c.l.b16 %v4725_v15 }
  0xdb   :  { %v9569_v38 = vpop.permute.xlu1 %321  ;;  %v9571_v31 = vpop.permute.xlu0 %265  ;;  %v5260_v12 = vunpack.c.l.b16 %v4732_v40  ;;  %v3297_v50 = vadd.f32 %v3296_v21, %v3295_v46  ;;  %vm1927_vm11 = vcmp.eq.s32.totalorder %v9539_v6, %v9291_v25  ;;  %v4726_v23 = vpack.c.bf16 %v3255_v36, %v3255_v36 }
  0xdc   :  { %v3260_v4 = vrot.slane %v3259_v58, 1  ;;  %v3212_v47 = vrot.slane %v3211_v17, 1  ;;  %v8096_v14 = vsel %vm1912_vm9, 1.0, %v12737_v35  ;;  %v12743_v9 = vrot.slane %v9335_v51, %v9184_v29 }
  0xdd   :  { %657 = vbcast.lane.b32.xlu1 %v12741_v37, 256  ;;  %601 = vbcast.lane.b32.xlu0 %v12742_v55, 256  ;;  %v9599_v18 = vunpack.c.l.b16 %v4717_v16  ;;  %v5527_v30 = vsel %vm5500_vm6, %v5268_v43, %v5526_v62  ;;  %v3347_v13 = vadd.f32 %v8110_v59, %v3346_v42  ;;  %vm1904_vm12 = vcmp.eq.s32.totalorder %v9526_v26, %v9291_v25 }
  0xde   :  { %v12744_v6 = vrot.slane %v9324_v44, %v9184_v29  ;;  %v4718_v46 = vpack.c.bf16 %v3207_v61, %v3207_v61  ;;  %v5269_v53 = vunpack.c.l.b16 %v4741_v52  ;;  %v3299_v5 = vadd.f32 %v8102_v48, %v3298_v56 }
  0xdf   :  { %v9587_v41 = vpop.permute.xlu1 %328  ;;  %v9594_v28 = vpop.permute.xlu0 %272  ;;  %v8111_v39 = vsel %vm1927_vm11, 1.0, %v12737_v35  ;;  %v5520_v57 = vsel %vm5500_vm6, %v5260_v12, %v5519_v54  ;;  %v4733_v15 = vpack.c.bf16 %v3297_v50, %v3297_v50  ;;  %v3262_v40 = vrot.slane %v8096_v14, 4 }
  0xe0   :  { %vm1919_vm13 = vcmp.eq.s32.totalorder %v9541_v60, %v9291_v25  ;;  %v9611_v59 = vunpack.c.l.b16 %v4726_v23  ;;  %v3261_v21 = vadd.f32 %v3260_v4, %v3259_v58  ;;  %v9613_v26 = vadd.f32 %v3212_v47, %v3211_v17 }
  0xe1   :  { %762 = vbcast.lane.b32.xlu1 %v12743_v9, 256  ;;  %706 = vbcast.lane.b32.xlu0 %v12744_v6, 256  ;;  %v8088_v36 = vsel %vm1904_vm12, 1.0, %v12737_v35  ;;  %v12745_v48 = vrot.slane %v9307_v0, %v9192_v33  ;;  %v3348_v16 = vrot.slane %v3347_v13, 2  ;;  %v3352_v54 = vrot.slane %v8111_v39, 4 }
  0xe2   :  { %v8103_v43 = vsel %vm1919_vm13, 1.0, %v12737_v35  ;;  %vm1913_vm14 = vcmp.eq.s32.totalorder %v9549_v7, %v9291_v25  ;;  %v12746_v60 = vrot.slane %v9300_v34, %v9192_v33  ;;  %v9627_v58 = vunpack.c.l.b16 %v4718_v46 }
  0xe3   :  { %v9616_v37 = vpop.permute.xlu1 %342  ;;  %v9630_v17 = vsel %vm5502_vm8, %v5269_v53, %v5527_v30  ;;  %v3300_v42 = vrot.slane %v3299_v5, 2  ;;  %vm1905_vm15 = vcmp.eq.s32.totalorder %v9551_v8, %v9291_v25  ;;  %v9634_v0 = vpop.permute.xlu0 %335  ;;  %v5261_v55 = vunpack.c.l.b16 %v4733_v15 }
  0xe4   :  { %v3263_v62 = vadd.f32 %v8096_v14, %v3262_v40  ;;  %v3214_v61 = vrot.slane %v8088_v36, 4  ;;  %v3304_v52 = vrot.slane %v8103_v43, 4  ;;  %v4727_v7 = vpack.c.bf16 %v3261_v21, %v3261_v21 }
  0xe5   :  { %664 = vbcast.lane.b32.xlu1 %v12745_v48, 256  ;;  %608 = vbcast.lane.b32.xlu0 %v12746_v60, 256  ;;  %v4719_v34 = vpack.c.bf16 %v9613_v26, %v9613_v26  ;;  %v8097_v56 = vsel %vm1913_vm14, 1.0, %v12737_v35  ;;  %vm1928_vm0 = vcmp.eq.s32.totalorder %v9569_v38, %v9291_v25  ;;  %v12747_v12 = vrot.slane %v9335_v51, %v9190_v32 }
  0xe6   :  { %v3349_v8 = vadd.f32 %v3348_v16, %v3347_v13  ;;  %v3353_v50 = vadd.f32 %v8111_v39, %v3352_v54  ;;  %v8089_v23 = vsel %vm1905_vm15, 1.0, %v12737_v35  ;;  %v8112_v4 = vsel %vm1928_vm0, 1.0, %v12737_v35 }
  0xe7   :  { %v12748_v47 = vrot.slane %v9324_v44, %v9190_v32  ;;  %v3301_v14 = vadd.f32 %v3300_v42, %v3299_v5  ;;  %v3358_v9 = vrot.slane %v8112_v4, 4  ;;  %vm1920_vm1 = vcmp.eq.s32.totalorder %v9571_v31, %v9291_v25  ;;  %v9653_v38 = vpop.permute.xlu1 %398  ;;  %v9657_v5 = vpop.permute.xlu0 %391 }
  0xe8   :  { %vm1929_vm2 = vcmp.eq.s32.totalorder %v9587_v41, %v9291_v25  ;;  %v3264_v30 = vrot.slane %v3263_v62, 2  ;;  %v3305_v13 = vadd.f32 %v8103_v43, %v3304_v52  ;;  %v3268_v6 = vrot.slane %v8097_v56, 4 }
  0xe9   :  { %769 = vbcast.lane.b32.xlu1 %v12747_v12, 256  ;;  %713 = vbcast.lane.b32.xlu0 %v12748_v47, 256  ;;  %v8104_v46 = vsel %vm1920_vm1, 1.0, %v12737_v35  ;;  %v3220_v53 = vrot.slane %v8089_v23, 4  ;;  %v3359_v39 = vadd.f32 %v8112_v4, %v3358_v9  ;;  %v8113_v40 = vsel %vm1929_vm2, 1.0, %v12737_v35 }
  0xea   :  { %v3310_v15 = vrot.slane %v8104_v46, 4  ;;  %v12749_v31 = vrot.slane %v9335_v51, %v9192_v33  ;;  %v9663_v41 = vsel %vm5502_vm8, %v5261_v55, %v5520_v57  ;;  %v3215_v21 = vadd.f32 %v8088_v36, %v3214_v61 }
  0xeb   :  { %v3354_v26 = vrot.slane %v3353_v50, 2  ;;  %v3364_v48 = vrot.slane %v8113_v40, 4  ;;  %v12750_v16 = vrot.slane %v9324_v44, %v9192_v33  ;;  %v3350_v54 = vrot.slane %v3349_v8, 1  ;;  %v9673_v4 = vpop.permute.xlu1 %405 }
  0xec   :  { %v3302_v43 = vrot.slane %v3301_v14, 1  ;;  %v3311_v60 = vadd.f32 %v8104_v46, %v3310_v15  ;;  %vm1921_vm3 = vcmp.eq.s32.totalorder %v9594_v28, %v9291_v25  ;;  %v9670_v42 = vunpack.c.l.b16 %v4727_v7 }
  0xed   :  { %776 = vbcast.lane.b32.xlu1 %v12749_v31, 256  ;;  %720 = vbcast.lane.b32.xlu0 %v12750_v16, 256  ;;  %v3306_v51 = vrot.slane %v3305_v13, 2  ;;  %v3269_v52 = vadd.f32 %v8097_v56, %v3268_v6  ;;  %v3360_v12 = vrot.slane %v3359_v39, 2  ;;  %v3265_v57 = vadd.f32 %v3264_v30, %v3263_v62  ;;  %v9686_v30 = vpop.permute.xlu0 %349 }
  0xee   :  { %v3221_v55 = vadd.f32 %v8089_v23, %v3220_v53  ;;  %v3365_v36 = vadd.f32 %v8113_v40, %v3364_v48  ;;  %v8105_v61 = vsel %vm1921_vm3, 1.0, %v12737_v35  ;;  %v12751_v44 = vrot.slane %v9408_v1, %v9120_v3 }
  0xef   :  { %v3355_v47 = vadd.f32 %v3354_v26, %v3353_v50  ;;  %v3312_v9 = vrot.slane %v3311_v60, 2  ;;  %v3316_v46 = vrot.slane %v8105_v61, 4  ;;  %vm1931_vm4 = vcmp.eq.s32.totalorder %v9616_v37, %v9291_v25 }
  0xf0   :  { %v12752_v28 = vrot.slane %v9408_v1, %v9118_v2  ;;  %v3351_v62 = vadd.f32 %v3350_v54, %v3349_v8  ;;  %v9683_v7 = vadd.f32 %v3302_v43, %v3301_v14  ;;  %v3216_v56 = vrot.slane %v3215_v21, 2  ;;  %v9702_v54 = vpop.permute.xlu1 %454 }
  0xf1   :  { %790 = vbcast.lane.b32.xlu1 %v12751_v44, 256  ;;  %v8115_v23 = vsel %vm1931_vm4, 1.0, %v12737_v35  ;;  %v9688_v6 = vunpack.c.l.b16 %v4719_v34  ;;  %v3307_v50 = vadd.f32 %v3306_v51, %v3305_v13  ;;  %v3270_v53 = vrot.slane %v3269_v52, 2 }
  0xf2   :  { %783 = vbcast.lane.b32.xlu0 %v12752_v28, 256  ;;  %v3361_v15 = vadd.f32 %v3360_v12, %v3359_v39  ;;  %v3222_v40 = vrot.slane %v3221_v55, 2  ;;  %v3366_v31 = vrot.slane %v3365_v36, 2  ;;  %vm1930_vm5 = vcmp.eq.s32.totalorder %v9634_v0, %v9291_v25 }
  0xf3   :  { %vm1939_vm7 = vcmp.eq.s32.totalorder %v9653_v38, %v9291_v25  ;;  %v12753_v37 = vrot.slane %v9420_v22, %v9120_v3  ;;  %v3356_v8 = vrot.slane %v3355_v47, 1  ;;  %v3313_v14 = vadd.f32 %v3312_v9, %v3311_v60  ;;  %v9708_v9 = vpop.permute.xlu0 %447 }
  0xf4   :  { %v3317_v26 = vadd.f32 %v8105_v61, %v3316_v46  ;;  %v3376_v34 = vrot.slane %v8115_v23, 4  ;;  %v12754_v13 = vrot.slane %v9420_v22, %v9118_v2  ;;  %v4742_v39 = vpack.c.bf16 %v3351_v62, %v3351_v62 }
  0xf5   :  { %846 = vbcast.lane.b32.xlu1 %v12753_v37, 256  ;;  %v4734_v48 = vpack.c.bf16 %v9683_v7, %v9683_v7  ;;  %v3266_v0 = vrot.slane %v3265_v57, 1  ;;  %v3217_v16 = vadd.f32 %v3216_v56, %v3215_v21  ;;  %v3308_v38 = vrot.slane %v3307_v50, 1 }
  0xf6   :  { %839 = vbcast.lane.b32.xlu0 %v12754_v13, 256  ;;  %v3362_v43 = vrot.slane %v3361_v15, 1  ;;  %v8114_v51 = vsel %vm1930_vm5, 1.0, %v12737_v35  ;;  %v8123_v60 = vsel %vm1939_vm7, 1.0, %v12737_v35  ;;  %v3271_v12 = vadd.f32 %v3270_v53, %v3269_v52 }
  0xf7   :  { %v3223_v61 = vadd.f32 %v3222_v40, %v3221_v55  ;;  %v3367_v44 = vadd.f32 %v3366_v31, %v3365_v36  ;;  %vm1938_vm9 = vcmp.eq.s32.totalorder %v9657_v5, %v9291_v25  ;;  %v12755_v46 = vrot.slane %v9420_v22, %v9140_v10 }
  0xf8   :  { %v3357_v21 = vadd.f32 %v3356_v8, %v3355_v47  ;;  %v3314_v28 = vrot.slane %v3313_v14, 1  ;;  %v3318_v62 = vrot.slane %v3317_v26, 2  ;;  %v3377_v7 = vadd.f32 %v8115_v23, %v3376_v34  ;;  %v9723_v8 = vpop.permute.xlu1 %510 }
  0xf9   :  { %853 = vbcast.lane.b32.xlu1 %v12755_v46, 256  ;;  %v12756_v56 = vrot.slane %v9408_v1, %v9140_v10  ;;  %v9716_v52 = vadd.f32 %v3266_v0, %v3265_v57  ;;  %v3218_v55 = vrot.slane %v3217_v16, 1  ;;  %v3370_v36 = vrot.slane %v8114_v51, 4 }
  0xfa   :  { %v3424_v53 = vrot.slane %v8123_v60, 4  ;;  %v3309_v5 = vadd.f32 %v3308_v38, %v3307_v50  ;;  %v3363_v40 = vadd.f32 %v3362_v43, %v3361_v15  ;;  %v8122_v31 = vsel %vm1938_vm9, 1.0, %v12737_v35  ;;  %v9732_v43 = vpop.permute.xlu0 %503 }
  0xfb   :  { %797 = vbcast.lane.b32.xlu0 %v12756_v56, 256  ;;  %vm1940_vm11 = vcmp.eq.s32.totalorder %v9673_v4, %v9291_v25  ;;  %v9721_v22 = vunpack.c.l.b16 %v4742_v39  ;;  %v3272_v47 = vrot.slane %v3271_v12, 1  ;;  %v3224_v23 = vrot.slane %v3223_v61, 1 }
  0xfc   :  { %v3368_v37 = vrot.slane %v3367_v44, 1  ;;  %v12757_v1 = vrot.slane %v9444_v45, %v9120_v3  ;;  %v4743_v57 = vpack.c.bf16 %v3357_v21, %v3357_v21  ;;  %v3315_v34 = vadd.f32 %v3314_v28, %v3313_v14 }
  0xfd   :  { %v3319_v50 = vadd.f32 %v3318_v62, %v3317_v26  ;;  %v3378_v15 = vrot.slane %v3377_v7, 2  ;;  %v12758_v13 = vrot.slane %v9444_v45, %v9118_v2  ;;  %v3371_v4 = vadd.f32 %v8114_v51, %v3370_v36 }
  0xfe   :  { %902 = vbcast.lane.b32.xlu1 %v12757_v1, 256  ;;  %v3425_v39 = vadd.f32 %v8123_v60, %v3424_v53  ;;  %v3418_v0 = vrot.slane %v8122_v31, 4  ;;  %v8124_v38 = vsel %vm1940_vm11, 1.0, %v12737_v35  ;;  %vm5504_vm12 = vcmask 1044484  }
  0xff   :  { %895 = vbcast.lane.b32.xlu0 %v12758_v13, 256  ;;  %v9734_v46 = vunpack.c.l.b16 %v4734_v48  ;;  %v3219_v56 = vadd.f32 %v3218_v55, %v3217_v16  ;;  %v4735_v1 = vpack.c.bf16 %v3309_v5, %v3309_v5  ;;  %v4744_v21 = vpack.c.bf16 %v3363_v40, %v3363_v40  ;;  %v9740_v55 = vpop.permute.xlu1 %412 }
 0x100   :  { %vm5506_vm13 = vcmask 1045509   ;;  %v3369_v14 = vadd.f32 %v3368_v37, %v3367_v44  ;;  %vm1932_vm14 = vcmp.eq.s32.totalorder %v9686_v30, %v9291_v25  ;;  %v3225_v45 = vadd.f32 %v3224_v23, %v3223_v61  ;;  %v9749_v23 = vpop.permute.xlu0 %356 }
 0x101   :  { %v3273_v26 = vadd.f32 %v3272_v47, %v3271_v12  ;;  %vm5508_vm15 = vcmask 1046534   ;;  %v4736_v51 = vpack.c.bf16 %v3315_v34, %v3315_v34  ;;  %v3320_v60 = vrot.slane %v3319_v50, 1 }
 0x102   :  { %v3379_v28 = vadd.f32 %v3378_v15, %v3377_v7  ;;  %v3430_v62 = vrot.slane %v8124_v38, 4  ;;  %vm5510_vm0 = vcmask 1047559   ;;  %v9738_v36 = vunpack.c.l.b16 %v4743_v57 }
 0x103   :  { %v3372_v48 = vrot.slane %v3371_v4, 2  ;;  %v3426_v53 = vrot.slane %v3425_v39, 2  ;;  %v3419_v16 = vadd.f32 %v8122_v31, %v3418_v0  ;;  %v9742_v5 = vunpack.c.l.b16 %v4735_v1 }
 0x104   :  { %v8116_v44 = vsel %vm1932_vm14, 1.0, %v12737_v35  ;;  %v4720_v30 = vpack.c.bf16 %v3219_v56, %v3219_v56  ;;  %v4728_v12 = vpack.c.bf16 %v9716_v52, %v9716_v52  ;;  %v9747_v61 = vunpack.c.l.b16 %v4744_v21 }
 0x105   :  { %v4745_v7 = vpack.c.bf16 %v3369_v14, %v3369_v14  ;;  %v4721_v40 = vpack.c.bf16 %v3225_v45, %v3225_v45  ;;  %v4729_v47 = vpack.c.bf16 %v3273_v26, %v3273_v26  ;;  %v5264_v37 = vunpack.c.l.b16 %v4736_v51 }
 0x106   :  { %v3321_v57 = vadd.f32 %v3320_v60, %v3319_v50  ;;  %v3380_v31 = vrot.slane %v3379_v28, 1  ;;  %v3431_v34 = vadd.f32 %v8124_v38, %v3430_v62  ;;  %v3373_v15 = vadd.f32 %v3372_v48, %v3371_v4  ;;  %v9771_v60 = vpop.permute.xlu0 %461 }
 0x107   :  { %v3427_v13 = vadd.f32 %v3426_v53, %v3425_v39  ;;  %v3420_v0 = vrot.slane %v3419_v16, 2  ;;  %v3382_v1 = vrot.slane %v8116_v44, 4  ;;  %v5248_v35 = vunpack.c.l.b16 %v4720_v30  ;;  %v9761_v39 = vpop.permute.xlu1 %517 }
 0x108   :  { %v5256_v56 = vunpack.c.l.b16 %v4728_v12  ;;  %v5501_v52 = vsel %vm5500_vm6, %v9563_v20, %v9497_v63  ;;  %v5513_v21 = vsel %vm5500_vm6, %v9509_v11, %v9488_v27  ;;  %v5249_v14 = vunpack.c.l.b16 %v4721_v40 }
 0x109   :  { %v5257_v45 = vunpack.c.l.b16 %v4729_v47  ;;  %v5503_v50 = vsel %vm5502_vm8, %v9599_v18, %v5501_v52  ;;  %v5514_v4 = vsel %vm5502_vm8, %v9589_v49, %v5513_v21  ;;  %v4737_v38 = vpack.c.bf16 %v3321_v57, %v3321_v57 }
 0x10a   :  { %v3432_v26 = vrot.slane %v3431_v34, 2  ;;  %v5505_v51 = vsel %vm5504_vm12, %v9627_v58, %v5503_v50  ;;  %v5515_v63 = vsel %vm5504_vm12, %v9611_v59, %v5514_v4  ;;  %v3381_v20 = vadd.f32 %v3380_v31, %v3379_v28 }
 0x10b   :  { %v3383_v27 = vadd.f32 %v8116_v44, %v3382_v1  ;;  %v5507_v11 = vsel %vm5506_vm13, %v9688_v6, %v5505_v51  ;;  %v5516_v18 = vsel %vm5506_vm13, %v9670_v42, %v5515_v63  ;;  %v3374_v49 = vrot.slane %v3373_v15, 1 }
 0x10c   :  { %v3428_v62 = vrot.slane %v3427_v13, 1  ;;  %v5509_v48 = vsel %vm5508_vm15, %v5248_v35, %v5507_v11  ;;  %v5517_v53 = vsel %vm5508_vm15, %v5256_v56, %v5516_v18  ;;  %v3421_v58 = vadd.f32 %v3420_v0, %v3419_v16  ;;  %v9785_v35 = vpop.permute.xlu1 %419 }
 0x10d   :  { %v5511_v30 = vsel %vm5510_vm0, %v5249_v14, %v5509_v48  ;;  %v5518_v59 = vsel %vm5510_vm0, %v5257_v45, %v5517_v53  ;;  %vm1947_vm1 = vcmp.eq.s32.totalorder %v9702_v54, %v9291_v25  ;;  %v5273_v6 = vunpack.c.l.b16 %v4745_v7 }
 0x10e   :  { %v3433_v28 = vadd.f32 %v3432_v26, %v3431_v34  ;;  %v5729_v44 = vpack.c.b16 %v5518_v59, %v5511_v30  ;;  %vm1946_vm2 = vcmp.eq.s32.totalorder %v9708_v9, %v9291_v25  ;;  %v5265_v42 = vunpack.c.l.b16 %v4737_v38  ;;  %v9793_v34 = vpop.permute.xlu0 %363 }
 0x10f   :  { %v3384_v12 = vrot.slane %v3383_v27, 2  ;;  %vm1955_vm3 = vcmp.eq.s32.totalorder %v9723_v8, %v9291_v25  ;;  %vm1954_vm4 = vcmp.eq.s32.totalorder %v9732_v43, %v9291_v25  ;;  %v4747_v16 = vpack.c.bf16 %v3381_v20, %v3381_v20 }
 0x110   :  { %v3375_v40 = vadd.f32 %v3374_v49, %v3373_v15  ;;  %v3429_v47 = vadd.f32 %v3428_v62, %v3427_v13  ;;  %8723 = vmatprep.mubr.bf16.mxu0 %v5729_v44  ;;  %v12759_v54 = vmov 0.0   ;;  %v3422_v57 = vrot.slane %v3421_v58, 1 }
 0x111   :  { %v8131_v7 = vsel %vm1947_vm1, 1.0, %v12759_v54  ;;  %v8130_v31 = vsel %vm1946_vm2, 1.0, %v12759_v54  ;;  %v8139_v9 = vsel %vm1955_vm3, 1.0, %v12759_v54  ;;  %v5522_v8 = vsel %vm5504_vm12, %v9734_v46, %v9663_v41 }
 0x112   :  { %v3434_v43 = vrot.slane %v3433_v28, 1  ;;  %v8138_v0 = vsel %vm1954_vm4, 1.0, %v12759_v54  ;;  %v5523_v15 = vsel %vm5506_vm13, %v9742_v5, %v5522_v8  ;;  %v5529_v13 = vsel %vm5504_vm12, %v9721_v22, %v9630_v17  ;;  %v9810_v17 = vpop.permute.xlu1 %524 }
 0x113   :  { %v3385_v1 = vadd.f32 %v3384_v12, %v3383_v27  ;;  %v3472_v56 = vrot.slane %v8131_v7, 4  ;;  %v5524_v52 = vsel %vm5508_vm15, %v5264_v37, %v5523_v15  ;;  %v5530_v21 = vsel %vm5506_vm13, %v9738_v36, %v5529_v13  ;;  %v9835_v13 = vld [vmem:[%s12728_s0 + $0x78] sm:$0xff] }
 0x114   :  { %v3466_v41 = vrot.slane %v8130_v31, 4  ;;  %v3520_v46 = vrot.slane %v8139_v9, 4  ;;  %v5525_v14 = vsel %vm5510_vm0, %v5265_v42, %v5524_v52  ;;  %v5531_v45 = vsel %vm5508_vm15, %v9747_v61, %v5530_v21  ;;  %v9815_v61 = vpop.permute.xlu0 %468 }
 0x115   :  { %v3423_v50 = vadd.f32 %v3422_v57, %v3421_v58  ;;  %v3514_v5 = vrot.slane %v8138_v0, 4  ;;  %v5532_v4 = vsel %vm5510_vm0, %v5273_v6, %v5531_v45  ;;  %vm1941_vm5 = vcmp.eq.s32.totalorder %v9740_v55, %v9291_v25 }
 0x116   :  { %v4746_v22 = vpack.c.bf16 %v3375_v40, %v3375_v40  ;;  %v4755_v37 = vpack.c.bf16 %v3429_v47, %v3429_v47  ;;  %v5730_v38 = vpack.c.b16 %v5532_v4, %v5525_v14  ;;  %v3386_v36 = vrot.slane %v3385_v1, 1  ;;  %v9823_v59 = vpop.permute.xlu1 %426 }
 0x117   :  { %v3473_v26 = vadd.f32 %v8131_v7, %v3472_v56  ;;  %v8125_v51 = vsel %vm1941_vm5, 1.0, %v12759_v54  ;;  %vm1933_vm7 = vcmp.eq.s32.totalorder %v9749_v23, %v9291_v25  ;;  %v3435_v63 = vadd.f32 %v3434_v43, %v3433_v28 }
 0x118   :  { %v3467_v20 = vadd.f32 %v8130_v31, %v3466_v41  ;;  %v3521_v27 = vadd.f32 %v8139_v9, %v3520_v46  ;;  %8724 = vmatmul.mubr.bf16.vlgmr.msra.gmra.mxu0 %v5730_v38  ;;  %vm1956_vm9 = vcmp.eq.s32.totalorder %v9761_v39, %v9291_v25  ;;  %v5275_v55 = vunpack.c.l.b16 %v4747_v16  ;;  %v9828_v40 = vpop.permute.xlu0 %370 }
 0x119   :  { %v4754_v11 = vpack.c.bf16 %v3423_v50, %v3423_v50  ;;  %v3515_v18 = vadd.f32 %v8138_v0, %v3514_v5  ;;  %v5274_v49 = vunpack.c.l.b16 %v4746_v22  ;;  %v3436_v62 = vrot.slane %v8125_v51, 4 }
 0x11a   :  { %v8117_v48 = vsel %vm1933_vm7, 1.0, %v12759_v54  ;;  %vm1948_vm11 = vcmp.eq.s32.totalorder %v9771_v60, %v9291_v25  ;;  %v5283_v23 = vunpack.c.l.b16 %v4755_v37  ;;  %v3387_v53 = vadd.f32 %v3386_v36, %v3385_v1  ;;  %v9840_v52 = vpop.permute.xlu1 %531 }
 0x11b   :  { %v3474_v58 = vrot.slane %v3473_v26, 2  ;;  %v8140_v30 = vsel %vm1956_vm9, 1.0, %v12759_v54  ;;  %v4756_v6 = vpack.c.bf16 %v3435_v63, %v3435_v63  ;;  %v3468_v28 = vrot.slane %v3467_v20, 2 }
 0x11c   :  { %v3522_v39 = vrot.slane %v3521_v27, 2  ;;  %v8132_v44 = vsel %vm1948_vm11, 1.0, %v12759_v54  ;;  %v5282_v42 = vunpack.c.l.b16 %v4754_v11  ;;  %v3516_v12 = vrot.slane %v3515_v18, 2  ;;  %v9845_v22 = vpop.permute.xlu0 %475 }
 0x11d   :  { %v3388_v16 = vrot.slane %v8117_v48, 4  ;;  %vm1942_vm14 = vcmp.eq.s32.totalorder %v9785_v35, %v9291_v25  ;;  %v3437_v60 = vadd.f32 %v8125_v51, %v3436_v62  ;;  %v3526_v47 = vrot.slane %v8140_v30, 4 }
 0x11e   :  { %v3478_v7 = vrot.slane %v8132_v44, 4  ;;  %v5533_v57 = vsel %vm5498_vm10, %v5275_v55, %v5274_v49  ;;  %v4748_v31 = vpack.c.bf16 %v3387_v53, %v3387_v53  ;;  %v3475_v9 = vadd.f32 %v3474_v58, %v3473_v26 }
 0x11f   :  { %v5284_v8 = vunpack.c.l.b16 %v4756_v6  ;;  %v3469_v43 = vadd.f32 %v3468_v28, %v3467_v20  ;;  %v3523_v0 = vadd.f32 %v3522_v39, %v3521_v27  ;;  %v8126_v15 = vsel %vm1942_vm14, 1.0, %v12759_v54 }
 0x120   :  { %v5540_v35 = vsel %vm5498_vm10, %v5283_v23, %v5282_v42  ;;  %v3517_v1 = vadd.f32 %v3516_v12, %v3515_v18  ;;  %v3389_v56 = vadd.f32 %v8117_v48, %v3388_v16  ;;  %vm1934_vm1 = vcmp.eq.s32.totalorder %v9793_v34, %v9291_v25  ;;  %v9860_v23 = vpop.permute.xlu1 %433 }
 0x121   :  { %v3438_v21 = vrot.slane %v3437_v60, 2  ;;  %v3527_v41 = vadd.f32 %v8140_v30, %v3526_v47  ;;  %v3479_v46 = vadd.f32 %v8132_v44, %v3478_v7  ;;  %v8118_v14 = vsel %vm1934_vm1, 1.0, %v12759_v54  ;;  %v9871_v44 = vpop.permute.xlu0 %377 }
 0x122   :  { %v5276_v45 = vunpack.c.l.b16 %v4748_v31  ;;  %v3476_v50 = vrot.slane %v3475_v9, 1  ;;  %v3442_v5 = vrot.slane %v8126_v15, 4  ;;  %v956_v4 = vrot.slane %v9835_v13, %v9120_v3  ;;  %v9883_v31 = vld [vmem:[%s12728_s0 + $0x60] sm:$0xff] }
 0x123   :  { %v3470_v37 = vrot.slane %v3469_v43, 1  ;;  %v3524_v38 = vrot.slane %v3523_v0, 1  ;;  %v3394_v36 = vrot.slane %v8118_v14, 4  ;;  %v949_v34 = vrot.slane %v9835_v13, %v9118_v2 }
 0x124   :  { %v9850_v26 = vsel %vm5500_vm6, %v5284_v8, %v5540_v35  ;;  %v3518_v51 = vrot.slane %v3517_v1, 1  ;;  %v3390_v63 = vrot.slane %v3389_v56, 2  ;;  %958 = vbcast.lane.b32.xlu1 %v956_v4, 256  ;;  %vm1957_vm2 = vcmp.eq.s32.totalorder %v9810_v17, %v9291_v25 }
 0x125   :  { %v3439_v20 = vadd.f32 %v3438_v21, %v3437_v60  ;;  %v3528_v27 = vrot.slane %v3527_v41, 2  ;;  %v3480_v55 = vrot.slane %v3479_v46, 2  ;;  %951 = vbcast.lane.b32.xlu0 %v949_v34, 256  ;;  %v8141_v11 = vsel %vm1957_vm2, 1.0, %v12759_v54  ;;  %v9897_v21 = vpop.permute.xlu1 %538  ;;  %v9910_v34 = vld [vmem:[%s12728_s0 + $0x70] sm:$0xff] }
 0x126   :  { %v9856_v18 = vsel %vm5500_vm6, %v5276_v45, %v5533_v57  ;;  %v9858_v49 = vadd.f32 %v3476_v50, %v3475_v9  ;;  %v3443_v62 = vadd.f32 %v8126_v15, %v3442_v5  ;;  %v3532_v48 = vrot.slane %v8141_v11, 4  ;;  %v9876_v57 = vld [vmem:[%s12728_s0 + $0x68] sm:$0xff] }
 0x127   :  { %v9862_v53 = vadd.f32 %v3470_v37, %v3469_v43  ;;  %v9864_v58 = vadd.f32 %v3524_v38, %v3523_v0  ;;  %v3395_v17 = vadd.f32 %v8118_v14, %v3394_v36  ;;  %vm1949_vm3 = vcmp.eq.s32.totalorder %v9815_v61, %v9291_v25  ;;  %v9902_v37 = vpop.permute.xlu0 %482 }
 0x128   :  { %v9868_v30 = vadd.f32 %v3518_v51, %v3517_v1  ;;  %v3391_v6 = vadd.f32 %v3390_v63, %v3389_v56  ;;  %v3533_v28 = vadd.f32 %v8141_v11, %v3532_v48  ;;  %v8133_v39 = vsel %vm1949_vm3, 1.0, %v12759_v54 }
 0x129   :  { %v3440_v42 = vrot.slane %v3439_v20, 1  ;;  %v3529_v12 = vadd.f32 %v3528_v27, %v3527_v41  ;;  %v3481_v16 = vadd.f32 %v3480_v55, %v3479_v46  ;;  %v3484_v60 = vrot.slane %v8133_v39, 4 }
 0x12a   :  { %v3444_v47 = vrot.slane %v3443_v62, 2  ;;  %v3534_v7 = vrot.slane %v3533_v28, 2  ;;  %v858_v61 = vrot.slane %v9876_v57, %v9164_v19  ;;  %v802_v9 = vrot.slane %v9883_v31, %v9164_v19 }
 0x12b   :  { %v4763_v8 = vpack.c.bf16 %v9858_v49, %v9858_v49  ;;  %v4762_v43 = vpack.c.bf16 %v9862_v53, %v9862_v53  ;;  %v3396_v0 = vrot.slane %v3395_v17, 2  ;;  %v3485_v15 = vadd.f32 %v8133_v39, %v3484_v60  ;;  %v9926_v60 = vpop.permute.xlu0 %384 }
 0x12c   :  { %v4771_v35 = vpack.c.bf16 %v9864_v58, %v9864_v58  ;;  %v4770_v1 = vpack.c.bf16 %v9868_v30, %v9868_v30  ;;  %v3392_v56 = vrot.slane %v3391_v6, 1  ;;  %860 = vbcast.lane.b32.xlu1 %v858_v61, 256  ;;  %804 = vbcast.lane.b32.xlu0 %v802_v9, 256  ;;  %vm1943_vm4 = vcmp.eq.s32.totalorder %v9823_v59, %v9291_v25  ;;  %v9921_v58 = vpop.permute.xlu1 %440 }
 0x12d   :  { %v3441_v41 = vadd.f32 %v3440_v42, %v3439_v20  ;;  %v3535_v46 = vadd.f32 %v3534_v7, %v3533_v28  ;;  %v3486_v14 = vrot.slane %v3485_v15, 2  ;;  %v8127_v45 = vsel %vm1943_vm4, 1.0, %v12759_v54 }
 0x12e   :  { %v3530_v50 = vrot.slane %v3529_v12, 1  ;;  %v3482_v5 = vrot.slane %v3481_v16, 1  ;;  %v3445_v4 = vadd.f32 %v3444_v47, %v3443_v62  ;;  %vm1935_vm5 = vcmp.eq.s32.totalorder %v9828_v40, %v9291_v25 }
 0x12f   :  { %v3397_v38 = vadd.f32 %v3396_v0, %v3395_v17  ;;  %v8119_v36 = vsel %vm1935_vm5, 1.0, %v12759_v54  ;;  %v963_v59 = vrot.slane %v9835_v13, %v9140_v10  ;;  %v907_v51 = vrot.slane %v9910_v34, %v9140_v10 }
 0x130   :  { %v3393_v63 = vadd.f32 %v3392_v56, %v3391_v6  ;;  %v3487_v20 = vadd.f32 %v3486_v14, %v3485_v15  ;;  %v3448_v27 = vrot.slane %v8127_v45, 4  ;;  %v3400_v40 = vrot.slane %v8119_v36, 4 }
 0x131   :  { %v3536_v55 = vrot.slane %v3535_v46, 1  ;;  %965 = vbcast.lane.b32.xlu1 %v963_v59, 256  ;;  %909 = vbcast.lane.b32.xlu0 %v907_v51, 256  ;;  %vm1958_vm7 = vcmp.eq.s32.totalorder %v9840_v52, %v9291_v25  ;;  %vm1950_vm9 = vcmp.eq.s32.totalorder %v9845_v22, %v9291_v25  ;;  %v865_v11 = vrot.slane %v9876_v57, %v9174_v24 }
 0x132   :  { %v4757_v49 = vpack.c.bf16 %v3441_v41, %v3441_v41  ;;  %v3531_v62 = vadd.f32 %v3530_v50, %v3529_v12  ;;  %v3483_v48 = vadd.f32 %v3482_v5, %v3481_v16  ;;  %v8142_v53 = vsel %vm1958_vm7, 1.0, %v12759_v54 }
 0x133   :  { %v3446_v17 = vrot.slane %v3445_v4, 1  ;;  %v3398_v30 = vrot.slane %v3397_v38, 1  ;;  %v8134_v6 = vsel %vm1950_vm9, 1.0, %v12759_v54  ;;  %v809_v52 = vrot.slane %v9883_v31, %v9174_v24 }
 0x134   :  { %v5291_v28 = vunpack.c.l.b16 %v4763_v8  ;;  %v3449_v39 = vadd.f32 %v8127_v45, %v3448_v27  ;;  %v3401_v22 = vadd.f32 %v8119_v36, %v3400_v40  ;;  %v3538_v42 = vrot.slane %v8142_v53, 4 }
 0x135   :  { %v5290_v47 = vunpack.c.l.b16 %v4762_v43  ;;  %v4749_v12 = vpack.c.bf16 %v3393_v63, %v3393_v63  ;;  %v3537_v16 = vadd.f32 %v3536_v55, %v3535_v46  ;;  %v3488_v7 = vrot.slane %v3487_v20, 1  ;;  %867 = vbcast.lane.b32.xlu1 %v865_v11, 256  ;;  %811 = vbcast.lane.b32.xlu0 %v809_v52, 256  ;;  %v9930_v43 = vpop.permute.xlu1 %545  ;;  %v9936_v63 = vpop.permute.xlu0 %489 }
 0x136   :  { %v5299_v61 = vunpack.c.l.b16 %v4771_v35  ;;  %v5298_v9 = vunpack.c.l.b16 %v4770_v1  ;;  %v4772_v0 = vpack.c.bf16 %v3531_v62, %v3531_v62  ;;  %v3490_v15 = vrot.slane %v8134_v6, 4 }
 0x137   :  { %v5285_v56 = vunpack.c.l.b16 %v4757_v49  ;;  %v4764_v41 = vpack.c.bf16 %v3483_v48, %v3483_v48  ;;  %v3447_v14 = vadd.f32 %v3446_v17, %v3445_v4  ;;  %v3399_v50 = vadd.f32 %v3398_v30, %v3397_v38 }
 0x138   :  { %v3450_v8 = vrot.slane %v3449_v39, 2  ;;  %v3402_v45 = vrot.slane %v3401_v22, 2  ;;  %v3539_v5 = vadd.f32 %v8142_v53, %v3538_v42  ;;  %vm1944_vm11 = vcmp.eq.s32.totalorder %v9860_v23, %v9291_v25 }
 0x139   :  { %v5277_v46 = vunpack.c.l.b16 %v4749_v12  ;;  %v4773_v36 = vpack.c.bf16 %v3537_v16, %v3537_v16  ;;  %v3489_v59 = vadd.f32 %v3488_v7, %v3487_v20  ;;  %v970_v35 = vrot.slane %v9835_v13, %v9164_v19 }
 0x13a   :  { %v5547_v1 = vsel %vm5498_vm10, %v5291_v28, %v5290_v47  ;;  %v5554_v51 = vsel %vm5498_vm10, %v5299_v61, %v5298_v9  ;;  %v5300_v4 = vunpack.c.l.b16 %v4772_v0  ;;  %v3491_v38 = vadd.f32 %v8134_v6, %v3490_v15  ;;  %v9953_v28 = vpop.permute.xlu1 %552 }
 0x13b   :  { %v5292_v27 = vunpack.c.l.b16 %v4764_v41  ;;  %v4758_v40 = vpack.c.bf16 %v3447_v14, %v3447_v14  ;;  %v8128_v23 = vsel %vm1944_vm11, 1.0, %v12759_v54  ;;  %972 = vbcast.lane.b32.xlu1 %v970_v35, 256  ;;  %v914_v55 = vrot.slane %v9910_v34, %v9164_v19 }
 0x13c   :  { %v4750_v20 = vpack.c.bf16 %v3399_v50, %v3399_v50  ;;  %v3451_v11 = vadd.f32 %v3450_v8, %v3449_v39  ;;  %v3403_v49 = vadd.f32 %v3402_v45, %v3401_v22  ;;  %v3540_v62 = vrot.slane %v3539_v5, 2 }
 0x13d   :  { %v9943_v48 = vsel %vm5502_vm8, %v5285_v56, %v9850_v26  ;;  %v9947_v53 = vsel %vm5502_vm8, %v5277_v46, %v9856_v18  ;;  %v5301_v17 = vunpack.c.l.b16 %v4773_v36  ;;  %v4765_v30 = vpack.c.bf16 %v3489_v59, %v3489_v59  ;;  %916 = vbcast.lane.b32.xlu0 %v914_v55, 256 }
 0x13e   :  { %v3492_v6 = vrot.slane %v3491_v38, 2  ;;  %v3454_v52 = vrot.slane %v8128_v23, 4  ;;  %vm1936_vm14 = vcmp.eq.s32.totalorder %v9871_v44, %v9291_v25  ;;  %vm1959_vm1 = vcmp.eq.s32.totalorder %v9897_v21, %v9291_v25  ;;  %v9963_v44 = vpop.permute.xlu0 %496 }
 0x13f   :  { %v5555_v26 = vsel %vm5500_vm6, %v5300_v4, %v5554_v51  ;;  %v5548_v39 = vsel %vm5500_vm6, %v5292_v27, %v5547_v1  ;;  %v9957_v22 = vunpack.c.l.b16 %v4758_v40  ;;  %v872_v18 = vrot.slane %v9876_v57, %v9184_v29 }
 0x140   :  { %v9961_v42 = vunpack.c.l.b16 %v4750_v20  ;;  %v3452_v47 = vrot.slane %v3451_v11, 1  ;;  %v3404_v12 = vrot.slane %v3403_v49, 1  ;;  %v3541_v16 = vadd.f32 %v3540_v62, %v3539_v5  ;;  %v9981_v5 = vpop.permute.xlu1 %566 }
 0x141   :  { %v8120_v21 = vsel %vm1936_vm14, 1.0, %v12759_v54  ;;  %v8143_v7 = vsel %vm1959_vm1, 1.0, %v12759_v54  ;;  %874 = vbcast.lane.b32.xlu1 %v872_v18, 256  ;;  %v816_v61 = vrot.slane %v9883_v31, %v9184_v29  ;;  %vm1945_vm2 = vcmp.eq.s32.totalorder %v9921_v58, %v9291_v25 }
 0x142   :  { %v9972_v9 = vsel %vm5502_vm8, %v5301_v17, %v5555_v26  ;;  %v5293_v0 = vunpack.c.l.b16 %v4765_v30  ;;  %v3493_v15 = vadd.f32 %v3492_v6, %v3491_v38  ;;  %v3455_v56 = vadd.f32 %v8128_v23, %v3454_v52  ;;  %v9995_v4 = vpop.permute.xlu0 %559 }
 0x143   :  { %vm1951_vm3 = vcmp.eq.s32.totalorder %v9902_v37, %v9291_v25  ;;  %818 = vbcast.lane.b32.xlu0 %v816_v61, 256  ;;  %v8129_v41 = vsel %vm1945_vm2, 1.0, %v12759_v54  ;;  %vm1937_vm4 = vcmp.eq.s32.totalorder %v9926_v60, %v9291_v25  ;;  %v977_v14 = vrot.slane %v9835_v13, %v9174_v24 }
 0x144   :  { %v3453_v50 = vadd.f32 %v3452_v47, %v3451_v11  ;;  %v3542_v58 = vrot.slane %v3541_v16, 1  ;;  %v3406_v8 = vrot.slane %v8120_v21, 4  ;;  %v3544_v45 = vrot.slane %v8143_v7, 4  ;;  %v10003_v26 = vpop.permute.xlu1 %622 }
 0x145   :  { %v3405_v46 = vadd.f32 %v3404_v12, %v3403_v49  ;;  %v8121_v36 = vsel %vm1937_vm4, 1.0, %v12759_v54  ;;  %979 = vbcast.lane.b32.xlu1 %v977_v14, 256  ;;  %v921_v59 = vrot.slane %v9910_v34, %v9174_v24  ;;  %vm1960_vm5 = vcmp.eq.s32.totalorder %v9930_v43, %v9291_v25 }
 0x146   :  { %v9989_v60 = vsel %vm5502_vm8, %v5293_v0, %v5548_v39  ;;  %v3494_v35 = vrot.slane %v3493_v15, 1  ;;  %v8135_v1 = vsel %vm1951_vm3, 1.0, %v12759_v54  ;;  %v3460_v51 = vrot.slane %v8129_v41, 4 }
 0x147   :  { %v3456_v38 = vrot.slane %v3455_v56, 2  ;;  %v3412_v27 = vrot.slane %v8121_v36, 4  ;;  %923 = vbcast.lane.b32.xlu0 %v921_v59, 256  ;;  %v8144_v40 = vsel %vm1960_vm5, 1.0, %v12759_v54  ;;  %vm1952_vm7 = vcmp.eq.s32.totalorder %v9936_v63, %v9291_v25 }
 0x148   :  { %v4759_v43 = vpack.c.bf16 %v3453_v50, %v3453_v50  ;;  %v3543_v23 = vadd.f32 %v3542_v58, %v3541_v16  ;;  %v3407_v55 = vadd.f32 %v8120_v21, %v3406_v8  ;;  %v3545_v20 = vadd.f32 %v8143_v7, %v3544_v45  ;;  %v10011_v7 = vpop.permute.xlu0 %615 }
 0x149   :  { %v4751_v11 = vpack.c.bf16 %v3405_v46, %v3405_v46  ;;  %v3496_v49 = vrot.slane %v8135_v1, 4  ;;  %v8136_v37 = vsel %vm1952_vm7, 1.0, %v12759_v54  ;;  %v879_v62 = vrot.slane %v9876_v57, %v9190_v32 }
 0x14a   :  { %v3495_v17 = vadd.f32 %v3494_v35, %v3493_v15  ;;  %v3461_v30 = vadd.f32 %v8129_v41, %v3460_v51  ;;  %v3413_v6 = vadd.f32 %v8121_v36, %v3412_v27  ;;  %v3550_v52 = vrot.slane %v8144_v40, 4 }
 0x14b   :  { %v3457_v39 = vadd.f32 %v3456_v38, %v3455_v56  ;;  %v3502_v18 = vrot.slane %v8136_v37, 4  ;;  %881 = vbcast.lane.b32.xlu1 %v879_v62, 256  ;;  %v823_v63 = vrot.slane %v9883_v31, %v9190_v32  ;;  %vm1961_vm9 = vcmp.eq.s32.totalorder %v9953_v28, %v9291_v25 }
 0x14c   :  { %v10009_v47 = vunpack.c.l.b16 %v4759_v43  ;;  %v4774_v12 = vpack.c.bf16 %v3543_v23, %v3543_v23  ;;  %v3408_v16 = vrot.slane %v3407_v55, 2  ;;  %v3546_v21 = vrot.slane %v3545_v20, 2 }
 0x14d   :  { %v10013_v61 = vunpack.c.l.b16 %v4751_v11  ;;  %v3497_v0 = vadd.f32 %v8135_v1, %v3496_v49  ;;  %825 = vbcast.lane.b32.xlu0 %v823_v63, 256  ;;  %v8145_v15 = vsel %vm1961_vm9, 1.0, %v12759_v54  ;;  %vm1953_vm11 = vcmp.eq.s32.totalorder %v9963_v44, %v9291_v25  ;;  %v10023_v1 = vpop.permute.xlu1 %629  ;;  %v10029_v11 = vpop.permute.xlu0 %573 }
 0x14e   :  { %v3462_v56 = vrot.slane %v3461_v30, 2  ;;  %v3414_v41 = vrot.slane %v3413_v6, 2  ;;  %v3551_v14 = vadd.f32 %v8144_v40, %v3550_v52  ;;  %v3503_v28 = vadd.f32 %v8136_v37, %v3502_v18 }
 0x14f   :  { %v4766_v50 = vpack.c.bf16 %v3495_v17, %v3495_v17  ;;  %v3458_v58 = vrot.slane %v3457_v39, 1  ;;  %v8137_v8 = vsel %vm1953_vm11, 1.0, %v12759_v54  ;;  %v984_v45 = vrot.slane %v9835_v13, %v9184_v29 }
 0x150   :  { %v10021_v46 = vunpack.c.l.b16 %v4774_v12  ;;  %v3409_v36 = vadd.f32 %v3408_v16, %v3407_v55  ;;  %v3547_v59 = vadd.f32 %v3546_v21, %v3545_v20  ;;  %v3556_v35 = vrot.slane %v8145_v15, 4 }
 0x151   :  { %v3498_v51 = vrot.slane %v3497_v0, 2  ;;  %v3508_v44 = vrot.slane %v8137_v8, 4  ;;  %986 = vbcast.lane.b32.xlu1 %v984_v45, 256  ;;  %v928_v38 = vrot.slane %v9910_v34, %v9184_v29  ;;  %vm1963_vm14 = vcmp.eq.s32.totalorder %v9981_v5, %v9291_v25  ;;  %v10039_v21 = vpop.permute.xlu1 %678 }
 0x152   :  { %v3463_v27 = vadd.f32 %v3462_v56, %v3461_v30  ;;  %v3415_v40 = vadd.f32 %v3414_v41, %v3413_v6  ;;  %v3552_v43 = vrot.slane %v3551_v14, 2  ;;  %v3504_v23 = vrot.slane %v3503_v28, 2 }
 0x153   :  { %v10031_v55 = vunpack.c.l.b16 %v4766_v50  ;;  %v3459_v20 = vadd.f32 %v3458_v58, %v3457_v39  ;;  %930 = vbcast.lane.b32.xlu0 %v928_v38, 256  ;;  %v8147_v49 = vsel %vm1963_vm14, 1.0, %v12759_v54  ;;  %vm1962_vm1 = vcmp.eq.s32.totalorder %v9995_v4, %v9291_v25  ;;  %v10046_v58 = vpop.permute.xlu0 %671 }
 0x154   :  { %v3410_v37 = vrot.slane %v3409_v36, 1  ;;  %v3548_v62 = vrot.slane %v3547_v59, 1  ;;  %v3557_v17 = vadd.f32 %v8145_v15, %v3556_v35  ;;  %v3568_v52 = vrot.slane %v8147_v49, 4 }
 0x155   :  { %v3499_v5 = vadd.f32 %v3498_v51, %v3497_v0  ;;  %v3509_v30 = vadd.f32 %v8137_v8, %v3508_v44  ;;  %v8146_v6 = vsel %vm1962_vm1, 1.0, %v12759_v54  ;;  %v886_v18 = vrot.slane %v9876_v57, %v9192_v33 }
 0x156   :  { %v3464_v63 = vrot.slane %v3463_v27, 1  ;;  %v3416_v12 = vrot.slane %v3415_v40, 1  ;;  %v3553_v39 = vadd.f32 %v3552_v43, %v3551_v14  ;;  %v3505_v16 = vadd.f32 %v3504_v23, %v3503_v28 }
 0x157   :  { %v3569_v56 = vadd.f32 %v8147_v49, %v3568_v52  ;;  %v3562_v41 = vrot.slane %v8146_v6, 4  ;;  %888 = vbcast.lane.b32.xlu1 %v886_v18, 256  ;;  %v830_v4 = vrot.slane %v9883_v31, %v9192_v33  ;;  %vm1971_vm2 = vcmp.eq.s32.totalorder %v10003_v26, %v9291_v25  ;;  %v10054_v49 = vpop.permute.xlu1 %734  ;;  %v10059_v18 = vpop.permute.xlu0 %727 }
 0x158   :  { %v4760_v0 = vpack.c.bf16 %v3459_v20, %v3459_v20  ;;  %v3411_v15 = vadd.f32 %v3410_v37, %v3409_v36  ;;  %v3558_v50 = vrot.slane %v3557_v17, 2  ;;  %v8155_v57 = vsel %vm1971_vm2, 1.0, %v12759_v54 }
 0x159   :  { %v3549_v14 = vadd.f32 %v3548_v62, %v3547_v59  ;;  %v3500_v28 = vrot.slane %v3499_v5, 1  ;;  %v3510_v8 = vrot.slane %v3509_v30, 2  ;;  %v3563_v45 = vadd.f32 %v8146_v6, %v3562_v41  ;;  %832 = vbcast.lane.b32.xlu0 %v830_v4, 256 }
 0x15a   :  { %v3465_v35 = vadd.f32 %v3464_v63, %v3463_v27  ;;  %v3554_v51 = vrot.slane %v3553_v39, 1  ;;  %v3616_v44 = vrot.slane %v8155_v57, 4  ;;  %vm1970_vm3 = vcmp.eq.s32.totalorder %v10011_v7, %v9291_v25 }
 0x15b   :  { %v3417_v31 = vadd.f32 %v3416_v12, %v3415_v40  ;;  %v3506_v26 = vrot.slane %v3505_v16, 1  ;;  %v3570_v38 = vrot.slane %v3569_v56, 2  ;;  %v991_v36 = vrot.slane %v9835_v13, %v9190_v32 }
 0x15c   :  { %v5288_v43 = vunpack.c.l.b16 %v4760_v0  ;;  %v4752_v23 = vpack.c.bf16 %v3411_v15, %v3411_v15  ;;  %v3559_v20 = vadd.f32 %v3558_v50, %v3557_v17  ;;  %v935_v59 = vrot.slane %v9910_v34, %v9190_v32 }
 0x15d   :  { %v4775_v27 = vpack.c.bf16 %v3549_v14, %v3549_v14  ;;  %v3511_v37 = vadd.f32 %v3510_v8, %v3509_v30  ;;  %v3564_v62 = vrot.slane %v3563_v45, 2  ;;  %v8154_v52 = vsel %vm1970_vm3, 1.0, %v12759_v54  ;;  %993 = vbcast.lane.b32.xlu1 %v991_v36, 256 }
 0x15e   :  { %v3501_v7 = vadd.f32 %v3500_v28, %v3499_v5  ;;  %v4761_v40 = vpack.c.bf16 %v3465_v35, %v3465_v35  ;;  %v3617_v6 = vadd.f32 %v8155_v57, %v3616_v44  ;;  %937 = vbcast.lane.b32.xlu0 %v935_v59, 256  ;;  %vm1972_vm4 = vcmp.eq.s32.totalorder %v10023_v1, %v9291_v25 }
 0x15f   :  { %v4753_v17 = vpack.c.bf16 %v3417_v31, %v3417_v31  ;;  %v10061_v63 = vadd.f32 %v3554_v51, %v3553_v39  ;;  %v10063_v12 = vadd.f32 %v3506_v26, %v3505_v16  ;;  %v3571_v41 = vadd.f32 %v3570_v38, %v3569_v56  ;;  %v10072_v56 = vpop.permute.xlu1 %636  ;;  %v10080_v31 = vpop.permute.xlu0 %580 }
 0x160   :  { %v3560_v30 = vrot.slane %v3559_v20, 1  ;;  %v3610_v4 = vrot.slane %v8154_v52, 4  ;;  %v998_v0 = vrot.slane %v9835_v13, %v9192_v33  ;;  %v942_v5 = vrot.slane %v9910_v34, %v9192_v33 }
 0x161   :  { %v5280_v15 = vunpack.c.l.b16 %v4752_v23  ;;  %v3512_v50 = vrot.slane %v3511_v37, 1  ;;  %v3565_v57 = vadd.f32 %v3564_v62, %v3563_v45  ;;  %v8156_v1 = vsel %vm1972_vm4, 1.0, %v12759_v54 }
 0x162   :  { %v10070_v14 = vunpack.c.l.b16 %v4775_v27  ;;  %v4767_v39 = vpack.c.bf16 %v3501_v7, %v3501_v7  ;;  %v5289_v28 = vunpack.c.l.b16 %v4761_v40  ;;  %v3618_v16 = vrot.slane %v3617_v6, 2  ;;  %1000 = vbcast.lane.b32.xlu1 %v998_v0, 256  ;;  %944 = vbcast.lane.b32.xlu0 %v942_v5, 256 }
 0x163   :  { %v5281_v8 = vunpack.c.l.b16 %v4753_v17  ;;  %v4776_v13 = vpack.c.bf16 %v10061_v63, %v10061_v63  ;;  %v4768_v34 = vpack.c.bf16 %v10063_v12, %v10063_v12  ;;  %v3572_v35 = vrot.slane %v3571_v41, 1  ;;  %v10112_v12 = vpop.permute.xlu0 %685 }
 0x164   :  { %v3561_v45 = vadd.f32 %v3560_v30, %v3559_v20  ;;  %v3611_v51 = vadd.f32 %v8154_v52, %v3610_v4  ;;  %v3622_v44 = vrot.slane %v8156_v1, 4  ;;  %vm1964_vm5 = vcmp.eq.s32.totalorder %v10029_v11, %v9291_v25  ;;  %v10104_v52 = vpop.permute.xlu1 %741 }
 0x165   :  { %v3513_v26 = vadd.f32 %v3512_v50, %v3511_v37  ;;  %v3566_v38 = vrot.slane %v3565_v57, 1  ;;  %v5536_v36 = vsel %vm5504_vm12, %v9961_v42, %v9947_v53  ;;  %v5543_v23 = vsel %vm5504_vm12, %v9957_v22, %v9943_v48  ;;  %v10100_v48 = vld [vmem:[%s12728_s0 + $0x80] sm:$0xff] }
 0x166   :  { %v3619_v59 = vadd.f32 %v3618_v16, %v3617_v6  ;;  %v5537_v20 = vsel %vm5506_vm13, %v10013_v61, %v5536_v36  ;;  %v5544_v27 = vsel %vm5506_vm13, %v10009_v47, %v5543_v23  ;;  %vm1979_vm7 = vcmp.eq.s32.totalorder %v10039_v21, %v9291_v25 }
 0x167   :  { %v3573_v11 = vadd.f32 %v3572_v35, %v3571_v41  ;;  %v8148_v37 = vsel %vm1964_vm5, 1.0, %v12759_v54  ;;  %v5538_v62 = vsel %vm5508_vm15, %v5280_v15, %v5537_v20  ;;  %v5545_v53 = vsel %vm5508_vm15, %v5288_v43, %v5544_v27 }
 0x168   :  { %v3612_v22 = vrot.slane %v3611_v51, 2  ;;  %v3623_v42 = vadd.f32 %v8156_v1, %v3622_v44  ;;  %v5539_v61 = vsel %vm5510_vm0, %v5281_v8, %v5538_v62  ;;  %v5546_v47 = vsel %vm5510_vm0, %v5289_v28, %v5545_v53 }
 0x169   :  { %v3567_v21 = vadd.f32 %v3566_v38, %v3565_v57  ;;  %v5731_v7 = vpack.c.b16 %v5546_v47, %v5539_v61  ;;  %v8163_v40 = vsel %vm1979_vm7, 1.0, %v12759_v54  ;;  %vm1978_vm9 = vcmp.eq.s32.totalorder %v10046_v58, %v9291_v25  ;;  %v10121_v58 = vld [vmem:[%s12728_s0 + $0x88] sm:$0xff] }
 0x16a   :  { %v3620_v43 = vrot.slane %v3619_v59, 1  ;;  %v3574_v6 = vrot.slane %v8148_v37, 4  ;;  %v8162_v17 = vsel %vm1978_vm9, 1.0, %v12759_v54  ;;  %v1012_v63 = vrot.slane %v10100_v48, %v9120_v3 }
 0x16b   :  { %v5295_v41 = vunpack.c.l.b16 %v4767_v39  ;;  %v4777_v30 = vpack.c.bf16 %v3561_v45, %v3561_v45  ;;  %v4769_v4 = vpack.c.bf16 %v3513_v26, %v3513_v26  ;;  %8727 = vmatprep.mubr.bf16.mxu0 %v5731_v7  ;;  %v1005_v0 = vrot.slane %v10100_v48, %v9118_v2  ;;  %v10125_v45 = vpop.permute.xlu1 %643 }
 0x16c   :  { %v4779_v5 = vpack.c.bf16 %v3573_v11, %v3573_v11  ;;  %v3624_v15 = vrot.slane %v3623_v42, 2  ;;  %v3664_v50 = vrot.slane %v8163_v40, 4  ;;  %1014 = vbcast.lane.b32.xlu1 %v1012_v63, 256  ;;  %vm1987_vm11 = vcmp.eq.s32.totalorder %v10054_v49, %v9291_v25 }
 0x16d   :  { %v4778_v57 = vpack.c.bf16 %v3567_v21, %v3567_v21  ;;  %v3613_v1 = vadd.f32 %v3612_v22, %v3611_v51  ;;  %v3658_v39 = vrot.slane %v8162_v17, 4  ;;  %1007 = vbcast.lane.b32.xlu0 %v1005_v0, 256  ;;  %vm1986_vm14 = vcmp.eq.s32.totalorder %v10059_v18, %v9291_v25 }
 0x16e   :  { %v5304_v28 = vunpack.c.l.b16 %v4776_v13  ;;  %v5296_v16 = vunpack.c.l.b16 %v4768_v34  ;;  %v3621_v8 = vadd.f32 %v3620_v43, %v3619_v59  ;;  %v3575_v35 = vadd.f32 %v8148_v37, %v3574_v6  ;;  %v10133_v13 = vpop.permute.xlu0 %587 }
 0x16f   :  { %v5305_v44 = vunpack.c.l.b16 %v4777_v30  ;;  %v8171_v49 = vsel %vm1987_vm11, 1.0, %v12759_v54  ;;  %v1068_v26 = vrot.slane %v10121_v58, %v9120_v3  ;;  %v1061_v51 = vrot.slane %v10121_v58, %v9118_v2  ;;  %v10147_v43 = vpop.permute.xlu1 %748 }
 0x170   :  { %v5297_v38 = vunpack.c.l.b16 %v4769_v4  ;;  %v3625_v36 = vadd.f32 %v3624_v15, %v3623_v42  ;;  %v3665_v23 = vadd.f32 %v8163_v40, %v3664_v50  ;;  %v8170_v18 = vsel %vm1986_vm14, 1.0, %v12759_v54 }
 0x171   :  { %v5307_v34 = vunpack.c.l.b16 %v4779_v5  ;;  %v5306_v59 = vunpack.c.l.b16 %v4778_v57  ;;  %v3614_v20 = vrot.slane %v3613_v1, 1  ;;  %v3659_v27 = vadd.f32 %v8162_v17, %v3658_v39  ;;  %1070 = vbcast.lane.b32.xlu1 %v1068_v26, 256  ;;  %1063 = vbcast.lane.b32.xlu0 %v1061_v51, 256 }
 0x172   :  { %v4787_v11 = vpack.c.bf16 %v3621_v8, %v3621_v8  ;;  %v3576_v37 = vrot.slane %v3575_v35, 2  ;;  %v3712_v62 = vrot.slane %v8171_v49, 4  ;;  %v5550_v53 = vsel %vm5504_vm12, %v10031_v55, %v9989_v60 }
 0x173   :  { %v3706_v22 = vrot.slane %v8170_v18, 4  ;;  %v5551_v42 = vsel %vm5506_vm13, %v5295_v41, %v5550_v53  ;;  %v5557_v61 = vsel %vm5504_vm12, %v10021_v46, %v9972_v9  ;;  %vm1973_vm1 = vcmp.eq.s32.totalorder %v10072_v56, %v9291_v25  ;;  %v10153_v41 = vpop.permute.xlu0 %692 }
 0x174   :  { %v3626_v47 = vrot.slane %v3625_v36, 1  ;;  %v3666_v21 = vrot.slane %v3665_v23, 2  ;;  %v5552_v7 = vsel %vm5508_vm15, %v5296_v16, %v5551_v42  ;;  %v5558_v40 = vsel %vm5506_vm13, %v10070_v14, %v5557_v61 }
 0x175   :  { %v3660_v60 = vrot.slane %v3659_v27, 2  ;;  %v5553_v55 = vsel %vm5510_vm0, %v5297_v38, %v5552_v7  ;;  %v5559_v6 = vsel %vm5508_vm15, %v5304_v28, %v5558_v40  ;;  %v8157_v17 = vsel %vm1973_vm1, 1.0, %v12759_v54 }
 0x176   :  { %v3615_v9 = vadd.f32 %v3614_v20, %v3613_v1  ;;  %v3577_v46 = vadd.f32 %v3576_v37, %v3575_v35  ;;  %v3713_v63 = vadd.f32 %v8171_v49, %v3712_v62  ;;  %v5560_v56 = vsel %vm5510_vm0, %v5305_v44, %v5559_v6  ;;  %v10174_v35 = vpop.permute.xlu1 %650 }
 0x177   :  { %v3707_v30 = vadd.f32 %v8170_v18, %v3706_v22  ;;  %v5732_v4 = vpack.c.b16 %v5560_v56, %v5553_v55  ;;  %v3628_v0 = vrot.slane %v8157_v17, 4  ;;  %vm1965_vm2 = vcmp.eq.s32.totalorder %v10080_v31, %v9291_v25  ;;  %v10172_v31 = vld [vmem:[%s12728_s0 + $0x90] sm:$0xff]  ;;  %v10178_v18 = vpop.permute.xlu0 %594 }
 0x178   :  { %v10158_v14 = vsel %vm5498_vm10, %v5307_v34, %v5306_v59  ;;  %v3627_v5 = vadd.f32 %v3626_v47, %v3625_v36  ;;  %v8149_v15 = vsel %vm1965_vm2, 1.0, %v12759_v54  ;;  %v1075_v50 = vrot.slane %v10121_v58, %v9140_v10 }
 0x179   :  { %v5315_v57 = vunpack.c.l.b16 %v4787_v11  ;;  %v3667_v1 = vadd.f32 %v3666_v21, %v3665_v23  ;;  %v3661_v39 = vadd.f32 %v3660_v60, %v3659_v27  ;;  %8728 = vmatmul.mubr.bf16.gmra.mxu0 %v5732_v4  ;;  %v1019_v28 = vrot.slane %v10100_v48, %v9140_v10  ;;  %v10185_v27 = vld [vmem:[%s12728_s0 + $0x98] sm:$0xff] }
 0x17a   :  { %v3629_v16 = vadd.f32 %v8157_v17, %v3628_v0  ;;  %v3580_v8 = vrot.slane %v8149_v15, 4  ;;  %1077 = vbcast.lane.b32.xlu1 %v1075_v50, 256  ;;  %vm1988_vm3 = vcmp.eq.s32.totalorder %v10104_v52, %v9291_v25  ;;  %vm1980_vm4 = vcmp.eq.s32.totalorder %v10112_v12, %v9291_v25  ;;  %v10194_v60 = vpop.permute.xlu1 %755 }
 0x17b   :  { %v3578_v44 = vrot.slane %v3577_v46, 1  ;;  %v3714_v49 = vrot.slane %v3713_v63, 2  ;;  %v3708_v26 = vrot.slane %v3707_v30, 2  ;;  %1021 = vbcast.lane.b32.xlu0 %v1019_v28, 256  ;;  %v8172_v51 = vsel %vm1988_vm3, 1.0, %v12759_v54  ;;  %v10200_v56 = vpop.permute.xlu0 %699 }
 0x17c   :  { %v4786_v38 = vpack.c.bf16 %v3615_v9, %v3615_v9  ;;  %v4788_v36 = vpack.c.bf16 %v3627_v5, %v3627_v5  ;;  %v3718_v23 = vrot.slane %v8172_v51, 4  ;;  %v8164_v52 = vsel %vm1980_vm4, 1.0, %v12759_v54 }
 0x17d   :  { %v3668_v12 = vrot.slane %v3667_v1, 1  ;;  %v3662_v34 = vrot.slane %v3661_v39, 1  ;;  %v3670_v59 = vrot.slane %v8164_v52, 4  ;;  %v1124_v20 = vrot.slane %v10172_v31, %v9120_v3 }
 0x17e   :  { %v3630_v11 = vrot.slane %v3629_v16, 2  ;;  %v3581_v37 = vadd.f32 %v8149_v15, %v3580_v8  ;;  %v1117_v62 = vrot.slane %v10172_v31, %v9118_v2  ;;  %vm1974_vm5 = vcmp.eq.s32.totalorder %v10125_v45, %v9291_v25 }
 0x17f   :  { %v3579_v53 = vadd.f32 %v3578_v44, %v3577_v46  ;;  %v3715_v22 = vadd.f32 %v3714_v49, %v3713_v63  ;;  %v3709_v42 = vadd.f32 %v3708_v26, %v3707_v30  ;;  %1126 = vbcast.lane.b32.xlu1 %v1124_v20, 256  ;;  %v8158_v61 = vsel %vm1974_vm5, 1.0, %v12759_v54  ;;  %v10209_v26 = vpop.permute.xlu1 %657 }
 0x180   :  { %v5314_v47 = vunpack.c.l.b16 %v4786_v38  ;;  %v3719_v21 = vadd.f32 %v8172_v51, %v3718_v23  ;;  %v3671_v7 = vadd.f32 %v8164_v52, %v3670_v59  ;;  %1119 = vbcast.lane.b32.xlu0 %v1117_v62, 256  ;;  %v1180_v40 = vrot.slane %v10185_v27, %v9120_v3 }
 0x181   :  { %v5316_v55 = vunpack.c.l.b16 %v4788_v36  ;;  %v3669_v6 = vadd.f32 %v3668_v12, %v3667_v1  ;;  %v3663_v17 = vadd.f32 %v3662_v34, %v3661_v39  ;;  %vm1966_vm7 = vcmp.eq.s32.totalorder %v10133_v13, %v9291_v25  ;;  %v10215_v34 = vpop.permute.xlu0 %601 }
 0x182   :  { %v3631_v45 = vadd.f32 %v3630_v11, %v3629_v16  ;;  %v3582_v9 = vrot.slane %v3581_v37, 2  ;;  %v3634_v46 = vrot.slane %v8158_v61, 4  ;;  %v1173_v63 = vrot.slane %v10185_v27, %v9118_v2 }
 0x183   :  { %v4780_v30 = vpack.c.bf16 %v3579_v53, %v3579_v53  ;;  %v3716_v4 = vrot.slane %v3715_v22, 1  ;;  %v3710_v0 = vrot.slane %v3709_v42, 1  ;;  %1182 = vbcast.lane.b32.xlu1 %v1180_v40, 256  ;;  %vm1989_vm9 = vcmp.eq.s32.totalorder %v10147_v43, %v9291_v25 }
 0x184   :  { %v3720_v5 = vrot.slane %v3719_v21, 2  ;;  %v3672_v15 = vrot.slane %v3671_v7, 2  ;;  %v8150_v50 = vsel %vm1966_vm7, 1.0, %v12759_v54  ;;  %1175 = vbcast.lane.b32.xlu0 %v1173_v63, 256  ;;  %v8173_v13 = vsel %vm1989_vm9, 1.0, %v12759_v54 }
 0x185   :  { %v5568_v1 = vsel %vm5498_vm10, %v5315_v57, %v5314_v47  ;;  %v4795_v39 = vpack.c.bf16 %v3669_v6, %v3669_v6  ;;  %v4794_v28 = vpack.c.bf16 %v3663_v17, %v3663_v17  ;;  %v3724_v16 = vrot.slane %v8173_v13, 4  ;;  %v10227_v6 = vpop.permute.xlu1 %762 }
 0x186   :  { %v3632_v8 = vrot.slane %v3631_v45, 1  ;;  %v3583_v44 = vadd.f32 %v3582_v9, %v3581_v37  ;;  %v3635_v49 = vadd.f32 %v8158_v61, %v3634_v46  ;;  %vm1981_vm11 = vcmp.eq.s32.totalorder %v10153_v41, %v9291_v25 }
 0x187   :  { %v10212_v43 = vsel %vm5500_vm6, %v5316_v55, %v5568_v1  ;;  %v5308_v51 = vunpack.c.l.b16 %v4780_v30  ;;  %v3717_v38 = vadd.f32 %v3716_v4, %v3715_v22  ;;  %v3586_v36 = vrot.slane %v8150_v50, 4  ;;  %v10235_v4 = vpop.permute.xlu0 %706 }
 0x188   :  { %v3711_v23 = vadd.f32 %v3710_v0, %v3709_v42  ;;  %v3721_v52 = vadd.f32 %v3720_v5, %v3719_v21  ;;  %v3673_v57 = vadd.f32 %v3672_v15, %v3671_v7  ;;  %v8165_v12 = vsel %vm1981_vm11, 1.0, %v12759_v54 }
 0x189   :  { %v5323_v59 = vunpack.c.l.b16 %v4795_v39  ;;  %v5322_v20 = vunpack.c.l.b16 %v4794_v28  ;;  %v3725_v11 = vadd.f32 %v8173_v13, %v3724_v16  ;;  %v3676_v37 = vrot.slane %v8165_v12, 4  ;;  %v8807_v28 = vld [vmem:[#allocation5 + $0x74] ss:$8 sps:$4 sm:$0xff]  }
 0x18a   :  { %v3633_v41 = vadd.f32 %v3632_v8, %v3631_v45  ;;  %v3584_v62 = vrot.slane %v3583_v44, 1  ;;  %v3636_v53 = vrot.slane %v3635_v49, 2  ;;  %v1082_v61 = vrot.slane %v10121_v58, %v9164_v19  ;;  %6094 = vmatprep.subr.bf16.mxu1 %v8807_v28 }
 0x18b   :  { %v10221_v22 = vsel %vm5500_vm6, %v5308_v51, %v10158_v14  ;;  %v4803_v42 = vpack.c.bf16 %v3717_v38, %v3717_v38  ;;  %v3587_v47 = vadd.f32 %v8150_v50, %v3586_v36  ;;  %v1026_v21 = vrot.slane %v10100_v48, %v9164_v19  ;;  %v10246_v36 = vpop.permute.xlu1 %664 }
 0x18c   :  { %v4802_v7 = vpack.c.bf16 %v3711_v23, %v3711_v23  ;;  %v3722_v40 = vrot.slane %v3721_v52, 1  ;;  %v3674_v55 = vrot.slane %v3673_v57, 1  ;;  %1084 = vbcast.lane.b32.xlu1 %v1082_v61, 256  ;;  %vm1975_vm14 = vcmp.eq.s32.totalorder %v10174_v35, %v9291_v25 }
 0x18d   :  { %v10230_v17 = vsel %vm5498_vm10, %v5323_v59, %v5322_v20  ;;  %v3726_v45 = vrot.slane %v3725_v11, 2  ;;  %v3677_v14 = vadd.f32 %v8165_v12, %v3676_v37  ;;  %1028 = vbcast.lane.b32.xlu0 %v1026_v21, 256  ;;  %v8159_v9 = vsel %vm1975_vm14, 1.0, %v12759_v54  ;;  %v8810_v37 = vld [vmem:[#allocation5 + $0x64] ss:$8 sps:$4 sm:$0xff]  }
 0x18e   :  { %v4789_v46 = vpack.c.bf16 %v3633_v41, %v3633_v41  ;;  %v3585_v63 = vadd.f32 %v3584_v62, %v3583_v44  ;;  %v3637_v30 = vadd.f32 %v3636_v53, %v3635_v49  ;;  %vm1967_vm1 = vcmp.eq.s32.totalorder %v10178_v18, %v9291_v25  ;;  %v8809_v18 = vld [vmem:[#allocation5 + $0x70] ss:$8 sps:$4 sm:$0xff]  }
 0x18f   :  { %v3588_v0 = vrot.slane %v3587_v47, 2  ;;  %v3640_v35 = vrot.slane %v8159_v9, 4  ;;  %v8151_v5 = vsel %vm1967_vm1, 1.0, %v12759_v54  ;;  %v1187_v15 = vrot.slane %v10185_v27, %v9140_v10  ;;  %6095 = vmatpush1.bf16.msra.mxu1 %v8809_v18 }
 0x190   :  { %v3723_v50 = vadd.f32 %v3722_v40, %v3721_v52  ;;  %v3675_v13 = vadd.f32 %v3674_v55, %v3673_v57  ;;  %v3592_v1 = vrot.slane %v8151_v5, 4  ;;  %v1131_v39 = vrot.slane %v10172_v31, %v9140_v10  ;;  %6096 = vmatprep.subr.bf16.mxu1 %v8810_v37 }
 0x191   :  { %v3727_v16 = vadd.f32 %v3726_v45, %v3725_v11  ;;  %v3678_v8 = vrot.slane %v3677_v14, 2  ;;  %1189 = vbcast.lane.b32.xlu1 %v1187_v15, 256  ;;  %vm1990_vm2 = vcmp.eq.s32.totalorder %v10194_v60, %v9291_v25  ;;  %vm1982_vm3 = vcmp.eq.s32.totalorder %v10200_v56, %v9291_v25  ;;  %v10254_v11 = vpop.permute.xlu0 %608 }
 0x192   :  { %v5331_v44 = vunpack.c.l.b16 %v4803_v42  ;;  %v5330_v49 = vunpack.c.l.b16 %v4802_v7  ;;  %v5317_v51 = vunpack.c.l.b16 %v4789_v46  ;;  %v3638_v38 = vrot.slane %v3637_v30, 1  ;;  %1133 = vbcast.lane.b32.xlu0 %v1131_v39, 256  ;;  %v8812_v42 = vld [vmem:[#allocation5 + $0x60] ss:$8 sps:$4 sm:$0xff]  }
 0x193   :  { %v3589_v23 = vadd.f32 %v3588_v0, %v3587_v47  ;;  %v3641_v52 = vadd.f32 %v8159_v9, %v3640_v35  ;;  %v8174_v57 = vsel %vm1990_vm2, 1.0, %v12759_v54  ;;  %v8166_v12 = vsel %vm1982_vm3, 1.0, %v12759_v54  ;;  %v10262_v0 = vpop.permute.xlu1 %769  ;;  %6097 = vmatpush1.bf16.msra.mxu1 %v8812_v42  ;;  %v8813_v35 = vld [vmem:[#allocation5 + $0x54] ss:$8 sps:$4 sm:$0xff]  }
 0x194   :  { %v4781_v60 = vpack.c.bf16 %v3585_v63, %v3585_v63  ;;  %v3593_v59 = vadd.f32 %v8151_v5, %v3592_v1  ;;  %v1089_v56 = vrot.slane %v10121_v58, %v9174_v24  ;;  %v1033_v20 = vrot.slane %v10100_v48, %v9174_v24  ;;  %6098 = vmatprep.subr.bf16.mxu1 %v8813_v35 }
 0x195   :  { %v4804_v41 = vpack.c.bf16 %v3723_v50, %v3723_v50  ;;  %v4796_v62 = vpack.c.bf16 %v3675_v13, %v3675_v13  ;;  %v3728_v53 = vrot.slane %v3727_v16, 1  ;;  %v3679_v61 = vadd.f32 %v3678_v8, %v3677_v14  ;;  %v10266_v28 = vpop.permute.xlu0 %713 }
 0x196   :  { %v3730_v47 = vrot.slane %v8174_v57, 4  ;;  %v3682_v21 = vrot.slane %v8166_v12, 4  ;;  %1091 = vbcast.lane.b32.xlu1 %v1089_v56, 256  ;;  %1035 = vbcast.lane.b32.xlu0 %v1033_v20, 256  ;;  %vm1976_vm4 = vcmp.eq.s32.totalorder %v10209_v26, %v9291_v25  ;;  %vm1968_vm5 = vcmp.eq.s32.totalorder %v10215_v34, %v9291_v25  ;;  %v8815_v34 = vld [vmem:[#allocation5 + $0x50] ss:$8 sps:$4 sm:$0xff]  }
 0x197   :  { %v3639_v7 = vadd.f32 %v3638_v38, %v3637_v30  ;;  %v3590_v40 = vrot.slane %v3589_v23, 1  ;;  %v3642_v55 = vrot.slane %v3641_v52, 2  ;;  %v8160_v45 = vsel %vm1976_vm4, 1.0, %v12759_v54  ;;  %6099 = vmatpush1.bf16.msra.mxu1 %v8815_v34 }
 0x198   :  { %v5309_v9 = vunpack.c.l.b16 %v4781_v60  ;;  %v3594_v46 = vrot.slane %v3593_v59, 2  ;;  %v3646_v14 = vrot.slane %v8160_v45, 4  ;;  %v8152_v63 = vsel %vm1968_vm5, 1.0, %v12759_v54 }
 0x199   :  { %v5332_v5 = vunpack.c.l.b16 %v4804_v41  ;;  %v5324_v26 = vunpack.c.l.b16 %v4796_v62  ;;  %v3729_v15 = vadd.f32 %v3728_v53, %v3727_v16  ;;  %v3680_v50 = vrot.slane %v3679_v61, 1  ;;  %v8818_v41 = vld [vmem:[#allocation5 + $0x40] ss:$8 sps:$4 sm:$0xff]   ;;  %v10280_v53 = vpop.permute.xlu1 %776 }
 0x19a   :  { %v3731_v30 = vadd.f32 %v8174_v57, %v3730_v47  ;;  %v3683_v13 = vadd.f32 %v8166_v12, %v3682_v21  ;;  %v3598_v1 = vrot.slane %v8152_v63, 4  ;;  %v1194_v39 = vrot.slane %v10185_v27, %v9164_v19  ;;  %v8816_v57 = vld [vmem:[#allocation5 + $0x44] ss:$8 sps:$4 sm:$0xff]  }
 0x19b   :  { %v4790_v8 = vpack.c.bf16 %v3639_v7, %v3639_v7  ;;  %v3591_v18 = vadd.f32 %v3590_v40, %v3589_v23  ;;  %v3643_v38 = vadd.f32 %v3642_v55, %v3641_v52  ;;  %v1138_v60 = vrot.slane %v10172_v31, %v9164_v19  ;;  %6100 = vmatprep.subr.bf16.mxu1 %v8816_v57  ;;  %v10290_v7 = vpop.permute.xlu0 %720 }
 0x19c   :  { %v5582_v56 = vsel %vm5498_vm10, %v5331_v44, %v5330_v49  ;;  %v3595_v16 = vadd.f32 %v3594_v46, %v3593_v59  ;;  %v3647_v20 = vadd.f32 %v8160_v45, %v3646_v14  ;;  %1196 = vbcast.lane.b32.xlu1 %v1194_v39, 256  ;;  %v10273_v12 = vsel %vm5502_vm8, %v5317_v51, %v10212_v43 }
 0x19d   :  { %v10277_v37 = vsel %vm5502_vm8, %v5309_v9, %v10221_v22  ;;  %v4805_v23 = vpack.c.bf16 %v3729_v15, %v3729_v15  ;;  %v3681_v52 = vadd.f32 %v3680_v50, %v3679_v61  ;;  %1140 = vbcast.lane.b32.xlu0 %v1138_v60, 256  ;;  %v5583_v62 = vsel %vm5500_vm6, %v5332_v5, %v5582_v56  ;;  %v10305_v15 = vpop.permute.xlu1 %790 }
 0x19e   :  { %v3732_v44 = vrot.slane %v3731_v30, 2  ;;  %v3684_v49 = vrot.slane %v3683_v13, 2  ;;  %v3599_v59 = vadd.f32 %v8152_v63, %v3598_v1  ;;  %v5576_v43 = vsel %vm5500_vm6, %v5324_v26, %v10230_v17  ;;  %6101 = vmatpush1.bf16.msra.mxu1 %v8818_v41 }
 0x19f   :  { %v10284_v51 = vunpack.c.l.b16 %v4790_v8  ;;  %v4782_v42 = vpack.c.bf16 %v3591_v18, %v3591_v18  ;;  %v3644_v22 = vrot.slane %v3643_v38, 1  ;;  %v3596_v47 = vrot.slane %v3595_v16, 1  ;;  %v10312_v8 = vpop.permute.xlu0 %783 }
 0x1a0   :  { %v3648_v21 = vrot.slane %v3647_v20, 2  ;;  %vm1991_vm7 = vcmp.eq.s32.totalorder %v10227_v6, %v9291_v25  ;;  %v1096_v61 = vrot.slane %v10121_v58, %v9184_v29  ;;  %v5333_v40 = vunpack.c.l.b16 %v4805_v23 }
 0x1a1   :  { %v4797_v55 = vpack.c.bf16 %v3681_v52, %v3681_v52  ;;  %vm1983_vm9 = vcmp.eq.s32.totalorder %v10235_v4, %v9291_v25  ;;  %v1040_v17 = vrot.slane %v10100_v48, %v9184_v29  ;;  %v3733_v45 = vadd.f32 %v3732_v44, %v3731_v30 }
 0x1a2   :  { %v3685_v9 = vadd.f32 %v3684_v49, %v3683_v13  ;;  %v3600_v46 = vrot.slane %v3599_v59, 2  ;;  %1098 = vbcast.lane.b32.xlu1 %v1096_v61, 256  ;;  %vm1977_vm11 = vcmp.eq.s32.totalorder %v10246_v36, %v9291_v25  ;;  %v8175_v6 = vsel %vm1991_vm7, 1.0, %v12759_v54 }
 0x1a3   :  { %1042 = vbcast.lane.b32.xlu0 %v1040_v17, 256  ;;  %v8161_v14 = vsel %vm1977_vm11, 1.0, %v12759_v54  ;;  %vm1969_vm14 = vcmp.eq.s32.totalorder %v10254_v11, %v9291_v25  ;;  %v1201_v4 = vrot.slane %v10185_v27, %v9174_v24  ;;  %v3645_v63 = vadd.f32 %v3644_v22, %v3643_v38  ;;  %v10335_v17 = vpop.permute.xlu0 %839 }
 0x1a4   :  { %v3597_v35 = vadd.f32 %v3596_v47, %v3595_v16  ;;  %v3649_v5 = vadd.f32 %v3648_v21, %v3647_v20  ;;  %v8167_v26 = vsel %vm1983_vm9, 1.0, %v12759_v54  ;;  %v10307_v50 = vunpack.c.l.b16 %v4782_v42 }
 0x1a5   :  { %v3652_v36 = vrot.slane %v8161_v14, 4  ;;  %v8153_v34 = vsel %vm1969_vm14, 1.0, %v12759_v54  ;;  %v1145_v30 = vrot.slane %v10172_v31, %v9174_v24  ;;  %v5325_v13 = vunpack.c.l.b16 %v4797_v55 }
 0x1a6   :  { %v3734_v11 = vrot.slane %v3733_v45, 1  ;;  %v3686_v1 = vrot.slane %v3685_v9, 1  ;;  %v3736_v39 = vrot.slane %v8175_v6, 4  ;;  %1203 = vbcast.lane.b32.xlu1 %v1201_v4, 256  ;;  %v3601_v18 = vadd.f32 %v3600_v46, %v3599_v59 }
 0x1a7   :  { %v3688_v38 = vrot.slane %v8167_v26, 4  ;;  %v3604_v60 = vrot.slane %v8153_v34, 4  ;;  %1147 = vbcast.lane.b32.xlu0 %v1145_v30, 256  ;;  %vm1992_vm1 = vcmp.eq.s32.totalorder %v10262_v0, %v9291_v25  ;;  %v10317_v56 = vsel %vm5502_vm8, %v5333_v40, %v5583_v62  ;;  %v10324_v0 = vpop.permute.xlu1 %846 }
 0x1a8   :  { %v4791_v16 = vpack.c.bf16 %v3645_v63, %v3645_v63  ;;  %v4783_v20 = vpack.c.bf16 %v3597_v35, %v3597_v35  ;;  %v3650_v57 = vrot.slane %v3649_v5, 1  ;;  %v3653_v23 = vadd.f32 %v8161_v14, %v3652_v36 }
 0x1a9   :  { %v3605_v52 = vadd.f32 %v8153_v34, %v3604_v60  ;;  %v1103_v41 = vrot.slane %v10121_v58, %v9190_v32  ;;  %v1047_v44 = vrot.slane %v10100_v48, %v9190_v32  ;;  %v3735_v49 = vadd.f32 %v3734_v11, %v3733_v45 }
 0x1aa   :  { %v3687_v59 = vadd.f32 %v3686_v1, %v3685_v9  ;;  %v3737_v42 = vadd.f32 %v8175_v6, %v3736_v39  ;;  %v8176_v22 = vsel %vm1992_vm1, 1.0, %v12759_v54  ;;  %v10327_v62 = vsel %vm5502_vm8, %v5325_v13, %v5576_v43  ;;  %v8819_v1 = vld [vmem:[#allocation5 + $0x34] ss:$8 sps:$4 sm:$0xff]   ;;  %v8821_v39 = vld [vmem:[#allocation5 + $0x30] ss:$8 sps:$4 sm:$0xff]  }
 0x1ab   :  { %v3602_v47 = vrot.slane %v3601_v18, 1  ;;  %v3689_v21 = vadd.f32 %v8167_v26, %v3688_v38  ;;  %vm1984_vm2 = vcmp.eq.s32.totalorder %v10266_v28, %v9291_v25  ;;  %1105 = vbcast.lane.b32.xlu1 %v1103_v41, 256  ;;  %1049 = vbcast.lane.b32.xlu0 %v1047_v44, 256  ;;  %v10331_v61 = vunpack.c.l.b16 %v4791_v16 }
 0x1ac   :  { %v3651_v40 = vadd.f32 %v3650_v57, %v3649_v5  ;;  %v3606_v55 = vrot.slane %v3605_v52, 2  ;;  %vm1993_vm3 = vcmp.eq.s32.totalorder %v10280_v53, %v9291_v25  ;;  %v10337_v45 = vunpack.c.l.b16 %v4783_v20  ;;  %v10355_v20 = vpop.permute.xlu0 %797  ;;  %6102 = vmatprep.subr.bf16.mxu1 %v8819_v1 }
 0x1ad   :  { %v3654_v43 = vrot.slane %v3653_v23, 2  ;;  %v3742_v9 = vrot.slane %v8176_v22, 4  ;;  %vm1985_vm4 = vcmp.eq.s32.totalorder %v10290_v7, %v9291_v25  ;;  %v4806_v46 = vpack.c.bf16 %v3735_v49, %v3735_v49  ;;  %v10348_v7 = vpop.permute.xlu1 %853  ;;  %6103 = vmatpush1.bf16.msra.mxu1 %v8821_v39 }
 0x1ae   :  { %v4798_v28 = vpack.c.bf16 %v3687_v59, %v3687_v59  ;;  %v3738_v6 = vrot.slane %v3737_v42, 2  ;;  %v8168_v14 = vsel %vm1984_vm2, 1.0, %v12759_v54  ;;  %v3603_v4 = vadd.f32 %v3602_v47, %v3601_v18 }
 0x1af   :  { %v3690_v63 = vrot.slane %v3689_v21, 2  ;;  %v8177_v35 = vsel %vm1993_vm3, 1.0, %v12759_v54  ;;  %v1208_v53 = vrot.slane %v10185_v27, %v9184_v29  ;;  %v4792_v5 = vpack.c.bf16 %v3651_v40, %v3651_v40 }
 0x1b0   :  { %v3607_v26 = vadd.f32 %v3606_v55, %v3605_v52  ;;  %v8169_v36 = vsel %vm1985_vm4, 1.0, %v12759_v54  ;;  %v1152_v34 = vrot.slane %v10172_v31, %v9184_v29  ;;  %v3655_v30 = vadd.f32 %v3654_v43, %v3653_v23 }
 0x1b1   :  { %v3743_v13 = vadd.f32 %v8176_v22, %v3742_v9  ;;  %v3694_v11 = vrot.slane %v8168_v14, 4  ;;  %1210 = vbcast.lane.b32.xlu1 %v1208_v53, 256  ;;  %vm1995_vm5 = vcmp.eq.s32.totalorder %v10305_v15, %v9291_v25  ;;  %v10352_v18 = vunpack.c.l.b16 %v4806_v46  ;;  %v10368_v9 = vpop.permute.xlu1 %902 }
 0x1b2   :  { %v3739_v38 = vadd.f32 %v3738_v6, %v3737_v42  ;;  %v3748_v60 = vrot.slane %v8177_v35, 4  ;;  %1154 = vbcast.lane.b32.xlu0 %v1152_v34, 256  ;;  %v8179_v16 = vsel %vm1995_vm5, 1.0, %v12759_v54  ;;  %v10357_v57 = vunpack.c.l.b16 %v4798_v28 }
 0x1b3   :  { %v3691_v23 = vadd.f32 %v3690_v63, %v3689_v21  ;;  %v3700_v52 = vrot.slane %v8169_v36, 4  ;;  %v3760_v41 = vrot.slane %v8179_v16, 4  ;;  %v4784_v44 = vpack.c.bf16 %v3603_v4, %v3603_v4  ;;  %v10376_v4 = vpop.permute.xlu0 %895 }
 0x1b4   :  { %v3608_v49 = vrot.slane %v3607_v26, 1  ;;  %vm1994_vm7 = vcmp.eq.s32.totalorder %v10312_v8, %v9291_v25  ;;  %v1110_v15 = vrot.slane %v10121_v58, %v9192_v33  ;;  %v10363_v59 = vunpack.c.l.b16 %v4792_v5 }
 0x1b5   :  { %v3656_v42 = vrot.slane %v3655_v30, 1  ;;  %v3744_v22 = vrot.slane %v3743_v13, 2  ;;  %v3695_v47 = vadd.f32 %v8168_v14, %v3694_v11  ;;  %v3740_v40 = vrot.slane %v3739_v38, 1 }
 0x1b6   :  { %v3749_v55 = vadd.f32 %v8177_v35, %v3748_v60  ;;  %v8178_v21 = vsel %vm1994_vm7, 1.0, %v12759_v54  ;;  %1112 = vbcast.lane.b32.xlu1 %v1110_v15, 256  ;;  %v1054_v43 = vrot.slane %v10100_v48, %v9192_v33  ;;  %v3692_v8 = vrot.slane %v3691_v23, 1  ;;  %v8824_v60 = vld [vmem:[#allocation5 + $0x20] ss:$8 sps:$4 sm:$0xff]  }
 0x1b7   :  { %v3701_v46 = vadd.f32 %v8169_v36, %v3700_v52  ;;  %v3761_v28 = vadd.f32 %v8179_v16, %v3760_v41  ;;  %v3754_v58 = vrot.slane %v8178_v21, 4  ;;  %v3609_v6 = vadd.f32 %v3608_v49, %v3607_v26  ;;  %v10386_v52 = vpop.permute.xlu1 %958 }
 0x1b8   :  { %1056 = vbcast.lane.b32.xlu0 %v1054_v43, 256  ;;  %vm2003_vm9 = vcmp.eq.s32.totalorder %v10324_v0, %v9291_v25  ;;  %vm2002_vm11 = vcmp.eq.s32.totalorder %v10335_v17, %v9291_v25  ;;  %v1215_v14 = vrot.slane %v10185_v27, %v9190_v32  ;;  %v3657_v48 = vadd.f32 %v3656_v42, %v3655_v30  ;;  %v8822_v17 = vld [vmem:[#allocation5 + $0x24] ss:$8 sps:$4 sm:$0xff]  }
 0x1b9   :  { %v10378_v63 = vadd.f32 %v3744_v22, %v3743_v13  ;;  %v3696_v35 = vrot.slane %v3695_v47, 2  ;;  %v3755_v53 = vadd.f32 %v8178_v21, %v3754_v58  ;;  %v3750_v5 = vrot.slane %v3749_v55, 2  ;;  %6104 = vmatprep.subr.bf16.mxu1 %v8822_v17  ;;  %v8827_v22 = vld [vmem:[#allocation5 + $0x10] ss:$8 sps:$4 sm:$0xff]  }
 0x1ba   :  { %v8187_v26 = vsel %vm2003_vm9, 1.0, %v12759_v54  ;;  %v8186_v36 = vsel %vm2002_vm11, 1.0, %v12759_v54  ;;  %1217 = vbcast.lane.b32.xlu1 %v1215_v14, 256  ;;  %v1159_v0 = vrot.slane %v10172_v31, %v9190_v32  ;;  %v5312_v34 = vunpack.c.l.b16 %v4784_v44  ;;  %6105 = vmatpush1.bf16.msra.mxu1 %v8824_v60  ;;  %v8825_v44 = vld [vmem:[#allocation5 + $0x14] ss:$8 sps:$4 sm:$0xff]   ;;  %v10395_v14 = vpop.permute.xlu0 %951 }
 0x1bb   :  { %v3702_v11 = vrot.slane %v3701_v46, 2  ;;  %v3762_v1 = vrot.slane %v3761_v28, 2  ;;  %v3808_v39 = vrot.slane %v8187_v26, 4  ;;  %v4785_v30 = vpack.c.bf16 %v3609_v6, %v3609_v6  ;;  %6106 = vmatprep.subr.bf16.mxu1 %v8825_v44 }
 0x1bc   :  { %v3756_v13 = vrot.slane %v3755_v53, 2  ;;  %v3802_v16 = vrot.slane %v8186_v36, 4  ;;  %1161 = vbcast.lane.b32.xlu0 %v1159_v0, 256  ;;  %vm2004_vm14 = vcmp.eq.s32.totalorder %v10348_v7, %v9291_v25  ;;  %v10388_v41 = vadd.f32 %v3740_v40, %v3739_v38 }
 0x1bd   :  { %v4793_v49 = vpack.c.bf16 %v3657_v48, %v3657_v48  ;;  %v3697_v15 = vadd.f32 %v3696_v35, %v3695_v47  ;;  %v3809_v42 = vadd.f32 %v8187_v26, %v3808_v39  ;;  %v10390_v21 = vadd.f32 %v3692_v8, %v3691_v23 }
 0x1be   :  { %v3746_v43 = vrot.slane %v10378_v63, 1  ;;  %v3751_v58 = vadd.f32 %v3750_v5, %v3749_v55  ;;  %v1222_v6 = vrot.slane %v10185_v27, %v9192_v33  ;;  %v3703_v0 = vadd.f32 %v3702_v11, %v3701_v46  ;;  %6107 = vmatpush1.bf16.msra.mxu1 %v8827_v22  ;;  %v10420_v39 = vpop.permute.xlu0 %804 }
 0x1bf   :  { %v3763_v17 = vadd.f32 %v3762_v1, %v3761_v28  ;;  %v8188_v38 = vsel %vm2004_vm14, 1.0, %v12759_v54  ;;  %vm1996_vm1 = vcmp.eq.s32.totalorder %v10355_v20, %v9291_v25  ;;  %v5313_v23 = vunpack.c.l.b16 %v4785_v30 }
 0x1c0   :  { %v3757_v47 = vadd.f32 %v3756_v13, %v3755_v53  ;;  %v3803_v40 = vadd.f32 %v8186_v36, %v3802_v16  ;;  %1224 = vbcast.lane.b32.xlu1 %v1222_v6, 256  ;;  %v1166_v27 = vrot.slane %v10172_v31, %v9192_v33  ;;  %v5321_v55 = vunpack.c.l.b16 %v4793_v49  ;;  %v10411_v53 = vpop.permute.xlu1 %860 }
 0x1c1   :  { %v3698_v8 = vrot.slane %v3697_v15, 1  ;;  %v3810_v46 = vrot.slane %v3809_v42, 2  ;;  %v5564_v28 = vsel %vm5504_vm12, %v10307_v50, %v10277_v37  ;;  %v3752_v7 = vrot.slane %v3751_v58, 1 }
 0x1c2   :  { %v3814_v48 = vrot.slane %v8188_v38, 4  ;;  %v8180_v20 = vsel %vm1996_vm1, 1.0, %v12759_v54  ;;  %1168 = vbcast.lane.b32.xlu0 %v1166_v27, 256  ;;  %v5565_v35 = vsel %vm5506_vm13, %v10337_v45, %v5564_v28  ;;  %v3704_v5 = vrot.slane %v3703_v0, 1  ;;  %v10454_v28 = vld [vmem:[%s12728_s0 + $0xa8] sm:$0xff] }
 0x1c3   :  { %v3764_v31 = vrot.slane %v3763_v17, 1  ;;  %v5566_v26 = vsel %vm5508_vm15, %v5312_v34, %v5565_v35  ;;  %v5571_v36 = vsel %vm5504_vm12, %v10284_v51, %v10273_v12  ;;  %v3758_v37 = vrot.slane %v3757_v47, 1 }
 0x1c4   :  { %v3804_v50 = vrot.slane %v3803_v40, 2  ;;  %v5567_v11 = vsel %vm5510_vm0, %v5313_v23, %v5566_v26  ;;  %v5572_v1 = vsel %vm5506_vm13, %v10331_v61, %v5571_v36  ;;  %v3747_v45 = vadd.f32 %v3746_v43, %v10378_v63  ;;  %v10431_v63 = vld [vmem:[%s12728_s0 + $0xa0] sm:$0xff]  ;;  %v10437_v43 = vpop.permute.xlu1 %965 }
 0x1c5   :  { %v3811_v60 = vadd.f32 %v3810_v46, %v3809_v42  ;;  %v3766_v30 = vrot.slane %v8180_v20, 4  ;;  %v5573_v34 = vsel %vm5508_vm15, %v10363_v59, %v5572_v1  ;;  %v3699_v13 = vadd.f32 %v3698_v8, %v3697_v15 }
 0x1c6   :  { %v3753_v16 = vadd.f32 %v3752_v7, %v3751_v58  ;;  %v3815_v49 = vadd.f32 %v8188_v38, %v3814_v48  ;;  %v5574_v12 = vsel %vm5510_vm0, %v5321_v55, %v5573_v34  ;;  %v4807_v51 = vpack.c.bf16 %v10388_v41, %v10388_v41  ;;  %v8828_v58 = vld [vmem:[#allocation5 + $0x4] ss:$8 sps:$4 sm:$0xff]   ;;  %v8830_v41 = vld [vmem:[#allocation5] ss:$8 sps:$4 sm:$0xff]  }
 0x1c7   :  { %v3705_v44 = vadd.f32 %v3704_v5, %v3703_v0  ;;  %v3765_v22 = vadd.f32 %v3764_v31, %v3763_v17  ;;  %v5733_v61 = vpack.c.b16 %v5574_v12, %v5567_v11  ;;  %v4799_v42 = vpack.c.bf16 %v10390_v21, %v10390_v21  ;;  %6108 = vmatprep.subr.bf16.mxu1 %v8828_v58 }
 0x1c8   :  { %v3759_v59 = vadd.f32 %v3758_v37, %v3757_v47  ;;  %v3805_v15 = vadd.f32 %v3804_v50, %v3803_v40  ;;  %vm2011_vm2 = vcmp.eq.s32.totalorder %v10368_v9, %v9291_v25  ;;  %v4808_v6 = vpack.c.bf16 %v3747_v45, %v3747_v45  ;;  %v10443_v47 = vpop.permute.xlu0 %909  ;;  %6109 = vmatpush1.bf16.msra.mxu1 %v8830_v41  ;;  %v10462_v1 = vpop.permute.xlu1 %867 }
 0x1c9   :  { %v3812_v0 = vrot.slane %v3811_v60, 1  ;;  %v3767_v17 = vadd.f32 %v8180_v20, %v3766_v30  ;;  %8731 = vmatprep.mubr.bf16.mxu0 %v5733_v61  ;;  %vm2010_vm3 = vcmp.eq.s32.totalorder %v10376_v4, %v9291_v25  ;;  %v4800_v38 = vpack.c.bf16 %v3699_v13, %v3699_v13 }
 0x1ca   :  { %v4809_v23 = vpack.c.bf16 %v3753_v16, %v3753_v16  ;;  %v3816_v27 = vrot.slane %v3815_v49, 2  ;;  %v1236_v21 = vrot.slane %v10431_v63, %v9120_v3  ;;  %v4801_v40 = vpack.c.bf16 %v3705_v44, %v3705_v44 }
 0x1cb   :  { %v4811_v55 = vpack.c.bf16 %v3765_v22, %v3765_v22  ;;  %v8195_v8 = vsel %vm2011_vm2, 1.0, %v12759_v54  ;;  %v1229_v46 = vrot.slane %v10431_v63, %v9118_v2  ;;  %v5335_v7 = vunpack.c.l.b16 %v4807_v51 }
 0x1cc   :  { %v4810_v48 = vpack.c.bf16 %v3759_v59, %v3759_v59  ;;  %v3806_v20 = vrot.slane %v3805_v15, 1  ;;  %v8194_v35 = vsel %vm2010_vm3, 1.0, %v12759_v54  ;;  %1238 = vbcast.lane.b32.xlu1 %v1236_v21, 256  ;;  %v5327_v9 = vunpack.c.l.b16 %v4799_v42  ;;  %v10488_v41 = vpop.permute.xlu1 %972 }
 0x1cd   :  { %v5336_v5 = vunpack.c.l.b16 %v4808_v6  ;;  %v3813_v31 = vadd.f32 %v3812_v0, %v3811_v60  ;;  %v3768_v26 = vrot.slane %v3767_v17, 2  ;;  %1231 = vbcast.lane.b32.xlu0 %v1229_v46, 256  ;;  %v5328_v36 = vunpack.c.l.b16 %v4800_v38 }
 0x1ce   :  { %v3817_v37 = vadd.f32 %v3816_v27, %v3815_v49  ;;  %v3856_v50 = vrot.slane %v8195_v8, 4  ;;  %v1292_v11 = vrot.slane %v10454_v28, %v9120_v3  ;;  %v5337_v45 = vunpack.c.l.b16 %v4809_v23  ;;  %v10468_v49 = vpop.permute.xlu0 %811 }
 0x1cf   :  { %v5329_v30 = vunpack.c.l.b16 %v4801_v40  ;;  %v5339_v34 = vunpack.c.l.b16 %v4811_v55  ;;  %v3850_v13 = vrot.slane %v8194_v35, 4  ;;  %v5338_v4 = vunpack.c.l.b16 %v4810_v48 }
 0x1d0   :  { %v3807_v16 = vadd.f32 %v3806_v20, %v3805_v15  ;;  %vm2019_vm4 = vcmp.eq.s32.totalorder %v10386_v52, %v9291_v25  ;;  %1294 = vbcast.lane.b32.xlu1 %v1292_v11, 256  ;;  %v1285_v60 = vrot.slane %v10454_v28, %v9118_v2  ;;  %v4819_v12 = vpack.c.bf16 %v3813_v31, %v3813_v31  ;;  %v10511_v11 = vpop.permute.xlu1 %874 }
 0x1d1   :  { %v3769_v51 = vadd.f32 %v3768_v26, %v3767_v17  ;;  %vm2018_vm5 = vcmp.eq.s32.totalorder %v10395_v14, %v9291_v25  ;;  %v5578_v44 = vsel %vm5504_vm12, %v10357_v57, %v10327_v62  ;;  %v3818_v22 = vrot.slane %v3817_v37, 1 }
 0x1d2   :  { %v3857_v61 = vadd.f32 %v8195_v8, %v3856_v50  ;;  %1287 = vbcast.lane.b32.xlu0 %v1285_v60, 256  ;;  %v5579_v52 = vsel %vm5506_vm13, %v5327_v9, %v5578_v44  ;;  %vm2005_vm7 = vcmp.eq.s32.totalorder %v10411_v53, %v9291_v25  ;;  %v3851_v42 = vadd.f32 %v8194_v35, %v3850_v13  ;;  %v10494_v27 = vpop.permute.xlu0 %916 }
 0x1d3   :  { %v8203_v59 = vsel %vm2019_vm4, 1.0, %v12759_v54  ;;  %v5580_v15 = vsel %vm5508_vm15, %v5328_v36, %v5579_v52  ;;  %v5585_v14 = vsel %vm5504_vm12, %v10352_v18, %v10317_v56  ;;  %v8202_v58 = vsel %vm2018_vm5, 1.0, %v12759_v54 }
 0x1d4   :  { %v5581_v62 = vsel %vm5510_vm0, %v5329_v30, %v5580_v15  ;;  %v5586_v57 = vsel %vm5506_vm13, %v5335_v7, %v5585_v14  ;;  %vm1997_vm9 = vcmp.eq.s32.totalorder %v10420_v39, %v9291_v25  ;;  %v4818_v53 = vpack.c.bf16 %v3807_v16, %v3807_v16 }
 0x1d5   :  { %v3770_v6 = vrot.slane %v3769_v51, 1  ;;  %v5587_v0 = vsel %vm5508_vm15, %v5336_v5, %v5586_v57  ;;  %v8189_v17 = vsel %vm2005_vm7, 1.0, %v12759_v54  ;;  %v3858_v38 = vrot.slane %v3857_v61, 2  ;;  %v10508_v5 = vld [vmem:[%s12728_s0 + $0xb0] sm:$0xff] }
 0x1d6   :  { %v3904_v23 = vrot.slane %v8203_v59, 4  ;;  %v5588_v56 = vsel %vm5510_vm0, %v5337_v45, %v5587_v0  ;;  %v8181_v18 = vsel %vm1997_vm9, 1.0, %v12759_v54  ;;  %v10497_v21 = vsel %vm5498_vm10, %v5339_v34, %v5338_v4  ;;  %v10518_v16 = vpop.permute.xlu0 %818 }
 0x1d7   :  { %v3852_v39 = vrot.slane %v3851_v42, 2  ;;  %v3898_v40 = vrot.slane %v8202_v58, 4  ;;  %v5734_v55 = vpack.c.b16 %v5588_v56, %v5581_v62  ;;  %v5347_v8 = vunpack.c.l.b16 %v4819_v12 }
 0x1d8   :  { %v3820_v46 = vrot.slane %v8189_v17, 4  ;;  %v3772_v7 = vrot.slane %v8181_v18, 4  ;;  %v1299_v48 = vrot.slane %v10454_v28, %v9140_v10  ;;  %v5346_v20 = vunpack.c.l.b16 %v4818_v53 }
 0x1d9   :  { %v3819_v35 = vadd.f32 %v3818_v22, %v3817_v37  ;;  %8732 = vmatmul.mubr.bf16.gmra.mxu0 %v5734_v55  ;;  %v1243_v9 = vrot.slane %v10431_v63, %v9140_v10  ;;  %vm2020_vm11 = vcmp.eq.s32.totalorder %v10437_v43, %v9291_v25  ;;  %v3771_v31 = vadd.f32 %v3770_v6, %v3769_v51 }
 0x1da   :  { %v3859_v26 = vadd.f32 %v3858_v38, %v3857_v61  ;;  %v3905_v36 = vadd.f32 %v8203_v59, %v3904_v23  ;;  %1301 = vbcast.lane.b32.xlu1 %v1299_v48, 256  ;;  %v8204_v50 = vsel %vm2020_vm11, 1.0, %v12759_v54  ;;  %v3853_v37 = vadd.f32 %v3852_v39, %v3851_v42 }
 0x1db   :  { %v3899_v45 = vadd.f32 %v8202_v58, %v3898_v40  ;;  %1245 = vbcast.lane.b32.xlu0 %v1243_v9, 256  ;;  %v3910_v30 = vrot.slane %v8204_v50, 4  ;;  %vm2012_vm14 = vcmp.eq.s32.totalorder %v10443_v47, %v9291_v25  ;;  %v3821_v43 = vadd.f32 %v8189_v17, %v3820_v46  ;;  %v10530_v47 = vld [vmem:[%s12728_s0 + $0xb8] sm:$0xff] }
 0x1dc   :  { %v3773_v34 = vadd.f32 %v8181_v18, %v3772_v7  ;;  %v8196_v13 = vsel %vm2012_vm14, 1.0, %v12759_v54  ;;  %v1348_v4 = vrot.slane %v10508_v5, %v9120_v3  ;;  %v4820_v60 = vpack.c.bf16 %v3819_v35, %v3819_v35  ;;  %v10540_v18 = vpop.permute.xlu0 %923 }
 0x1dd   :  { %v3911_v12 = vadd.f32 %v8204_v50, %v3910_v30  ;;  %v3862_v51 = vrot.slane %v8196_v13, 4  ;;  %v1341_v44 = vrot.slane %v10508_v5, %v9118_v2  ;;  %v5596_v22 = vsel %vm5498_vm10, %v5347_v8, %v5346_v20 }
 0x1de   :  { %v4812_v61 = vpack.c.bf16 %v3771_v31, %v3771_v31  ;;  %1350 = vbcast.lane.b32.xlu1 %v1348_v4, 256  ;;  %vm2006_vm1 = vcmp.eq.s32.totalorder %v10462_v1, %v9291_v25  ;;  %vm1998_vm2 = vcmp.eq.s32.totalorder %v10468_v49, %v9291_v25  ;;  %v3860_v52 = vrot.slane %v3859_v26, 1  ;;  %v10534_v1 = vpop.permute.xlu1 %979 }
 0x1df   :  { %v3854_v42 = vrot.slane %v3853_v37, 1  ;;  %v3906_v59 = vrot.slane %v3905_v36, 2  ;;  %1343 = vbcast.lane.b32.xlu0 %v1341_v44, 256  ;;  %v8190_v15 = vsel %vm2006_vm1, 1.0, %v12759_v54  ;;  %v3900_v14 = vrot.slane %v3899_v45, 2 }
 0x1e0   :  { %v3822_v58 = vrot.slane %v3821_v43, 2  ;;  %v3774_v62 = vrot.slane %v3773_v34, 2  ;;  %v8182_v57 = vsel %vm1998_vm2, 1.0, %v12759_v54  ;;  %v3912_v53 = vrot.slane %v3911_v12, 2 }
 0x1e1   :  { %v3863_v49 = vadd.f32 %v8196_v13, %v3862_v51  ;;  %v3826_v6 = vrot.slane %v8190_v15, 4  ;;  %v1404_v0 = vrot.slane %v10530_v47, %v9120_v3  ;;  %v5348_v17 = vunpack.c.l.b16 %v4820_v60 }
 0x1e2   :  { %v5340_v38 = vunpack.c.l.b16 %v4812_v61  ;;  %v3778_v23 = vrot.slane %v8182_v57, 4  ;;  %v1397_v56 = vrot.slane %v10530_v47, %v9118_v2  ;;  %v3861_v39 = vadd.f32 %v3860_v52, %v3859_v26 }
 0x1e3   :  { %v3855_v40 = vadd.f32 %v3854_v42, %v3853_v37  ;;  %v3907_v55 = vadd.f32 %v3906_v59, %v3905_v36  ;;  %1406 = vbcast.lane.b32.xlu1 %v1404_v0, 256  ;;  %vm2021_vm3 = vcmp.eq.s32.totalorder %v10488_v41, %v9291_v25  ;;  %v3901_v8 = vadd.f32 %v3900_v14, %v3899_v45  ;;  %v10554_v41 = vpop.permute.xlu1 %881 }
 0x1e4   :  { %v3823_v46 = vadd.f32 %v3822_v58, %v3821_v43  ;;  %v3775_v7 = vadd.f32 %v3774_v62, %v3773_v34  ;;  %1399 = vbcast.lane.b32.xlu0 %v1397_v56, 256  ;;  %v8205_v48 = vsel %vm2021_vm3, 1.0, %v12759_v54  ;;  %v3913_v20 = vadd.f32 %v3912_v53, %v3911_v12  ;;  %v10559_v12 = vpop.permute.xlu0 %825 }
 0x1e5   :  { %v3864_v35 = vrot.slane %v3863_v49, 2  ;;  %v3827_v9 = vadd.f32 %v8190_v15, %v3826_v6  ;;  %v3916_v31 = vrot.slane %v8205_v48, 4  ;;  %v10546_v50 = vsel %vm5500_vm6, %v5348_v17, %v5596_v22 }
 0x1e6   :  { %v10550_v26 = vsel %vm5500_vm6, %v5340_v38, %v10497_v21  ;;  %v3779_v36 = vadd.f32 %v8182_v57, %v3778_v23  ;;  %vm2013_vm4 = vcmp.eq.s32.totalorder %v10494_v27, %v9291_v25  ;;  %v4827_v37 = vpack.c.bf16 %v3861_v39, %v3861_v39 }
 0x1e7   :  { %v4826_v45 = vpack.c.bf16 %v3855_v40, %v3855_v40  ;;  %v3908_v30 = vrot.slane %v3907_v55, 1  ;;  %v3917_v43 = vadd.f32 %v8205_v48, %v3916_v31  ;;  %v3902_v34 = vrot.slane %v3901_v8, 1  ;;  %v10568_v53 = vpop.permute.xlu1 %986 }
 0x1e8   :  { %v3824_v13 = vrot.slane %v3823_v46, 1  ;;  %v8197_v4 = vsel %vm2013_vm4, 1.0, %v12759_v54  ;;  %v1306_v60 = vrot.slane %v10454_v28, %v9164_v19  ;;  %v3776_v21 = vrot.slane %v3775_v7, 1  ;;  %v10573_v39 = vpop.permute.xlu0 %930 }
 0x1e9   :  { %v3914_v51 = vrot.slane %v3913_v20, 1  ;;  %v3865_v44 = vadd.f32 %v3864_v35, %v3863_v49  ;;  %v3828_v22 = vrot.slane %v3827_v9, 2  ;;  %v3780_v27 = vrot.slane %v3779_v36, 2 }
 0x1ea   :  { %v3868_v61 = vrot.slane %v8197_v4, 4  ;;  %1308 = vbcast.lane.b32.xlu1 %v1306_v60, 256  ;;  %v1250_v52 = vrot.slane %v10431_v63, %v9164_v19  ;;  %vm2007_vm5 = vcmp.eq.s32.totalorder %v10511_v11, %v9291_v25  ;;  %v5355_v42 = vunpack.c.l.b16 %v4827_v37 }
 0x1eb   :  { %v5354_v59 = vunpack.c.l.b16 %v4826_v45  ;;  %v3909_v15 = vadd.f32 %v3908_v30, %v3907_v55  ;;  %v3918_v14 = vrot.slane %v3917_v43, 2  ;;  %v3903_v58 = vadd.f32 %v3902_v34, %v3901_v8 }
 0x1ec   :  { %v3869_v62 = vadd.f32 %v8197_v4, %v3868_v61  ;;  %1252 = vbcast.lane.b32.xlu0 %v1250_v52, 256  ;;  %v8191_v57 = vsel %vm2007_vm5, 1.0, %v12759_v54  ;;  %vm1999_vm7 = vcmp.eq.s32.totalorder %v10518_v16, %v9291_v25  ;;  %v3825_v49 = vadd.f32 %v3824_v13, %v3823_v46 }
 0x1ed   :  { %v3777_v6 = vadd.f32 %v3776_v21, %v3775_v7  ;;  %v3915_v0 = vadd.f32 %v3914_v51, %v3913_v20  ;;  %v3866_v17 = vrot.slane %v3865_v44, 1  ;;  %v3829_v38 = vadd.f32 %v3828_v22, %v3827_v9 }
 0x1ee   :  { %v3781_v11 = vadd.f32 %v3780_v27, %v3779_v36  ;;  %v8183_v23 = vsel %vm1999_vm7, 1.0, %v12759_v54  ;;  %v1411_v56 = vrot.slane %v10530_v47, %v9140_v10  ;;  %v4835_v40 = vpack.c.bf16 %v3909_v15, %v3909_v15 }
 0x1ef   :  { %v3919_v55 = vadd.f32 %v3918_v14, %v3917_v43  ;;  %v3832_v8 = vrot.slane %v8191_v57, 4  ;;  %v3784_v48 = vrot.slane %v8183_v23, 4  ;;  %v4834_v16 = vpack.c.bf16 %v3903_v58, %v3903_v58  ;;  %v10582_v43 = vpop.permute.xlu1 %888 }
 0x1f0   :  { %v3870_v35 = vrot.slane %v3869_v62, 2  ;;  %1413 = vbcast.lane.b32.xlu1 %v1411_v56, 256  ;;  %v1355_v46 = vrot.slane %v10508_v5, %v9140_v10  ;;  %vm2022_vm9 = vcmp.eq.s32.totalorder %v10534_v1, %v9291_v25  ;;  %v4821_v7 = vpack.c.bf16 %v3825_v49, %v3825_v49 }
 0x1f1   :  { %v4813_v20 = vpack.c.bf16 %v3777_v6, %v3777_v6  ;;  %v4836_v9 = vpack.c.bf16 %v3915_v0, %v3915_v0  ;;  %v3867_v31 = vadd.f32 %v3866_v17, %v3865_v44  ;;  %v3830_v36 = vrot.slane %v3829_v38, 1  ;;  %v10589_v44 = vpop.permute.xlu0 %832 }
 0x1f2   :  { %v3782_v37 = vrot.slane %v3781_v11, 1  ;;  %1357 = vbcast.lane.b32.xlu0 %v1355_v46, 256  ;;  %v8206_v45 = vsel %vm2022_vm9, 1.0, %v12759_v54  ;;  %v1313_v30 = vrot.slane %v10454_v28, %v9174_v24  ;;  %v3920_v34 = vrot.slane %v3919_v55, 1 }
 0x1f3   :  { %v3833_v13 = vadd.f32 %v8191_v57, %v3832_v8  ;;  %v3785_v4 = vadd.f32 %v8183_v23, %v3784_v48  ;;  %vm2014_vm11 = vcmp.eq.s32.totalorder %v10540_v18, %v9291_v25  ;;  %v5603_v1 = vsel %vm5498_vm10, %v5355_v42, %v5354_v59  ;;  %v10598_v0 = vpop.permute.xlu1 %993 }
 0x1f4   :  { %v5363_v60 = vunpack.c.l.b16 %v4835_v40  ;;  %v3871_v21 = vadd.f32 %v3870_v35, %v3869_v62  ;;  %1315 = vbcast.lane.b32.xlu1 %v1313_v30, 256  ;;  %v1257_v51 = vrot.slane %v10431_v63, %v9174_v24  ;;  %v5362_v22 = vunpack.c.l.b16 %v4834_v16 }
 0x1f5   :  { %v5349_v27 = vunpack.c.l.b16 %v4821_v7  ;;  %v4828_v61 = vpack.c.bf16 %v3867_v31, %v3867_v31  ;;  %v3922_v52 = vrot.slane %v8206_v45, 4  ;;  %v5341_v15 = vunpack.c.l.b16 %v4813_v20  ;;  %v10607_v48 = vpop.permute.xlu0 %937 }
 0x1f6   :  { %v3831_v14 = vadd.f32 %v3830_v36, %v3829_v38  ;;  %v3783_v58 = vadd.f32 %v3782_v37, %v3781_v11  ;;  %v8198_v57 = vsel %vm2014_vm11, 1.0, %v12759_v54  ;;  %1259 = vbcast.lane.b32.xlu0 %v1257_v51, 256  ;;  %v5364_v18 = vunpack.c.l.b16 %v4836_v9 }
 0x1f7   :  { %v3921_v42 = vadd.f32 %v3920_v34, %v3919_v55  ;;  %v3834_v59 = vrot.slane %v3833_v13, 2  ;;  %v3786_v62 = vrot.slane %v3785_v4, 2  ;;  %v3872_v49 = vrot.slane %v3871_v21, 1 }
 0x1f8   :  { %vm2008_vm14 = vcmp.eq.s32.totalorder %v10554_v41, %v9291_v25  ;;  %vm2000_vm1 = vcmp.eq.s32.totalorder %v10559_v12, %v9291_v25  ;;  %v1418_v6 = vrot.slane %v10530_v47, %v9164_v19  ;;  %v5610_v17 = vsel %vm5498_vm10, %v5363_v60, %v5362_v22 }
 0x1f9   :  { %v5356_v38 = vunpack.c.l.b16 %v4828_v61  ;;  %v3923_v11 = vadd.f32 %v8206_v45, %v3922_v52  ;;  %v3874_v23 = vrot.slane %v8198_v57, 4  ;;  %v10603_v56 = vsel %vm5502_vm8, %v5349_v27, %v10546_v50  ;;  %v10638_v22 = vpop.permute.xlu0 %944 }
 0x1fa   :  { %v4822_v40 = vpack.c.bf16 %v3831_v14, %v3831_v14  ;;  %v4814_v55 = vpack.c.bf16 %v3783_v58, %v3783_v58  ;;  %1420 = vbcast.lane.b32.xlu1 %v1418_v6, 256  ;;  %v1362_v8 = vrot.slane %v10508_v5, %v9164_v19  ;;  %v3835_v16 = vadd.f32 %v3834_v59, %v3833_v13 }
 0x1fb   :  { %v3787_v35 = vadd.f32 %v3786_v62, %v3785_v4  ;;  %v8192_v46 = vsel %vm2008_vm14, 1.0, %v12759_v54  ;;  %v8184_v50 = vsel %vm2000_vm1, 1.0, %v12759_v54  ;;  %v10619_v7 = vsel %vm5502_vm8, %v5341_v15, %v10550_v26  ;;  %v10629_v26 = vpop.permute.xlu1 %1000 }
 0x1fc   :  { %v5611_v20 = vsel %vm5500_vm6, %v5364_v18, %v5610_v17  ;;  %v4837_v9 = vpack.c.bf16 %v3921_v42, %v3921_v42  ;;  %v3873_v31 = vadd.f32 %v3872_v49, %v3871_v21  ;;  %1364 = vbcast.lane.b32.xlu0 %v1362_v8, 256  ;;  %v5604_v36 = vsel %vm5500_vm6, %v5356_v38, %v5603_v1 }
 0x1fd   :  { %v3924_v37 = vrot.slane %v3923_v11, 2  ;;  %v3875_v45 = vadd.f32 %v8198_v57, %v3874_v23  ;;  %vm2023_vm2 = vcmp.eq.s32.totalorder %v10568_v53, %v9291_v25  ;;  %v10625_v41 = vunpack.c.l.b16 %v4822_v40  ;;  %v1008_v8 = vpop.permute.xlu0 %1007 }
 0x1fe   :  { %v3838_v12 = vrot.slane %v8192_v46, 4  ;;  %v3790_v30 = vrot.slane %v8184_v50, 4  ;;  %vm2015_vm3 = vcmp.eq.s32.totalorder %v10573_v39, %v9291_v25  ;;  %v10631_v34 = vunpack.c.l.b16 %v4814_v55 }
 0x1ff   :  { %v3836_v13 = vrot.slane %v3835_v16, 1  ;;  %v3788_v4 = vrot.slane %v3787_v35, 1  ;;  %v1320_v1 = vrot.slane %v10454_v28, %v9184_v29  ;;  %v5365_v60 = vunpack.c.l.b16 %v4837_v9 }
 0x200   :  { %v4829_v21 = vpack.c.bf16 %v3873_v31, %v3873_v31  ;;  %v8207_v53 = vsel %vm2023_vm2, 1.0, %v12759_v54  ;;  %v1264_v51 = vrot.slane %v10431_v63, %v9184_v29  ;;  %v3925_v27 = vadd.f32 %v3924_v37, %v3923_v11 }
 0x201   :  { %v3876_v39 = vrot.slane %v3875_v45, 2  ;;  %v8199_v61 = vsel %vm2015_vm3, 1.0, %v12759_v54  ;;  %1322 = vbcast.lane.b32.xlu1 %v1320_v1, 256  ;;  %vm2009_vm4 = vcmp.eq.s32.totalorder %v10582_v43, %v9291_v25  ;;  %v3839_v52 = vadd.f32 %v8192_v46, %v3838_v12  ;;  %v10649_v43 = vpop.permute.xlu1 %1014 }
 0x202   :  { %v3791_v15 = vadd.f32 %v8184_v50, %v3790_v30  ;;  %1266 = vbcast.lane.b32.xlu0 %v1264_v51, 256  ;;  %v8193_v14 = vsel %vm2009_vm4, 1.0, %v12759_v54  ;;  %vm2001_vm5 = vcmp.eq.s32.totalorder %v10589_v44, %v9291_v25  ;;  %v3837_v58 = vadd.f32 %v3836_v13, %v3835_v16 }
 0x203   :  { %v3789_v57 = vadd.f32 %v3788_v4, %v3787_v35  ;;  %v3928_v18 = vrot.slane %v8207_v53, 4  ;;  %v8185_v42 = vsel %vm2001_vm5, 1.0, %v12759_v54  ;;  %v3880_v59 = vrot.slane %v8199_v61, 4 }
 0x204   :  { %v3844_v62 = vrot.slane %v8193_v14, 4  ;;  %v3796_v49 = vrot.slane %v8185_v42, 4  ;;  %v1425_v6 = vrot.slane %v10530_v47, %v9174_v24  ;;  %v10652_v17 = vsel %vm5502_vm8, %v5365_v60, %v5611_v20 }
 0x205   :  { %v5357_v38 = vunpack.c.l.b16 %v4829_v21  ;;  %v3877_v11 = vadd.f32 %v3876_v39, %v3875_v45  ;;  %v1369_v44 = vrot.slane %v10508_v5, %v9174_v24  ;;  %v3926_v23 = vrot.slane %v3925_v27, 1  ;;  %v10667_v60 = vpop.permute.xlu1 %1070 }
 0x206   :  { %v3840_v40 = vrot.slane %v3839_v52, 2  ;;  %v3792_v55 = vrot.slane %v3791_v15, 2  ;;  %1427 = vbcast.lane.b32.xlu1 %v1425_v6, 256  ;;  %vm2024_vm7 = vcmp.eq.s32.totalorder %v10598_v0, %v9291_v25  ;;  %v4823_v16 = vpack.c.bf16 %v3837_v58, %v3837_v58 }
 0x207   :  { %v4815_v35 = vpack.c.bf16 %v3789_v57, %v3789_v57  ;;  %1371 = vbcast.lane.b32.xlu0 %v1369_v44, 256  ;;  %v8208_v46 = vsel %vm2024_vm7, 1.0, %v12759_v54  ;;  %vm2016_vm9 = vcmp.eq.s32.totalorder %v10607_v48, %v9291_v25  ;;  %v3929_v50 = vadd.f32 %v8207_v53, %v3928_v18 }
 0x208   :  { %v3881_v20 = vadd.f32 %v8199_v61, %v3880_v59  ;;  %v3845_v9 = vadd.f32 %v8193_v14, %v3844_v62  ;;  %v3797_v31 = vadd.f32 %v8185_v42, %v3796_v49  ;;  %v3878_v37 = vrot.slane %v3877_v11, 1  ;;  %v10675_v14 = vpop.permute.xlu0 %1063 }
 0x209   :  { %v3934_v45 = vrot.slane %v8208_v46, 4  ;;  %v8200_v12 = vsel %vm2016_vm9, 1.0, %v12759_v54  ;;  %v1327_v0 = vrot.slane %v10454_v28, %v9190_v32  ;;  %v10665_v30 = vsel %vm5502_vm8, %v5357_v38, %v5604_v36 }
 0x20a   :  { %v3927_v13 = vadd.f32 %v3926_v23, %v3925_v27  ;;  %v3841_v4 = vadd.f32 %v3840_v40, %v3839_v52  ;;  %v3793_v1 = vadd.f32 %v3792_v55, %v3791_v15  ;;  %v10669_v48 = vunpack.c.l.b16 %v4823_v16  ;;  %v10687_v23 = vpop.permute.xlu1 %1077 }
 0x20b   :  { %v3886_v21 = vrot.slane %v8200_v12, 4  ;;  %1329 = vbcast.lane.b32.xlu1 %v1327_v0, 256  ;;  %v1271_v53 = vrot.slane %v10431_v63, %v9190_v32  ;;  %vm2025_vm11 = vcmp.eq.s32.totalorder %v10629_v26, %v9291_v25  ;;  %v3930_v51 = vrot.slane %v3929_v50, 2 }
 0x20c   :  { %v3882_v39 = vrot.slane %v3881_v20, 2  ;;  %v3846_v61 = vrot.slane %v3845_v9, 2  ;;  %v3798_v36 = vrot.slane %v3797_v31, 2  ;;  %v10677_v27 = vunpack.c.l.b16 %v4815_v35 }
 0x20d   :  { %v3879_v52 = vadd.f32 %v3878_v37, %v3877_v11  ;;  %v3935_v15 = vadd.f32 %v8208_v46, %v3934_v45  ;;  %1273 = vbcast.lane.b32.xlu0 %v1271_v53, 256  ;;  %vm2017_vm14 = vcmp.eq.s32.totalorder %v10638_v22, %v9291_v25  ;;  %v4838_v58 = vpack.c.bf16 %v3927_v13, %v3927_v13  ;;  %v10692_v37 = vpop.permute.xlu0 %1021 }
 0x20e   :  { %v3842_v57 = vrot.slane %v3841_v4, 1  ;;  %v3794_v18 = vrot.slane %v3793_v1, 1  ;;  %v8209_v42 = vsel %vm2025_vm11, 1.0, %v12759_v54  ;;  %v3887_v26 = vadd.f32 %v8200_v12, %v3886_v21 }
 0x20f   :  { %v8201_v59 = vsel %vm2017_vm14, 1.0, %v12759_v54  ;;  %v1432_v62 = vrot.slane %v10530_v47, %v9184_v29  ;;  %v1376_v49 = vrot.slane %v10508_v5, %v9184_v29  ;;  %v3931_v6 = vadd.f32 %v3930_v51, %v3929_v50 }
 0x210   :  { %v3883_v38 = vadd.f32 %v3882_v39, %v3881_v20  ;;  %v3847_v11 = vadd.f32 %v3846_v61, %v3845_v9  ;;  %v3799_v44 = vadd.f32 %v3798_v36, %v3797_v31  ;;  %v3936_v22 = vrot.slane %v3935_v15, 2  ;;  %v10704_v39 = vpop.permute.xlu1 %1126 }
 0x211   :  { %v3940_v40 = vrot.slane %v8209_v42, 4  ;;  %1434 = vbcast.lane.b32.xlu1 %v1432_v62, 256  ;;  %1378 = vbcast.lane.b32.xlu0 %v1376_v49, 256  ;;  %vm2027_vm1 = vcmp.eq.s32.totalorder %v10649_v43, %v9291_v25  ;;  %vm2026_vm2 = vcmp.eq.s32.totalorder %v1008_v8, %v9291_v25  ;;  %v4830_v55 = vpack.c.bf16 %v3879_v52, %v3879_v52 }
 0x212   :  { %v3843_v16 = vadd.f32 %v3842_v57, %v3841_v4  ;;  %v3795_v35 = vadd.f32 %v3794_v18, %v3793_v1  ;;  %v3892_v46 = vrot.slane %v8201_v59, 4  ;;  %v3888_v50 = vrot.slane %v3887_v26, 2 }
 0x213   :  { %v8211_v20 = vsel %vm2027_vm1, 1.0, %v12759_v54  ;;  %v8210_v9 = vsel %vm2026_vm2, 1.0, %v12759_v54  ;;  %v1334_v31 = vrot.slane %v10454_v28, %v9192_v33  ;;  %v3932_v45 = vrot.slane %v3931_v6, 1 }
 0x214   :  { %v3884_v12 = vrot.slane %v3883_v38, 1  ;;  %v3848_v0 = vrot.slane %v3847_v11, 1  ;;  %v3800_v43 = vrot.slane %v3799_v44, 1  ;;  %v3937_v13 = vadd.f32 %v3936_v22, %v3935_v15 }
 0x215   :  { %v3941_v8 = vadd.f32 %v8209_v42, %v3940_v40  ;;  %1336 = vbcast.lane.b32.xlu1 %v1334_v31, 256  ;;  %v1278_v4 = vrot.slane %v10431_v63, %v9192_v33  ;;  %vm2035_vm3 = vcmp.eq.s32.totalorder %v10667_v60, %v9291_v25  ;;  %v10702_v1 = vunpack.c.l.b16 %v4838_v58  ;;  %v10709_v42 = vpop.permute.xlu0 %1119 }
 0x216   :  { %v3893_v21 = vadd.f32 %v8201_v59, %v3892_v46  ;;  %v3952_v53 = vrot.slane %v8211_v20, 4  ;;  %v3946_v51 = vrot.slane %v8210_v9, 4  ;;  %v10706_v28 = vunpack.c.l.b16 %v4830_v55 }
 0x217   :  { %v4824_v61 = vpack.c.bf16 %v3843_v16, %v3843_v16  ;;  %v4816_v36 = vpack.c.bf16 %v3795_v35, %v3795_v35  ;;  %v3889_v52 = vadd.f32 %v3888_v50, %v3887_v26  ;;  %1280 = vbcast.lane.b32.xlu0 %v1278_v4, 256  ;;  %v3933_v15 = vadd.f32 %v3932_v45, %v3931_v6  ;;  %v10721_v35 = vpop.permute.xlu1 %1182 }
 0x218   :  { %v3849_v57 = vadd.f32 %v3848_v0, %v3847_v11  ;;  %v3801_v18 = vadd.f32 %v3800_v43, %v3799_v44  ;;  %v8219_v63 = vsel %vm2035_vm3, 1.0, %v12759_v54  ;;  %v10711_v60 = vadd.f32 %v3884_v12, %v3883_v38 }
 0x219   :  { %v3938_v58 = vrot.slane %v3937_v13, 1  ;;  %v3942_v59 = vrot.slane %v3941_v8, 2  ;;  %v1439_v62 = vrot.slane %v10530_v47, %v9190_v32  ;;  %v3894_v49 = vrot.slane %v3893_v21, 2 }
 0x21a   :  { %v3953_v22 = vadd.f32 %v8211_v20, %v3952_v53  ;;  %v3947_v40 = vadd.f32 %v8210_v9, %v3946_v51  ;;  %vm2034_vm4 = vcmp.eq.s32.totalorder %v10675_v14, %v9291_v25  ;;  %v3890_v26 = vrot.slane %v3889_v52, 1 }
 0x21b   :  { %v4000_v6 = vrot.slane %v8219_v63, 4  ;;  %1441 = vbcast.lane.b32.xlu1 %v1439_v62, 256  ;;  %v1383_v11 = vrot.slane %v10508_v5, %v9190_v32  ;;  %vm2036_vm5 = vcmp.eq.s32.totalorder %v10687_v23, %v9291_v25  ;;  %v5352_v38 = vunpack.c.l.b16 %v4824_v61  ;;  %v10727_v23 = vpop.permute.xlu0 %1175 }
 0x21c   :  { %v4839_v44 = vpack.c.bf16 %v3933_v15, %v3933_v15  ;;  %v4825_v55 = vpack.c.bf16 %v3849_v57, %v3849_v57  ;;  %v4817_v16 = vpack.c.bf16 %v3801_v18, %v3801_v18  ;;  %v5344_v46 = vunpack.c.l.b16 %v4816_v36 }
 0x21d   :  { %v4831_v50 = vpack.c.bf16 %v10711_v60, %v10711_v60  ;;  %v3943_v14 = vadd.f32 %v3942_v59, %v3941_v8  ;;  %v8218_v20 = vsel %vm2034_vm4, 1.0, %v12759_v54  ;;  %1385 = vbcast.lane.b32.xlu0 %v1383_v11, 256  ;;  %v3895_v9 = vadd.f32 %v3894_v49, %v3893_v21 }
 0x21e   :  { %v3954_v31 = vrot.slane %v3953_v22, 2  ;;  %v3948_v45 = vrot.slane %v3947_v40, 2  ;;  %v8220_v12 = vsel %vm2036_vm5, 1.0, %v12759_v54  ;;  %v3939_v0 = vadd.f32 %v3938_v58, %v3937_v13 }
 0x21f   :  { %v3891_v43 = vadd.f32 %v3890_v26, %v3889_v52  ;;  %v4001_v4 = vadd.f32 %v8219_v63, %v4000_v6  ;;  %v1446_v53 = vrot.slane %v10530_v47, %v9192_v33  ;;  %v10731_v51 = vunpack.c.l.b16 %v4839_v44  ;;  %v10740_v63 = vpop.permute.xlu1 %1084 }
 0x220   :  { %v5353_v61 = vunpack.c.l.b16 %v4825_v55  ;;  %v5345_v8 = vunpack.c.l.b16 %v4817_v16  ;;  %v3994_v36 = vrot.slane %v8218_v20, 4  ;;  %v3944_v15 = vrot.slane %v3943_v14, 1  ;;  %v10758_v16 = vld [vmem:[%s12728_s0 + $0xc0] sm:$0xff] }
 0x221   :  { %v4006_v57 = vrot.slane %v8220_v12, 4  ;;  %vm2028_vm7 = vcmp.eq.s32.totalorder %v10692_v37, %v9291_v25  ;;  %1448 = vbcast.lane.b32.xlu1 %v1446_v53, 256  ;;  %v1390_v21 = vrot.slane %v10508_v5, %v9192_v33  ;;  %v3896_v13 = vrot.slane %v3895_v9, 1 }
 0x222   :  { %v3955_v52 = vadd.f32 %v3954_v31, %v3953_v22  ;;  %v3949_v18 = vadd.f32 %v3948_v45, %v3947_v40  ;;  %v5592_v47 = vsel %vm5504_vm12, %v10631_v34, %v10619_v7  ;;  %v4840_v60 = vpack.c.bf16 %v3939_v0, %v3939_v0  ;;  %v10749_v40 = vpop.permute.xlu0 %1028 }
 0x223   :  { %v4832_v58 = vpack.c.bf16 %v3891_v43, %v3891_v43  ;;  %v4002_v59 = vrot.slane %v4001_v4, 2  ;;  %1392 = vbcast.lane.b32.xlu0 %v1390_v21, 256  ;;  %v5593_v37 = vsel %vm5506_vm13, %v10677_v27, %v5592_v47  ;;  %v3995_v62 = vadd.f32 %v8218_v20, %v3994_v36  ;;  %v10780_v36 = vld [vmem:[%s12728_s0 + $0xc8] sm:$0xff] }
 0x224   :  { %v8212_v49 = vsel %vm2028_vm7, 1.0, %v12759_v54  ;;  %v5594_v5 = vsel %vm5508_vm15, %v5344_v46, %v5593_v37  ;;  %v5599_v22 = vsel %vm5504_vm12, %v10625_v41, %v10603_v56  ;;  %v3945_v7 = vadd.f32 %v3944_v15, %v3943_v14 }
 0x225   :  { %v4007_v34 = vadd.f32 %v8220_v12, %v4006_v57  ;;  %v5595_v26 = vsel %vm5510_vm0, %v5345_v8, %v5594_v5  ;;  %v5600_v6 = vsel %vm5506_vm13, %v10669_v48, %v5599_v22  ;;  %v3897_v11 = vadd.f32 %v3896_v13, %v3895_v9  ;;  %v10784_v13 = vpop.f32.mrf.mxu0 }
 0x226   :  { %v3956_v27 = vrot.slane %v3955_v52, 1  ;;  %v3950_v44 = vrot.slane %v3949_v18, 1  ;;  %v5601_v55 = vsel %vm5508_vm15, %v5352_v38, %v5600_v6  ;;  %v3958_v56 = vrot.slane %v8212_v49, 4  ;;  %v10766_v38 = vpop.permute.xlu1 %1189 }
 0x227   :  { %v5602_v41 = vsel %vm5510_vm0, %v5353_v61, %v5601_v55  ;;  %vm2043_vm9 = vcmp.eq.s32.totalorder %v10704_v39, %v9291_v25  ;;  %vm2042_vm11 = vcmp.eq.s32.totalorder %v10709_v42, %v9291_v25  ;;  %v4003_v48 = vadd.f32 %v4002_v59, %v4001_v4  ;;  %v10773_v4 = vpop.permute.xlu0 %1133 }
 0x228   :  { %v3996_v46 = vrot.slane %v3995_v62, 2  ;;  %v5735_v14 = vpack.c.b16 %v5602_v41, %v5595_v26  ;;  %v8227_v20 = vsel %vm2043_vm9, 1.0, %v12759_v54  ;;  %v5359_v9 = vunpack.c.l.b16 %v4831_v50  ;;  %v10798_v26 = vpop.f32.mrf.mxu0 }
 0x229   :  { %v4008_v31 = vrot.slane %v4007_v34, 2  ;;  %v4048_v45 = vrot.slane %v8227_v20, 4  ;;  %v1460_v12 = vrot.slane %v10758_v16, %v9120_v3  ;;  %v4841_v0 = vpack.c.bf16 %v3945_v7, %v3945_v7 }
 0x22a   :  { %v4833_v43 = vpack.c.bf16 %v3897_v11, %v3897_v11  ;;  %8735 = vmatprep.mubr.bf16.mxu0 %v5735_v14  ;;  %v8226_v39 = vsel %vm2042_vm11, 1.0, %v12759_v54  ;;  %v1453_v42 = vrot.slane %v10758_v16, %v9118_v2  ;;  %v5368_v53 = vunpack.c.l.b16 %v4840_v60 }
 0x22b   :  { %v3957_v61 = vadd.f32 %v3956_v27, %v3955_v52  ;;  %v10775_v8 = vadd.f32 %v3950_v44, %v3949_v18  ;;  %v3959_v50 = vadd.f32 %v8212_v49, %v3958_v56  ;;  %1462 = vbcast.lane.b32.xlu1 %v1460_v12, 256  ;;  %v5360_v15 = vunpack.c.l.b16 %v4832_v58  ;;  %v10800_v6 = vpop.permute.xlu0 %1035 }
 0x22c   :  { %v4004_v57 = vrot.slane %v4003_v48, 1  ;;  %v3997_v21 = vadd.f32 %v3996_v46, %v3995_v62  ;;  %1455 = vbcast.lane.b32.xlu0 %v1453_v42, 256  ;;  %vm2051_vm14 = vcmp.eq.s32.totalorder %v10721_v35, %v9291_v25  ;;  %v4009_v47 = vadd.f32 %v4008_v31, %v4007_v34  ;;  %v10792_v62 = vpop.permute.xlu1 %1091 }
 0x22d   :  { %v4049_v52 = vadd.f32 %v8227_v20, %v4048_v45  ;;  %v4042_v18 = vrot.slane %v8226_v39, 4  ;;  %vm2050_vm1 = vcmp.eq.s32.totalorder %v10727_v23, %v9291_v25  ;;  %v5369_v60 = vunpack.c.l.b16 %v4841_v0  ;;  %v10817_v0 = vpop.f32.mrf.mxu0 }
 0x22e   :  { %v5361_v59 = vunpack.c.l.b16 %v4833_v43  ;;  %v1516_v37 = vrot.slane %v10780_v36, %v9120_v3  ;;  %v1509_v58 = vrot.slane %v10780_v36, %v9118_v2  ;;  %v4843_v49 = vpack.c.bf16 %v3957_v61, %v3957_v61 }
 0x22f   :  { %v4842_v35 = vpack.c.bf16 %v10775_v8, %v10775_v8  ;;  %v3960_v5 = vrot.slane %v3959_v50, 2  ;;  %v8235_v22 = vsel %vm2051_vm14, 1.0, %v12759_v54  ;;  %v4005_v7 = vadd.f32 %v4004_v57, %v4003_v48  ;;  %v10827_v8 = vpop.permute.xlu0 %1140 }
 0x230   :  { %v3998_v34 = vrot.slane %v3997_v21, 1  ;;  %v8234_v23 = vsel %vm2050_vm1, 1.0, %v12759_v54  ;;  %1518 = vbcast.lane.b32.xlu1 %v1516_v37, 256  ;;  %1511 = vbcast.lane.b32.xlu0 %v1509_v58, 256  ;;  %v4010_v11 = vrot.slane %v4009_v47, 1  ;;  %v4050_v27 = vrot.slane %v4049_v52, 2  ;;  %v10819_v43 = vpop.permute.xlu1 %1196 }
 0x231   :  { %v4043_v44 = vadd.f32 %v8226_v39, %v4042_v18  ;;  %v5606_v55 = vsel %vm5504_vm12, %v10706_v28, %v10665_v30  ;;  %v9058_v56 = vmov 0   ;;  %v4096_v41 = vrot.slane %v8235_v22, 4 }
 0x232   :  { %6126 = vmatprep.mubr.bf16.mxu1 %v9058_v56  ;;  %v5607_v48 = vsel %vm5506_vm13, %v5359_v9, %v5606_v55  ;;  %v5613_v46 = vsel %vm5504_vm12, %v10702_v1, %v10652_v17  ;;  %vm2037_vm2 = vcmp.eq.s32.totalorder %v10740_v63, %v9291_v25  ;;  %v3961_v14 = vadd.f32 %v3960_v5, %v3959_v50 }
 0x233   :  { %v4090_v20 = vrot.slane %v8234_v23, 4  ;;  %v5608_v31 = vsel %vm5508_vm15, %v5360_v15, %v5607_v48  ;;  %v5614_v30 = vsel %vm5506_vm13, %v10731_v51, %v5613_v46  ;;  %v4851_v28 = vpack.c.bf16 %v4005_v7, %v4005_v7  ;;  %v10862_v48 = vpop.permute.xlu0 %1042 }
 0x234   :  { %v3999_v45 = vadd.f32 %v3998_v34, %v3997_v21  ;;  %v5609_v12 = vsel %vm5510_vm0, %v5361_v59, %v5608_v31  ;;  %v5615_v9 = vsel %vm5508_vm15, %v5368_v53, %v5614_v30  ;;  %v10821_v17 = vadd.f32 %v4010_v11, %v4009_v47  ;;  %v10849_v7 = vpop.permute.xlu1 %1098 }
 0x235   :  { %v4044_v1 = vrot.slane %v4043_v44, 2  ;;  %v5616_v63 = vsel %vm5510_vm0, %v5369_v60, %v5615_v9  ;;  %v8221_v39 = vsel %vm2037_vm2, 1.0, %v12759_v54  ;;  %v4051_v42 = vadd.f32 %v4050_v27, %v4049_v52  ;;  %v5846_v60 = vpop.f32.mrf.mxu0 }
 0x236   :  { %v4097_v61 = vadd.f32 %v8235_v22, %v4096_v41  ;;  %v5736_v51 = vpack.c.b16 %v5616_v63, %v5609_v12  ;;  %vm2029_vm3 = vcmp.eq.s32.totalorder %v10749_v40, %v9291_v25  ;;  %v10829_v53 = vunpack.c.l.b16 %v4843_v49  ;;  %v10847_v22 = vld [vmem:[%s12728_s0 + $0xd0] sm:$0xff] }
 0x237   :  { %v3962_v50 = vrot.slane %v3961_v14, 1  ;;  %v4091_v15 = vadd.f32 %v8234_v23, %v4090_v20  ;;  %v8213_v57 = vsel %vm2029_vm3, 1.0, %v12759_v54  ;;  %v10832_v21 = vunpack.c.l.b16 %v4842_v35 }
 0x238   :  { %8736 = vmatmul.mubr.bf16.gmra.mxu0 %v5736_v51  ;;  %v4012_v47 = vrot.slane %v8221_v39, 4  ;;  %v3964_v18 = vrot.slane %v8213_v57, 4  ;;  %v1523_v52 = vrot.slane %v10780_v36, %v9140_v10  ;;  %v10836_v59 = vunpack.c.l.b16 %v4851_v28 }
 0x239   :  { %v4850_v40 = vpack.c.bf16 %v3999_v45, %v3999_v45  ;;  %v4045_v37 = vadd.f32 %v4044_v1, %v4043_v44  ;;  %v1467_v58 = vrot.slane %v10758_v16, %v9140_v10  ;;  %v4852_v49 = vpack.c.bf16 %v10821_v17, %v10821_v17 }
 0x23a   :  { %v4052_v5 = vrot.slane %v4051_v42, 1  ;;  %v4098_v35 = vrot.slane %v4097_v61, 2  ;;  %1525 = vbcast.lane.b32.xlu1 %v1523_v52, 256  ;;  %vm2052_vm4 = vcmp.eq.s32.totalorder %v10766_v38, %v9291_v25  ;;  %v10851_v34 = vadd.f32 %v3962_v50, %v3961_v14  ;;  %v10860_v38 = vld [vmem:[%s12728_s0 + $0xd8] sm:$0xff] }
 0x23b   :  { %v4092_v23 = vrot.slane %v4091_v15, 2  ;;  %1469 = vbcast.lane.b32.xlu0 %v1467_v58, 256  ;;  %v8236_v11 = vsel %vm2052_vm4, 1.0, %v12759_v54  ;;  %v5970_v27 = vpack.c.bf16 %v5846_v60, %v10798_v26  ;;  %v4013_v44 = vadd.f32 %v8221_v39, %v4012_v47  ;;  %v10886_v47 = vpop.permute.xlu0 %1147 }
 0x23c   :  { %v3965_v55 = vadd.f32 %v8213_v57, %v3964_v18  ;;  %v4102_v41 = vrot.slane %v8236_v11, 4  ;;  %vm2044_vm5 = vcmp.eq.s32.totalorder %v10773_v4, %v9291_v25  ;;  %v4046_v46 = vrot.slane %v4045_v37, 1 }
 0x23d   :  { %v8228_v14 = vsel %vm2044_vm5, 1.0, %v12759_v54  ;;  %v1572_v20 = vrot.slane %v10847_v22, %v9120_v3  ;;  %v1565_v26 = vrot.slane %v10847_v22, %v9118_v2  ;;  %6127 = vmatmul.mubr.bf16.vlgmr.msra.gmra.mxu1 %v5970_v27  ;;  %v4053_v31 = vadd.f32 %v4052_v5, %v4051_v42  ;;  %v10876_v42 = vpop.permute.xlu1 %1203 }
 0x23e   :  { %v4099_v30 = vadd.f32 %v4098_v35, %v4097_v61  ;;  %v4103_v4 = vadd.f32 %v8236_v11, %v4102_v41  ;;  %v4054_v28 = vrot.slane %v8228_v14, 4  ;;  %6136 = vmatprep.mubr.bf16.mxu1 %v9058_v56  ;;  %v5378_v45 = vunpack.c.l.b16 %v4850_v40 }
 0x23f   :  { %1574 = vbcast.lane.b32.xlu1 %v1572_v20, 256  ;;  %1567 = vbcast.lane.b32.xlu0 %v1565_v26, 256  ;;  %vm2038_vm7 = vcmp.eq.s32.totalorder %v10792_v62, %v9291_v25  ;;  %vm2030_vm9 = vcmp.eq.s32.totalorder %v10800_v6, %v9291_v25  ;;  %v1628_v12 = vrot.slane %v10860_v38, %v9120_v3  ;;  %v4014_v1 = vrot.slane %v4013_v44, 2  ;;  %v10907_v20 = vpop.permute.xlu0 %1049 }
 0x240   :  { %v4093_v9 = vadd.f32 %v4092_v23, %v4091_v15  ;;  %v3966_v63 = vrot.slane %v3965_v55, 2  ;;  %v4055_v39 = vadd.f32 %v8228_v14, %v4054_v28  ;;  %v8222_v61 = vsel %vm2038_vm7, 1.0, %v12759_v54 }
 0x241   :  { %v8214_v51 = vsel %vm2030_vm9, 1.0, %v12759_v54  ;;  %v1621_v50 = vrot.slane %v10860_v38, %v9118_v2  ;;  %vm2053_vm11 = vcmp.eq.s32.totalorder %v10819_v43, %v9291_v25  ;;  %v4047_v62 = vadd.f32 %v4046_v46, %v4045_v37  ;;  %v10899_v41 = vpop.permute.xlu1 %1105 }
 0x242   :  { %v5971_v6 = vpack.c.bf16 %v10817_v0, %v10784_v13  ;;  %v4104_v15 = vrot.slane %v4103_v4, 2  ;;  %v4056_v57 = vrot.slane %v4055_v39, 2  ;;  %v4018_v18 = vrot.slane %v8222_v61, 4 }
 0x243   :  { %v3970_v52 = vrot.slane %v8214_v51, 4  ;;  %1630 = vbcast.lane.b32.xlu1 %v1628_v12, 256  ;;  %1623 = vbcast.lane.b32.xlu0 %v1621_v50, 256  ;;  %v8237_v60 = vsel %vm2053_vm11, 1.0, %v12759_v54  ;;  %vm2045_vm14 = vcmp.eq.s32.totalorder %v10827_v8, %v9291_v25  ;;  %v5617_v43 = vsel %vm5498_vm10, %v10829_v53, %v10832_v21 }
 0x244   :  { %v4844_v13 = vpack.c.bf16 %v10851_v34, %v10851_v34  ;;  %v4859_v0 = vpack.c.bf16 %v4053_v31, %v4053_v31  ;;  %v4100_v40 = vrot.slane %v4099_v30, 1  ;;  %v4094_v37 = vrot.slane %v4093_v9, 1 }
 0x245   :  { %v4015_v58 = vadd.f32 %v4014_v1, %v4013_v44  ;;  %v3967_v5 = vadd.f32 %v3966_v63, %v3965_v55  ;;  %v8229_v35 = vsel %vm2045_vm14, 1.0, %v12759_v54  ;;  %6137 = vmatmul.mubr.bf16.gmra.mxu1 %v5971_v6  ;;  %v5624_v23 = vsel %vm5498_vm10, %v10836_v59, %v5378_v45  ;;  %v10919_v50 = vpop.permute.xlu1 %1210 }
 0x246   :  { %v4858_v11 = vpack.c.bf16 %v4047_v62, %v4047_v62  ;;  %v4105_v8 = vadd.f32 %v4104_v15, %v4103_v4  ;;  %v4108_v27 = vrot.slane %v8237_v60, 4  ;;  %6146 = vmatprep.mubr.bf16.mxu1 %v9058_v56  ;;  %v5380_v53 = vunpack.c.l.b16 %v4852_v49 }
 0x247   :  { %v4057_v21 = vadd.f32 %v4056_v57, %v4055_v39  ;;  %v4019_v34 = vadd.f32 %v8222_v61, %v4018_v18  ;;  %v3971_v44 = vadd.f32 %v8214_v51, %v3970_v52  ;;  %v5372_v55 = vunpack.c.l.b16 %v4844_v13 }
 0x248   :  { %v4101_v46 = vadd.f32 %v4100_v40, %v4099_v30  ;;  %v4060_v14 = vrot.slane %v8229_v35, 4  ;;  %v1530_v59 = vrot.slane %v10780_v36, %v9164_v19  ;;  %v5387_v26 = vunpack.c.l.b16 %v4859_v0 }
 0x249   :  { %v4095_v31 = vadd.f32 %v4094_v37, %v4093_v9  ;;  %v4016_v4 = vrot.slane %v4015_v58, 1  ;;  %v3968_v28 = vrot.slane %v3967_v5, 1  ;;  %v5386_v45 = vunpack.c.l.b16 %v4858_v11 }
 0x24a   :  { %v4106_v12 = vrot.slane %v4105_v8, 1  ;;  %v4109_v1 = vadd.f32 %v8237_v60, %v4108_v27  ;;  %1532 = vbcast.lane.b32.xlu1 %v1530_v59, 256  ;;  %v1474_v17 = vrot.slane %v10758_v16, %v9164_v19  ;;  %v10912_v49 = vsel %vm5500_vm6, %v5380_v53, %v5624_v23 }
 0x24b   :  { %v4058_v30 = vrot.slane %v4057_v21, 1  ;;  %v4020_v63 = vrot.slane %v4019_v34, 2  ;;  %v3972_v39 = vrot.slane %v3971_v44, 2  ;;  %v10915_v61 = vsel %vm5500_vm6, %v5372_v55, %v5617_v43  ;;  %v10928_v43 = vpop.permute.xlu0 %1154 }
 0x24c   :  { %v4867_v51 = vpack.c.bf16 %v4101_v46, %v4101_v46  ;;  %v4061_v9 = vadd.f32 %v8229_v35, %v4060_v14  ;;  %1476 = vbcast.lane.b32.xlu0 %v1474_v17, 256  ;;  %vm2039_vm1 = vcmp.eq.s32.totalorder %v10849_v7, %v9291_v25  ;;  %v4866_v62 = vpack.c.bf16 %v4095_v31, %v4095_v31 }
 0x24d   :  { %v4017_v6 = vadd.f32 %v4016_v4, %v4015_v58  ;;  %v3969_v15 = vadd.f32 %v3968_v28, %v3967_v5  ;;  %vm2031_vm2 = vcmp.eq.s32.totalorder %v10862_v48, %v9291_v25  ;;  %v10924_v57 = vsel %vm5498_vm10, %v5387_v26, %v5386_v45 }
 0x24e   :  { %v4107_v18 = vadd.f32 %v4106_v12, %v4105_v8  ;;  %v4110_v52 = vrot.slane %v4109_v1, 2  ;;  %v1635_v60 = vrot.slane %v10860_v38, %v9140_v10  ;;  %v4059_v13 = vadd.f32 %v4058_v30, %v4057_v21  ;;  %v10939_v21 = vpop.permute.xlu1 %1112 }
 0x24f   :  { %v4021_v7 = vadd.f32 %v4020_v63, %v4019_v34  ;;  %v3973_v0 = vadd.f32 %v3972_v39, %v3971_v44  ;;  %v8223_v40 = vsel %vm2039_vm1, 1.0, %v12759_v54  ;;  %v4062_v37 = vrot.slane %v4061_v9, 2  ;;  %v10944_v31 = vpop.permute.xlu0 %1056 }
 0x250   :  { %v8215_v58 = vsel %vm2031_vm2, 1.0, %v12759_v54  ;;  %1637 = vbcast.lane.b32.xlu1 %v1635_v60, 256  ;;  %v1579_v48 = vrot.slane %v10847_v22, %v9140_v10  ;;  %vm2054_vm3 = vcmp.eq.s32.totalorder %v10876_v42, %v9291_v25  ;;  %v5395_v5 = vunpack.c.l.b16 %v4867_v51 }
 0x251   :  { %v5394_v35 = vunpack.c.l.b16 %v4866_v62  ;;  %v4853_v23 = vpack.c.bf16 %v4017_v6, %v4017_v6  ;;  %v4845_v11 = vpack.c.bf16 %v3969_v15, %v3969_v15  ;;  %v4111_v8 = vadd.f32 %v4110_v52, %v4109_v1 }
 0x252   :  { %v4024_v27 = vrot.slane %v8223_v40, 4  ;;  %1581 = vbcast.lane.b32.xlu0 %v1579_v48, 256  ;;  %v8238_v53 = vsel %vm2054_vm3, 1.0, %v12759_v54  ;;  %vm2046_vm4 = vcmp.eq.s32.totalorder %v10886_v47, %v9291_v25  ;;  %v4868_v34 = vpack.c.bf16 %v4107_v18, %v4107_v18  ;;  %v10952_v18 = vpop.permute.xlu1 %1217 }
 0x253   :  { %v4860_v44 = vpack.c.bf16 %v4059_v13, %v4059_v13  ;;  %v3976_v55 = vrot.slane %v8215_v58, 4  ;;  %v8230_v46 = vsel %vm2046_vm4, 1.0, %v12759_v54  ;;  %v4022_v42 = vrot.slane %v4021_v7, 1 }
 0x254   :  { %v3974_v14 = vrot.slane %v3973_v0, 1  ;;  %v4063_v59 = vadd.f32 %v4062_v37, %v4061_v9  ;;  %v1537_v26 = vrot.slane %v10780_v36, %v9174_v24  ;;  %v5638_v4 = vsel %vm5498_vm10, %v5395_v5, %v5394_v35  ;;  %v10964_v37 = vpop.permute.xlu0 %1161 }
 0x255   :  { %v5381_v28 = vunpack.c.l.b16 %v4853_v23  ;;  %v4114_v45 = vrot.slane %v8238_v53, 4  ;;  %v1481_v47 = vrot.slane %v10758_v16, %v9174_v24  ;;  %v4112_v12 = vrot.slane %v4111_v8, 1 }
 0x256   :  { %v4025_v1 = vadd.f32 %v8223_v40, %v4024_v27  ;;  %v4066_v17 = vrot.slane %v8230_v46, 4  ;;  %1539 = vbcast.lane.b32.xlu1 %v1537_v26, 256  ;;  %vm2040_vm5 = vcmp.eq.s32.totalorder %v10899_v41, %v9291_v25  ;;  %v5373_v30 = vunpack.c.l.b16 %v4845_v11 }
 0x257   :  { %v5396_v63 = vunpack.c.l.b16 %v4868_v34  ;;  %v5388_v39 = vunpack.c.l.b16 %v4860_v44  ;;  %v3977_v51 = vadd.f32 %v8215_v58, %v3976_v55  ;;  %1483 = vbcast.lane.b32.xlu0 %v1481_v47, 256  ;;  %v4023_v9 = vadd.f32 %v4022_v42, %v4021_v7 }
 0x258   :  { %v3975_v62 = vadd.f32 %v3974_v14, %v3973_v0  ;;  %v4064_v6 = vrot.slane %v4063_v59, 1  ;;  %v8224_v15 = vsel %vm2040_vm5, 1.0, %v12759_v54  ;;  %v4115_v52 = vadd.f32 %v8238_v53, %v4114_v45 }
 0x259   :  { %vm2032_vm7 = vcmp.eq.s32.totalorder %v10907_v20, %v9291_v25  ;;  %v1642_v60 = vrot.slane %v10860_v38, %v9164_v19  ;;  %v1586_v41 = vrot.slane %v10847_v22, %v9164_v19  ;;  %v10962_v13 = vsel %vm5502_vm8, %v5381_v28, %v10912_v49  ;;  %v10992_v28 = vpop.permute.xlu0 %1168 }
 0x25a   :  { %v4113_v7 = vadd.f32 %v4112_v12, %v4111_v8  ;;  %v4026_v0 = vrot.slane %v4025_v1, 2  ;;  %v4067_v40 = vadd.f32 %v8230_v46, %v4066_v17  ;;  %v10968_v58 = vsel %vm5502_vm8, %v5373_v30, %v10915_v61 }
 0x25b   :  { %v3978_v48 = vrot.slane %v3977_v51, 2  ;;  %v4030_v5 = vrot.slane %v8224_v15, 4  ;;  %1644 = vbcast.lane.b32.xlu1 %v1642_v60, 256  ;;  %1588 = vbcast.lane.b32.xlu0 %v1586_v41, 256  ;;  %vm2055_vm9 = vcmp.eq.s32.totalorder %v10919_v50, %v9291_v25  ;;  %v5639_v35 = vsel %vm5500_vm6, %v5396_v63, %v5638_v4  ;;  %v10982_v50 = vpop.permute.xlu1 %1224 }
 0x25c   :  { %v4854_v49 = vpack.c.bf16 %v4023_v9, %v4023_v9  ;;  %v4846_v23 = vpack.c.bf16 %v3975_v62, %v3975_v62  ;;  %v8216_v11 = vsel %vm2032_vm7, 1.0, %v12759_v54  ;;  %v5632_v61 = vsel %vm5500_vm6, %v5388_v39, %v10924_v57 }
 0x25d   :  { %v4065_v8 = vadd.f32 %v4064_v6, %v4063_v59  ;;  %v4116_v27 = vrot.slane %v4115_v52, 2  ;;  %v8239_v53 = vsel %vm2055_vm9, 1.0, %v12759_v54  ;;  %v4869_v34 = vpack.c.bf16 %v4113_v7, %v4113_v7 }
 0x25e   :  { %v4027_v44 = vadd.f32 %v4026_v0, %v4025_v1  ;;  %v4068_v55 = vrot.slane %v4067_v40, 2  ;;  %vm2047_vm11 = vcmp.eq.s32.totalorder %v10928_v43, %v9291_v25  ;;  %v3979_v46 = vadd.f32 %v3978_v48, %v3977_v51 }
 0x25f   :  { %v4031_v42 = vadd.f32 %v8224_v15, %v4030_v5  ;;  %v3982_v14 = vrot.slane %v8216_v11, 4  ;;  %v1544_v20 = vrot.slane %v10780_v36, %v9184_v29  ;;  %v10986_v26 = vunpack.c.l.b16 %v4854_v49  ;;  %v11010_v5 = vpop.permute.xlu0 %1231 }
 0x260   :  { %v10988_v57 = vunpack.c.l.b16 %v4846_v23  ;;  %v4120_v59 = vrot.slane %v8239_v53, 4  ;;  %v1488_v4 = vrot.slane %v10758_v16, %v9184_v29  ;;  %v4861_v45 = vpack.c.bf16 %v4065_v8, %v4065_v8 }
 0x261   :  { %v4117_v43 = vadd.f32 %v4116_v27, %v4115_v52  ;;  %v8231_v47 = vsel %vm2047_vm11, 1.0, %v12759_v54  ;;  %1546 = vbcast.lane.b32.xlu1 %v1544_v20, 256  ;;  %vm2041_vm14 = vcmp.eq.s32.totalorder %v10939_v21, %v9291_v25  ;;  %v5397_v12 = vunpack.c.l.b16 %v4869_v34  ;;  %v11003_v21 = vpop.permute.xlu1 %1238 }
 0x262   :  { %v4028_v1 = vrot.slane %v4027_v44, 1  ;;  %v4069_v17 = vadd.f32 %v4068_v55, %v4067_v40  ;;  %1490 = vbcast.lane.b32.xlu0 %v1488_v4, 256  ;;  %v8225_v30 = vsel %vm2041_vm14, 1.0, %v12759_v54  ;;  %v3980_v63 = vrot.slane %v3979_v46, 1 }
 0x263   :  { %v4032_v39 = vrot.slane %v4031_v42, 2  ;;  %v3983_v51 = vadd.f32 %v8216_v11, %v3982_v14  ;;  %vm2033_vm1 = vcmp.eq.s32.totalorder %v10944_v31, %v9291_v25  ;;  %v4121_v9 = vadd.f32 %v8239_v53, %v4120_v59 }
 0x264   :  { %v4072_v62 = vrot.slane %v8231_v47, 4  ;;  %v8217_v6 = vsel %vm2033_vm1, 1.0, %v12759_v54  ;;  %v1649_v15 = vrot.slane %v10860_v38, %v9174_v24  ;;  %v5389_v52 = vunpack.c.l.b16 %v4861_v45 }
 0x265   :  { %v4118_v60 = vrot.slane %v4117_v43, 1  ;;  %v4036_v41 = vrot.slane %v8225_v30, 4  ;;  %v3988_v7 = vrot.slane %v8217_v6, 4  ;;  %v11006_v0 = vsel %vm5502_vm8, %v5397_v12, %v5639_v35  ;;  %v11024_v20 = vpop.permute.xlu1 %1294 }
 0x266   :  { %v4029_v40 = vadd.f32 %v4028_v1, %v4027_v44  ;;  %v4070_v48 = vrot.slane %v4069_v17, 1  ;;  %1651 = vbcast.lane.b32.xlu1 %v1649_v15, 256  ;;  %v1593_v31 = vrot.slane %v10847_v22, %v9174_v24  ;;  %v3981_v49 = vadd.f32 %v3980_v63, %v3979_v46 }
 0x267   :  { %v4033_v23 = vadd.f32 %v4032_v39, %v4031_v42  ;;  %v3984_v11 = vrot.slane %v3983_v51, 2  ;;  %vm2056_vm2 = vcmp.eq.s32.totalorder %v10952_v18, %v9291_v25  ;;  %v4122_v8 = vrot.slane %v4121_v9, 2 }
 0x268   :  { %v4073_v27 = vadd.f32 %v8231_v47, %v4072_v62  ;;  %1595 = vbcast.lane.b32.xlu0 %v1593_v31, 256  ;;  %vm2048_vm3 = vcmp.eq.s32.totalorder %v10964_v37, %v9291_v25  ;;  %v1551_v35 = vrot.slane %v10780_v36, %v9190_v32  ;;  %v11019_v53 = vsel %vm5502_vm8, %v5389_v52, %v5632_v61 }
 0x269   :  { %v4119_v34 = vadd.f32 %v4118_v60, %v4117_v43  ;;  %v4037_v44 = vadd.f32 %v8225_v30, %v4036_v41  ;;  %v3989_v55 = vadd.f32 %v8217_v6, %v3988_v7  ;;  %v4855_v46 = vpack.c.bf16 %v4029_v40, %v4029_v40  ;;  %v11031_v43 = vpop.permute.xlu0 %1287  ;;  %v11041_v7 = vpop.permute.xlu1 %1301 }
 0x26a   :  { %v4071_v42 = vadd.f32 %v4070_v48, %v4069_v17  ;;  %v8240_v14 = vsel %vm2056_vm2, 1.0, %v12759_v54  ;;  %1553 = vbcast.lane.b32.xlu1 %v1551_v35, 256  ;;  %v1495_v18 = vrot.slane %v10758_v16, %v9190_v32  ;;  %v4847_v37 = vpack.c.bf16 %v3981_v49, %v3981_v49 }
 0x26b   :  { %v4034_v59 = vrot.slane %v4033_v23, 1  ;;  %v3985_v4 = vadd.f32 %v3984_v11, %v3983_v51  ;;  %v8232_v45 = vsel %vm2048_vm3, 1.0, %v12759_v54  ;;  %v4123_v61 = vadd.f32 %v4122_v8, %v4121_v9 }
 0x26c   :  { %v4074_v47 = vrot.slane %v4073_v27, 2  ;;  %1497 = vbcast.lane.b32.xlu0 %v1495_v18, 256  ;;  %vm2057_vm4 = vcmp.eq.s32.totalorder %v10982_v50, %v9291_v25  ;;  %vm2049_vm5 = vcmp.eq.s32.totalorder %v10992_v28, %v9291_v25  ;;  %v4870_v12 = vpack.c.bf16 %v4119_v34, %v4119_v34 }
 0x26d   :  { %v4038_v1 = vrot.slane %v4037_v44, 2  ;;  %v3990_v17 = vrot.slane %v3989_v55, 2  ;;  %v4126_v30 = vrot.slane %v8240_v14, 4  ;;  %v4862_v63 = vpack.c.bf16 %v4071_v42, %v4071_v42 }
 0x26e   :  { %v4078_v39 = vrot.slane %v8232_v45, 4  ;;  %v8241_v51 = vsel %vm2057_vm4, 1.0, %v12759_v54  ;;  %v1656_v9 = vrot.slane %v10860_v38, %v9184_v29  ;;  %v4035_v62 = vadd.f32 %v4034_v59, %v4033_v23 }
 0x26f   :  { %v3986_v6 = vrot.slane %v3985_v4, 1  ;;  %v4132_v15 = vrot.slane %v8241_v51, 4  ;;  %v8233_v50 = vsel %vm2049_vm5, 1.0, %v12759_v54  ;;  %v11037_v52 = vunpack.c.l.b16 %v4855_v46 }
 0x270   :  { %v4124_v28 = vrot.slane %v4123_v61, 1  ;;  %v4075_v60 = vadd.f32 %v4074_v47, %v4073_v27  ;;  %1658 = vbcast.lane.b32.xlu1 %v1656_v9, 256  ;;  %v1600_v41 = vrot.slane %v10847_v22, %v9184_v29  ;;  %v4039_v40 = vadd.f32 %v4038_v1, %v4037_v44  ;;  %v11049_v27 = vpop.permute.xlu0 %1245 }
 0x271   :  { %v3991_v48 = vadd.f32 %v3990_v17, %v3989_v55  ;;  %v4127_v31 = vadd.f32 %v8240_v14, %v4126_v30  ;;  %vm2059_vm7 = vcmp.eq.s32.totalorder %v11003_v21, %v9291_v25  ;;  %v11045_v49 = vunpack.c.l.b16 %v4847_v37 }
 0x272   :  { %v11047_v23 = vunpack.c.l.b16 %v4870_v12  ;;  %v4079_v11 = vadd.f32 %v8232_v45, %v4078_v39  ;;  %v4084_v8 = vrot.slane %v8233_v50, 4  ;;  %1602 = vbcast.lane.b32.xlu0 %v1600_v41, 256  ;;  %v11051_v35 = vunpack.c.l.b16 %v4862_v63 }
 0x273   :  { %v4856_v34 = vpack.c.bf16 %v4035_v62, %v4035_v62  ;;  %v3987_v46 = vadd.f32 %v3986_v6, %v3985_v4  ;;  %v4133_v42 = vadd.f32 %v8241_v51, %v4132_v15  ;;  %v4125_v44 = vadd.f32 %v4124_v28, %v4123_v61  ;;  %v11062_v61 = vpop.permute.xlu1 %1350 }
 0x274   :  { %v4076_v55 = vrot.slane %v4075_v60, 1  ;;  %v8243_v14 = vsel %vm2059_vm7, 1.0, %v12759_v54  ;;  %v1558_v21 = vrot.slane %v10780_v36, %v9192_v33  ;;  %v4040_v18 = vrot.slane %v4039_v40, 1 }
 0x275   :  { %v3992_v37 = vrot.slane %v3991_v48, 1  ;;  %v4128_v59 = vrot.slane %v4127_v31, 2  ;;  %vm2058_vm9 = vcmp.eq.s32.totalorder %v11010_v5, %v9291_v25  ;;  %v4080_v45 = vrot.slane %v4079_v11, 2 }
 0x276   :  { %v4085_v47 = vadd.f32 %v8233_v50, %v4084_v8  ;;  %1560 = vbcast.lane.b32.xlu1 %v1558_v21, 256  ;;  %v1502_v4 = vrot.slane %v10758_v16, %v9192_v33  ;;  %vm2067_vm11 = vcmp.eq.s32.totalorder %v11024_v20, %v9291_v25  ;;  %v11064_v12 = vunpack.c.l.b16 %v4856_v34  ;;  %v11071_v16 = vpop.permute.xlu0 %1343 }
 0x277   :  { %v4848_v36 = vpack.c.bf16 %v3987_v46, %v3987_v46  ;;  %v4134_v1 = vrot.slane %v4133_v42, 2  ;;  %v4144_v17 = vrot.slane %v8243_v14, 4  ;;  %v4871_v30 = vpack.c.bf16 %v4125_v44, %v4125_v44 }
 0x278   :  { %v11066_v63 = vadd.f32 %v4076_v55, %v4075_v60  ;;  %v8242_v5 = vsel %vm2058_vm9, 1.0, %v12759_v54  ;;  %1504 = vbcast.lane.b32.xlu0 %v1502_v4, 256  ;;  %vm2066_vm14 = vcmp.eq.s32.totalorder %v11031_v43, %v9291_v25  ;;  %v4041_v39 = vadd.f32 %v4040_v18, %v4039_v40 }
 0x279   :  { %v3993_v20 = vadd.f32 %v3992_v37, %v3991_v48  ;;  %v4129_v51 = vadd.f32 %v4128_v59, %v4127_v31  ;;  %v8251_v9 = vsel %vm2067_vm11, 1.0, %v12759_v54  ;;  %v4081_v62 = vadd.f32 %v4080_v45, %v4079_v11  ;;  %v11083_v48 = vpop.permute.xlu1 %1406 }
 0x27a   :  { %v4086_v6 = vrot.slane %v4085_v47, 2  ;;  %v8250_v15 = vsel %vm2066_vm14, 1.0, %v12759_v54  ;;  %v1663_v50 = vrot.slane %v10860_v38, %v9190_v32  ;;  %v5376_v28 = vunpack.c.l.b16 %v4848_v36  ;;  %v11089_v21 = vpop.permute.xlu0 %1399 }
 0x27b   :  { %v4135_v60 = vadd.f32 %v4134_v1, %v4133_v42  ;;  %v4145_v41 = vadd.f32 %v8243_v14, %v4144_v17  ;;  %v4138_v8 = vrot.slane %v8242_v5, 4  ;;  %v4863_v43 = vpack.c.bf16 %v11066_v63, %v11066_v63 }
 0x27c   :  { %v4192_v34 = vrot.slane %v8251_v9, 4  ;;  %1665 = vbcast.lane.b32.xlu1 %v1663_v50, 256  ;;  %v1607_v40 = vrot.slane %v10847_v22, %v9190_v32  ;;  %vm2068_vm1 = vcmp.eq.s32.totalorder %v11041_v7, %v9291_v25  ;;  %v4857_v31 = vpack.c.bf16 %v4041_v39, %v4041_v39 }
 0x27d   :  { %v4849_v11 = vpack.c.bf16 %v3993_v20, %v3993_v20  ;;  %v4130_v46 = vrot.slane %v4129_v51, 1  ;;  %v4186_v44 = vrot.slane %v8250_v15, 4  ;;  %v11085_v42 = vunpack.c.l.b16 %v4871_v30 }
 0x27e   :  { %v4082_v55 = vrot.slane %v4081_v62, 1  ;;  %v4087_v14 = vadd.f32 %v4086_v6, %v4085_v47  ;;  %1609 = vbcast.lane.b32.xlu0 %v1607_v40, 256  ;;  %vm2060_vm2 = vcmp.eq.s32.totalorder %v11049_v27, %v9291_v25  ;;  %v4136_v18 = vrot.slane %v4135_v60, 1  ;;  %v11108_v40 = vpop.permute.xlu0 %1252 }
 0x27f   :  { %v4146_v37 = vrot.slane %v4145_v41, 2  ;;  %v4139_v59 = vadd.f32 %v8242_v5, %v4138_v8  ;;  %v8252_v7 = vsel %vm2068_vm1, 1.0, %v12759_v54  ;;  %v4193_v45 = vadd.f32 %v8251_v9, %v4192_v34  ;;  %v11100_v9 = vpop.permute.xlu1 %1308 }
 0x280   :  { %v8244_v4 = vsel %vm2060_vm2, 1.0, %v12759_v54  ;;  %v1670_v36 = vrot.slane %v10860_v38, %v9192_v33  ;;  %v1614_v47 = vrot.slane %v10847_v22, %v9192_v33  ;;  %v5385_v1 = vunpack.c.l.b16 %v4857_v31 }
 0x281   :  { %v5377_v17 = vunpack.c.l.b16 %v4849_v11  ;;  %v4131_v30 = vadd.f32 %v4130_v46, %v4129_v51  ;;  %v4187_v27 = vadd.f32 %v8250_v15, %v4186_v44  ;;  %v4083_v39 = vadd.f32 %v4082_v55, %v4081_v62 }
 0x282   :  { %v4088_v20 = vrot.slane %v4087_v14, 1  ;;  %v4198_v6 = vrot.slane %v8252_v7, 4  ;;  %1672 = vbcast.lane.b32.xlu1 %v1670_v36, 256  ;;  %1616 = vbcast.lane.b32.xlu0 %v1614_v47, 256  ;;  %v5620_v5 = vsel %vm5504_vm12, %v10988_v57, %v10968_v58  ;;  %v4137_v50 = vadd.f32 %v4136_v18, %v4135_v60 }
 0x283   :  { %v4147_v38 = vadd.f32 %v4146_v37, %v4145_v41  ;;  %v4150_v8 = vrot.slane %v8244_v4, 4  ;;  %v5621_v22 = vsel %vm5506_vm13, %v11045_v49, %v5620_v5  ;;  %v4140_v34 = vrot.slane %v4139_v59, 2  ;;  %v11123_v37 = vpop.permute.xlu1 %1413 }
 0x284   :  { %v4194_v51 = vrot.slane %v4193_v45, 2  ;;  %v5622_v62 = vsel %vm5508_vm15, %v5376_v28, %v5621_v22  ;;  %v5627_v15 = vsel %vm5504_vm12, %v10986_v26, %v10962_v13  ;;  %v4872_v31 = vpack.c.bf16 %v4131_v30, %v4131_v30  ;;  %v11120_v13 = vld [vmem:[%s12728_s0 + $0xe0] sm:$0xff] }
 0x285   :  { %v4188_v58 = vrot.slane %v4187_v27, 2  ;;  %v5623_v57 = vsel %vm5510_vm0, %v5377_v17, %v5622_v62  ;;  %v5628_v60 = vsel %vm5506_vm13, %v11037_v52, %v5627_v15  ;;  %v4089_v41 = vadd.f32 %v4088_v20, %v4087_v14 }
 0x286   :  { %v4199_v11 = vadd.f32 %v8252_v7, %v4198_v6  ;;  %v5629_v49 = vsel %vm5508_vm15, %v11064_v12, %v5628_v60  ;;  %vm2075_vm3 = vcmp.eq.s32.totalorder %v11062_v61, %v9291_v25  ;;  %v4864_v26 = vpack.c.bf16 %v4083_v39, %v4083_v39  ;;  %v11145_v39 = vpop.f32.mrf.mxu0 }
 0x287   :  { %v4148_v28 = vrot.slane %v4147_v38, 1  ;;  %v4151_v46 = vadd.f32 %v8244_v4, %v4150_v8  ;;  %v5630_v44 = vsel %vm5510_vm0, %v5385_v1, %v5629_v49  ;;  %v4873_v55 = vpack.c.bf16 %v4137_v50, %v4137_v50 }
 0x288   :  { %v4141_v52 = vadd.f32 %v4140_v34, %v4139_v59  ;;  %v4195_v14 = vadd.f32 %v4194_v51, %v4193_v45  ;;  %v5737_v18 = vpack.c.b16 %v5630_v44, %v5623_v57  ;;  %v4189_v12 = vadd.f32 %v4188_v58, %v4187_v27  ;;  %v11133_v45 = vpop.permute.xlu0 %1357  ;;  %v11143_v27 = vld [vmem:[%s12728_s0 + $0xe8] sm:$0xff]  ;;  %v11153_v51 = vpop.permute.xlu1 %1315 }
 0x289   :  { %v8259_v7 = vsel %vm2075_vm3, 1.0, %v12759_v54  ;;  %vm2074_vm4 = vcmp.eq.s32.totalorder %v11071_v16, %v9291_v25  ;;  %v1684_v61 = vrot.slane %v11120_v13, %v9120_v3  ;;  %v4865_v36 = vpack.c.bf16 %v4089_v41, %v4089_v41  ;;  %v11160_v58 = vpop.f32.mrf.mxu0 }
 0x28a   :  { %v4200_v47 = vrot.slane %v4199_v11, 2  ;;  %8739 = vmatprep.mubr.bf16.mxu0 %v5737_v18  ;;  %v8258_v4 = vsel %vm2074_vm4, 1.0, %v12759_v54  ;;  %v1677_v59 = vrot.slane %v11120_v13, %v9118_v2  ;;  %v5391_v1 = vunpack.c.l.b16 %v4863_v43 }
 0x28b   :  { %v5400_v17 = vunpack.c.l.b16 %v4872_v31  ;;  %v11138_v30 = vadd.f32 %v4148_v28, %v4147_v38  ;;  %v4152_v16 = vrot.slane %v4151_v46, 2  ;;  %1686 = vbcast.lane.b32.xlu1 %v1684_v61, 256  ;;  %v5392_v20 = vunpack.c.l.b16 %v4864_v26 }
 0x28c   :  { %v4142_v6 = vrot.slane %v4141_v52, 1  ;;  %v4240_v5 = vrot.slane %v8259_v7, 4  ;;  %1679 = vbcast.lane.b32.xlu0 %v1677_v59, 256  ;;  %vm2083_vm5 = vcmp.eq.s32.totalorder %v11083_v48, %v9291_v25  ;;  %v4196_v63 = vrot.slane %v4195_v14, 1 }
 0x28d   :  { %v4190_v43 = vrot.slane %v4189_v12, 1  ;;  %v4234_v50 = vrot.slane %v8258_v4, 4  ;;  %vm2082_vm7 = vcmp.eq.s32.totalorder %v11089_v21, %v9291_v25  ;;  %v5401_v38 = vunpack.c.l.b16 %v4873_v55 }
 0x28e   :  { %v5393_v8 = vunpack.c.l.b16 %v4865_v36  ;;  %v4201_v22 = vadd.f32 %v4200_v47, %v4199_v11  ;;  %v1740_v34 = vrot.slane %v11143_v27, %v9120_v3  ;;  %v4875_v62 = vpack.c.bf16 %v11138_v30, %v11138_v30  ;;  %v11166_v11 = vpop.permute.xlu0 %1259 }
 0x28f   :  { %v4153_v15 = vadd.f32 %v4152_v16, %v4151_v46  ;;  %v8267_v48 = vsel %vm2083_vm5, 1.0, %v12759_v54  ;;  %v1733_v31 = vrot.slane %v11143_v27, %v9118_v2  ;;  %v4143_v21 = vadd.f32 %v4142_v6, %v4141_v52 }
 0x290   :  { %v4241_v57 = vadd.f32 %v8259_v7, %v4240_v5  ;;  %v8266_v60 = vsel %vm2082_vm7, 1.0, %v12759_v54  ;;  %1742 = vbcast.lane.b32.xlu1 %v1740_v34, 256  ;;  %v5634_v41 = vsel %vm5504_vm12, %v11051_v35, %v11019_v53  ;;  %v4197_v49 = vadd.f32 %v4196_v63, %v4195_v14  ;;  %v11176_v14 = vpop.f32.mrf.mxu0 }
 0x291   :  { %v4191_v26 = vadd.f32 %v4190_v43, %v4189_v12  ;;  %v4235_v28 = vadd.f32 %v8258_v4, %v4234_v50  ;;  %1735 = vbcast.lane.b32.xlu0 %v1733_v31, 256  ;;  %v5635_v46 = vsel %vm5506_vm13, %v5391_v1, %v5634_v41  ;;  %v4202_v44 = vrot.slane %v4201_v22, 1  ;;  %v11181_v4 = vpop.permute.xlu1 %1420 }
 0x292   :  { %v4288_v55 = vrot.slane %v8267_v48, 4  ;;  %v5636_v52 = vsel %vm5508_vm15, %v5392_v20, %v5635_v46  ;;  %v5641_v18 = vsel %vm5504_vm12, %v11047_v23, %v11006_v0  ;;  %v4154_v7 = vrot.slane %v4153_v15, 1  ;;  %v11185_v6 = vpop.permute.xlu0 %1364 }
 0x293   :  { %v4282_v61 = vrot.slane %v8266_v60, 4  ;;  %v5637_v53 = vsel %vm5510_vm0, %v5393_v8, %v5636_v52  ;;  %v5642_v35 = vsel %vm5506_vm13, %v11085_v42, %v5641_v18  ;;  %v4874_v12 = vpack.c.bf16 %v4143_v21, %v4143_v21 }
 0x294   :  { %v4242_v36 = vrot.slane %v4241_v57, 2  ;;  %v5643_v47 = vsel %vm5508_vm15, %v5400_v17, %v5642_v35  ;;  %vm2069_vm9 = vcmp.eq.s32.totalorder %v11100_v9, %v9291_v25  ;;  %v4883_v59 = vpack.c.bf16 %v4197_v49, %v4197_v49  ;;  %v5862_v17 = vpop.f32.mrf.mxu0 }
 0x295   :  { %v4236_v0 = vrot.slane %v4235_v28, 2  ;;  %v5644_v23 = vsel %vm5510_vm0, %v5401_v38, %v5643_v47  ;;  %v8253_v1 = vsel %vm2069_vm9, 1.0, %v12759_v54  ;;  %v4882_v30 = vpack.c.bf16 %v4191_v26, %v4191_v26 }
 0x296   :  { %v4203_v16 = vadd.f32 %v4202_v44, %v4201_v22  ;;  %v4289_v42 = vadd.f32 %v8267_v48, %v4288_v55  ;;  %v5738_v20 = vpack.c.b16 %v5644_v23, %v5637_v53  ;;  %v4155_v5 = vadd.f32 %v4154_v7, %v4153_v15 }
 0x297   :  { %v4283_v63 = vadd.f32 %v8266_v60, %v4282_v61  ;;  %vm2061_vm11 = vcmp.eq.s32.totalorder %v11108_v40, %v9291_v25  ;;  %v1747_v9 = vrot.slane %v11143_v27, %v9140_v10  ;;  %v5403_v43 = vunpack.c.l.b16 %v4875_v62  ;;  %v11200_v62 = vld [vmem:[%s12728_s0 + $0xf0] sm:$0xff] }
 0x298   :  { %v5402_v50 = vunpack.c.l.b16 %v4874_v12  ;;  %v4243_v38 = vadd.f32 %v4242_v36, %v4241_v57  ;;  %8740 = vmatmul.mubr.bf16.gmra.mxu0 %v5738_v20  ;;  %v4204_v8 = vrot.slane %v8253_v1, 4  ;;  %v5411_v34 = vunpack.c.l.b16 %v4883_v59  ;;  %v11202_v57 = vpop.permute.xlu1 %1322 }
 0x299   :  { %v4237_v22 = vadd.f32 %v4236_v0, %v4235_v28  ;;  %v8245_v48 = vsel %vm2061_vm11, 1.0, %v12759_v54  ;;  %1749 = vbcast.lane.b32.xlu1 %v1747_v9, 256  ;;  %v1691_v15 = vrot.slane %v11120_v13, %v9140_v10  ;;  %v5410_v31 = vunpack.c.l.b16 %v4882_v30 }
 0x29a   :  { %v4290_v21 = vrot.slane %v4289_v42, 2  ;;  %vm2084_vm14 = vcmp.eq.s32.totalorder %v11123_v37, %v9291_v25  ;;  %v5972_v40 = vpack.c.bf16 %v5862_v17, %v11160_v58  ;;  %v4884_v60 = vpack.c.bf16 %v4203_v16, %v4203_v16  ;;  %v11207_v37 = vpop.permute.xlu0 %1266 }
 0x29b   :  { %v4876_v41 = vpack.c.bf16 %v4155_v5, %v4155_v5  ;;  %v4284_v49 = vrot.slane %v4283_v63, 2  ;;  %1693 = vbcast.lane.b32.xlu0 %v1691_v15, 256  ;;  %v8268_v26 = vsel %vm2084_vm14, 1.0, %v12759_v54  ;;  %v4244_v28 = vrot.slane %v4243_v38, 1 }
 0x29c   :  { %v4205_v46 = vadd.f32 %v8253_v1, %v4204_v8  ;;  %v4156_v44 = vrot.slane %v8245_v48, 4  ;;  %vm2076_vm1 = vcmp.eq.s32.totalorder %v11133_v45, %v9291_v25  ;;  %6147 = vmatmul.mubr.bf16.gmra.mxu1 %v5972_v40  ;;  %v4238_v58 = vrot.slane %v4237_v22, 1  ;;  %v11219_v45 = vld [vmem:[%s12728_s0 + $0xf8] sm:$0xff]  ;;  %v11227_v1 = vpop.permute.xlu1 %1427 }
 0x29d   :  { %v8260_v55 = vsel %vm2076_vm1, 1.0, %v12759_v54  ;;  %v1796_v52 = vrot.slane %v11200_v62, %v9120_v3  ;;  %v1789_v18 = vrot.slane %v11200_v62, %v9118_v2  ;;  %6156 = vmatprep.mubr.bf16.mxu1 %v9058_v56  ;;  %v5645_v7 = vsel %vm5498_vm10, %v5403_v43, %v5402_v50 }
 0x29e   :  { %v4291_v61 = vadd.f32 %v4290_v21, %v4289_v42  ;;  %v4294_v53 = vrot.slane %v8268_v26, 4  ;;  %v4246_v35 = vrot.slane %v8260_v55, 4  ;;  %v5652_v12 = vsel %vm5498_vm10, %v5411_v34, %v5410_v31  ;;  %v11233_v17 = vpop.permute.xlu0 %1371 }
 0x29f   :  { %v5412_v36 = vunpack.c.l.b16 %v4884_v60  ;;  %v4285_v47 = vadd.f32 %v4284_v49, %v4283_v63  ;;  %1798 = vbcast.lane.b32.xlu1 %v1796_v52, 256  ;;  %1791 = vbcast.lane.b32.xlu0 %v1789_v18, 256  ;;  %vm2070_vm2 = vcmp.eq.s32.totalorder %v11153_v51, %v9291_v25  ;;  %v4206_v59 = vrot.slane %v4205_v46, 2 }
 0x2a0   :  { %v4157_v0 = vadd.f32 %v8245_v48, %v4156_v44  ;;  %v8254_v23 = vsel %vm2070_vm2, 1.0, %v12759_v54  ;;  %vm2062_vm3 = vcmp.eq.s32.totalorder %v11166_v11, %v9291_v25  ;;  %v5404_v30 = vunpack.c.l.b16 %v4876_v41  ;;  %v11250_v40 = vpop.permute.xlu1 %1329 }
 0x2a1   :  { %v4245_v16 = vadd.f32 %v4244_v28, %v4243_v38  ;;  %v4239_v42 = vadd.f32 %v4238_v58, %v4237_v22  ;;  %v1852_v20 = vrot.slane %v11219_v45, %v9120_v3  ;;  %v4292_v5 = vrot.slane %v4291_v61, 1 }
 0x2a2   :  { %v5973_v63 = vpack.c.bf16 %v11176_v14, %v11145_v39  ;;  %v4295_v51 = vadd.f32 %v8268_v26, %v4294_v53  ;;  %v4247_v9 = vadd.f32 %v8260_v55, %v4246_v35  ;;  %v4210_v43 = vrot.slane %v8254_v23, 4  ;;  %v11255_v58 = vpop.permute.xlu0 %1273 }
 0x2a3   :  { %v8246_v50 = vsel %vm2062_vm3, 1.0, %v12759_v54  ;;  %1854 = vbcast.lane.b32.xlu1 %v1852_v20, 256  ;;  %v1845_v11 = vrot.slane %v11219_v45, %v9118_v2  ;;  %vm2085_vm4 = vcmp.eq.s32.totalorder %v11181_v4, %v9291_v25  ;;  %v11241_v38 = vsel %vm5500_vm6, %v5412_v36, %v5652_v12 }
 0x2a4   :  { %v4286_v8 = vrot.slane %v4285_v47, 1  ;;  %v4207_v34 = vadd.f32 %v4206_v59, %v4205_v46  ;;  %v4158_v39 = vrot.slane %v4157_v0, 2  ;;  %6157 = vmatmul.mubr.bf16.gmra.mxu1 %v5973_v63  ;;  %v4891_v14 = vpack.c.bf16 %v4245_v16, %v4245_v16 }
 0x2a5   :  { %v4890_v22 = vpack.c.bf16 %v4239_v42, %v4239_v42  ;;  %1847 = vbcast.lane.b32.xlu0 %v1845_v11, 256  ;;  %v8269_v48 = vsel %vm2085_vm4, 1.0, %v12759_v54  ;;  %vm2077_vm5 = vcmp.eq.s32.totalorder %v11185_v6, %v9291_v25  ;;  %6166 = vmatprep.mubr.bf16.mxu1 %v9058_v56  ;;  %v11248_v15 = vsel %vm5500_vm6, %v5404_v30, %v5645_v7  ;;  %v11265_v42 = vpop.permute.xlu1 %1434 }
 0x2a6   :  { %v4296_v4 = vrot.slane %v4295_v51, 2  ;;  %v4248_v31 = vrot.slane %v4247_v9, 2  ;;  %v4162_v21 = vrot.slane %v8246_v50, 4  ;;  %v4293_v60 = vadd.f32 %v4292_v5, %v4291_v61 }
 0x2a7   :  { %v4211_v41 = vadd.f32 %v8254_v23, %v4210_v43  ;;  %v4300_v49 = vrot.slane %v8269_v48, 4  ;;  %v8261_v26 = vsel %vm2077_vm5, 1.0, %v12759_v54  ;;  %v11253_v28 = vadd.f32 %v4286_v8, %v4285_v47 }
 0x2a8   :  { %v4208_v46 = vrot.slane %v4207_v34, 1  ;;  %v4159_v44 = vadd.f32 %v4158_v39, %v4157_v0  ;;  %v4252_v6 = vrot.slane %v8261_v26, 4  ;;  %v5419_v55 = vunpack.c.l.b16 %v4891_v14 }
 0x2a9   :  { %v5418_v52 = vunpack.c.l.b16 %v4890_v22  ;;  %v4301_v18 = vadd.f32 %v8269_v48, %v4300_v49  ;;  %v1754_v7 = vrot.slane %v11143_v27, %v9164_v19  ;;  %v4297_v53 = vadd.f32 %v4296_v4, %v4295_v51 }
 0x2aa   :  { %v4249_v35 = vadd.f32 %v4248_v31, %v4247_v9  ;;  %v4163_v61 = vadd.f32 %v8246_v50, %v4162_v21  ;;  %v4253_v12 = vadd.f32 %v8261_v26, %v4252_v6  ;;  %v4212_v36 = vrot.slane %v4211_v41, 2  ;;  %v11273_v50 = vpop.permute.xlu0 %1378  ;;  %v11285_v26 = vpop.permute.xlu1 %1336 }
 0x2ab   :  { %v4302_v59 = vrot.slane %v4301_v18, 2  ;;  %1756 = vbcast.lane.b32.xlu1 %v1754_v7, 256  ;;  %v1698_v47 = vrot.slane %v11120_v13, %v9164_v19  ;;  %vm2071_vm7 = vcmp.eq.s32.totalorder %v11202_v57, %v9291_v25  ;;  %v4899_v0 = vpack.c.bf16 %v4293_v60, %v4293_v60 }
 0x2ac   :  { %v4898_v23 = vpack.c.bf16 %v11253_v28, %v11253_v28  ;;  %v4209_v30 = vadd.f32 %v4208_v46, %v4207_v34  ;;  %v4160_v16 = vrot.slane %v4159_v44, 1  ;;  %v11268_v20 = vsel %vm5498_vm10, %v5419_v55, %v5418_v52 }
 0x2ad   :  { %v4254_v5 = vrot.slane %v4253_v12, 2  ;;  %1700 = vbcast.lane.b32.xlu0 %v1698_v47, 256  ;;  %v8255_v63 = vsel %vm2071_vm7, 1.0, %v12759_v54  ;;  %vm2063_vm9 = vcmp.eq.s32.totalorder %v11207_v37, %v9291_v25  ;;  %v4298_v51 = vrot.slane %v4297_v53, 1 }
 0x2ae   :  { %v4250_v57 = vrot.slane %v4249_v35, 1  ;;  %v4164_v9 = vrot.slane %v4163_v61, 2  ;;  %v4216_v43 = vrot.slane %v8255_v63, 4  ;;  %v4213_v11 = vadd.f32 %v4212_v36, %v4211_v41 }
 0x2af   :  { %v4303_v8 = vadd.f32 %v4302_v59, %v4301_v18  ;;  %v8247_v34 = vsel %vm2063_vm9, 1.0, %v12759_v54  ;;  %v1859_v39 = vrot.slane %v11219_v45, %v9140_v10  ;;  %v4885_v14 = vpack.c.bf16 %v4209_v30, %v4209_v30 }
 0x2b0   :  { %v4161_v22 = vadd.f32 %v4160_v16, %v4159_v44  ;;  %v4217_v48 = vadd.f32 %v8255_v63, %v4216_v43  ;;  %v4168_v4 = vrot.slane %v8247_v34, 4  ;;  %v4255_v31 = vadd.f32 %v4254_v5, %v4253_v12 }
 0x2b1   :  { %1861 = vbcast.lane.b32.xlu1 %v1859_v39, 256  ;;  %v1803_v37 = vrot.slane %v11200_v62, %v9140_v10  ;;  %vm2086_vm11 = vcmp.eq.s32.totalorder %v11227_v1, %v9291_v25  ;;  %vm2078_vm14 = vcmp.eq.s32.totalorder %v11233_v17, %v9291_v25  ;;  %v4299_v21 = vadd.f32 %v4298_v51, %v4297_v53  ;;  %v11290_v17 = vpop.permute.xlu0 %1280 }
 0x2b2   :  { %v4251_v60 = vadd.f32 %v4250_v57, %v4249_v35  ;;  %v4165_v41 = vadd.f32 %v4164_v9, %v4163_v61  ;;  %v8270_v49 = vsel %vm2086_vm11, 1.0, %v12759_v54  ;;  %v4214_v28 = vrot.slane %v4213_v11, 1  ;;  %v11299_v57 = vpop.permute.xlu1 %1441 }
 0x2b3   :  { %v4304_v46 = vrot.slane %v4303_v8, 1  ;;  %1805 = vbcast.lane.b32.xlu0 %v1803_v37, 256  ;;  %v8262_v44 = vsel %vm2078_vm14, 1.0, %v12759_v54  ;;  %v1761_v6 = vrot.slane %v11143_v27, %v9174_v24  ;;  %v5427_v55 = vunpack.c.l.b16 %v4899_v0 }
 0x2b4   :  { %v4877_v1 = vpack.c.bf16 %v4161_v22, %v4161_v22  ;;  %v4218_v52 = vrot.slane %v4217_v48, 2  ;;  %v4169_v18 = vadd.f32 %v8247_v34, %v4168_v4  ;;  %v4256_v7 = vrot.slane %v4255_v31, 1 }
 0x2b5   :  { %v4306_v53 = vrot.slane %v8270_v49, 4  ;;  %1763 = vbcast.lane.b32.xlu1 %v1761_v6, 256  ;;  %v1705_v35 = vrot.slane %v11120_v13, %v9174_v24  ;;  %vm2072_vm1 = vcmp.eq.s32.totalorder %v11250_v40, %v9291_v25  ;;  %v5426_v61 = vunpack.c.l.b16 %v4898_v23 }
 0x2b6   :  { %v4900_v12 = vpack.c.bf16 %v4299_v21, %v4299_v21  ;;  %v4892_v36 = vpack.c.bf16 %v4251_v60, %v4251_v60  ;;  %v4258_v59 = vrot.slane %v8262_v44, 4  ;;  %v5413_v47 = vunpack.c.l.b16 %v4885_v14  ;;  %v11304_v14 = vpop.permute.xlu0 %1385 }
 0x2b7   :  { %v4215_v0 = vadd.f32 %v4214_v28, %v4213_v11  ;;  %v4166_v30 = vrot.slane %v4165_v41, 1  ;;  %v4305_v16 = vadd.f32 %v4304_v46, %v4303_v8  ;;  %1707 = vbcast.lane.b32.xlu0 %v1705_v35, 256  ;;  %v4219_v5 = vadd.f32 %v4218_v52, %v4217_v48  ;;  %v11320_v52 = vpop.permute.xlu1 %1448 }
 0x2b8   :  { %v4170_v63 = vrot.slane %v4169_v18, 2  ;;  %v8256_v51 = vsel %vm2072_vm1, 1.0, %v12759_v54  ;;  %vm2064_vm2 = vcmp.eq.s32.totalorder %v11255_v58, %v9291_v25  ;;  %v5405_v9 = vunpack.c.l.b16 %v4877_v1 }
 0x2b9   :  { %v4257_v40 = vadd.f32 %v4256_v7, %v4255_v31  ;;  %v4307_v23 = vadd.f32 %v8270_v49, %v4306_v53  ;;  %v1866_v43 = vrot.slane %v11219_v45, %v9164_v19  ;;  %v5666_v11 = vsel %vm5498_vm10, %v5427_v55, %v5426_v61 }
 0x2ba   :  { %v5428_v34 = vunpack.c.l.b16 %v4900_v12  ;;  %v5420_v8 = vunpack.c.l.b16 %v4892_v36  ;;  %v4259_v39 = vadd.f32 %v8262_v44, %v4258_v59  ;;  %v4167_v22 = vadd.f32 %v4166_v30, %v4165_v41  ;;  %v11328_v12 = vpop.permute.xlu0 %1392 }
 0x2bb   :  { %v4222_v48 = vrot.slane %v8256_v51, 4  ;;  %v8248_v4 = vsel %vm2064_vm2, 1.0, %v12759_v54  ;;  %1868 = vbcast.lane.b32.xlu1 %v1866_v43, 256  ;;  %v1810_v58 = vrot.slane %v11200_v62, %v9164_v19  ;;  %v4886_v31 = vpack.c.bf16 %v4215_v0, %v4215_v0 }
 0x2bc   :  { %v4901_v37 = vpack.c.bf16 %v4305_v16, %v4305_v16  ;;  %v4220_v21 = vrot.slane %v4219_v5, 1  ;;  %v4171_v60 = vadd.f32 %v4170_v63, %v4169_v18  ;;  %v11311_v49 = vsel %vm5502_vm8, %v5413_v47, %v11241_v38 }
 0x2bd   :  { %v11315_v28 = vsel %vm5502_vm8, %v5405_v9, %v11248_v15  ;;  %v4893_v41 = vpack.c.bf16 %v4257_v40, %v4257_v40  ;;  %v4308_v46 = vrot.slane %v4307_v23, 2  ;;  %1812 = vbcast.lane.b32.xlu0 %v1810_v58, 256  ;;  %v5667_v44 = vsel %vm5500_vm6, %v5428_v34, %v5666_v11  ;;  %v11344_v40 = vpop.permute.xlu1 %1462 }
 0x2be   :  { %v5660_v6 = vsel %vm5500_vm6, %v5420_v8, %v11268_v20  ;;  %v4260_v55 = vrot.slane %v4259_v39, 2  ;;  %v4174_v1 = vrot.slane %v8248_v4, 4  ;;  %v4878_v18 = vpack.c.bf16 %v4167_v22, %v4167_v22 }
 0x2bf   :  { %v4223_v7 = vadd.f32 %v8256_v51, %v4222_v48  ;;  %vm2087_vm3 = vcmp.eq.s32.totalorder %v11265_v42, %v9291_v25  ;;  %v1768_v38 = vrot.slane %v11143_v27, %v9184_v29  ;;  %v11326_v15 = vunpack.c.l.b16 %v4886_v31 }
 0x2c0   :  { %v5429_v53 = vunpack.c.l.b16 %v4901_v37  ;;  %v4221_v35 = vadd.f32 %v4220_v21, %v4219_v5  ;;  %v4172_v61 = vrot.slane %v4171_v60, 1  ;;  %v5421_v20 = vunpack.c.l.b16 %v4893_v41 }
 0x2c1   :  { %v4309_v36 = vadd.f32 %v4308_v46, %v4307_v23  ;;  %1770 = vbcast.lane.b32.xlu1 %v1768_v38, 256  ;;  %v1712_v59 = vrot.slane %v11120_v13, %v9184_v29  ;;  %vm2073_vm4 = vcmp.eq.s32.totalorder %v11285_v26, %v9291_v25  ;;  %v4261_v42 = vadd.f32 %v4260_v55, %v4259_v39  ;;  %v11352_v39 = vpop.permute.xlu0 %1455 }
 0x2c2   :  { %v4175_v47 = vadd.f32 %v8248_v4, %v4174_v1  ;;  %v8271_v0 = vsel %vm2087_vm3, 1.0, %v12759_v54  ;;  %vm2079_vm5 = vcmp.eq.s32.totalorder %v11273_v50, %v9291_v25  ;;  %v4224_v30 = vrot.slane %v4223_v7, 2  ;;  %v11369_v1 = vpop.permute.xlu1 %1518 }
 0x2c3   :  { %1714 = vbcast.lane.b32.xlu0 %v1712_v59, 256  ;;  %v8257_v16 = vsel %vm2073_vm4, 1.0, %v12759_v54  ;;  %vm2065_vm7 = vcmp.eq.s32.totalorder %v11290_v17, %v9291_v25  ;;  %v1873_v5 = vrot.slane %v11219_v45, %v9174_v24  ;;  %v11342_v63 = vunpack.c.l.b16 %v4878_v18 }
 0x2c4   :  { %v4887_v26 = vpack.c.bf16 %v4221_v35, %v4221_v35  ;;  %v4173_v51 = vadd.f32 %v4172_v61, %v4171_v60  ;;  %v4228_v9 = vrot.slane %v8257_v16, 4  ;;  %v4312_v23 = vrot.slane %v8271_v0, 4 }
 0x2c5   :  { %v8263_v50 = vsel %vm2079_vm5, 1.0, %v12759_v54  ;;  %v8249_v43 = vsel %vm2065_vm7, 1.0, %v12759_v54  ;;  %1875 = vbcast.lane.b32.xlu1 %v1873_v5, 256  ;;  %v1817_v11 = vrot.slane %v11200_v62, %v9174_v24  ;;  %v4310_v17 = vrot.slane %v4309_v36, 1 }
 0x2c6   :  { %v4262_v34 = vrot.slane %v4261_v42, 1  ;;  %v4176_v8 = vrot.slane %v4175_v47, 2  ;;  %vm2088_vm9 = vcmp.eq.s32.totalorder %v11299_v57, %v9291_v25  ;;  %v11355_v22 = vsel %vm5502_vm8, %v5429_v53, %v5667_v44 }
 0x2c7   :  { %v11358_v48 = vsel %vm5502_vm8, %v5421_v20, %v5660_v6  ;;  %v4225_v4 = vadd.f32 %v4224_v30, %v4223_v7  ;;  %v4180_v58 = vrot.slane %v8249_v43, 4  ;;  %1819 = vbcast.lane.b32.xlu0 %v1817_v11, 256  ;;  %v4879_v31 = vpack.c.bf16 %v4173_v51, %v4173_v51  ;;  %v11378_v20 = vpop.permute.xlu0 %1511  ;;  %v11390_v11 = vpop.permute.xlu1 %1525 }
 0x2c8   :  { %v4264_v37 = vrot.slane %v8263_v50, 4  ;;  %v4229_v24 = vadd.f32 %v8257_v16, %v4228_v9  ;;  %vm2080_vm11 = vcmp.eq.s32.totalorder %v11304_v14, %v9291_v25  ;;  %v4313_v21 = vadd.f32 %v8271_v0, %v4312_v23 }
 0x2c9   :  { %v4181_v60 = vadd.f32 %v8249_v43, %v4180_v58  ;;  %v8272_v57 = vsel %vm2088_vm9, 1.0, %v12759_v54  ;;  %v1775_v41 = vrot.slane %v11143_v27, %v9190_v32  ;;  %v11365_v46 = vunpack.c.l.b16 %v4887_v26 }
 0x2ca   :  { %v4311_v44 = vadd.f32 %v4310_v17, %v4309_v36  ;;  %v11367_v6 = vadd.f32 %v4262_v34, %v4261_v42  ;;  %v4177_v55 = vadd.f32 %v4176_v8, %v4175_v47  ;;  %v4226_v18 = vrot.slane %v4225_v4, 1 }
 0x2cb   :  { %v8264_v7 = vsel %vm2080_vm11, 1.0, %v12759_v54  ;;  %1777 = vbcast.lane.b32.xlu1 %v1775_v41, 256  ;;  %v1719_v14 = vrot.slane %v11120_v13, %v9190_v32  ;;  %vm2089_vm14 = vcmp.eq.s32.totalorder %v11320_v52, %v9291_v25  ;;  %v11376_v38 = vunpack.c.l.b16 %v4879_v31 }
 0x2cc   :  { %v4265_v53 = vadd.f32 %v8263_v50, %v4264_v37  ;;  %v4230_v35 = vrot.slane %v4229_v24, 2  ;;  %v4318_v61 = vrot.slane %v8272_v57, 4  ;;  %v4314_v36 = vrot.slane %v4313_v21, 2  ;;  %v11398_v37 = vpop.permute.xlu0 %1469 }
 0x2cd   :  { %v4182_v59 = vrot.slane %v4181_v60, 2  ;;  %1721 = vbcast.lane.b32.xlu0 %v1719_v14, 256  ;;  %v8273_v42 = vsel %vm2089_vm14, 1.0, %v12759_v54  ;;  %vm2081_vm1 = vcmp.eq.s32.totalorder %v11328_v12, %v9291_v25  ;;  %v4902_v47 = vpack.c.bf16 %v4311_v44, %v4311_v44 }
 0x2ce   :  { %v4178_v0 = vrot.slane %v4177_v55, 1  ;;  %v4270_v30 = vrot.slane %v8264_v7, 4  ;;  %v4324_v16 = vrot.slane %v8273_v42, 4  ;;  %v4894_v52 = vpack.c.bf16 %v11367_v6, %v11367_v6 }
 0x2cf   :  { %v11385_v5 = vadd.f32 %v4226_v18, %v4225_v4  ;;  %v8265_v26 = vsel %vm2081_vm1, 1.0, %v12759_v54  ;;  %v1880_v51 = vrot.slane %v11219_v45, %v9184_v29  ;;  %v4266_v9 = vrot.slane %v4265_v53, 2 }
 0x2d0   :  { %v4231_v23 = vadd.f32 %v4230_v35, %v4229_v24  ;;  %v4319_v50 = vadd.f32 %v8272_v57, %v4318_v61  ;;  %v4276_v43 = vrot.slane %v8265_v26, 4  ;;  %v4315_v12 = vadd.f32 %v4314_v36, %v4313_v21  ;;  %v11408_v36 = vpop.permute.xlu1 %1574 }
 0x2d1   :  { %v4183_v17 = vadd.f32 %v4182_v59, %v4181_v60  ;;  %1882 = vbcast.lane.b32.xlu1 %v1880_v51, 256  ;;  %v1824_v34 = vrot.slane %v11200_v62, %v9184_v29  ;;  %vm2091_vm2 = vcmp.eq.s32.totalorder %v11344_v40, %v9291_v25  ;;  %v11396_v8 = vunpack.c.l.b16 %v4902_v47 }
 0x2d2   :  { %v4179_v4 = vadd.f32 %v4178_v0, %v4177_v55  ;;  %v4271_v58 = vadd.f32 %v8264_v7, %v4270_v30  ;;  %v4325_v31 = vadd.f32 %v8273_v42, %v4324_v16  ;;  %v4888_v24 = vpack.c.bf16 %v11385_v5, %v11385_v5 }
 0x2d3   :  { %v4277_v57 = vadd.f32 %v8265_v26, %v4276_v43  ;;  %1826 = vbcast.lane.b32.xlu0 %v1824_v34, 256  ;;  %v8275_v21 = vsel %vm2091_vm2, 1.0, %v12759_v54  ;;  %vm2090_vm3 = vcmp.eq.s32.totalorder %v11352_v39, %v9291_v25  ;;  %v4267_v29 = vadd.f32 %v4266_v9, %v4265_v53 }
 0x2d4   :  { %v4232_v60 = vrot.slane %v4231_v23, 1  ;;  %v4320_v40 = vrot.slane %v4319_v50, 2  ;;  %v4336_v41 = vrot.slane %v8275_v21, 4  ;;  %v4316_v44 = vrot.slane %v4315_v12, 1 }
 0x2d5   :  { %v4184_v6 = vrot.slane %v4183_v17, 1  ;;  %v8274_v55 = vsel %vm2090_vm3, 1.0, %v12759_v54  ;;  %v1782_v18 = vrot.slane %v11143_v27, %v9192_v33  ;;  %v4880_v7 = vpack.c.bf16 %v4179_v4, %v4179_v4  ;;  %v11414_v27 = vpop.permute.xlu0 %1567 }
 0x2d6   :  { %v4272_v14 = vrot.slane %v4271_v58, 2  ;;  %v4326_v35 = vrot.slane %v4325_v31, 2  ;;  %v4337_v61 = vadd.f32 %v8275_v21, %v4336_v41  ;;  %v4278_v59 = vrot.slane %v4277_v57, 2 }
 0x2d7   :  { %v4330_v42 = vrot.slane %v8274_v55, 4  ;;  %1784 = vbcast.lane.b32.xlu1 %v1782_v18, 256  ;;  %v1726_v39 = vrot.slane %v11120_v13, %v9192_v33  ;;  %vm2099_vm4 = vcmp.eq.s32.totalorder %v11369_v1, %v9291_v25  ;;  %v4268_v53 = vrot.slane %v4267_v29, 1 }
 0x2d8   :  { %v4233_v47 = vadd.f32 %v4232_v60, %v4231_v23  ;;  %v4321_v0 = vadd.f32 %v4320_v40, %v4319_v50  ;;  %v4338_v30 = vrot.slane %v4337_v61, 2  ;;  %v11416_v16 = vadd.f32 %v4316_v44, %v4315_v12  ;;  %v11429_v60 = vpop.permute.xlu1 %1630 }
 0x2d9   :  { %v4185_v5 = vadd.f32 %v4184_v6, %v4183_v17  ;;  %1728 = vbcast.lane.b32.xlu0 %v1726_v39, 256  ;;  %v8283_v26 = vsel %vm2099_vm4, 1.0, %v12759_v54  ;;  %v1887_v51 = vrot.slane %v11219_v45, %v9190_v32  ;;  %v11421_v9 = vunpack.c.l.b16 %v4894_v52 }
 0x2da   :  { %v4273_v13 = vadd.f32 %v4272_v14, %v4271_v58  ;;  %v4327_v43 = vadd.f32 %v4326_v35, %v4325_v31  ;;  %v4331_v1 = vadd.f32 %v8274_v55, %v4330_v42  ;;  %v4279_v34 = vadd.f32 %v4278_v59, %v4277_v57 }
 0x2db   :  { %v4384_v23 = vrot.slane %v8283_v26, 4  ;;  %vm2098_vm5 = vcmp.eq.s32.totalorder %v11378_v20, %v9291_v25  ;;  %1889 = vbcast.lane.b32.xlu1 %v1887_v51, 256  ;;  %v1831_v50 = vrot.slane %v11200_v62, %v9190_v32  ;;  %v11427_v12 = vadd.f32 %v4268_v53, %v4267_v29  ;;  %v11436_v32 = vpop.permute.xlu0 %1623 }
 0x2dc   :  { %v4889_v17 = vpack.c.bf16 %v4233_v47, %v4233_v47  ;;  %v4322_v4 = vrot.slane %v4321_v0, 1  ;;  %v4339_v21 = vadd.f32 %v4338_v30, %v4337_v61  ;;  %v5416_v52 = vunpack.c.l.b16 %v4888_v24  ;;  %v11450_v53 = vpop.permute.xlu1 %1532 }
 0x2dd   :  { %v5408_v58 = vunpack.c.l.b16 %v4880_v7  ;;  %v4903_v31 = vpack.c.bf16 %v11416_v16, %v11416_v16  ;;  %v4881_v57 = vpack.c.bf16 %v4185_v5, %v4185_v5  ;;  %1833 = vbcast.lane.b32.xlu0 %v1831_v50, 256  ;;  %v4274_v40 = vrot.slane %v4273_v13, 1 }
 0x2de   :  { %v4332_v20 = vrot.slane %v4331_v1, 2  ;;  %v8282_v41 = vsel %vm2098_vm5, 1.0, %v12759_v54  ;;  %vm2100_vm7 = vcmp.eq.s32.totalorder %v11390_v11, %v9291_v25  ;;  %v4328_v29 = vrot.slane %v4327_v43, 1 }
 0x2df   :  { %v4280_v44 = vrot.slane %v4279_v34, 1  ;;  %v4385_v6 = vadd.f32 %v8283_v26, %v4384_v23  ;;  %v1894_v24 = vrot.slane %v11219_v45, %v9192_v33  ;;  %v4895_v55 = vpack.c.bf16 %v11427_v12, %v11427_v12 }
 0x2e0   :  { %v5417_v18 = vunpack.c.l.b16 %v4889_v17  ;;  %v4323_v7 = vadd.f32 %v4322_v4, %v4321_v0  ;;  %v4340_v14 = vrot.slane %v4339_v21, 1  ;;  %v5409_v35 = vunpack.c.l.b16 %v4881_v57 }
 0x2e1   :  { %v4378_v61 = vrot.slane %v8282_v41, 4  ;;  %v8284_v59 = vsel %vm2100_vm7, 1.0, %v12759_v54  ;;  %1896 = vbcast.lane.b32.xlu1 %v1894_v24, 256  ;;  %v1838_v11 = vrot.slane %v11200_v62, %v9192_v33  ;;  %v4275_v42 = vadd.f32 %v4274_v40, %v4273_v13  ;;  %v11458_v13 = vpop.permute.xlu0 %1476 }
 0x2e2   :  { %v4333_v39 = vadd.f32 %v4332_v20, %v4331_v1  ;;  %vm2092_vm9 = vcmp.eq.s32.totalorder %v11398_v37, %v9291_v25  ;;  %v5648_v45 = vsel %vm5504_vm12, %v11342_v63, %v11315_v28  ;;  %v4329_v47 = vadd.f32 %v4328_v29, %v4327_v43  ;;  %v8831_v28 = vld [vmem:[#allocation7 + $0xe0] ss:$16 sps:$4 sm:$0xff]   ;;  %v8833_v63 = vld [vmem:[#allocation7 + $0xe4] ss:$16 sps:$4 sm:$0xff]  }
 0x2e3   :  { %v4281_v0 = vadd.f32 %v4280_v44, %v4279_v34  ;;  %v4386_v30 = vrot.slane %v4385_v6, 2  ;;  %1840 = vbcast.lane.b32.xlu0 %v1838_v11, 256  ;;  %v5649_v5 = vsel %vm5506_vm13, %v11376_v38, %v5648_v45  ;;  %v4341_v26 = vadd.f32 %v4340_v14, %v4339_v21  ;;  %6789 = vmatprep.subr.bf16.mxu0 %v8833_v63  ;;  %v8836_v37 = vld [vmem:[#allocation7 + $0xc4] ss:$16 sps:$4 sm:$0xff]  }
 0x2e4   :  { %v4390_v33 = vrot.slane %v8284_v59, 4  ;;  %v5650_v62 = vsel %vm5508_vm15, %v5408_v58, %v5649_v5  ;;  %v5655_v51 = vsel %vm5504_vm12, %v11326_v15, %v11311_v49  ;;  %v4379_v1 = vadd.f32 %v8282_v41, %v4378_v61  ;;  %6790 = vmatpush1.bf16.msra.mxu0 %v8831_v28  ;;  %v8834_v58 = vld [vmem:[#allocation7 + $0xc0] ss:$16 sps:$4 sm:$0xff]  }
 0x2e5   :  { %v8276_v43 = vsel %vm2092_vm9, 1.0, %v12759_v54  ;;  %v5651_v38 = vsel %vm5510_vm0, %v5409_v35, %v5650_v62  ;;  %v5656_v34 = vsel %vm5506_vm13, %v11365_v46, %v5655_v51  ;;  %v4904_v23 = vpack.c.bf16 %v4323_v7, %v4323_v7  ;;  %v11471_v46 = vpop.permute.xlu1 %1637  ;;  %6791 = vmatprep.subr.bf16.mxu0 %v8836_v37  ;;  %v8837_v5 = vld [vmem:[#allocation7 + $0xa0] ss:$16 sps:$4 sm:$0xff]  }
 0x2e6   :  { %v4896_v50 = vpack.c.bf16 %v4275_v42, %v4275_v42  ;;  %v4334_v12 = vrot.slane %v4333_v39, 1  ;;  %v5657_v49 = vsel %vm5508_vm15, %v5416_v52, %v5656_v34  ;;  %v4905_v15 = vpack.c.bf16 %v4329_v47, %v4329_v47 }
 0x2e7   :  { %v4897_v17 = vpack.c.bf16 %v4281_v0, %v4281_v0  ;;  %v4387_v4 = vadd.f32 %v4386_v30, %v4385_v6  ;;  %v5658_v21 = vsel %vm5510_vm0, %v5417_v18, %v5657_v49  ;;  %v4391_v57 = vadd.f32 %v8284_v59, %v4390_v33 }
 0x2e8   :  { %v4342_v40 = vrot.slane %v8276_v43, 4  ;;  %v5739_v20 = vpack.c.b16 %v5658_v21, %v5651_v38  ;;  %vm2107_vm11 = vcmp.eq.s32.totalorder %v11408_v36, %v9291_v25  ;;  %v4907_v41 = vpack.c.bf16 %v4341_v26, %v4341_v26  ;;  %v11480_v36 = vpop.permute.xlu0 %1581  ;;  %6792 = vmatpush1.bf16.msra.mxu0 %v8834_v58 }
 0x2e9   :  { %v4380_v29 = vrot.slane %v4379_v1, 2  ;;  %vm2106_vm14 = vcmp.eq.s32.totalorder %v11414_v27, %v9291_v25  ;;  %vm2115_vm1 = vcmp.eq.s32.totalorder %v11429_v60, %v9291_v25  ;;  %v5431_v52 = vunpack.c.l.b16 %v4903_v31  ;;  %v11486_v27 = vpop.f32.mrf.mxu0  ;;  %v11496_v30 = vpop.permute.xlu1 %1539 }
 0x2ea   :  { %v5423_v44 = vunpack.c.l.b16 %v4895_v55  ;;  %v5432_v6 = vunpack.c.l.b16 %v4904_v23  ;;  %v4335_v24 = vadd.f32 %v4334_v12, %v4333_v39  ;;  %8743 = vmatprep.mubr.bf16.mxu0 %v5739_v20  ;;  %v4388_v18 = vrot.slane %v4387_v4, 1  ;;  %v8839_v39 = vld [vmem:[#allocation7 + $0xa4] ss:$16 sps:$4 sm:$0xff]  }
 0x2eb   :  { %v8291_v7 = vsel %vm2107_vm11, 1.0, %v12759_v54  ;;  %v8290_v14 = vsel %vm2106_vm14, 1.0, %v12759_v54  ;;  %vm2114_vm2 = vcmp.eq.s32.totalorder %v11436_v32, %v9291_v25  ;;  %v5424_v35 = vunpack.c.l.b16 %v4896_v50  ;;  %v11499_v51 = vpop.f32.mrf.mxu0  ;;  %6793 = vmatprep.subr.bf16.mxu0 %v8839_v39  ;;  %v8842_v50 = vld [vmem:[#allocation7 + $0x84] ss:$16 sps:$4 sm:$0xff]  }
 0x2ec   :  { %v4392_v16 = vrot.slane %v4391_v57, 2  ;;  %v4343_v31 = vadd.f32 %v8276_v43, %v4342_v40  ;;  %v8299_v55 = vsel %vm2115_vm1, 1.0, %v12759_v54  ;;  %v5433_v61 = vunpack.c.l.b16 %v4905_v15  ;;  %6794 = vmatpush1.bf16.msra.mxu0 %v8837_v5 }
 0x2ed   :  { %v5425_v59 = vunpack.c.l.b16 %v4897_v17  ;;  %v5435_v11 = vunpack.c.l.b16 %v4907_v41  ;;  %v4381_v42 = vadd.f32 %v4380_v29, %v4379_v1  ;;  %v4432_v45 = vrot.slane %v8291_v7, 4  ;;  %v8840_v17 = vld [vmem:[#allocation7 + $0x80] ss:$16 sps:$4 sm:$0xff]   ;;  %v11514_v58 = vpop.f32.mrf.mxu0  ;;  %6795 = vmatprep.subr.bf16.mxu0 %v8842_v50  ;;  %v11516_v41 = vpop.permute.xlu1 %1644 }
 0x2ee   :  { %v4426_v47 = vrot.slane %v8290_v14, 4  ;;  %v8298_v32 = vsel %vm2114_vm2, 1.0, %v12759_v54  ;;  %v5662_v0 = vsel %vm5504_vm12, %v11421_v9, %v11358_v48  ;;  %v4906_v26 = vpack.c.bf16 %v4335_v24, %v4335_v24  ;;  %v11505_v48 = vpop.permute.xlu0 %1483 }
 0x2ef   :  { %v4389_v33 = vadd.f32 %v4388_v18, %v4387_v4  ;;  %v4480_v60 = vrot.slane %v8299_v55, 4  ;;  %v5663_v62 = vsel %vm5506_vm13, %v5423_v44, %v5662_v0  ;;  %v4393_v28 = vadd.f32 %v4392_v16, %v4391_v57  ;;  %v8848_v0 = vld [vmem:[#allocation7 + $0x44] ss:$16 sps:$4 sm:$0xff]  }
 0x2f0   :  { %v4344_v63 = vrot.slane %v4343_v31, 2  ;;  %v5664_v1 = vsel %vm5508_vm15, %v5424_v35, %v5663_v62  ;;  %v5669_v43 = vsel %vm5504_vm12, %v11396_v8, %v11355_v22  ;;  %v4382_v9 = vrot.slane %v4381_v42, 1  ;;  %6796 = vmatpush1.bf16.msra.mxu0 %v8840_v17 }
 0x2f1   :  { %v4474_v38 = vrot.slane %v8298_v32, 4  ;;  %v5665_v34 = vsel %vm5510_vm0, %v5425_v59, %v5664_v1  ;;  %v5670_v23 = vsel %vm5506_vm13, %v5431_v52, %v5669_v43  ;;  %v4433_v12 = vadd.f32 %v8291_v7, %v4432_v45 }
 0x2f2   :  { %v4427_v49 = vadd.f32 %v8290_v14, %v4426_v47  ;;  %v5671_v15 = vsel %vm5508_vm15, %v5432_v6, %v5670_v23  ;;  %vm2101_vm3 = vcmp.eq.s32.totalorder %v11450_v53, %v9291_v25  ;;  %v5434_v4 = vunpack.c.l.b16 %v4906_v26  ;;  %v8845_v53 = vld [vmem:[#allocation7 + $0x64] ss:$16 sps:$4 sm:$0xff]   ;;  %v11523_v7 = vpop.permute.xlu0 %1588  ;;  %v8843_v14 = vld [vmem:[#allocation7 + $0x60] ss:$16 sps:$4 sm:$0xff]  }
 0x2f3   :  { %v4481_v22 = vadd.f32 %v8299_v55, %v4480_v60  ;;  %v5672_v8 = vsel %vm5510_vm0, %v5433_v61, %v5671_v15  ;;  %v8285_v21 = vsel %vm2101_vm3, 1.0, %v12759_v54  ;;  %v4915_v37 = vpack.c.bf16 %v4389_v33, %v4389_v33  ;;  %6797 = vmatprep.subr.bf16.mxu0 %v8845_v53  ;;  %v8846_v33 = vld [vmem:[#allocation7 + $0x40] ss:$16 sps:$4 sm:$0xff]   ;;  %v8851_v23 = vld [vmem:[#allocation7 + $0x24] ss:$16 sps:$4 sm:$0xff]  }
 0x2f4   :  { %v4394_v57 = vrot.slane %v4393_v28, 1  ;;  %v5740_v40 = vpack.c.b16 %v5672_v8, %v5665_v34  ;;  %v4396_v20 = vrot.slane %v8285_v21, 4  ;;  %v4345_v29 = vadd.f32 %v4344_v63, %v4343_v31  ;;  %v5878_v31 = vpop.f32.mrf.mxu0  ;;  %6798 = vmatpush1.bf16.msra.mxu0 %v8843_v14  ;;  %v8854_v53 = vld [vmem:[#allocation7 + $0x4] ss:$16 sps:$4 sm:$0xff]   ;;  %v8852_v14 = vld [vmem:[#allocation7] ss:$16 sps:$4 sm:$0xff]  }
 0x2f5   :  { %v4475_v52 = vadd.f32 %v8298_v32, %v4474_v38  ;;  %vm2093_vm4 = vcmp.eq.s32.totalorder %v11458_v13, %v9291_v25  ;;  %v11520_v44 = vadd.f32 %v4382_v9, %v4381_v42  ;;  %v4434_v6 = vrot.slane %v4433_v12, 2  ;;  %6799 = vmatprep.subr.bf16.mxu0 %v8848_v0 }
 0x2f6   :  { %v4428_v24 = vrot.slane %v4427_v49, 2  ;;  %8744 = vmatmul.mubr.bf16.gmra.mxu0 %v5740_v40  ;;  %v8277_v18 = vsel %vm2093_vm4, 1.0, %v12759_v54  ;;  %v4482_v35 = vrot.slane %v4481_v22, 2  ;;  %v4397_v16 = vadd.f32 %v8285_v21, %v4396_v20 }
 0x2f7   :  { %v4348_v55 = vrot.slane %v8277_v18, 4  ;;  %vm2116_vm5 = vcmp.eq.s32.totalorder %v11471_v46, %v9291_v25  ;;  %v11528_v13 = vsel %vm5498_vm10, %v5435_v11, %v5434_v4  ;;  %v11530_v61 = vunpack.c.l.b16 %v4915_v37  ;;  %v11540_v11 = vpop.permute.xlu1 %1546 }
 0x2f8   :  { %v11532_v59 = vadd.f32 %v4394_v57, %v4393_v28  ;;  %v8300_v42 = vsel %vm2116_vm5, 1.0, %v12759_v54  ;;  %v4346_v39 = vrot.slane %v4345_v29, 1  ;;  %v4476_v45 = vrot.slane %v4475_v52, 2  ;;  %6800 = vmatpush1.bf16.msra.mxu0 %v8846_v33 }
 0x2f9   :  { %v4349_v47 = vadd.f32 %v8277_v18, %v4348_v55  ;;  %v4486_v32 = vrot.slane %v8300_v42, 4  ;;  %v4914_v46 = vpack.c.bf16 %v11520_v44, %v11520_v44  ;;  %v4435_v5 = vadd.f32 %v4434_v6, %v4433_v12  ;;  %6801 = vmatprep.subr.bf16.mxu0 %v8851_v23 }
 0x2fa   :  { %v5974_v26 = vpack.c.bf16 %v5878_v31, %v11499_v51  ;;  %vm2108_vm7 = vcmp.eq.s32.totalorder %v11480_v36, %v9291_v25  ;;  %v4429_v60 = vadd.f32 %v4428_v24, %v4427_v49  ;;  %v4483_v62 = vadd.f32 %v4482_v35, %v4481_v22  ;;  %v11547_v51 = vpop.permute.xlu0 %1490 }
 0x2fb   :  { %v4398_v28 = vrot.slane %v4397_v16, 2  ;;  %v4487_v63 = vadd.f32 %v8300_v42, %v4486_v32  ;;  %v4350_v1 = vrot.slane %v4349_v47, 2  ;;  %v8292_v43 = vsel %vm2108_vm7, 1.0, %v12759_v54  ;;  %v11557_v57 = vpop.permute.xlu1 %1651  ;;  %v8857_v32 = vld [vmem:[#allocation7 + $0x1e4] ss:$16 sps:$4 sm:$0xff]  }
 0x2fc   :  { %6167 = vmatmul.mubr.bf16.gmra.mxu1 %v5974_v26  ;;  %vm2102_vm9 = vcmp.eq.s32.totalorder %v11496_v30, %v9291_v25  ;;  %vm2094_vm11 = vcmp.eq.s32.totalorder %v11505_v48, %v9291_v25  ;;  %v11549_v36 = vadd.f32 %v4346_v39, %v4345_v29  ;;  %v4477_v9 = vadd.f32 %v4476_v45, %v4475_v52  ;;  %v8849_v30 = vld [vmem:[#allocation7 + $0x20] ss:$16 sps:$4 sm:$0xff]  }
 0x2fd   :  { %v4488_v38 = vrot.slane %v4487_v63, 2  ;;  %v4438_v34 = vrot.slane %v8292_v43, 4  ;;  %6176 = vmatprep.mubr.bf16.mxu1 %v9058_v56  ;;  %v4436_v50 = vrot.slane %v4435_v5, 1  ;;  %v8286_v12 = vsel %vm2102_vm9, 1.0, %v12759_v54  ;;  %6802 = vmatpush1.bf16.msra.mxu0 %v8849_v30 }
 0x2fe   :  { %v8278_v49 = vsel %vm2094_vm11, 1.0, %v12759_v54  ;;  %vm2117_vm14 = vcmp.eq.s32.totalorder %v11516_v41, %v9291_v25  ;;  %v4430_v48 = vrot.slane %v4429_v60, 1  ;;  %v4484_v15 = vrot.slane %v4483_v62, 1  ;;  %v11565_v18 = vpop.permute.xlu0 %1595  ;;  %6803 = vmatprep.subr.bf16.mxu0 %v8854_v53 }
 0x2ff   :  { %v4399_v17 = vadd.f32 %v4398_v28, %v4397_v16  ;;  %v4439_v4 = vadd.f32 %v8292_v43, %v4438_v34  ;;  %v4351_v22 = vadd.f32 %v4350_v1, %v4349_v47  ;;  %v4402_v8 = vrot.slane %v8286_v12, 4  ;;  %v11573_v33 = vpop.permute.xlu1 %1553 }
 0x300   :  { %v4354_v21 = vrot.slane %v8278_v49, 4  ;;  %v8301_v37 = vsel %vm2117_vm14, 1.0, %v12759_v54  ;;  %v4478_v40 = vrot.slane %v4477_v9, 1  ;;  %v4489_v20 = vadd.f32 %v4488_v38, %v4487_v63 }
 0x301   :  { %v4440_v29 = vrot.slane %v4439_v4, 2  ;;  %v4492_v52 = vrot.slane %v8301_v37, 4  ;;  %v4916_v41 = vpack.c.bf16 %v11532_v59, %v11532_v59  ;;  %v5975_v6 = vpack.c.bf16 %v11514_v58, %v11486_v27  ;;  %6804 = vmatpush1.bf16.msra.mxu0 %v8852_v14 }
 0x302   :  { %v4403_v24 = vadd.f32 %v8286_v12, %v4402_v8  ;;  %vm2109_vm1 = vcmp.eq.s32.totalorder %v11523_v7, %v9291_v25  ;;  %v4437_v35 = vadd.f32 %v4436_v50, %v4435_v5  ;;  %v4431_v16 = vadd.f32 %v4430_v48, %v4429_v60  ;;  %v8855_v60 = vld [vmem:[#allocation7 + $0x1e0] ss:$16 sps:$4 sm:$0xff]   ;;  %6805 = vmatprep.subr.bf16.mxu0 %v8857_v32  ;;  %v11579_v34 = vpop.permute.xlu0 %1497 }
 0x303   :  { %v4400_v55 = vrot.slane %v4399_v17, 1  ;;  %v4493_v31 = vadd.f32 %v8301_v37, %v4492_v52  ;;  %v4908_v42 = vpack.c.bf16 %v11549_v36, %v11549_v36  ;;  %v4352_v39 = vrot.slane %v4351_v22, 1 }
 0x304   :  { %v4355_v59 = vadd.f32 %v8278_v49, %v4354_v21  ;;  %v8293_v45 = vsel %vm2109_vm1, 1.0, %v12759_v54  ;;  %6177 = vmatmul.mubr.bf16.gmra.mxu1 %v5975_v6  ;;  %v4485_v27 = vadd.f32 %v4484_v15, %v4483_v62  ;;  %v4479_v58 = vadd.f32 %v4478_v40, %v4477_v9  ;;  %v8860_v49 = vld [vmem:[#allocation7 + $0x1c4] ss:$16 sps:$4 sm:$0xff]   ;;  %v8858_v15 = vld [vmem:[#allocation7 + $0x1c0] ss:$16 sps:$4 sm:$0xff]  }
 0x305   :  { %v4490_v7 = vrot.slane %v4489_v20, 1  ;;  %v4441_v47 = vadd.f32 %v4440_v29, %v4439_v4  ;;  %6186 = vmatprep.mubr.bf16.mxu1 %v9058_v56  ;;  %v4404_v0 = vrot.slane %v4403_v24, 2  ;;  %v4494_v5 = vrot.slane %v4493_v31, 2  ;;  %6806 = vmatpush2.bf16.msra.mxu0 %v8855_v60  ;;  %v11583_v29 = vpop.permute.xlu1 %1658  ;;  %v8863_v6 = vld [vmem:[#allocation7 + $0x1a4] ss:$16 sps:$4 sm:$0xff]  }
 0x306   :  { %v4444_v26 = vrot.slane %v8293_v45, 4  ;;  %vm2103_vm2 = vcmp.eq.s32.totalorder %v11540_v11, %v9291_v25  ;;  %v5442_v28 = vunpack.c.l.b16 %v4914_v46  ;;  %v4923_v62 = vpack.c.bf16 %v4437_v35, %v4437_v35  ;;  %6807 = vmatprep.subr.bf16.mxu0 %v8860_v49  ;;  %v8867_v49 = vld [vmem:[#allocation7 + $0x160] ss:$16 sps:$4 sm:$0xff]  }
 0x307   :  { %v4922_v63 = vpack.c.bf16 %v4431_v16, %v4431_v16  ;;  %v4401_v1 = vadd.f32 %v4400_v55, %v4399_v17  ;;  %v4353_v43 = vadd.f32 %v4352_v39, %v4351_v22  ;;  %v4356_v36 = vrot.slane %v4355_v59, 2  ;;  %v11591_v55 = vpop.permute.xlu0 %1602 }
 0x308   :  { %v4445_v9 = vadd.f32 %v8293_v45, %v4444_v26  ;;  %v8287_v38 = vsel %vm2103_vm2, 1.0, %v12759_v54  ;;  %v5444_v11 = vunpack.c.l.b16 %v4916_v41  ;;  %v4931_v23 = vpack.c.bf16 %v4485_v27, %v4485_v27 }
 0x309   :  { %v4491_v50 = vadd.f32 %v4490_v7, %v4489_v20  ;;  %v4442_v12 = vrot.slane %v4441_v47, 1  ;;  %v5436_v30 = vunpack.c.l.b16 %v4908_v42  ;;  %v4930_v44 = vpack.c.bf16 %v4479_v58, %v4479_v58  ;;  %6808 = vmatpush2.bf16.msra.mxu0 %v8858_v15  ;;  %v1561_v60 = vpop.permute.xlu1 %1560 }
 0x30a   :  { %v4405_v46 = vadd.f32 %v4404_v0, %v4403_v24  ;;  %v4495_v48 = vadd.f32 %v4494_v5, %v4493_v31  ;;  %v5451_v17 = vunpack.c.l.b16 %v4923_v62  ;;  %v4446_v4 = vrot.slane %v4445_v9, 2  ;;  %v8861_v31 = vld [vmem:[#allocation7 + $0x1a0] ss:$16 sps:$4 sm:$0xff]   ;;  %6809 = vmatprep.subr.bf16.mxu0 %v8863_v6  ;;  %v8866_v0 = vld [vmem:[#allocation7 + $0x184] ss:$16 sps:$4 sm:$0xff]  }
 0x30b   :  { %v4408_v22 = vrot.slane %v8287_v38, 4  ;;  %vm2095_vm3 = vcmp.eq.s32.totalorder %v11547_v51, %v9291_v25  ;;  %v5450_v8 = vunpack.c.l.b16 %v4922_v63  ;;  %v4917_v21 = vpack.c.bf16 %v4401_v1, %v4401_v1 }
 0x30c   :  { %v4909_v37 = vpack.c.bf16 %v4353_v43, %v4353_v43  ;;  %v4357_v40 = vadd.f32 %v4356_v36, %v4355_v59  ;;  %v5680_v20 = vsel %vm5498_vm10, %v11530_v61, %v5442_v28  ;;  %v5459_v52 = vunpack.c.l.b16 %v4931_v23  ;;  %v8864_v28 = vld [vmem:[#allocation7 + $0x180] ss:$16 sps:$4 sm:$0xff]  }
 0x30d   :  { %v4932_v53 = vpack.c.bf16 %v4491_v50, %v4491_v50  ;;  %v4443_v41 = vadd.f32 %v4442_v12, %v4441_v47  ;;  %v5458_v24 = vunpack.c.l.b16 %v4930_v44  ;;  %v4406_v14 = vrot.slane %v4405_v46, 1  ;;  %6810 = vmatpush2.bf16.msra.mxu0 %v8861_v31 }
 0x30e   :  { %v4496_v35 = vrot.slane %v4495_v48, 1  ;;  %v8279_v16 = vsel %vm2095_vm3, 1.0, %v12759_v54  ;;  %v5681_v42 = vsel %vm5500_vm6, %v5444_v11, %v5680_v20  ;;  %v5674_v61 = vsel %vm5500_vm6, %v5436_v30, %v11528_v13  ;;  %6811 = vmatprep.subr.bf16.mxu0 %v8866_v0  ;;  %v8869_v30 = vld [vmem:[#allocation7 + $0x164] ss:$16 sps:$4 sm:$0xff]  }
 0x30f   :  { %v4447_v39 = vadd.f32 %v4446_v4, %v4445_v9  ;;  %v4409_v59 = vadd.f32 %v8287_v38, %v4408_v22  ;;  %v5687_v45 = vsel %vm5498_vm10, %v5451_v17, %v5450_v8  ;;  %v5445_v27 = vunpack.c.l.b16 %v4917_v21  ;;  %v1505_v38 = vpop.permute.xlu0 %1504 }
 0x310   :  { %v5437_v58 = vunpack.c.l.b16 %v4909_v37  ;;  %v4358_v7 = vrot.slane %v4357_v40, 1  ;;  %v5460_v47 = vunpack.c.l.b16 %v4932_v53  ;;  %v4924_v51 = vpack.c.bf16 %v4443_v41, %v4443_v41 }
 0x311   :  { %v4360_v32 = vrot.slane %v8279_v16, 4  ;;  %vm2118_vm4 = vcmp.eq.s32.totalorder %v11557_v57, %v9291_v25  ;;  %v5694_v5 = vsel %vm5498_vm10, %v5459_v52, %v5458_v24  ;;  %v4407_v26 = vadd.f32 %v4406_v14, %v4405_v46  ;;  %6812 = vmatpush2.bf16.msra.mxu0 %v8864_v28  ;;  %v8875_v24 = vld [vmem:[#allocation7 + $0x124] ss:$16 sps:$4 sm:$0xff]  }
 0x312   :  { %v4497_v13 = vadd.f32 %v4496_v35, %v4495_v48  ;;  %vm2110_vm5 = vcmp.eq.s32.totalorder %v11565_v18, %v9291_v25  ;;  %v4448_v62 = vrot.slane %v4447_v39, 1  ;;  %v4410_v63 = vrot.slane %v4409_v59, 2  ;;  %v8872_v48 = vld [vmem:[#allocation7 + $0x144] ss:$16 sps:$4 sm:$0xff]   ;;  %6813 = vmatprep.subr.bf16.mxu0 %v8869_v30 }
 0x313   :  { %vm2104_vm7 = vcmp.eq.s32.totalorder %v11573_v33, %v9291_v25  ;;  %vm2096_vm9 = vcmp.eq.s32.totalorder %v11579_v34, %v9291_v25  ;;  %v11607_v1 = vsel %vm5502_vm8, %v5445_v27, %v5681_v42  ;;  %v11610_v43 = vsel %vm5502_vm8, %v5437_v58, %v5674_v61  ;;  %v1666_v33 = vpop.permute.xlu1 %1665  ;;  %v8870_v34 = vld [vmem:[#allocation7 + $0x140] ss:$16 sps:$4 sm:$0xff]   ;;  %v1610_v6 = vpop.permute.xlu0 %1609 }
 0x314   :  { %v4359_v36 = vadd.f32 %v4358_v7, %v4357_v40  ;;  %v8302_v9 = vsel %vm2118_vm4, 1.0, %v12759_v54  ;;  %v5695_v11 = vsel %vm5500_vm6, %v5460_v47, %v5694_v5  ;;  %v5452_v23 = vunpack.c.l.b16 %v4924_v51  ;;  %v8878_v7 = vld [vmem:[#allocation7 + $0x104] ss:$16 sps:$4 sm:$0xff]  }
 0x315   :  { %v4361_v50 = vadd.f32 %v8279_v16, %v4360_v32  ;;  %v8294_v12 = vsel %vm2110_vm5, 1.0, %v12759_v54  ;;  %v4918_v44 = vpack.c.bf16 %v4407_v26, %v4407_v26  ;;  %v8288_v57 = vsel %vm2104_vm7, 1.0, %v12759_v54  ;;  %6814 = vmatpush2.bf16.msra.mxu0 %v8867_v49 }
 0x316   :  { %v8280_v46 = vsel %vm2096_vm9, 1.0, %v12759_v54  ;;  %vm2119_vm11 = vcmp.eq.s32.totalorder %v11583_v29, %v9291_v25  ;;  %v4933_v15 = vpack.c.bf16 %v4497_v13, %v4497_v13  ;;  %v4449_v18 = vadd.f32 %v4448_v62, %v4447_v39  ;;  %6815 = vmatprep.subr.bf16.mxu0 %v8872_v48  ;;  %v8873_v39 = vld [vmem:[#allocation7 + $0x120] ss:$16 sps:$4 sm:$0xff]  }
 0x317   :  { %v4411_v17 = vadd.f32 %v4410_v63, %v4409_v59  ;;  %v4498_v4 = vrot.slane %v8302_v9, 4  ;;  %v4910_v22 = vpack.c.bf16 %v4359_v36, %v4359_v36  ;;  %v4450_v8 = vrot.slane %v8294_v12, 4  ;;  %v1673_v5 = vpop.permute.xlu1 %1672 }
 0x318   :  { %v8303_v21 = vsel %vm2119_vm11, 1.0, %v12759_v54  ;;  %vm2111_vm14 = vcmp.eq.s32.totalorder %v11591_v55, %v9291_v25  ;;  %v11635_v37 = vsel %vm5500_vm6, %v5452_v23, %v5687_v45  ;;  %v4362_v40 = vrot.slane %v4361_v50, 2 }
 0x319   :  { %v4414_v29 = vrot.slane %v8288_v57, 4  ;;  %v4366_v20 = vrot.slane %v8280_v46, 4  ;;  %v11637_v52 = vunpack.c.l.b16 %v4918_v44  ;;  %v4504_v53 = vrot.slane %v8303_v21, 4  ;;  %6816 = vmatpush2.bf16.msra.mxu0 %v8870_v34 }
 0x31a   :  { %v8295_v41 = vsel %vm2111_vm14, 1.0, %v12759_v54  ;;  %vm2105_vm1 = vcmp.eq.s32.totalorder %v1561_v60, %v9291_v25  ;;  %v5461_v14 = vunpack.c.l.b16 %v4933_v15  ;;  %v4925_v35 = vpack.c.bf16 %v4449_v18, %v4449_v18  ;;  %6817 = vmatprep.subr.bf16.mxu0 %v8875_v24 }
 0x31b   :  { %v4412_v16 = vrot.slane %v4411_v17, 1  ;;  %v4499_v55 = vadd.f32 %v8302_v9, %v4498_v4  ;;  %v4451_v31 = vadd.f32 %v8294_v12, %v4450_v8  ;;  %v4456_v42 = vrot.slane %v8295_v41, 4  ;;  %v1617_v9 = vpop.permute.xlu0 %1616 }
 0x31c   :  { %v8289_v61 = vsel %vm2105_vm1, 1.0, %v12759_v54  ;;  %vm2097_vm2 = vcmp.eq.s32.totalorder %v1505_v38, %v9291_v25  ;;  %v11643_v59 = vunpack.c.l.b16 %v4910_v22  ;;  %v4363_v45 = vadd.f32 %v4362_v40, %v4361_v50  ;;  %v8876_v38 = vld [vmem:[#allocation7 + $0x100] ss:$16 sps:$4 sm:$0xff]   ;;  %v1687_v22 = vpop.permute.xlu1 %1686 }
 0x31d   :  { %v4415_v27 = vadd.f32 %v8288_v57, %v4414_v29  ;;  %v4367_v58 = vadd.f32 %v8280_v46, %v4366_v20  ;;  %v4505_v47 = vadd.f32 %v8303_v21, %v4504_v53  ;;  %v4457_v51 = vadd.f32 %v8295_v41, %v4456_v42  ;;  %6818 = vmatpush2.bf16.msra.mxu0 %v8873_v39 }
 0x31e   :  { %v4420_v32 = vrot.slane %v8289_v61, 4  ;;  %v8281_v0 = vsel %vm2097_vm2, 1.0, %v12759_v54  ;;  %v11647_v26 = vsel %vm5502_vm8, %v5461_v14, %v5695_v11  ;;  %v5453_v13 = vunpack.c.l.b16 %v4925_v35  ;;  %6819 = vmatprep.subr.bf16.mxu0 %v8878_v7 }
 0x31f   :  { %v11649_v60 = vadd.f32 %v4412_v16, %v4411_v17  ;;  %v4500_v28 = vrot.slane %v4499_v55, 2  ;;  %v4452_v62 = vrot.slane %v4451_v31, 2  ;;  %v4372_v36 = vrot.slane %v8281_v0, 4  ;;  %v1680_v53 = vpop.permute.xlu0 %1679 }
 0x320   :  { %v4421_v63 = vadd.f32 %v8289_v61, %v4420_v32  ;;  %vm2120_vm3 = vcmp.eq.s32.totalorder %v1666_v33, %v9291_v25  ;;  %v4364_v23 = vrot.slane %v4363_v45, 1  ;;  %v4416_v50 = vrot.slane %v4415_v27, 2 }
 0x321   :  { %v4368_v12 = vrot.slane %v4367_v58, 2  ;;  %v8304_v49 = vsel %vm2120_vm3, 1.0, %v12759_v54  ;;  %v4506_v11 = vrot.slane %v4505_v47, 2  ;;  %v4458_v30 = vrot.slane %v4457_v51, 2  ;;  %6820 = vmatpush2.bf16.msra.mxu0 %v8876_v38 }
 0x322   :  { %v4373_v44 = vadd.f32 %v8281_v0, %v4372_v36  ;;  %v4510_v57 = vrot.slane %v8304_v49, 4  ;;  %v4919_v46 = vpack.c.bf16 %v11649_v60, %v11649_v60  ;;  %v4422_v48 = vrot.slane %v4421_v63, 2 }
 0x323   :  { %vm2112_vm4 = vcmp.eq.s32.totalorder %v1610_v6, %v9291_v25  ;;  %vm2121_vm5 = vcmp.eq.s32.totalorder %v1673_v5, %v9291_v25  ;;  %v4501_v15 = vadd.f32 %v4500_v28, %v4499_v55  ;;  %v4453_v18 = vadd.f32 %v4452_v62, %v4451_v31  ;;  %v1736_v36 = vpop.permute.xlu0 %1735 }
 0x324   :  { %v4374_v17 = vrot.slane %v4373_v44, 2  ;;  %v4511_v4 = vadd.f32 %v8304_v49, %v4510_v57  ;;  %v4365_v8 = vadd.f32 %v4364_v23, %v4363_v45  ;;  %v8296_v21 = vsel %vm2112_vm4, 1.0, %v12759_v54 }
 0x325   :  { %v8305_v33 = vsel %vm2121_vm5, 1.0, %v12759_v54  ;;  %vm2113_vm7 = vcmp.eq.s32.totalorder %v1617_v9, %v9291_v25  ;;  %v4417_v34 = vadd.f32 %v4416_v50, %v4415_v27  ;;  %v4369_v40 = vadd.f32 %v4368_v12, %v4367_v58 }
 0x326   :  { %v4507_v29 = vadd.f32 %v4506_v11, %v4505_v47  ;;  %v4459_v20 = vadd.f32 %v4458_v30, %v4457_v51  ;;  %v4423_v41 = vadd.f32 %v4422_v48, %v4421_v63  ;;  %v4462_v6 = vrot.slane %v8296_v21, 4  ;;  %v1743_v47 = vpop.permute.xlu1 %1742 }
 0x327   :  { %v4516_v24 = vrot.slane %v8305_v33, 4  ;;  %v8297_v14 = vsel %vm2113_vm7, 1.0, %v12759_v54  ;;  %v4502_v35 = vrot.slane %v4501_v15, 1  ;;  %v4454_v16 = vrot.slane %v4453_v18, 1 }
 0x328   :  { %v4375_v55 = vadd.f32 %v4374_v17, %v4373_v44  ;;  %v4512_v31 = vrot.slane %v4511_v4, 2  ;;  %v4463_v42 = vadd.f32 %v8296_v21, %v4462_v6  ;;  %v4468_v39 = vrot.slane %v8297_v14, 4 }
 0x329   :  { %v4517_v61 = vadd.f32 %v8305_v33, %v4516_v24  ;;  %vm2123_vm9 = vcmp.eq.s32.totalorder %v1687_v22, %v9291_v25  ;;  %v11664_v45 = vsel %vm5502_vm8, %v5453_v13, %v11635_v37  ;;  %v4911_v27 = vpack.c.bf16 %v4365_v8, %v4365_v8 }
 0x32a   :  { %v4418_v58 = vrot.slane %v4417_v34, 1  ;;  %v4370_v7 = vrot.slane %v4369_v40, 1  ;;  %v4508_v51 = vrot.slane %v4507_v29, 1  ;;  %v4460_v32 = vrot.slane %v4459_v20, 1 }
 0x32b   :  { %v4424_v0 = vrot.slane %v4423_v41, 1  ;;  %v8307_v5 = vsel %vm2123_vm9, 1.0, %v12759_v54  ;;  %v4503_v60 = vadd.f32 %v4502_v35, %v4501_v15  ;;  %v4376_v28 = vrot.slane %v4375_v55, 1 }
 0x32c   :  { %v4513_v62 = vadd.f32 %v4512_v31, %v4511_v4  ;;  %v4469_v63 = vadd.f32 %v8297_v14, %v4468_v39  ;;  %v4455_v9 = vadd.f32 %v4454_v16, %v4453_v18  ;;  %v4464_v38 = vrot.slane %v4463_v42, 2  ;;  %v1750_v4 = vpop.permute.xlu1 %1749 }
 0x32d   :  { %v4518_v23 = vrot.slane %v4517_v61, 2  ;;  %vm2122_vm11 = vcmp.eq.s32.totalorder %v1680_v53, %v9291_v25  ;;  %v11668_v37 = vunpack.c.l.b16 %v4919_v46  ;;  %v4419_v13 = vadd.f32 %v4418_v58, %v4417_v34  ;;  %v1694_v34 = vpop.permute.xlu0 %1693 }
 0x32e   :  { %v4371_v50 = vadd.f32 %v4370_v7, %v4369_v40  ;;  %v4528_v12 = vrot.slane %v8307_v5, 4  ;;  %v4509_v49 = vadd.f32 %v4508_v51, %v4507_v29  ;;  %v4461_v11 = vadd.f32 %v4460_v32, %v4459_v20 }
 0x32f   :  { %v4425_v30 = vadd.f32 %v4424_v0, %v4423_v41  ;;  %v8306_v44 = vsel %vm2122_vm11, 1.0, %v12759_v54  ;;  %v4934_v57 = vpack.c.bf16 %v4503_v60, %v4503_v60  ;;  %v4377_v48 = vadd.f32 %v4376_v28, %v4375_v55 }
 0x330   :  { %v4514_v15 = vrot.slane %v4513_v62, 1  ;;  %v4470_v17 = vrot.slane %v4469_v63, 2  ;;  %v5439_v18 = vunpack.c.l.b16 %v4911_v27  ;;  %v4926_v22 = vpack.c.bf16 %v4455_v9, %v4455_v9  ;;  %v1799_v58 = vpop.permute.xlu1 %1798 }
 0x331   :  { %v4465_v8 = vadd.f32 %v4464_v38, %v4463_v42  ;;  %v4519_v21 = vadd.f32 %v4518_v23, %v4517_v61  ;;  %v4920_v33 = vpack.c.bf16 %v4419_v13, %v4419_v13  ;;  %v4529_v46 = vadd.f32 %v8307_v5, %v4528_v12 }
 0x332   :  { %v4522_v53 = vrot.slane %v8306_v44, 4  ;;  %vm2131_vm14 = vcmp.eq.s32.totalorder %v1743_v47, %v9291_v25  ;;  %v4912_v40 = vpack.c.bf16 %v4371_v50, %v4371_v50  ;;  %v4935_v29 = vpack.c.bf16 %v4509_v49, %v4509_v49 }
 0x333   :  { %v4927_v20 = vpack.c.bf16 %v4461_v11, %v4461_v11  ;;  %v4921_v41 = vpack.c.bf16 %v4425_v30, %v4425_v30  ;;  %v11672_v6 = vunpack.c.l.b16 %v4934_v57  ;;  %v4913_v24 = vpack.c.bf16 %v4377_v48, %v4377_v48 }
 0x334   :  { %v4515_v14 = vadd.f32 %v4514_v15, %v4513_v62  ;;  %v4471_v35 = vadd.f32 %v4470_v17, %v4469_v63  ;;  %v4466_v16 = vrot.slane %v4465_v8, 1  ;;  %v4520_v55 = vrot.slane %v4519_v21, 1  ;;  %v1792_v62 = vpop.permute.xlu0 %1791 }
 0x335   :  { %v8315_v31 = vsel %vm2131_vm14, 1.0, %v12759_v54  ;;  %vm2130_vm1 = vcmp.eq.s32.totalorder %v1736_v36, %v9291_v25  ;;  %v11676_v42 = vunpack.c.l.b16 %v4926_v22  ;;  %v5448_v61 = vunpack.c.l.b16 %v4920_v33 }
 0x336   :  { %v4530_v39 = vrot.slane %v4529_v46, 2  ;;  %v4523_v27 = vadd.f32 %v8306_v44, %v4522_v53  ;;  %v5440_v7 = vunpack.c.l.b16 %v4912_v40  ;;  %v11678_v47 = vunpack.c.l.b16 %v4935_v29 }
 0x337   :  { %v11680_v51 = vunpack.c.l.b16 %v4927_v20  ;;  %v5449_v32 = vunpack.c.l.b16 %v4921_v41  ;;  %v5441_v0 = vunpack.c.l.b16 %v4913_v24  ;;  %v4472_v5 = vrot.slane %v4471_v35, 1  ;;  %v11705_v20 = vpop.f32.mrf.mxu0 }
 0x338   :  { %v4576_v60 = vrot.slane %v8315_v31, 4  ;;  %v8314_v28 = vsel %vm2130_vm1, 1.0, %v12759_v54  ;;  %v4936_v63 = vpack.c.bf16 %v4515_v14, %v4515_v14  ;;  %v4467_v36 = vadd.f32 %v4466_v16, %v4465_v8 }
 0x339   :  { %v4521_v9 = vadd.f32 %v4520_v55, %v4519_v21  ;;  %v5676_v38 = vsel %vm5504_vm12, %v11643_v59, %v11610_v43  ;;  %v4531_v23 = vadd.f32 %v4530_v39, %v4529_v46  ;;  %v4524_v13 = vrot.slane %v4523_v27, 2  ;;  %v1855_v59 = vpop.permute.xlu1 %1854 }
 0x33a   :  { %vm2132_vm2 = vcmp.eq.s32.totalorder %v1750_v4, %v9291_v25  ;;  %v5677_v50 = vsel %vm5506_vm13, %v5439_v18, %v5676_v38  ;;  %v4570_v12 = vrot.slane %v8314_v28, 4  ;;  %vm2124_vm3 = vcmp.eq.s32.totalorder %v1694_v34, %v9291_v25 }
 0x33b   :  { %v5678_v49 = vsel %vm5508_vm15, %v5440_v7, %v5677_v50  ;;  %v5683_v11 = vsel %vm5504_vm12, %v11637_v52, %v11607_v1  ;;  %v4473_v30 = vadd.f32 %v4472_v5, %v4471_v35  ;;  %v4577_v44 = vadd.f32 %v8315_v31, %v4576_v60  ;;  %v1848_v52 = vpop.permute.xlu0 %1847 }
 0x33c   :  { %v5679_v57 = vsel %vm5510_vm0, %v5441_v0, %v5678_v49  ;;  %v5684_v43 = vsel %vm5506_vm13, %v11668_v37, %v5683_v11  ;;  %v4928_v48 = vpack.c.bf16 %v4467_v36, %v4467_v36  ;;  %v8316_v15 = vsel %vm2132_vm2, 1.0, %v12759_v54 }
 0x33d   :  { %v5685_v17 = vsel %vm5508_vm15, %v5448_v61, %v5684_v43  ;;  %vm2139_vm4 = vcmp.eq.s32.totalorder %v1799_v58, %v9291_v25  ;;  %v4532_v4 = vrot.slane %v4531_v23, 1  ;;  %v4525_v18 = vadd.f32 %v4524_v13, %v4523_v27  ;;  %v1757_v16 = vpop.permute.xlu1 %1756 }
 0x33e   :  { %v8308_v22 = vsel %vm2124_vm3, 1.0, %v12759_v54  ;;  %v5686_v1 = vsel %vm5510_vm0, %v5449_v32, %v5685_v17  ;;  %v5464_v8 = vunpack.c.l.b16 %v4936_v63  ;;  %v4571_v21 = vadd.f32 %v8314_v28, %v4570_v12  ;;  %v5891_v63 = vpop.f32.mrf.mxu0 }
 0x33f   :  { %v5741_v33 = vpack.c.b16 %v5686_v1, %v5679_v57  ;;  %v8323_v37 = vsel %vm2139_vm4, 1.0, %v12759_v54  ;;  %v4937_v46 = vpack.c.bf16 %v4521_v9, %v4521_v9  ;;  %v4929_v53 = vpack.c.bf16 %v4473_v30, %v4473_v30  ;;  %v1701_v0 = vpop.permute.xlu0 %1700 }
 0x340   :  { %v4578_v34 = vrot.slane %v4577_v44, 2  ;;  %v4582_v40 = vrot.slane %v8316_v15, 4  ;;  %v4534_v29 = vrot.slane %v8308_v22, 4  ;;  %vm2138_vm5 = vcmp.eq.s32.totalorder %v1792_v62, %v9291_v25 }
 0x341   :  { %8747 = vmatprep.mubr.bf16.mxu0 %v5741_v33  ;;  %vm2147_vm7 = vcmp.eq.s32.totalorder %v1855_v59, %v9291_v25  ;;  %vm2146_vm9 = vcmp.eq.s32.totalorder %v1848_v52, %v9291_v25  ;;  %v5456_v41 = vunpack.c.l.b16 %v4928_v48  ;;  %v4533_v24 = vadd.f32 %v4532_v4, %v4531_v23  ;;  %v1862_v43 = vpop.permute.xlu1 %1861 }
 0x342   :  { %v4526_v14 = vrot.slane %v4525_v18, 1  ;;  %v4624_v35 = vrot.slane %v8323_v37, 4  ;;  %v4572_v55 = vrot.slane %v4571_v21, 2  ;;  %v8322_v31 = vsel %vm2138_vm5, 1.0, %v12759_v54 }
 0x343   :  { %v8331_v61 = vsel %vm2147_vm7, 1.0, %v12759_v54  ;;  %v8330_v39 = vsel %vm2146_vm9, 1.0, %v12759_v54  ;;  %v5465_v27 = vunpack.c.l.b16 %v4937_v46  ;;  %v4579_v58 = vadd.f32 %v4578_v34, %v4577_v44 }
 0x344   :  { %v4583_v7 = vadd.f32 %v8316_v15, %v4582_v40  ;;  %v4618_v32 = vrot.slane %v8322_v31, 4  ;;  %v5457_v5 = vunpack.c.l.b16 %v4929_v53  ;;  %v4535_v60 = vadd.f32 %v8308_v22, %v4534_v29 }
 0x345   :  { %v4672_v28 = vrot.slane %v8331_v61, 4  ;;  %v4666_v62 = vrot.slane %v8330_v39, 4  ;;  %v4939_v36 = vpack.c.bf16 %v4533_v24, %v4533_v24  ;;  %v4625_v9 = vadd.f32 %v8323_v37, %v4624_v35  ;;  %v1764_v24 = vpop.permute.xlu1 %1763 }
 0x346   :  { %v4619_v38 = vadd.f32 %v8322_v31, %v4618_v32  ;;  %v5690_v23 = vsel %vm5504_vm12, %v11676_v42, %v11664_v45  ;;  %v4527_v13 = vadd.f32 %v4526_v14, %v4525_v18  ;;  %v4573_v50 = vadd.f32 %v4572_v55, %v4571_v21  ;;  %v11722_v42 = vpop.f32.mrf.mxu0  ;;  %v1806_v18 = vpop.permute.xlu0 %1805 }
 0x347   :  { %v4673_v12 = vadd.f32 %v8331_v61, %v4672_v28  ;;  %v5691_v49 = vsel %vm5506_vm13, %v11680_v51, %v5690_v23  ;;  %v4580_v11 = vrot.slane %v4579_v58, 1  ;;  %v4584_v30 = vrot.slane %v4583_v7, 2 }
 0x348   :  { %v5692_v44 = vsel %vm5508_vm15, %v5456_v41, %v5691_v49  ;;  %v5697_v57 = vsel %vm5504_vm12, %v11672_v6, %v11647_v26  ;;  %v4536_v59 = vrot.slane %v4535_v60, 2  ;;  %v4667_v48 = vadd.f32 %v8330_v39, %v4666_v62 }
 0x349   :  { %v5693_v15 = vsel %vm5510_vm0, %v5457_v5, %v5692_v44  ;;  %v5698_v45 = vsel %vm5506_vm13, %v11678_v47, %v5697_v57  ;;  %v4626_v17 = vrot.slane %v4625_v9, 2  ;;  %v4620_v51 = vrot.slane %v4619_v38, 2 }
 0x34a   :  { %v5699_v4 = vsel %vm5508_vm15, %v5464_v8, %v5698_v45  ;;  %vm2133_vm11 = vcmp.eq.s32.totalorder %v1757_v16, %v9291_v25  ;;  %v11726_v22 = vunpack.c.l.b16 %v4939_v36  ;;  %v4574_v26 = vrot.slane %v4573_v50, 1  ;;  %v5894_v8 = vpop.f32.mrf.mxu0  ;;  %v1708_v39 = vpop.permute.xlu0 %1707 }
 0x34b   :  { %v4674_v6 = vrot.slane %v4673_v12, 2  ;;  %v5700_v1 = vsel %vm5510_vm0, %v5465_v27, %v5699_v4  ;;  %v4938_v52 = vpack.c.bf16 %v4527_v13, %v4527_v13  ;;  %v4585_v21 = vadd.f32 %v4584_v30, %v4583_v7 }
 0x34c   :  { %v5742_v33 = vpack.c.b16 %v5700_v1, %v5693_v15  ;;  %v8317_v47 = vsel %vm2133_vm11, 1.0, %v12759_v54  ;;  %v4537_v37 = vadd.f32 %v4536_v59, %v4535_v60  ;;  %v4668_v46 = vrot.slane %v4667_v48, 2 }
 0x34d   :  { %v4588_v53 = vrot.slane %v8317_v47, 4  ;;  %vm2125_vm14 = vcmp.eq.s32.totalorder %v1701_v0, %v9291_v25  ;;  %v11731_v34 = vadd.f32 %v4580_v11, %v4579_v58  ;;  %v4627_v40 = vadd.f32 %v4626_v17, %v4625_v9 }
 0x34e   :  { %v4621_v29 = vadd.f32 %v4620_v51, %v4619_v38  ;;  %8748 = vmatmul.mubr.bf16.gmra.mxu0 %v5742_v33  ;;  %v8309_v41 = vsel %vm2125_vm14, 1.0, %v12759_v54  ;;  %v4575_v14 = vadd.f32 %v4574_v26, %v4573_v50  ;;  %v4675_v35 = vadd.f32 %v4674_v6, %v4673_v12  ;;  %v1869_v12 = vpop.permute.xlu1 %1868 }
 0x34f   :  { %v4589_v16 = vadd.f32 %v8317_v47, %v4588_v53  ;;  %v4540_v55 = vrot.slane %v8309_v41, 4  ;;  %v4586_v31 = vrot.slane %v4585_v21, 1  ;;  %vm2148_vm1 = vcmp.eq.s32.totalorder %v1862_v43, %v9291_v25 }
 0x350   :  { %v5976_v61 = vpack.c.bf16 %v5894_v8, %v5891_v63  ;;  %vm2140_vm2 = vcmp.eq.s32.totalorder %v1806_v18, %v9291_v25  ;;  %v4538_v27 = vrot.slane %v4537_v37, 1  ;;  %v4669_v58 = vadd.f32 %v4668_v46, %v4667_v48  ;;  %v1813_v48 = vpop.permute.xlu0 %1812 }
 0x351   :  { %v4590_v7 = vrot.slane %v4589_v16, 2  ;;  %v4541_v32 = vadd.f32 %v8309_v41, %v4540_v55  ;;  %v4628_v0 = vrot.slane %v4627_v40, 1  ;;  %v4622_v5 = vrot.slane %v4621_v29, 1 }
 0x352   :  { %v8332_v60 = vsel %vm2148_vm1, 1.0, %v12759_v54  ;;  %v8324_v28 = vsel %vm2140_vm2, 1.0, %v12759_v54  ;;  %6187 = vmatmul.mubr.bf16.gmra.mxu1 %v5976_v61  ;;  %v5466_v62 = vunpack.c.l.b16 %v4938_v52  ;;  %v4947_v36 = vpack.c.bf16 %v11731_v34, %v11731_v34  ;;  %v1771_v46 = vpop.permute.xlu1 %1770 }
 0x353   :  { %v4676_v9 = vrot.slane %v4675_v35, 1  ;;  %v4542_v63 = vrot.slane %v4541_v32, 2  ;;  %6196 = vmatprep.mubr.bf16.mxu1 %v9058_v56  ;;  %v4946_v38 = vpack.c.bf16 %v4575_v14, %v4575_v14  ;;  %v4587_v23 = vadd.f32 %v4586_v31, %v4585_v21 }
 0x354   :  { %v4678_v13 = vrot.slane %v8332_v60, 4  ;;  %v4630_v50 = vrot.slane %v8324_v28, 4  ;;  %v4670_v49 = vrot.slane %v4669_v58, 1  ;;  %v4591_v11 = vadd.f32 %v4590_v7, %v4589_v16  ;;  %v11751_v7 = vpop.f32.mrf.mxu1 }
 0x355   :  { %v4543_v30 = vadd.f32 %v4542_v63, %v4541_v32  ;;  %vm2134_vm3 = vcmp.eq.s32.totalorder %v1764_v24, %v9291_v25  ;;  %v4539_v44 = vadd.f32 %v4538_v27, %v4537_v37  ;;  %v4629_v57 = vadd.f32 %v4628_v0, %v4627_v40  ;;  %v1715_v24 = vpop.permute.xlu0 %1714 }
 0x356   :  { %v4623_v43 = vadd.f32 %v4622_v5, %v4621_v29  ;;  %v8318_v59 = vsel %vm2134_vm3, 1.0, %v12759_v54  ;;  %v4677_v15 = vadd.f32 %v4676_v9, %v4675_v35  ;;  %v4679_v45 = vadd.f32 %v8332_v60, %v4678_v13 }
 0x357   :  { %v4594_v17 = vrot.slane %v8318_v59, 4  ;;  %vm2126_vm4 = vcmp.eq.s32.totalorder %v1708_v39, %v9291_v25  ;;  %v4948_v51 = vpack.c.bf16 %v4587_v23, %v4587_v23  ;;  %v5977_v4 = vpack.c.bf16 %v11722_v42, %v11705_v20 }
 0x358   :  { %v4631_v18 = vadd.f32 %v8324_v28, %v4630_v50  ;;  %v8310_v26 = vsel %vm2126_vm4, 1.0, %v12759_v54  ;;  %v4671_v6 = vadd.f32 %v4670_v49, %v4669_v58  ;;  %v4592_v1 = vrot.slane %v4591_v11, 1  ;;  %v1876_v28 = vpop.permute.xlu1 %1875 }
 0x359   :  { %v4544_v52 = vrot.slane %v4543_v30, 1  ;;  %v4546_v21 = vrot.slane %v8310_v26, 4  ;;  %v4940_v33 = vpack.c.bf16 %v4539_v44, %v4539_v44  ;;  %v4955_v47 = vpack.c.bf16 %v4629_v57, %v4629_v57  ;;  %v11762_v57 = vpop.f32.mrf.mxu1 }
 0x35a   :  { %v4595_v37 = vadd.f32 %v8318_v59, %v4594_v17  ;;  %6197 = vmatmul.mubr.bf16.gmra.mxu1 %v5977_v4  ;;  %v5701_v53 = vsel %vm5498_vm10, %v11726_v22, %v5466_v62  ;;  %v4954_v8 = vpack.c.bf16 %v4623_v43, %v4623_v43  ;;  %v4963_v34 = vpack.c.bf16 %v4677_v15, %v4677_v15  ;;  %v11771_v4 = vld [vmem:[%s12731_s3] sm:$0x3] }
 0x35b   :  { %v4680_v40 = vrot.slane %v4679_v45, 2  ;;  %6206 = vmatprep.mubr.bf16.mxu1 %v9058_v56  ;;  %v5475_v20 = vunpack.c.l.b16 %v4947_v36  ;;  %v5474_v42 = vunpack.c.l.b16 %v4946_v38  ;;  %v4632_v29 = vrot.slane %v4631_v18, 2 }
 0x35c   :  { %v4547_v41 = vadd.f32 %v8310_v26, %v4546_v21  ;;  %v5476_v14 = vunpack.c.l.b16 %v4948_v51  ;;  %v4962_v35 = vpack.c.bf16 %v4671_v6, %v4671_v6  ;;  %v4593_v16 = vadd.f32 %v4592_v1, %v4591_v11  ;;  %v1778_v1 = vpop.permute.xlu1 %1777 }
 0x35d   :  { %v4545_v55 = vadd.f32 %v4544_v52, %v4543_v30  ;;  %v5468_v31 = vunpack.c.l.b16 %v4940_v33  ;;  %v5483_v61 = vunpack.c.l.b16 %v4955_v47  ;;  %v4596_v39 = vrot.slane %v4595_v37, 2  ;;  %v11779_v33 = vpop.f32.mrf.mxu1 }
 0x35e   :  { %vm2149_vm5 = vcmp.eq.s32.totalorder %v1869_v12, %v9291_v25  ;;  %v5482_v22 = vunpack.c.l.b16 %v4954_v8  ;;  %v5491_v27 = vunpack.c.l.b16 %v4963_v34  ;;  %v4681_v58 = vadd.f32 %v4680_v40, %v4679_v45  ;;  %v1820_v12 = vpop.permute.xlu0 %1819 }
 0x35f   :  { %v8333_v32 = vsel %vm2149_vm5, 1.0, %v12759_v54  ;;  %v4633_v0 = vadd.f32 %v4632_v29, %v4631_v18  ;;  %v4548_v5 = vrot.slane %v4547_v41, 2  ;;  %vm2141_vm7 = vcmp.eq.s32.totalorder %v1813_v48, %v9291_v25 }
 0x360   :  { %v4684_v60 = vrot.slane %v8333_v32, 4  ;;  %v5490_v62 = vunpack.c.l.b16 %v4962_v35  ;;  %v4949_v36 = vpack.c.bf16 %v4593_v16, %v4593_v16  ;;  %v4941_v9 = vpack.c.bf16 %v4545_v55, %v4545_v55  ;;  %v6134_v16 = vpop.f32.mrf.mxu1 }
 0x361   :  { %v8325_v63 = vsel %vm2141_vm7, 1.0, %v12759_v54  ;;  %v5708_v38 = vsel %vm5498_vm10, %v5475_v20, %v5474_v42  ;;  %v4597_v23 = vadd.f32 %v4596_v39, %v4595_v37  ;;  %v5702_v11 = vsel %vm5500_vm6, %v5468_v31, %v5701_v53 }
 0x362   :  { %v4685_v13 = vadd.f32 %v8333_v32, %v4684_v60  ;;  %v4636_v50 = vrot.slane %v8325_v63, 4  ;;  %v5709_v49 = vsel %vm5500_vm6, %v5476_v14, %v5708_v38  ;;  %v11760_v30 = vsel %vm5498_vm10, %v5483_v61, %v5482_v22  ;;  %v1722_v40 = vpop.permute.xlu0 %1721  ;;  %v1883_v32 = vpop.permute.xlu1 %1882 }
 0x363   :  { %v4682_v44 = vrot.slane %v4681_v58, 1  ;;  %v4634_v43 = vrot.slane %v4633_v0, 1  ;;  %v4549_v59 = vadd.f32 %v4548_v5, %v4547_v41  ;;  %v11765_v45 = vsel %vm5498_vm10, %v5491_v27, %v5490_v62 }
 0x364   :  { %v4686_v48 = vrot.slane %v4685_v13, 2  ;;  %v4637_v15 = vadd.f32 %v8325_v63, %v4636_v50  ;;  %v5477_v17 = vunpack.c.l.b16 %v4949_v36  ;;  %v5469_v51 = vunpack.c.l.b16 %v4941_v9 }
 0x365   :  { %vm2135_vm9 = vcmp.eq.s32.totalorder %v1771_v46, %v9291_v25  ;;  %v4598_v18 = vrot.slane %v4597_v23, 1  ;;  %vm2127_vm11 = vcmp.eq.s32.totalorder %v1715_v24, %v9291_v25  ;;  %v4683_v52 = vadd.f32 %v4682_v44, %v4681_v58 }
 0x366   :  { %v4687_v26 = vadd.f32 %v4686_v48, %v4685_v13  ;;  %v8319_v6 = vsel %vm2135_vm9, 1.0, %v12759_v54  ;;  %v11777_v21 = vrot.slane %v11771_v4, %v9120_v3  ;;  %v8311_v37 = vsel %vm2127_vm11, 1.0, %v12759_v54  ;;  %v1827_v63 = vpop.permute.xlu0 %1826 }
 0x367   :  { %v4600_v47 = vrot.slane %v8319_v6, 4  ;;  %v11782_v46 = vadd.f32 %v4634_v43, %v4633_v0  ;;  %v4550_v53 = vrot.slane %v4549_v59, 1  ;;  %v4638_v8 = vrot.slane %v4637_v15, 2 }
 0x368   :  { %v4552_v34 = vrot.slane %v8311_v37, 4  ;;  %v4688_v20 = vrot.slane %v4687_v26, 1  ;;  %vm2150_vm10 = vcmp.eq.s32.totalorder %v1876_v28, %v9291_v25  ;;  %vm2142_vm14 = vcmp.eq.s32.totalorder %v1820_v12, %v9291_v25 }
 0x369   :  { %v4601_v42 = vadd.f32 %v8319_v6, %v4600_v47  ;;  %v11787_v29 = vsel %vm5502_vm8, %v5477_v17, %v5709_v49  ;;  %v11790_v41 = vsel %vm5502_vm8, %v5469_v51, %v5702_v11  ;;  %v4599_v24 = vadd.f32 %v4598_v18, %v4597_v23 }
 0x36a   :  { %v4553_v14 = vadd.f32 %v8311_v37, %v4552_v34  ;;  %v4964_v35 = vpack.c.bf16 %v4683_v52, %v4683_v52  ;;  %v8334_v31 = vsel %vm2150_vm10, 1.0, %v12759_v54  ;;  %v8326_v61 = vsel %vm2142_vm14, 1.0, %v12759_v54 }
 0x36b   :  { %v4602_v55 = vrot.slane %v4601_v42, 2  ;;  %v4956_v39 = vpack.c.bf16 %v11782_v46, %v11782_v46  ;;  %v4551_v22 = vadd.f32 %v4550_v53, %v4549_v59  ;;  %v4639_v27 = vadd.f32 %v4638_v8, %v4637_v15  ;;  %v1729_v8 = vpop.permute.xlu0 %1728 }
 0x36c   :  { %v4554_v58 = vrot.slane %v4553_v14, 2  ;;  %v4689_v0 = vadd.f32 %v4688_v20, %v4687_v26  ;;  %v4690_v60 = vrot.slane %v8334_v31, 4  ;;  %v4642_v28 = vrot.slane %v8326_v61, 4  ;;  %v1785_v26 = vpop.permute.xlu1 %1784 }
 0x36d   :  { %v4603_v5 = vadd.f32 %v4602_v55, %v4601_v42  ;;  %v4950_v62 = vpack.c.bf16 %v4599_v24, %v4599_v24  ;;  %v11797_v36 = vadd.f32 %v6134_v16, %v11777_v21  ;;  %vm2136_vm1 = vcmp.eq.s32.totalorder %v1778_v1, %v9291_v25 }
 0x36e   :  { %v4555_v9 = vadd.f32 %v4554_v58, %v4553_v14  ;;  %v4691_v23 = vadd.f32 %v8334_v31, %v4690_v60  ;;  %v4643_v13 = vadd.f32 %v8326_v61, %v4642_v28  ;;  %v8320_v50 = vsel %vm2136_vm1, 1.0, %v12759_v54 }
 0x36f   :  { %v4604_v38 = vrot.slane %v4603_v5, 1  ;;  %v4942_v12 = vpack.c.bf16 %v4551_v22, %v4551_v22  ;;  %v4640_v49 = vrot.slane %v4639_v27, 1  ;;  %v4606_v44 = vrot.slane %v8320_v50, 4 }
 0x370   :  { %v4556_v11 = vrot.slane %v4555_v9, 1  ;;  %v4965_v43 = vpack.c.bf16 %v4689_v0, %v4689_v0  ;;  %v4692_v48 = vrot.slane %v4691_v23, 2  ;;  %vm2128_vm2 = vcmp.eq.s32.totalorder %v1722_v40, %v9291_v25 }
 0x371   :  { %v4605_v59 = vadd.f32 %v4604_v38, %v4603_v5  ;;  %v11802_v15 = vunpack.c.l.b16 %v4964_v35  ;;  %v4644_v17 = vrot.slane %v4643_v13, 2  ;;  %v4607_v51 = vadd.f32 %v8320_v50, %v4606_v44 }
 0x372   :  { %v8312_v18 = vsel %vm2128_vm2, 1.0, %v12759_v54  ;;  %v11805_v6 = vunpack.c.l.b16 %v4950_v62  ;;  %v4557_v1 = vadd.f32 %v4556_v11, %v4555_v9  ;;  %v4693_v52 = vadd.f32 %v4692_v48, %v4691_v23  ;;  %v11823_v62 = vpop.f32.mrf.mxu1 }
 0x373   :  { %v4558_v47 = vrot.slane %v8312_v18, 4  ;;  %v11807_v37 = vunpack.c.l.b16 %v4942_v12  ;;  %v4608_v53 = vrot.slane %v4607_v51, 2  ;;  %vm2151_vm3 = vcmp.eq.s32.totalorder %v1883_v32, %v9291_v25 }
 0x374   :  { %vm2143_vm4 = vcmp.eq.s32.totalorder %v1827_v63, %v9291_v25  ;;  %v11811_v34 = vunpack.c.l.b16 %v4965_v43  ;;  %v11813_v40 = vadd.f32 %v4640_v49, %v4639_v27  ;;  %v4951_v20 = vpack.c.bf16 %v4605_v59, %v4605_v59  ;;  %v1890_v27 = vpop.permute.xlu1 %1889 }
 0x375   :  { %v4559_v42 = vadd.f32 %v8312_v18, %v4558_v47  ;;  %v4645_v24 = vadd.f32 %v4644_v17, %v4643_v13  ;;  %v4609_v14 = vadd.f32 %v4608_v53, %v4607_v51  ;;  %v8335_v35 = vsel %vm2151_vm3, 1.0, %v12759_v54  ;;  %v1834_v13 = vpop.permute.xlu0 %1833  ;;  %v11833_v18 = vpop.f32.mrf.mxu1 }
 0x376   :  { %v8327_v16 = vsel %vm2143_vm4, 1.0, %v12759_v54  ;;  %v4943_v55 = vpack.c.bf16 %v4557_v1, %v4557_v1  ;;  %v4694_v31 = vrot.slane %v4693_v52, 1  ;;  %v4696_v22 = vrot.slane %v8335_v35, 4 }
 0x377   :  { %v4560_v61 = vrot.slane %v4559_v42, 2  ;;  %v4610_v58 = vrot.slane %v4609_v14, 1  ;;  %v4648_v32 = vrot.slane %v8327_v16, 4  ;;  %vm2137_vm5 = vcmp.eq.s32.totalorder %v1785_v26, %v9291_v25 }
 0x378   :  { %vm2129_vm7 = vcmp.eq.s32.totalorder %v1729_v8, %v9291_v25  ;;  %v4957_v0 = vpack.c.bf16 %v11813_v40, %v11813_v40  ;;  %v11821_v5 = vunpack.c.l.b16 %v4951_v20  ;;  %v4697_v28 = vadd.f32 %v8335_v35, %v4696_v22  ;;  %v1897_v8 = vpop.permute.xlu1 %1896 }
 0x379   :  { %v4561_v60 = vadd.f32 %v4560_v61, %v4559_v42  ;;  %v4646_v9 = vrot.slane %v4645_v24, 1  ;;  %v4649_v63 = vadd.f32 %v8327_v16, %v4648_v32  ;;  %v8321_v38 = vsel %vm2137_vm5, 1.0, %v12759_v54  ;;  %v1841_v61 = vpop.permute.xlu0 %1840  ;;  %v11842_v32 = vpop.f32.mrf.mxu0 }
 0x37a   :  { %v8313_v23 = vsel %vm2129_vm7, 1.0, %v12759_v54  ;;  %v11827_v50 = vunpack.c.l.b16 %v4943_v55  ;;  %v4611_v12 = vadd.f32 %v4610_v58, %v4609_v14  ;;  %v4698_v11 = vrot.slane %v4697_v28, 2 }
 0x37b   :  { %v4562_v49 = vrot.slane %v4561_v60, 1  ;;  %v11829_v44 = vadd.f32 %v4694_v31, %v4693_v52  ;;  %v4650_v43 = vrot.slane %v4649_v63, 2  ;;  %v4612_v59 = vrot.slane %v8321_v38, 4 }
 0x37c   :  { %v4564_v48 = vrot.slane %v8313_v23, 4  ;;  %v4699_v51 = vadd.f32 %v4698_v11, %v4697_v28  ;;  %vm2152_vm9 = vcmp.eq.s32.totalorder %v1890_v27, %v9291_v25  ;;  %vm2144_vm11 = vcmp.eq.s32.totalorder %v1834_v13, %v9291_v25  ;;  %v11844_v27 = vpop.f32.mrf.mxu1 }
 0x37d   :  { %v4563_v17 = vadd.f32 %v4562_v49, %v4561_v60  ;;  %v11835_v26 = vadd.f32 %v4646_v9, %v4645_v24  ;;  %v4651_v1 = vadd.f32 %v4650_v43, %v4649_v63  ;;  %v4613_v47 = vadd.f32 %v8321_v38, %v4612_v59 }
 0x37e   :  { %v4565_v53 = vadd.f32 %v8313_v23, %v4564_v48  ;;  %v4952_v20 = vpack.c.bf16 %v4611_v12, %v4611_v12  ;;  %v4700_v52 = vrot.slane %v4699_v51, 1  ;;  %v8336_v42 = vsel %vm2152_vm9, 1.0, %v12759_v54 }
 0x37f   :  { %v8328_v14 = vsel %vm2144_vm11, 1.0, %v12759_v54  ;;  %v4944_v35 = vpack.c.bf16 %v4563_v17, %v4563_v17  ;;  %v4614_v16 = vrot.slane %v4613_v47, 2  ;;  %v4702_v31 = vrot.slane %v8336_v42, 4 }
 0x380   :  { %v4566_v55 = vrot.slane %v4565_v53, 2  ;;  %v4966_v22 = vpack.c.bf16 %v11829_v44, %v11829_v44  ;;  %v4652_v24 = vrot.slane %v4651_v1, 1  ;;  %v4654_v58 = vrot.slane %v8328_v14, 4 }
 0x381   :  { %vm2153_vm10 = vcmp.eq.s32.totalorder %v1897_v8, %v9291_v25  ;;  %v4701_v60 = vadd.f32 %v4700_v52, %v4699_v51  ;;  %v4615_v28 = vadd.f32 %v4614_v16, %v4613_v47  ;;  %v4703_v63 = vadd.f32 %v8336_v42, %v4702_v31  ;;  %v5907_v8 = vpop.f32.mrf.mxu0  ;;  %v11849_v51 = vpop.f32.mrf.mxu1 }
 0x382   :  { %v4567_v9 = vadd.f32 %v4566_v55, %v4565_v53  ;;  %v5480_v38 = vunpack.c.l.b16 %v4952_v20  ;;  %v4655_v23 = vadd.f32 %v8328_v14, %v4654_v58  ;;  %v8337_v13 = vsel %vm2153_vm10, 1.0, %v12759_v54 }
 0x383   :  { %vm2145_vm14 = vcmp.eq.s32.totalorder %v1841_v61, %v9291_v25  ;;  %v5472_v12 = vunpack.c.l.b16 %v4944_v35  ;;  %v4616_v49 = vrot.slane %v4615_v28, 1  ;;  %v4704_v44 = vrot.slane %v4703_v63, 2  ;;  %v11856_v31 = vpop.f32.mrf.mxu1 }
 0x384   :  { %v4568_v11 = vrot.slane %v4567_v9, 1  ;;  %v4653_v43 = vadd.f32 %v4652_v24, %v4651_v1  ;;  %v4656_v59 = vrot.slane %v4655_v23, 2  ;;  %v4708_v48 = vrot.slane %v8337_v13, 4 }
 0x385   :  { %v8329_v17 = vsel %vm2145_vm14, 1.0, %v12759_v54  ;;  %v4967_v47 = vpack.c.bf16 %v4701_v60, %v4701_v60  ;;  %v4617_v53 = vadd.f32 %v4616_v49, %v4615_v28  ;;  %v4705_v52 = vadd.f32 %v4704_v44, %v4703_v63  ;;  %v11859_v28 = vpop.f32.mrf.mxu0 }
 0x386   :  { %v4569_v20 = vadd.f32 %v4568_v11, %v4567_v9  ;;  %v4657_v42 = vadd.f32 %v4656_v59, %v4655_v23  ;;  %v4709_v14 = vadd.f32 %v8337_v13, %v4708_v48  ;;  %v4660_v16 = vrot.slane %v8329_v17, 4  ;;  %v11870_v48 = vpop.f32.mrf.mxu1 }
 0x387   :  { %v5704_v25 = vsel %vm5504_vm12, %v11807_v37, %v11790_v41  ;;  %v4953_v35 = vpack.c.bf16 %v4617_v53, %v4617_v53  ;;  %v4706_v55 = vrot.slane %v4705_v52, 1  ;;  %v5711_v41 = vsel %vm5504_vm12, %v11805_v6, %v11787_v29  ;;  %v5910_v6 = vpop.f32.mrf.mxu0 }
 0x388   :  { %v4945_v1 = vpack.c.bf16 %v4569_v20, %v4569_v20  ;;  %v5705_v54 = vsel %vm5506_vm13, %v11827_v50, %v5704_v25  ;;  %v4658_v61 = vrot.slane %v4657_v42, 1  ;;  %v4710_v24 = vrot.slane %v4709_v14, 2  ;;  %v11882_v46 = vpop.f32.mrf.mxu1 }
 0x389   :  { %v4661_v58 = vadd.f32 %v8329_v17, %v4660_v16  ;;  %v5706_v60 = vsel %vm5508_vm15, %v5472_v12, %v5705_v54  ;;  %v5481_v9 = vunpack.c.l.b16 %v4953_v35  ;;  %v4707_v23 = vadd.f32 %v4706_v55, %v4705_v52 }
 0x38a   :  { %v5473_v63 = vunpack.c.l.b16 %v4945_v1  ;;  %v4659_v37 = vadd.f32 %v4658_v61, %v4657_v42  ;;  %v4711_v13 = vadd.f32 %v4710_v24, %v4709_v14  ;;  %v5712_v50 = vsel %vm5506_vm13, %v11821_v5, %v5711_v41 }
 0x38b   :  { %v4662_v49 = vrot.slane %v4661_v58, 2  ;;  %v4958_v11 = vpack.c.bf16 %v11835_v26, %v11835_v26  ;;  %v4968_v44 = vpack.c.bf16 %v4707_v23, %v4707_v23  ;;  %v5713_v59 = vsel %vm5508_vm15, %v5480_v38, %v5712_v50 }
 0x38c   :  { %v5707_v12 = vsel %vm5510_vm0, %v5473_v63, %v5706_v60  ;;  %v4959_v17 = vpack.c.bf16 %v4653_v43, %v4653_v43  ;;  %v4712_v53 = vrot.slane %v4711_v13, 1  ;;  %v5714_v29 = vsel %vm5510_vm0, %v5481_v9, %v5713_v59 }
 0x38d   :  { %v4663_v20 = vadd.f32 %v4662_v49, %v4661_v58  ;;  %v5484_v5 = vunpack.c.l.b16 %v4956_v39  ;;  %v5494_v52 = vunpack.c.l.b16 %v4966_v22  ;;  %v4960_v42 = vpack.c.bf16 %v4659_v37, %v4659_v37 }
 0x38e   :  { %v5743_v26 = vpack.c.b16 %v5714_v29, %v5707_v12  ;;  %v5485_v14 = vunpack.c.l.b16 %v4957_v0  ;;  %v5495_v38 = vunpack.c.l.b16 %v4967_v47  ;;  %v4713_v16 = vadd.f32 %v4712_v53, %v4711_v13 }
 0x38f   :  { %v4664_v25 = vrot.slane %v4663_v20, 1  ;;  %v5723_v43 = vsel %vm5500_vm6, %v11802_v15, %v11765_v45  ;;  %v5486_v35 = vunpack.c.l.b16 %v4958_v11  ;;  %v5496_v1 = vunpack.c.l.b16 %v4968_v44 }
 0x390   :  { %8751 = vmatprep.mubr.bf16.mxu0 %v5743_v26  ;;  %v5978_v55 = vpack.c.bf16 %v5910_v6, %v5907_v8  ;;  %v5724_v39 = vsel %vm5502_vm8, %v11811_v34, %v5723_v43  ;;  %v5487_v22 = vunpack.c.l.b16 %v4959_v17  ;;  %v4969_v54 = vpack.c.bf16 %v4713_v16, %v4713_v16  ;;  %v8879_v26 = vld [vmem:[#allocation7 + $0xe8] ss:$16 sps:$4 sm:$0xff]  }
 0x391   :  { %v4665_v40 = vadd.f32 %v4664_v25, %v4663_v20  ;;  %v5716_v0 = vsel %vm5500_vm6, %v5484_v5, %v11760_v30  ;;  %v6131_v47 = vadd.f32 %v11762_v57, %v11777_v21  ;;  %v5488_v61 = vunpack.c.l.b16 %v4960_v42  ;;  %v6154_v30 = vpop.f32.mrf.mxu1  ;;  %v8884_v25 = vld [vmem:[#allocation7 + $0xcc] ss:$16 sps:$4 sm:$0xff]  }
 0x392   :  { %v5725_v45 = vsel %vm5504_vm12, %v5494_v52, %v5724_v39  ;;  %6207 = vmatmul.mubr.bf16.gmra.mxu1 %v5978_v55  ;;  %v5717_v15 = vsel %vm5502_vm8, %v5485_v14, %v5716_v0  ;;  %v5497_v8 = vunpack.c.l.b16 %v4969_v54  ;;  %v6290_v9 = vmax.f32 %v11797_v36, 0.0  ;;  %v8881_v14 = vld [vmem:[#allocation7 + $0xec] ss:$16 sps:$4 sm:$0xff]  }
 0x393   :  { %v4961_v24 = vpack.c.bf16 %v4665_v40, %v4665_v40  ;;  %v5726_v58 = vsel %vm5506_vm13, %v5495_v38, %v5725_v45  ;;  %6216 = vmatprep.mubr.bf16.mxu1 %v9058_v56  ;;  %v5718_v34 = vsel %vm5504_vm12, %v5486_v35, %v5717_v15  ;;  %v11901_v41 = vrot.slane %v11771_v4, %v9118_v2  ;;  %v11909_v44 = vpop.f32.mrf.mxu1  ;;  %v8882_v35 = vld [vmem:[#allocation7 + $0xc8] ss:$16 sps:$4 sm:$0xff]   ;;  %v8887_v39 = vld [vmem:[#allocation7 + $0xac] ss:$16 sps:$4 sm:$0xff]  }
 0x394   :  { %v5727_v60 = vsel %vm5508_vm15, %v5496_v1, %v5726_v58  ;;  %v5719_v63 = vsel %vm5506_vm13, %v5487_v22, %v5718_v34  ;;  %v6288_v13 = vmax.f32 %v6131_v47, 0.0  ;;  %v5979_v36 = vpack.c.bf16 %v11859_v28, %v11842_v32  ;;  %8755 = vmatprep.subr.bf16.mxu1 %v8881_v14  ;;  %6982 = vmatprep.subr.bf16.mxu0 %v8881_v14  ;;  %v8885_v40 = vld [vmem:[#allocation7 + $0xa8] ss:$16 sps:$4 sm:$0xff]   ;;  %v8890_v47 = vld [vmem:[#allocation7 + $0x8c] ss:$16 sps:$4 sm:$0xff]  }
 0x395   :  { %v5489_v57 = vunpack.c.l.b16 %v4961_v24  ;;  %v5728_v23 = vsel %vm5510_vm0, %v5497_v8, %v5727_v60  ;;  %v5720_v37 = vsel %vm5508_vm15, %v5488_v61, %v5719_v63  ;;  %v6133_v50 = vadd.f32 %v11779_v33, %v11901_v41  ;;  %v6160_v32 = vpop.f32.mrf.mxu1  ;;  %8771 = vmatpush1.bf16.msra.mxu1 %v8879_v26  ;;  %v8888_v15 = vld [vmem:[#allocation7 + $0x88] ss:$16 sps:$4 sm:$0xff]  }
 0x396   :  { %v6145_v12 = vadd.f32 %v11849_v51, %v11777_v21  ;;  %v11913_v59 = vpack.c.bf16 %v6290_v9, %v6288_v13  ;;  %v6129_v4 = vadd.f32 %v11751_v7, %v11901_v41  ;;  %v6141_v17 = vadd.f32 %v11833_v18, %v11777_v21  ;;  %8756 = vmatprep.subr.bf16.mxu1 %v8884_v25  ;;  %v8891_v60 = vld [vmem:[#allocation7 + $0x68] ss:$16 sps:$4 sm:$0xff]  }
 0x397   :  { %v5721_v49 = vsel %vm5510_vm0, %v5489_v57, %v5720_v37  ;;  %v6289_v33 = vmax.f32 %v6133_v50, 0.0  ;;  %v6155_v51 = vadd.f32 %v6154_v30, %v11777_v21  ;;  %v6143_v7 = vadd.f32 %v11844_v27, %v11901_v41  ;;  %v6162_v6 = vpop.f32.mrf.mxu1  ;;  %v8896_v30 = vld [vmem:[#allocation7 + $0x4c] ss:$16 sps:$4 sm:$0xff]  }
 0x398   :  { %v5744_v11 = vpack.c.b16 %v5728_v23, %v5721_v49  ;;  %v6294_v28 = vmax.f32 %v6145_v12, 0.0  ;;  %v6287_v53 = vmax.f32 %v6129_v4, 0.0  ;;  %v6292_v20 = vmax.f32 %v6141_v17, 0.0  ;;  %v8894_v23 = vld [vmem:[#allocation7 + $0x48] ss:$16 sps:$4 sm:$0xff]  }
 0x399   :  { %v6151_v18 = vadd.f32 %v11870_v48, %v11777_v21  ;;  %v6139_v52 = vadd.f32 %v11823_v62, %v11901_v41  ;;  %v6298_v42 = vmax.f32 %v6155_v51, 0.0  ;;  %v6293_v38 = vmax.f32 %v6143_v7, 0.0  ;;  %v6164_v16 = vpop.f32.mrf.mxu1  ;;  %8772 = vmatpush1.bf16.msra.mxu1 %v8882_v35  ;;  %v8899_v37 = vld [vmem:[#allocation7 + $0x2c] ss:$16 sps:$4 sm:$0xff]  }
 0x39a   :  { %8752 = vmatmul.mubr.bf16.gmra.mxu0 %v5744_v11  ;;  %6217 = vmatmul.mubr.bf16.gmra.mxu1 %v5979_v36  ;;  %v11922_v29 = vpack.c.bf16 %v6289_v33, %v6287_v53  ;;  %v11926_v5 = vpack.c.bf16 %v6294_v28, %v6292_v20  ;;  %v6165_v62 = vadd.f32 %v6164_v16, %v11777_v21  ;;  %v8897_v11 = vld [vmem:[#allocation7 + $0x28] ss:$16 sps:$4 sm:$0xff]   ;;  %v8902_v36 = vld [vmem:[#allocation7 + $0xc] ss:$16 sps:$4 sm:$0xff]  }
 0x39b   :  { %6821 = vmatprep.mubr.bf16.mxu0 %v11913_v59  ;;  %6226 = vmatprep.mubr.bf16.mxu1 %v9058_v56  ;;  %v6296_v27 = vmax.f32 %v6151_v18, 0.0  ;;  %v6291_v43 = vmax.f32 %v6139_v52, 0.0  ;;  %v6153_v55 = vadd.f32 %v11882_v46, %v11901_v41  ;;  %v6161_v22 = vadd.f32 %v6160_v32, %v11777_v21  ;;  %v8900_v33 = vld [vmem:[#allocation7 + $0x8] ss:$16 sps:$4 sm:$0xff]   ;;  %v8905_v32 = vld [vmem:[#allocation7 + $0x1ec] ss:$16 sps:$4 sm:$0xff]  }
 0x39c   :  { %v6149_v54 = vadd.f32 %v11856_v31, %v11901_v41  ;;  %v6302_v0 = vmax.f32 %v6165_v62, 0.0  ;;  %8757 = vmatprep.subr.bf16.mxu1 %v8887_v39  ;;  %v8893_v31 = vld [vmem:[#allocation7 + $0x6c] ss:$16 sps:$4 sm:$0xff]   ;;  %v6163_v58 = vadd.f32 %v6162_v6, %v11901_v41  ;;  %v6159_v34 = vadd.f32 %v11909_v44, %v11901_v41  ;;  %v8903_v6 = vld [vmem:[#allocation7 + $0x1e8] ss:$16 sps:$4 sm:$0xff]  }
 0x39d   :  { %v11934_v48 = vpack.c.bf16 %v6298_v42, %v6296_v27  ;;  %v11937_v1 = vpack.c.bf16 %v6293_v38, %v6291_v43  ;;  %v6297_v61 = vmax.f32 %v6153_v55, 0.0  ;;  %v6300_v45 = vmax.f32 %v6161_v22, 0.0  ;;  %8773 = vmatpush1.bf16.msra.mxu1 %v8885_v40  ;;  %v8908_v52 = vld [vmem:[#allocation7 + $0x1cc] ss:$16 sps:$4 sm:$0xff]   ;;  %v8906_v43 = vld [vmem:[#allocation7 + $0x1c8] ss:$16 sps:$4 sm:$0xff]  }
 0x39e   :  { %v6295_v46 = vmax.f32 %v6149_v54, 0.0  ;;  %8758 = vmatprep.subr.bf16.mxu1 %v8890_v47  ;;  %v6301_v9 = vmax.f32 %v6163_v58, 0.0  ;;  %v6299_v57 = vmax.f32 %v6159_v34, 0.0  ;;  %v8909_v58 = vld [vmem:[#allocation7 + $0x1a8] ss:$16 sps:$4 sm:$0xff]  }
 0x39f   :  { %v11946_v8 = vpack.c.bf16 %v6302_v0, %v6300_v45  ;;  %v8911_v34 = vld [vmem:[#allocation7 + $0x1ac] ss:$16 sps:$4 sm:$0xff]  }
 0x3a0   :  { %v11948_v24 = vpack.c.bf16 %v6297_v61, %v6295_v46  ;;  %v11955_v13 = vpack.c.bf16 %v6301_v9, %v6299_v57  ;;  %v8915_v9 = vld [vmem:[#allocation7 + $0x168] ss:$16 sps:$4 sm:$0xff]   ;;  %v8917_v57 = vld [vmem:[#allocation7 + $0x16c] ss:$16 sps:$4 sm:$0xff]  }
 0x3a1   :  { %8774 = vmatpush1.bf16.msra.mxu1 %v8888_v15 }
 0x3a2   :  { %6822 = vmatmul.mubr.bf16.vlgmr.msra.gmra.mxu0 %v11922_v29  ;;  %8759 = vmatprep.subr.bf16.mxu1 %v8893_v31 }
 0x3a3   :  { %6831 = vmatprep.mubr.bf16.mxu0 %v11926_v5  ;;  %6983 = vmatpush1.bf16.msra.mxu0 %v8879_v26 }
 0x3a4   :  { %6984 = vmatprep.subr.bf16.mxu0 %v8884_v25 }
 0x3a5   :  { %8775 = vmatpush1.bf16.msra.mxu1 %v8891_v60 }
 0x3a6   :  { %8760 = vmatprep.subr.bf16.mxu1 %v8896_v30 }
 0x3a7   :  { %6985 = vmatpush1.bf16.msra.mxu0 %v8882_v35 }
 0x3a8   :  { %6986 = vmatprep.subr.bf16.mxu0 %v8887_v39 }
 0x3a9   :  { %8776 = vmatpush1.bf16.msra.mxu1 %v8894_v23 }
 0x3aa   :  { %6832 = vmatmul.mubr.bf16.gmra.mxu0 %v11937_v1  ;;  %8761 = vmatprep.subr.bf16.mxu1 %v8899_v37 }
 0x3ab   :  { %6841 = vmatprep.mubr.bf16.mxu0 %v11934_v48  ;;  %6987 = vmatpush1.bf16.msra.mxu0 %v8885_v40 }
 0x3ac   :  { %6988 = vmatprep.subr.bf16.mxu0 %v8890_v47 }
 0x3ad   :  { %8777 = vmatpush1.bf16.msra.mxu1 %v8897_v11 }
 0x3ae   :  { %8762 = vmatprep.subr.bf16.mxu1 %v8902_v36 }
 0x3af   :  { %6989 = vmatpush1.bf16.msra.mxu0 %v8888_v15 }
 0x3b0   :  { %6990 = vmatprep.subr.bf16.mxu0 %v8893_v31 }
 0x3b1   :  { %8778 = vmatpush1.bf16.msra.mxu1 %v8900_v33 }
 0x3b2   :  { %6842 = vmatmul.mubr.bf16.gmra.mxu0 %v11948_v24  ;;  %8763 = vmatprep.subr.bf16.mxu1 %v8905_v32 }
 0x3b3   :  { %6851 = vmatprep.mubr.bf16.mxu0 %v11946_v8  ;;  %6991 = vmatpush1.bf16.msra.mxu0 %v8891_v60  ;;  %v8912_v60 = vld [vmem:[#allocation7 + $0x188] ss:$16 sps:$4 sm:$0xff]  }
 0x3b4   :  { %6992 = vmatprep.subr.bf16.mxu0 %v8896_v30  ;;  %v8914_v30 = vld [vmem:[#allocation7 + $0x18c] ss:$16 sps:$4 sm:$0xff]  }
 0x3b5   :  { %8779 = vmatpush2.bf16.msra.mxu1 %v8903_v6 }
 0x3b6   :  { %v8745_v63 = vpop.f32.mrf.mxu0  ;;  %8764 = vmatprep.subr.bf16.mxu1 %v8908_v52 }
 0x3b7   :  { %6993 = vmatpush1.bf16.msra.mxu0 %v8894_v23  ;;  %v8920_v23 = vld [vmem:[#allocation7 + $0x14c] ss:$16 sps:$4 sm:$0xff]  }
 0x3b8   :  { %v5923_v49 = vpop.f32.mrf.mxu0  ;;  %6994 = vmatprep.subr.bf16.mxu0 %v8899_v37  ;;  %v8923_v37 = vld [vmem:[#allocation7 + $0x12c] ss:$16 sps:$4 sm:$0xff]  }
 0x3b9   :  { %8780 = vmatpush2.bf16.msra.mxu1 %v8906_v43 }
 0x3ba   :  { %6852 = vmatmul.mubr.bf16.gmra.mxu0 %v11955_v13  ;;  %v8746_v50 = vpop.f32.mrf.mxu0  ;;  %8765 = vmatprep.subr.bf16.mxu1 %v8911_v34 }
 0x3bb   :  { %6995 = vmatpush1.bf16.msra.mxu0 %v8897_v11  ;;  %v5981_v14 = vpack.c.bf16 %v8746_v50, %v8745_v63  ;;  %v8918_v63 = vld [vmem:[#allocation7 + $0x148] ss:$16 sps:$4 sm:$0xff]   ;;  %v8926_v11 = vld [vmem:[#allocation7 + $0x10c] ss:$16 sps:$4 sm:$0xff]  }
 0x3bc   :  { %v5926_v44 = vpop.f32.mrf.mxu0  ;;  %v6168_v12 = vpop.f32.mrf.mxu1  ;;  %6996 = vmatprep.subr.bf16.mxu0 %v8902_v36  ;;  %v8924_v50 = vld [vmem:[#allocation7 + $0x108] ss:$16 sps:$4 sm:$0xff]  }
 0x3bd   :  { %v5980_v4 = vpack.c.bf16 %v5926_v44, %v5923_v49  ;;  %v6169_v51 = vadd.f32 %v6168_v12, %v11901_v41  ;;  %8781 = vmatpush2.bf16.msra.mxu1 %v8909_v58  ;;  %v8921_v49 = vld [vmem:[#allocation7 + $0x128] ss:$16 sps:$4 sm:$0xff]  }
 0x3be   :  { %v6170_v17 = vpop.f32.mrf.mxu1  ;;  %8766 = vmatprep.subr.bf16.mxu1 %v8914_v30 }
 0x3bf   :  { %6227 = vmatmul.mubr.bf16.gmra.mxu1 %v5980_v4  ;;  %v6171_v53 = vadd.f32 %v6170_v17, %v11777_v21  ;;  %6997 = vmatpush1.bf16.msra.mxu0 %v8900_v33  ;;  %v6303_v25 = vmax.f32 %v6169_v51, 0.0 }
 0x3c0   :  { %v6172_v28 = vpop.f32.mrf.mxu1  ;;  %6236 = vmatprep.mubr.bf16.mxu1 %v9058_v56  ;;  %6998 = vmatprep.subr.bf16.mxu0 %v8905_v32 }
 0x3c1   :  { %v6173_v20 = vadd.f32 %v6172_v28, %v11901_v41  ;;  %v6304_v38 = vmax.f32 %v6171_v53, 0.0  ;;  %8782 = vmatpush2.bf16.msra.mxu1 %v8912_v60 }
 0x3c2   :  { %v6174_v7 = vpop.f32.mrf.mxu1  ;;  %8767 = vmatprep.subr.bf16.mxu1 %v8917_v57 }
 0x3c3   :  { %v6175_v18 = vadd.f32 %v6174_v7, %v11777_v21  ;;  %v6305_v42 = vmax.f32 %v6173_v20, 0.0  ;;  %6999 = vmatpush2.bf16.msra.mxu0 %v8903_v6 }
 0x3c4   :  { %v6178_v26 = vpop.f32.mrf.mxu1  ;;  %7000 = vmatprep.subr.bf16.mxu0 %v8908_v52 }
 0x3c5   :  { %v6306_v16 = vmax.f32 %v6175_v18, 0.0  ;;  %v11965_v62 = vpack.c.bf16 %v6305_v42, %v6303_v25  ;;  %v6179_v54 = vadd.f32 %v6178_v26, %v11901_v41  ;;  %8783 = vmatpush2.bf16.msra.mxu1 %v8915_v9 }
 0x3c6   :  { %v6180_v27 = vpop.f32.mrf.mxu1  ;;  %8768 = vmatprep.subr.bf16.mxu1 %v8920_v23 }
 0x3c7   :  { %6237 = vmatmul.mubr.bf16.gmra.mxu1 %v5981_v14  ;;  %v11963_v35 = vpack.c.bf16 %v6306_v16, %v6304_v38  ;;  %v6181_v39 = vadd.f32 %v6180_v27, %v11777_v21  ;;  %7001 = vmatpush2.bf16.msra.mxu0 %v8906_v43  ;;  %v6307_v46 = vmax.f32 %v6179_v54, 0.0 }
 0x3c8   :  { %v6182_v55 = vpop.f32.mrf.mxu1  ;;  %6246 = vmatprep.mubr.bf16.mxu1 %v9058_v56  ;;  %7002 = vmatprep.subr.bf16.mxu0 %v8911_v34 }
 0x3c9   :  { %v6183_v22 = vadd.f32 %v6182_v55, %v11901_v41  ;;  %6861 = vmatprep.mubr.bf16.mxu0 %v11963_v35  ;;  %v6308_v61 = vmax.f32 %v6181_v39, 0.0  ;;  %8784 = vmatpush2.bf16.msra.mxu1 %v8918_v63 }
 0x3ca   :  { %v6184_v40 = vpop.f32.mrf.mxu1  ;;  %6862 = vmatmul.mubr.bf16.gmra.mxu0 %v11965_v62  ;;  %8769 = vmatprep.subr.bf16.mxu1 %v8923_v37 }
 0x3cb   :  { %v6185_v0 = vadd.f32 %v6184_v40, %v11777_v21  ;;  %v6309_v47 = vmax.f32 %v6183_v22, 0.0  ;;  %7003 = vmatpush2.bf16.msra.mxu0 %v8909_v58 }
 0x3cc   :  { %7004 = vmatprep.subr.bf16.mxu0 %v8914_v30 }
 0x3cd   :  { %v6310_v45 = vmax.f32 %v6185_v0, 0.0  ;;  %v11976_v31 = vpack.c.bf16 %v6309_v47, %v6307_v46  ;;  %8785 = vmatpush2.bf16.msra.mxu1 %v8921_v49 }
 0x3ce   :  { %8770 = vmatprep.subr.bf16.mxu1 %v8926_v11 }
 0x3cf   :  { %v11974_v15 = vpack.c.bf16 %v6310_v45, %v6308_v61  ;;  %7005 = vmatpush2.bf16.msra.mxu0 %v8912_v60 }
 0x3d0   :  { %7006 = vmatprep.subr.bf16.mxu0 %v8917_v57 }
 0x3d1   :  { %6871 = vmatprep.mubr.bf16.mxu0 %v11974_v15  ;;  %8786 = vmatpush2.bf16.msra.mxu1 %v8924_v50 }
 0x3d2   :  { %6872 = vmatmul.mubr.bf16.gmra.mxu0 %v11976_v31 }
 0x3d3   :  { %7007 = vmatpush2.bf16.msra.mxu0 %v8915_v9 }
 0x3d4   :  { %7008 = vmatprep.subr.bf16.mxu0 %v8920_v23 }
 0x3d7   :  { %7009 = vmatpush2.bf16.msra.mxu0 %v8918_v63 }
 0x3d8   :  { %7010 = vmatprep.subr.bf16.mxu0 %v8923_v37 }
 0x3db   :  { %7011 = vmatpush2.bf16.msra.mxu0 %v8921_v49 }
 0x3dc   :  { %7012 = vmatprep.subr.bf16.mxu0 %v8926_v11 }
 0x3df   :  { %7013 = vmatpush2.bf16.msra.mxu0 %v8924_v50 }
 0x40e   :  { %v8749_v36 = vpop.f32.mrf.mxu0 }
 0x410   :  { %v5939_v44 = vpop.f32.mrf.mxu0 }
 0x412   :  { %v8750_v12 = vpop.f32.mrf.mxu0  ;;  %v6188_v4 = vpop.f32.mrf.mxu1 }
 0x413   :  { %v6189_v51 = vadd.f32 %v6188_v4, %v11901_v41  ;;  %v5983_v16 = vpack.c.bf16 %v8750_v12, %v8749_v36 }
 0x414   :  { %v5942_v17 = vpop.f32.mrf.mxu0  ;;  %v6190_v33 = vpop.f32.mrf.mxu1 }
 0x415   :  { %v5982_v32 = vpack.c.bf16 %v5942_v17, %v5939_v44  ;;  %v6191_v53 = vadd.f32 %v6190_v33, %v11777_v21  ;;  %v6311_v14 = vmax.f32 %v6189_v51, 0.0 }
 0x416   :  { %v6192_v28 = vpop.f32.mrf.mxu1 }
 0x417   :  { %6247 = vmatmul.mubr.bf16.gmra.mxu1 %v5982_v32  ;;  %v6193_v20 = vadd.f32 %v6192_v28, %v11901_v41  ;;  %v6312_v42 = vmax.f32 %v6191_v53, 0.0 }
 0x418   :  { %v6194_v7 = vpop.f32.mrf.mxu1  ;;  %6256 = vmatprep.mubr.bf16.mxu1 %v9058_v56 }
 0x419   :  { %v6195_v6 = vadd.f32 %v6194_v7, %v11777_v21  ;;  %v6313_v18 = vmax.f32 %v6193_v20, 0.0 }
 0x41a   :  { %v6198_v52 = vpop.f32.mrf.mxu1 }
 0x41b   :  { %v6314_v26 = vmax.f32 %v6195_v6, 0.0  ;;  %v11987_v27 = vpack.c.bf16 %v6313_v18, %v6311_v14  ;;  %v6199_v22 = vadd.f32 %v6198_v52, %v11901_v41 }
 0x41c   :  { %v6200_v38 = vpop.f32.mrf.mxu1 }
 0x41d   :  { %v11985_v25 = vpack.c.bf16 %v6314_v26, %v6312_v42  ;;  %v6201_v55 = vadd.f32 %v6200_v38, %v11777_v21  ;;  %v6315_v45 = vmax.f32 %v6199_v22, 0.0 }
 0x41e   :  { %v6202_v43 = vpop.f32.mrf.mxu1 }
 0x41f   :  { %6257 = vmatmul.mubr.bf16.gmra.mxu1 %v5983_v16  ;;  %v6203_v39 = vadd.f32 %v6202_v43, %v11901_v41  ;;  %6881 = vmatprep.mubr.bf16.mxu0 %v11985_v25  ;;  %v6316_v47 = vmax.f32 %v6201_v55, 0.0 }
 0x420   :  { %v6204_v54 = vpop.f32.mrf.mxu1  ;;  %6882 = vmatmul.mubr.bf16.gmra.mxu0 %v11987_v27  ;;  %6266 = vmatprep.mubr.bf16.mxu1 %v9058_v56 }
 0x421   :  { %v6205_v40 = vadd.f32 %v6204_v54, %v11777_v21  ;;  %v6317_v0 = vmax.f32 %v6203_v39, 0.0 }
 0x423   :  { %v6318_v61 = vmax.f32 %v6205_v40, 0.0  ;;  %v11996_v58 = vpack.c.bf16 %v6317_v0, %v6315_v45 }
 0x425   :  { %v6366_v46 = vpack.c.bf16 %v6318_v61, %v6316_v47 }
 0x427   :  { %6891 = vmatprep.mubr.bf16.mxu0 %v6366_v46 }
 0x428   :  { %6892 = vmatmul.mubr.bf16.gmra.mxu0 %v11996_v58 }
 0x452   :  { %v6208_v34 = vpop.f32.mrf.mxu1 }
 0x453   :  { %v6209_v63 = vadd.f32 %v6208_v34, %v11901_v41 }
 0x454   :  { %v6210_v60 = vpop.f32.mrf.mxu1 }
 0x455   :  { %v6211_v9 = vadd.f32 %v6210_v60, %v11777_v21  ;;  %v6319_v4 = vmax.f32 %v6209_v63, 0.0 }
 0x456   :  { %v6212_v30 = vpop.f32.mrf.mxu1 }
 0x457   :  { %v6213_v57 = vadd.f32 %v6212_v30, %v11901_v41  ;;  %v6320_v36 = vmax.f32 %v6211_v9, 0.0 }
 0x458   :  { %v6214_v23 = vpop.f32.mrf.mxu1 }
 0x459   :  { %v6215_v37 = vadd.f32 %v6214_v23, %v11777_v21  ;;  %v6321_v50 = vmax.f32 %v6213_v57, 0.0 }
 0x45a   :  { %v8753_v49 = vpop.f32.mrf.mxu0  ;;  %v6218_v11 = vpop.f32.mrf.mxu1 }
 0x45b   :  { %v6322_v44 = vmax.f32 %v6215_v37, 0.0  ;;  %v6367_v28 = vpack.c.bf16 %v6321_v50, %v6319_v4  ;;  %v6219_v6 = vadd.f32 %v6218_v11, %v11901_v41 }
 0x45c   :  { %v5955_v12 = vpop.f32.mrf.mxu0  ;;  %v6220_v17 = vpop.f32.mrf.mxu1 }
 0x45d   :  { %v6368_v33 = vpack.c.bf16 %v6322_v44, %v6320_v36  ;;  %v6221_v20 = vadd.f32 %v6220_v17, %v11777_v21  ;;  %v6323_v16 = vmax.f32 %v6219_v6, 0.0  ;;  %v8927_v44 = vld [vmem:[%s12734_s6 + $0x78] sm:$0xff]  }
 0x45e   :  { %v8754_v32 = vpop.f32.mrf.mxu0  ;;  %v6222_v53 = vpop.f32.mrf.mxu1  ;;  %8483 = vmatprep.subr.bf16.mxu0 %v8927_v44 }
 0x45f   :  { %v6223_v51 = vadd.f32 %v6222_v53, %v11901_v41  ;;  %6901 = vmatprep.mubr.bf16.mxu0 %v6368_v33  ;;  %v6324_v14 = vmax.f32 %v6221_v20, 0.0  ;;  %v5985_v39 = vpack.c.bf16 %v8754_v32, %v8753_v49 }
 0x460   :  { %v5958_v7 = vpop.f32.mrf.mxu0  ;;  %v6224_v18 = vpop.f32.mrf.mxu1  ;;  %6902 = vmatmul.mubr.bf16.gmra.mxu0 %v6367_v28 }
 0x461   :  { %v5984_v52 = vpack.c.bf16 %v5958_v7, %v5955_v12  ;;  %v6225_v42 = vadd.f32 %v6224_v18, %v11777_v21  ;;  %v6325_v26 = vmax.f32 %v6223_v51, 0.0 }
 0x463   :  { %6267 = vmatmul.mubr.bf16.gmra.mxu1 %v5984_v52  ;;  %v6326_v38 = vmax.f32 %v6225_v42, 0.0  ;;  %v6369_v55 = vpack.c.bf16 %v6325_v26, %v6323_v16 }
 0x464   :  { %6276 = vmatprep.mubr.bf16.mxu1 %v9058_v56 }
 0x465   :  { %v6370_v43 = vpack.c.bf16 %v6326_v38, %v6324_v14 }
 0x467   :  { %6911 = vmatprep.mubr.bf16.mxu0 %v6370_v43 }
 0x468   :  { %6912 = vmatmul.mubr.bf16.gmra.mxu0 %v6369_v55 }
 0x46b   :  { %6277 = vmatmul.mubr.bf16.gmra.mxu1 %v5985_v39 }
 0x46c   :  { %7054 = vmatprep.mubr.bf16.mxu1 %v11963_v35 }
 0x473   :  { %7055 = vmatmul.mubr.bf16.vlgmr.msra.gmra.mxu1 %v11965_v62 }
 0x474   :  { %7064 = vmatprep.mubr.bf16.mxu1 %v11974_v15 }
 0x47b   :  { %7065 = vmatmul.mubr.bf16.gmra.mxu1 %v11976_v31 }
 0x47c   :  { %7074 = vmatprep.mubr.bf16.mxu1 %v11985_v25 }
 0x47f   :  { %v6228_v22 = vpop.f32.mrf.mxu1 }
 0x480   :  { %v6229_v35 = vadd.f32 %v6228_v22, %v11901_v41 }
 0x481   :  { %v6230_v54 = vpop.f32.mrf.mxu1 }
 0x482   :  { %v6231_v40 = vadd.f32 %v6230_v54, %v11777_v21  ;;  %v6327_v25 = vmax.f32 %v6229_v35, 0.0 }
 0x483   :  { %7075 = vmatmul.mubr.bf16.gmra.mxu1 %v11987_v27  ;;  %v6232_v56 = vpop.f32.mrf.mxu1 }
 0x484   :  { %7084 = vmatprep.mubr.bf16.mxu1 %v6366_v46  ;;  %v6233_v0 = vadd.f32 %v6232_v56, %v11901_v41  ;;  %v6328_v31 = vmax.f32 %v6231_v40, 0.0 }
 0x485   :  { %v6234_v47 = vpop.f32.mrf.mxu1 }
 0x486   :  { %v6235_v62 = vadd.f32 %v6234_v47, %v11777_v21  ;;  %v6329_v15 = vmax.f32 %v6233_v0, 0.0 }
 0x487   :  { %v6238_v61 = vpop.f32.mrf.mxu1 }
 0x488   :  { %v6330_v45 = vmax.f32 %v6235_v62, 0.0  ;;  %v6371_v27 = vpack.c.bf16 %v6329_v15, %v6327_v25  ;;  %v6239_v57 = vadd.f32 %v6238_v61, %v11901_v41  ;;  %v12034_v62 = vpop.f32.mrf.mxu0 }
 0x489   :  { %v6240_v34 = vpop.f32.mrf.mxu1 }
 0x48a   :  { %v6372_v60 = vpack.c.bf16 %v6330_v45, %v6328_v31  ;;  %v6241_v30 = vadd.f32 %v6240_v34, %v11777_v21  ;;  %v6331_v11 = vmax.f32 %v6239_v57, 0.0  ;;  %v12036_v15 = vpop.f32.mrf.mxu0 }
 0x48b   :  { %7085 = vmatmul.mubr.bf16.gmra.mxu1 %v11996_v58  ;;  %v6242_v46 = vpop.f32.mrf.mxu1 }
 0x48c   :  { %7094 = vmatprep.mubr.bf16.mxu1 %v6368_v33  ;;  %v6243_v9 = vadd.f32 %v6242_v46, %v11901_v41  ;;  %6921 = vmatprep.mubr.bf16.mxu0 %v6372_v60  ;;  %v6332_v49 = vmax.f32 %v6241_v30, 0.0  ;;  %v12038_v61 = vpop.f32.mrf.mxu0 }
 0x48d   :  { %v6244_v63 = vpop.f32.mrf.mxu1  ;;  %6922 = vmatmul.mubr.bf16.gmra.mxu0 %v6371_v27 }
 0x48e   :  { %v6245_v23 = vadd.f32 %v6244_v63, %v11777_v21  ;;  %v6333_v37 = vmax.f32 %v6243_v9, 0.0  ;;  %v12040_v31 = vpop.f32.mrf.mxu0 }
 0x490   :  { %v6334_v50 = vmax.f32 %v6245_v23, 0.0  ;;  %v6373_v58 = vpack.c.bf16 %v6333_v37, %v6331_v11  ;;  %v12042_v45 = vpop.f32.mrf.mxu0 }
 0x492   :  { %v6374_v36 = vpack.c.bf16 %v6334_v50, %v6332_v49  ;;  %v12044_v25 = vpop.f32.mrf.mxu0 }
 0x493   :  { %7095 = vmatmul.mubr.bf16.gmra.mxu1 %v6367_v28 }
 0x494   :  { %7104 = vmatprep.mubr.bf16.mxu1 %v6370_v43  ;;  %6931 = vmatprep.mubr.bf16.mxu0 %v6374_v36  ;;  %v12046_v34 = vpop.f32.mrf.mxu0 }
 0x495   :  { %6932 = vmatmul.mubr.bf16.gmra.mxu0 %v6373_v58 }
 0x49b   :  { %7105 = vmatmul.mubr.bf16.gmra.mxu1 %v6369_v55 }
 0x49c   :  { %7114 = vmatprep.mubr.bf16.mxu1 %v6372_v60  ;;  %v12048_v60 = vpop.f32.mrf.mxu0 }
 0x4a3   :  { %7115 = vmatmul.mubr.bf16.gmra.mxu1 %v6371_v27  ;;  %v12050_v27 = vpop.f32.mrf.mxu0 }
 0x4a4   :  { %7124 = vmatprep.mubr.bf16.mxu1 %v6374_v36 }
 0x4a5   :  { %v12052_v46 = vpop.f32.mrf.mxu0 }
 0x4a7   :  { %v12054_v30 = vpop.f32.mrf.mxu0 }
 0x4a9   :  { %v12056_v9 = vpop.f32.mrf.mxu0 }
 0x4ab   :  { %7125 = vmatmul.mubr.bf16.gmra.mxu1 %v6373_v58  ;;  %v12058_v57 = vpop.f32.mrf.mxu0 }
 0x4ad   :  { %v12060_v63 = vpop.f32.mrf.mxu0 }
 0x4af   :  { %v12062_v49 = vpop.f32.mrf.mxu0 }
 0x4d7   :  { %v6248_v12 = vpop.f32.mrf.mxu1 }
 0x4d8   :  { %v6249_v28 = vadd.f32 %v6248_v12, %v11901_v41 }
 0x4d9   :  { %v6250_v4 = vpop.f32.mrf.mxu1 }
 0x4da   :  { %v6251_v33 = vadd.f32 %v6250_v4, %v11777_v21  ;;  %v6335_v52 = vmax.f32 %v6249_v28, 0.0  ;;  %v8943_v4 = vld [vmem:[%s12734_s6 + $0xf8] sm:$0xff]  }
 0x4db   :  { %v6252_v17 = vpop.f32.mrf.mxu1  ;;  %8595 = vmatprep.subr.bf16.mxu1 %v8943_v4 }
 0x4dc   :  { %v6253_v32 = vadd.f32 %v6252_v17, %v11901_v41  ;;  %v6336_v6 = vmax.f32 %v6251_v33, 0.0  ;;  %v8944_v17 = vld [vmem:[%s12734_s6 + $0xb8] sm:$0xff]   ;;  %v12074_v33 = vpop.f32.mrf.mxu0 }
 0x4dd   :  { %v6254_v53 = vpop.f32.mrf.mxu1  ;;  %8596 = vmatpush3.bf16.msra.mxu1 %v8944_v17  ;;  %v8949_v17 = vld [vmem:[%s12734_s6 + $0xe0] sm:$0xff]  }
 0x4de   :  { %v6255_v20 = vadd.f32 %v6254_v53, %v11777_v21  ;;  %v6337_v51 = vmax.f32 %v6253_v32, 0.0 }
 0x4df   :  { %v6258_v7 = vpop.f32.mrf.mxu1 }
 0x4e0   :  { %v6338_v18 = vmax.f32 %v6255_v20, 0.0  ;;  %v6375_v14 = vpack.c.bf16 %v6337_v51, %v6335_v52  ;;  %v6259_v55 = vadd.f32 %v6258_v7, %v11901_v41  ;;  %v12076_v51 = vpop.f32.mrf.mxu0 }
 0x4e1   :  { %v6260_v42 = vpop.f32.mrf.mxu1 }
 0x4e2   :  { %v6376_v26 = vpack.c.bf16 %v6338_v18, %v6336_v6  ;;  %v6261_v16 = vadd.f32 %v6260_v42, %v11777_v21  ;;  %v6339_v0 = vmax.f32 %v6259_v55, 0.0 }
 0x4e3   :  { %v6262_v38 = vpop.f32.mrf.mxu1 }
 0x4e4   :  { %v6263_v43 = vadd.f32 %v6262_v38, %v11901_v41  ;;  %6941 = vmatprep.mubr.bf16.mxu0 %v6376_v26  ;;  %7134 = vmatprep.mubr.bf16.mxu1 %v6376_v26  ;;  %v6340_v56 = vmax.f32 %v6261_v16, 0.0  ;;  %v12080_v38 = vpop.f32.mrf.mxu0 }
 0x4e5   :  { %v6264_v39 = vpop.f32.mrf.mxu1  ;;  %6942 = vmatmul.mubr.bf16.gmra.mxu0 %v6375_v14  ;;  %7135 = vmatmul.mubr.bf16.gmra.mxu1 %v6375_v14 }
 0x4e6   :  { %v6265_v22 = vadd.f32 %v6264_v39, %v11777_v21  ;;  %v6341_v54 = vmax.f32 %v6263_v43, 0.0 }
 0x4e8   :  { %v6342_v40 = vmax.f32 %v6265_v22, 0.0  ;;  %v6377_v47 = vpack.c.bf16 %v6341_v54, %v6339_v0 }
 0x4ea   :  { %v6378_v35 = vpack.c.bf16 %v6342_v40, %v6340_v56  ;;  %v12084_v56 = vpop.f32.mrf.mxu0 }
 0x4ec   :  { %6951 = vmatprep.mubr.bf16.mxu0 %v6378_v35  ;;  %7144 = vmatprep.mubr.bf16.mxu1 %v6378_v35 }
 0x4ed   :  { %6952 = vmatmul.mubr.bf16.gmra.mxu0 %v6377_v47  ;;  %7145 = vmatmul.mubr.bf16.gmra.mxu1 %v6377_v47  ;;  %v12086_v47 = vpop.f32.mrf.mxu0 }
 0x523   :  { %v6268_v23 = vpop.f32.mrf.mxu1 }
 0x524   :  { %v6269_v58 = vadd.f32 %v6268_v23, %v11901_v41  ;;  %v12095_v23 = vpop.f32.mrf.mxu0 }
 0x525   :  { %v6270_v37 = vpop.f32.mrf.mxu1 }
 0x526   :  { %v6271_v11 = vadd.f32 %v6270_v37, %v11777_v21  ;;  %v6343_v7 = vmax.f32 %v6269_v58, 0.0  ;;  %v8928_v37 = vld [vmem:[%s12734_s6 + $0x38] sm:$0xff]   ;;  %v8948_v58 = vld [vmem:[%s12734_s6 + $0xa8] sm:$0xff]  }
 0x527   :  { %v6272_v50 = vpop.f32.mrf.mxu1 }
 0x528   :  { %v6273_v36 = vadd.f32 %v6272_v50, %v11901_v41  ;;  %v6344_v53 = vmax.f32 %v6271_v11, 0.0  ;;  %v8929_v50 = vld [vmem:[%s12734_s6 + $0x70] sm:$0xff]   ;;  %v12103_v11 = vpop.f32.mrf.mxu0 }
 0x529   :  { %v6274_v44 = vpop.f32.mrf.mxu1 }
 0x52a   :  { %v6275_v12 = vadd.f32 %v6274_v44, %v11777_v21  ;;  %v6345_v32 = vmax.f32 %v6273_v36, 0.0  ;;  %v8947_v36 = vld [vmem:[%s12734_s6 + $0xe8] sm:$0xff]  }
 0x52b   :  { %v6278_v28 = vpop.f32.mrf.mxu1  ;;  %v8932_v44 = vld [vmem:[%s12734_s6 + $0x28] sm:$0xff]  }
 0x52c   :  { %v6346_v20 = vmax.f32 %v6275_v12, 0.0  ;;  %v6379_v52 = vpack.c.bf16 %v6345_v32, %v6343_v7  ;;  %v6279_v16 = vadd.f32 %v6278_v28, %v11901_v41  ;;  %v8933_v12 = vld [vmem:[%s12734_s6 + $0x60] sm:$0xff]   ;;  %v8951_v28 = vld [vmem:[%s12734_s6 + $0xd8] sm:$0xff]  }
 0x52d   :  { %v6280_v6 = vpop.f32.mrf.mxu1  ;;  %v8950_v32 = vld [vmem:[%s12734_s6 + $0xa0] sm:$0xff]   ;;  %v8952_v7 = vld [vmem:[%s12734_s6 + $0x98] sm:$0xff]  }
 0x52e   :  { %v6380_v18 = vpack.c.bf16 %v6346_v20, %v6344_v53  ;;  %v6281_v26 = vadd.f32 %v6280_v6, %v11777_v21  ;;  %v6347_v40 = vmax.f32 %v6279_v16, 0.0  ;;  %v8934_v53 = vld [vmem:[%s12734_s6 + $0x20] sm:$0xff]   ;;  %v8935_v20 = vld [vmem:[%s12734_s6 + $0x58] sm:$0xff]   ;;  %v8953_v6 = vld [vmem:[%s12734_s6 + $0xd0] sm:$0xff]  }
 0x52f   :  { %v6282_v42 = vpop.f32.mrf.mxu1 }
 0x530   :  { %v6283_v14 = vadd.f32 %v6282_v42, %v11901_v41  ;;  %6961 = vmatprep.mubr.bf16.mxu0 %v6380_v18  ;;  %7154 = vmatprep.mubr.bf16.mxu1 %v6380_v18  ;;  %v6348_v22 = vmax.f32 %v6281_v26, 0.0  ;;  %v8945_v41 = vld [vmem:[%s12734_s6 + $0xf0] sm:$0xff]  }
 0x531   :  { %v6284_v43 = vpop.f32.mrf.mxu1  ;;  %6962 = vmatmul.mubr.bf16.gmra.mxu0 %v6379_v52  ;;  %7155 = vmatmul.mubr.bf16.gmra.mxu1 %v6379_v52  ;;  %v8936_v52 = vld [vmem:[%s12734_s6 + $0x18] sm:$0xff]   ;;  %v8937_v26 = vld [vmem:[%s12734_s6 + $0x50] sm:$0xff]  }
 0x532   :  { %v6285_v55 = vadd.f32 %v6284_v43, %v11777_v21  ;;  %v6349_v39 = vmax.f32 %v6283_v14, 0.0  ;;  %v8946_v21 = vld [vmem:[%s12734_s6 + $0xb0] sm:$0xff]   ;;  %8597 = vmatprep.subr.bf16.mxu1 %v8945_v41 }
 0x533   :  { %8598 = vmatpush3.bf16.msra.mxu1 %v8946_v21  ;;  %v8938_v43 = vld [vmem:[%s12734_s6 + $0x10] sm:$0xff]  }
 0x534   :  { %v6350_v54 = vmax.f32 %v6285_v55, 0.0  ;;  %v6381_v35 = vpack.c.bf16 %v6349_v39, %v6347_v40  ;;  %8599 = vmatprep.subr.bf16.mxu1 %v8947_v36  ;;  %v8941_v40 = vld [vmem:[%s12734_s6 + $0x40] sm:$0xff]  }
 0x536   :  { %v6382_v0 = vpack.c.bf16 %v6350_v54, %v6348_v22 }
 0x537   :  { %8600 = vmatpush3.bf16.msra.mxu1 %v8948_v58 }
 0x538   :  { %6971 = vmatprep.mubr.bf16.mxu0 %v6382_v0  ;;  %7164 = vmatprep.mubr.bf16.mxu1 %v6382_v0 }
 0x539   :  { %6972 = vmatmul.mubr.bf16.gmra.mxu0 %v6381_v35  ;;  %7165 = vmatmul.mubr.bf16.gmra.mxu1 %v6381_v35 }
 0x53a   :  { %7014 = vmatprep.mubr.bf16.mxu0 %v11913_v59  ;;  %v8930_v59 = vld [vmem:[%s12734_s6 + $0x30] sm:$0xff]   ;;  %8601 = vmatprep.subr.bf16.mxu1 %v8949_v17 }
 0x53b   :  { %8602 = vmatpush3.bf16.msra.mxu1 %v8950_v32 }
 0x53c   :  { %8603 = vmatprep.subr.bf16.mxu1 %v8951_v28 }
 0x53f   :  { %8604 = vmatpush3.bf16.msra.mxu1 %v8952_v7 }
 0x540   :  { %8605 = vmatprep.subr.bf16.mxu1 %v8953_v6 }
 0x541   :  { %7015 = vmatmul.mubr.bf16.vlgmr.msra.gmra.mxu0 %v11922_v29  ;;  %v8931_v29 = vld [vmem:[%s12734_s6 + $0x68] sm:$0xff]  }
 0x542   :  { %7024 = vmatprep.mubr.bf16.mxu0 %v11926_v5  ;;  %8484 = vmatpush3.bf16.msra.mxu0 %v8928_v37  ;;  %v12119_v5 = vpop.f32.mrf.mxu0 }
 0x543   :  { %8485 = vmatprep.subr.bf16.mxu0 %v8929_v50 }
 0x544   :  { %v12127_v4 = vpop.f32.mrf.mxu0 }
 0x546   :  { %8486 = vmatpush3.bf16.msra.mxu0 %v8930_v59 }
 0x547   :  { %8487 = vmatprep.subr.bf16.mxu0 %v8931_v29 }
 0x549   :  { %7025 = vmatmul.mubr.bf16.gmra.mxu0 %v11937_v1  ;;  %v12143_v1 = vpop.f32.mrf.mxu0 }
 0x54a   :  { %7034 = vmatprep.mubr.bf16.mxu0 %v11934_v48  ;;  %8488 = vmatpush3.bf16.msra.mxu0 %v8932_v44  ;;  %v12154_v48 = vld [vmem:[%s12733_s5] sm:$0xf] }
 0x54b   :  { %8489 = vmatprep.subr.bf16.mxu0 %v8933_v12  ;;  %v12161_v18 = vrot.slane %v12154_v48, %v9120_v3  ;;  %v12166_v42 = vpop.f32.mrf.mxu0  ;;  %v8954_v3 = vld [vmem:[%s12734_s6 + $0x90] sm:$0xff]  }
 0x54c   :  { %8606 = vmatpush3.bf16.msra.mxu1 %v8954_v3 }
 0x54d   :  { %v6830_v14 = vadd.f32 %v12040_v31, %v12161_v18  ;;  %v6826_v16 = vadd.f32 %v12036_v15, %v12161_v18  ;;  %v12183_v55 = vpop.f32.mrf.mxu0  ;;  %v8939_v31 = vld [vmem:[%s12734_s6 + $0x48] sm:$0xff]   ;;  %v6836_v41 = vadd.f32 %v12044_v25, %v12161_v18  ;;  %v6850_v25 = vadd.f32 %v12056_v9, %v12161_v18 }
 0x54e   :  { %8490 = vmatpush3.bf16.msra.mxu0 %v8934_v53  ;;  %v6846_v44 = vadd.f32 %v12052_v46, %v12161_v18 }
 0x54f   :  { %8491 = vmatprep.subr.bf16.mxu0 %v8935_v20  ;;  %v7180_v39 = vmax.f32 %v6830_v14, 0.0  ;;  %v7176_v15 = vmax.f32 %v6826_v16, 0.0  ;;  %v12197_v54 = vpop.f32.mrf.mxu0  ;;  %v7184_v59 = vmax.f32 %v6836_v41, 0.0  ;;  %v7196_v32 = vmax.f32 %v6850_v25, 0.0 }
 0x551   :  { %7035 = vmatmul.mubr.bf16.gmra.mxu0 %v11948_v24  ;;  %v12190_v24 = vrot.slane %v12154_v48, %v9118_v2  ;;  %v6840_v2 = vadd.f32 %v12048_v60, %v12161_v18  ;;  %v7304_v0 = vpack.c.bf16 %v7180_v39, %v7176_v15  ;;  %v12212_v37 = vpop.f32.mrf.mxu0 }
 0x552   :  { %7044 = vmatprep.mubr.bf16.mxu0 %v11946_v8  ;;  %8492 = vmatpush3.bf16.msra.mxu0 %v8936_v52  ;;  %v8940_v8 = vld [vmem:[%s12734_s6 + $0x8] sm:$0xff]   ;;  %v6856_v52 = vadd.f32 %v12060_v63, %v12161_v18  ;;  %v6866_v63 = vadd.f32 %v12080_v38, %v12161_v18  ;;  %v6876_v38 = vadd.f32 %v12103_v11, %v12161_v18 }
 0x553   :  { %8493 = vmatprep.subr.bf16.mxu0 %v8937_v26  ;;  %v6828_v22 = vadd.f32 %v12038_v61, %v12190_v24  ;;  %v6824_v35 = vadd.f32 %v12034_v62, %v12190_v24  ;;  %v8942_v61 = vld [vmem:[%s12734_s6] sm:$0xff]   ;;  %v7188_v60 = vmax.f32 %v6840_v2, 0.0  ;;  %v12216_v36 = vpop.f32.mrf.mxu0  ;;  %v6834_v29 = vadd.f32 %v12042_v45, %v12190_v24 }
 0x554   :  { %v6848_v20 = vadd.f32 %v12054_v30, %v12190_v24  ;;  %v6860_v45 = vadd.f32 %v12074_v33, %v12161_v18  ;;  %v6844_v46 = vadd.f32 %v12050_v27, %v12190_v24  ;;  %v7200_v16 = vmax.f32 %v6856_v52, 0.0 }
 0x555   :  { %v7179_v21 = vmax.f32 %v6828_v22, 0.0  ;;  %v7175_v50 = vmax.f32 %v6824_v35, 0.0  ;;  %v7308_v58 = vpack.c.bf16 %v7188_v60, %v7184_v59  ;;  %v12224_v17 = vpop.f32.mrf.mxu0  ;;  %v7183_v28 = vmax.f32 %v6834_v29, 0.0 }
 0x556   :  { %8494 = vmatpush3.bf16.msra.mxu0 %v8938_v43  ;;  %v7195_v26 = vmax.f32 %v6848_v20, 0.0  ;;  %v7204_v14 = vmax.f32 %v6860_v45, 0.0  ;;  %v7191_v3 = vmax.f32 %v6844_v46, 0.0  ;;  %v6858_v33 = vadd.f32 %v12062_v49, %v12190_v24 }
 0x557   :  { %8495 = vmatprep.subr.bf16.mxu0 %v8939_v31  ;;  %v7303_v62 = vpack.c.bf16 %v7179_v21, %v7175_v50  ;;  %v12228_v9 = vpop.f32.mrf.mxu0  ;;  %v6870_v27 = vadd.f32 %v12086_v47, %v12161_v18  ;;  %v6854_v39 = vadd.f32 %v12058_v57, %v12190_v24  ;;  %v6868_v47 = vadd.f32 %v12084_v56, %v12190_v24  ;;  %v8955_v21 = vld [vmem:[%s12734_s6 + $0xc8] sm:$0xff]  }
 0x558   :  { %v7311_v43 = vpack.c.bf16 %v7195_v26, %v7191_v3  ;;  %v7316_v31 = vpack.c.bf16 %v7204_v14, %v7200_v16  ;;  %v6880_v35 = vadd.f32 %v12127_v4, %v12161_v18  ;;  %v6864_v41 = vadd.f32 %v12076_v51, %v12190_v24  ;;  %8607 = vmatprep.subr.bf16.mxu1 %v8955_v21  ;;  %v8956_v4 = vld [vmem:[%s12734_s6 + $0x88] sm:$0xff]  }
 0x559   :  { %7045 = vmatmul.mubr.bf16.gmra.mxu0 %v11955_v13  ;;  %v6838_v13 = vadd.f32 %v12046_v34, %v12190_v24  ;;  %v7192_v34 = vmax.f32 %v6846_v44, 0.0  ;;  %v12234_v6 = vpop.f32.mrf.mxu0  ;;  %v7212_v22 = vmax.f32 %v6870_v27, 0.0  ;;  %v7211_v60 = vmax.f32 %v6868_v47, 0.0  ;;  %8608 = vmatpush3.bf16.msra.mxu1 %v8956_v4 }
 0x55a   :  { %8496 = vmatpush3.bf16.msra.mxu0 %v8940_v8  ;;  %7662 = vmatprep.mubr.bf16.mxu0 %v7304_v0  ;;  %v7203_v8 = vmax.f32 %v6858_v33, 0.0  ;;  %v7208_v0 = vmax.f32 %v6866_v63, 0.0  ;;  %v7220_v56 = vmax.f32 %v6880_v35, 0.0  ;;  %v7207_v50 = vmax.f32 %v6864_v41, 0.0 }
 0x55b   :  { %8497 = vmatprep.subr.bf16.mxu0 %v8941_v40  ;;  %v7187_v12 = vmax.f32 %v6838_v13, 0.0  ;;  %v7312_v7 = vpack.c.bf16 %v7196_v32, %v7192_v34  ;;  %v12238_v30 = vpop.f32.mrf.mxu0  ;;  %v7199_v40 = vmax.f32 %v6854_v39, 0.0  ;;  %v7216_v59 = vmax.f32 %v6876_v38, 0.0 }
 0x55c   :  { %v7320_v57 = vpack.c.bf16 %v7212_v22, %v7208_v0  ;;  %v6878_v11 = vadd.f32 %v12119_v5, %v12190_v24  ;;  %v6890_v13 = vadd.f32 %v12197_v54, %v12161_v18  ;;  %v6886_v44 = vadd.f32 %v12166_v42, %v12161_v18  ;;  %v8957_v5 = vld [vmem:[%s12734_s6 + $0xc0] sm:$0xff]  }
 0x55d   :  { %v7307_v53 = vpack.c.bf16 %v7187_v12, %v7183_v28  ;;  %v12246_v15 = vpop.f32.mrf.mxu0  ;;  %v7315_v49 = vpack.c.bf16 %v7203_v8, %v7199_v40  ;;  %v7324_v25 = vpack.c.bf16 %v7220_v56, %v7216_v59  ;;  %v8958_v54 = vld [vmem:[%s12734_s6 + $0x80] sm:$0xff]   ;;  %v6888_v20 = vadd.f32 %v12183_v55, %v12190_v24  ;;  %8609 = vmatprep.subr.bf16.mxu1 %v8957_v5 }
 0x55e   :  { %8498 = vmatpush3.bf16.msra.mxu0 %v8942_v61  ;;  %v7219_v12 = vmax.f32 %v6878_v11, 0.0  ;;  %v7228_v32 = vmax.f32 %v6890_v13, 0.0  ;;  %v6900_v42 = vadd.f32 %v12228_v9, %v12161_v18  ;;  %8610 = vmatpush3.bf16.msra.mxu1 %v8958_v54  ;;  %v6884_v46 = vadd.f32 %v12143_v1, %v12190_v24 }
 0x55f   :  { %v6909_v2 = vpop.f32.mrf.mxu0  ;;  %v6896_v52 = vadd.f32 %v12216_v36, %v12161_v18  ;;  %v7227_v26 = vmax.f32 %v6888_v20, 0.0  ;;  %v6898_v33 = vadd.f32 %v12224_v17, %v12190_v24  ;;  %v6894_v1 = vadd.f32 %v12212_v37, %v12190_v24 }
 0x560   :  { %v7236_v3 = vmax.f32 %v6900_v42, 0.0  ;;  %v7223_v16 = vmax.f32 %v6884_v46, 0.0  ;;  %v6910_v27 = vadd.f32 %v6909_v2, %v12161_v18  ;;  %v6906_v36 = vadd.f32 %v12238_v30, %v12161_v18 }
 0x561   :  { %7663 = vmatmul.mubr.bf16.vlgmr.msra.gmra.mxu0 %v7303_v62  ;;  %v12256_v61 = vpop.f32.mrf.mxu0  ;;  %v7319_v62 = vpack.c.bf16 %v7211_v60, %v7207_v50  ;;  %v7232_v55 = vmax.f32 %v6896_v52, 0.0  ;;  %v7235_v39 = vmax.f32 %v6898_v33, 0.0  ;;  %v7231_v22 = vmax.f32 %v6894_v1, 0.0 }
 0x562   :  { %7670 = vmatprep.mubr.bf16.mxu0 %v7308_v58  ;;  %v6874_v58 = vadd.f32 %v12095_v23, %v12190_v24  ;;  %v7244_v8 = vmax.f32 %v6910_v27, 0.0  ;;  %v7240_v40 = vmax.f32 %v6906_v36, 0.0  ;;  %v6908_v17 = vadd.f32 %v12246_v15, %v12190_v24 }
 0x563   :  { %v6915_v51 = vpop.f32.mrf.mxu0  ;;  %v7331_v0 = vpack.c.bf16 %v7235_v39, %v7231_v22  ;;  %v6904_v37 = vadd.f32 %v12234_v6, %v12190_v24  ;;  %v6914_v59 = vadd.f32 %v12256_v61, %v12190_v24 }
 0x564   :  { %v7215_v28 = vmax.f32 %v6874_v58, 0.0  ;;  %v7336_v2 = vpack.c.bf16 %v7244_v8, %v7240_v40  ;;  %v6916_v30 = vadd.f32 %v6915_v51, %v12161_v18  ;;  %v7243_v35 = vmax.f32 %v6908_v17, 0.0 }
 0x565   :  { %v6917_v29 = vpop.f32.mrf.mxu0  ;;  %v7239_v38 = vmax.f32 %v6904_v37, 0.0  ;;  %v7247_v13 = vmax.f32 %v6914_v59, 0.0 }
 0x566   :  { %v7323_v23 = vpack.c.bf16 %v7219_v12, %v7215_v28  ;;  %v7248_v21 = vmax.f32 %v6916_v30, 0.0  ;;  %v6918_v56 = vadd.f32 %v6917_v29, %v12190_v24 }
 0x567   :  { %v6919_v34 = vpop.f32.mrf.mxu0  ;;  %v7335_v60 = vpack.c.bf16 %v7243_v35, %v7239_v38 }
 0x568   :  { %v6920_v47 = vadd.f32 %v6919_v34, %v12161_v18  ;;  %v7251_v51 = vmax.f32 %v6918_v56, 0.0 }
 0x569   :  { %7671 = vmatmul.mubr.bf16.gmra.mxu0 %v7307_v53  ;;  %v7224_v53 = vmax.f32 %v6886_v44, 0.0  ;;  %v6923_v45 = vpop.f32.mrf.mxu0 }
 0x56a   :  { %7678 = vmatprep.mubr.bf16.mxu0 %v7312_v7  ;;  %v7252_v41 = vmax.f32 %v6920_v47, 0.0  ;;  %v7339_v44 = vpack.c.bf16 %v7251_v51, %v7247_v13  ;;  %v6924_v34 = vadd.f32 %v6923_v45, %v12190_v24 }
 0x56b   :  { %v7328_v7 = vpack.c.bf16 %v7228_v32, %v7224_v53  ;;  %v6925_v14 = vpop.f32.mrf.mxu0 }
 0x56c   :  { %v7340_v4 = vpack.c.bf16 %v7252_v41, %v7248_v21  ;;  %v6926_v6 = vadd.f32 %v6925_v14, %v12161_v18  ;;  %v7255_v20 = vmax.f32 %v6924_v34, 0.0 }
 0x56d   :  { %v6927_v9 = vpop.f32.mrf.mxu0 }
 0x56e   :  { %v7256_v58 = vmax.f32 %v6926_v6, 0.0  ;;  %v6928_v29 = vadd.f32 %v6927_v9, %v12190_v24 }
 0x56f   :  { %v6929_v63 = vpop.f32.mrf.mxu0 }
 0x570   :  { %v6930_v50 = vadd.f32 %v6929_v63, %v12161_v18  ;;  %v7259_v53 = vmax.f32 %v6928_v29, 0.0 }
 0x571   :  { %7679 = vmatmul.mubr.bf16.gmra.mxu0 %v7311_v43  ;;  %v7327_v43 = vpack.c.bf16 %v7227_v26, %v7223_v16 }
 0x572   :  { %7686 = vmatprep.mubr.bf16.mxu0 %v7316_v31  ;;  %v7332_v31 = vpack.c.bf16 %v7236_v3, %v7232_v55  ;;  %v7260_v11 = vmax.f32 %v6930_v50, 0.0  ;;  %v7343_v52 = vpack.c.bf16 %v7259_v53, %v7255_v20 }
 0x574   :  { %v7344_v32 = vpack.c.bf16 %v7260_v11, %v7256_v58 }
 0x579   :  { %7687 = vmatmul.mubr.bf16.gmra.mxu0 %v7315_v49  ;;  %v6933_v49 = vpop.f32.mrf.mxu0 }
 0x57a   :  { %7694 = vmatprep.mubr.bf16.mxu0 %v7320_v57  ;;  %v6934_v16 = vadd.f32 %v6933_v49, %v12190_v24  ;;  %v12318_v49 = vpop.f32.mrf.mxu1 }
 0x57b   :  { %v6935_v57 = vpop.f32.mrf.mxu0 }
 0x57c   :  { %v6936_v5 = vadd.f32 %v6935_v57, %v12161_v18  ;;  %v12321_v35 = vpop.f32.mrf.mxu1 }
 0x57d   :  { %v6937_v15 = vpop.f32.mrf.mxu0 }
 0x57e   :  { %v6938_v26 = vadd.f32 %v6937_v15, %v12190_v24  ;;  %v12324_v38 = vpop.f32.mrf.mxu1 }
 0x580   :  { %v7267_v33 = vmax.f32 %v6938_v26, 0.0  ;;  %v12326_v56 = vpop.f32.mrf.mxu1 }
 0x581   :  { %7695 = vmatmul.mubr.bf16.gmra.mxu0 %v7319_v62  ;;  %v6939_v62 = vpop.f32.mrf.mxu0 }
 0x582   :  { %7702 = vmatprep.mubr.bf16.mxu0 %v7324_v25  ;;  %v6940_v28 = vadd.f32 %v6939_v62, %v12161_v18  ;;  %v12328_v15 = vpop.f32.mrf.mxu1 }
 0x589   :  { %7703 = vmatmul.mubr.bf16.gmra.mxu0 %v7323_v23  ;;  %v7268_v23 = vmax.f32 %v6940_v28, 0.0 }
 0x58a   :  { %7710 = vmatprep.mubr.bf16.mxu0 %v7328_v7  ;;  %v7264_v7 = vmax.f32 %v6936_v5, 0.0 }
 0x58c   :  { %v7348_v3 = vpack.c.bf16 %v7268_v23, %v7264_v7 }
 0x591   :  { %7711 = vmatmul.mubr.bf16.gmra.mxu0 %v7327_v43 }
 0x592   :  { %7718 = vmatprep.mubr.bf16.mxu0 %v7332_v31  ;;  %v7263_v31 = vmax.f32 %v6934_v16, 0.0 }
 0x594   :  { %v7347_v39 = vpack.c.bf16 %v7267_v33, %v7263_v31 }
 0x599   :  { %7719 = vmatmul.mubr.bf16.gmra.mxu0 %v7331_v0 }
 0x59a   :  { %7726 = vmatprep.mubr.bf16.mxu0 %v7336_v2 }
 0x5a1   :  { %7727 = vmatmul.mubr.bf16.gmra.mxu0 %v7335_v60 }
 0x5a2   :  { %7734 = vmatprep.mubr.bf16.mxu0 %v7340_v4  ;;  %v12330_v4 = vpop.f32.mrf.mxu1 }
 0x5a4   :  { %v12332_v50 = vpop.f32.mrf.mxu1 }
 0x5a5   :  { %v6943_v25 = vpop.f32.mrf.mxu0 }
 0x5a6   :  { %v6944_v22 = vadd.f32 %v6943_v25, %v12190_v24  ;;  %v12334_v59 = vpop.f32.mrf.mxu1 }
 0x5a7   :  { %v6945_v12 = vpop.f32.mrf.mxu0 }
 0x5a8   :  { %v6946_v45 = vadd.f32 %v6945_v12, %v12161_v18  ;;  %v7271_v2 = vmax.f32 %v6944_v22, 0.0  ;;  %v12336_v6 = vpop.f32.mrf.mxu1  ;;  %v12370_v22 = vrot.slane %v12154_v48, %v9164_v19 }
 0x5a9   :  { %7735 = vmatmul.mubr.bf16.gmra.mxu0 %v7339_v44  ;;  %v6947_v61 = vpop.f32.mrf.mxu0 }
 0x5aa   :  { %7742 = vmatprep.mubr.bf16.mxu0 %v7344_v32  ;;  %v7272_v27 = vmax.f32 %v6946_v45, 0.0  ;;  %v6948_v63 = vadd.f32 %v6947_v61, %v12190_v24  ;;  %v12338_v51 = vpop.f32.mrf.mxu1 }
 0x5ab   :  { %v6949_v54 = vpop.f32.mrf.mxu0 }
 0x5ac   :  { %v6950_v46 = vadd.f32 %v6949_v54, %v12161_v18  ;;  %v7275_v0 = vmax.f32 %v6948_v63, 0.0  ;;  %v12340_v62 = vpop.f32.mrf.mxu1 }
 0x5ad   :  { %v6953_v42 = vpop.f32.mrf.mxu0 }
 0x5ae   :  { %v7276_v43 = vmax.f32 %v6950_v46, 0.0  ;;  %v7351_v37 = vpack.c.bf16 %v7275_v0, %v7271_v2  ;;  %v6954_v57 = vadd.f32 %v6953_v42, %v12190_v24  ;;  %v12342_v11 = vpop.f32.mrf.mxu1 }
 0x5af   :  { %v6955_v14 = vpop.f32.mrf.mxu0 }
 0x5b0   :  { %v7352_v1 = vpack.c.bf16 %v7276_v43, %v7272_v27  ;;  %v6956_v8 = vadd.f32 %v6955_v14, %v12161_v18  ;;  %v7279_v21 = vmax.f32 %v6954_v57, 0.0  ;;  %v12344_v13 = vpop.f32.mrf.mxu1 }
 0x5b1   :  { %7743 = vmatmul.mubr.bf16.gmra.mxu0 %v7343_v52  ;;  %v6957_v55 = vpop.f32.mrf.mxu0 }
 0x5b2   :  { %7750 = vmatprep.mubr.bf16.mxu0 %v7348_v3  ;;  %v7280_v17 = vmax.f32 %v6956_v8, 0.0  ;;  %v6958_v30 = vadd.f32 %v6957_v55, %v12190_v24  ;;  %v12346_v25 = vpop.f32.mrf.mxu1  ;;  %v12366_v8 = vrot.slane %v12154_v48, %v9140_v10 }
 0x5b3   :  { %v6959_v9 = vpop.f32.mrf.mxu0 }
 0x5b4   :  { %v6960_v36 = vadd.f32 %v6959_v9, %v12161_v18  ;;  %v7283_v41 = vmax.f32 %v6958_v30, 0.0  ;;  %v12348_v29 = vpop.f32.mrf.mxu1 }
 0x5b6   :  { %v7284_v40 = vmax.f32 %v6960_v36, 0.0  ;;  %v7355_v60 = vpack.c.bf16 %v7283_v41, %v7279_v21  ;;  %v12354_v53 = vpop.f32.mrf.mxu1 }
 0x5b8   :  { %v7356_v47 = vpack.c.bf16 %v7284_v40, %v7280_v17  ;;  %v12356_v26 = vpop.f32.mrf.mxu1 }
 0x5b9   :  { %7751 = vmatmul.mubr.bf16.gmra.mxu0 %v7347_v39 }
 0x5ba   :  { %7758 = vmatprep.mubr.bf16.mxu0 %v7352_v1  ;;  %v12362_v9 = vpop.f32.mrf.mxu1 }
 0x5bc   :  { %v12372_v40 = vpop.f32.mrf.mxu1 }
 0x5be   :  { %v12378_v30 = vpop.f32.mrf.mxu1 }
 0x5c1   :  { %7759 = vmatmul.mubr.bf16.gmra.mxu0 %v7351_v37 }
 0x5c2   :  { %7766 = vmatprep.mubr.bf16.mxu0 %v7356_v47 }
 0x5c9   :  { %7767 = vmatmul.mubr.bf16.gmra.mxu0 %v7355_v60 }
 0x5f1   :  { %v6963_v58 = vpop.f32.mrf.mxu0 }
 0x5f2   :  { %v6964_v34 = vadd.f32 %v6963_v58, %v12190_v24 }
 0x5f3   :  { %v6965_v44 = vpop.f32.mrf.mxu0 }
 0x5f4   :  { %v6966_v32 = vadd.f32 %v6965_v44, %v12161_v18  ;;  %v7287_v7 = vmax.f32 %v6964_v34, 0.0  ;;  %v12380_v44 = vpop.f32.mrf.mxu1 }
 0x5f5   :  { %v6967_v12 = vpop.f32.mrf.mxu0 }
 0x5f6   :  { %v6968_v28 = vadd.f32 %v6967_v12, %v12190_v24  ;;  %v7288_v20 = vmax.f32 %v6966_v32, 0.0 }
 0x5f7   :  { %v6969_v61 = vpop.f32.mrf.mxu0 }
 0x5f8   :  { %v6970_v5 = vadd.f32 %v6969_v61, %v12161_v18  ;;  %v7291_v54 = vmax.f32 %v6968_v28, 0.0 }
 0x5f9   :  { %v6973_v23 = vpop.f32.mrf.mxu0 }
 0x5fa   :  { %v7292_v42 = vmax.f32 %v6970_v5, 0.0  ;;  %v7359_v14 = vpack.c.bf16 %v7291_v54, %v7287_v7  ;;  %v6974_v55 = vadd.f32 %v6973_v23, %v12190_v24  ;;  %v12386_v23 = vpop.f32.mrf.mxu1 }
 0x5fb   :  { %v6975_v46 = vpop.f32.mrf.mxu0 }
 0x5fc   :  { %v7360_v52 = vpack.c.bf16 %v7292_v42, %v7288_v20  ;;  %v6976_v45 = vadd.f32 %v6975_v46, %v12161_v18  ;;  %v7295_v39 = vmax.f32 %v6974_v55, 0.0 }
 0x5fd   :  { %v6977_v3 = vpop.f32.mrf.mxu0 }
 0x5fe   :  { %v6978_v16 = vadd.f32 %v6977_v3, %v12190_v24  ;;  %7774 = vmatprep.mubr.bf16.mxu0 %v7360_v52  ;;  %v7296_v1 = vmax.f32 %v6976_v45, 0.0  ;;  %v12388_v45 = vpop.f32.mrf.mxu1 }
 0x5ff   :  { %v6979_v43 = vpop.f32.mrf.mxu0  ;;  %7775 = vmatmul.mubr.bf16.gmra.mxu0 %v7359_v14 }
 0x600   :  { %v6980_v33 = vadd.f32 %v6979_v43, %v12161_v18  ;;  %v7299_v27 = vmax.f32 %v6978_v16, 0.0 }
 0x601   :  { %v7016_v31 = vpop.f32.mrf.mxu0 }
 0x602   :  { %v7300_v36 = vmax.f32 %v6980_v33, 0.0  ;;  %v7363_v18 = vpack.c.bf16 %v7299_v27, %v7295_v39  ;;  %v7017_v47 = vadd.f32 %v7016_v31, %v12366_v8 }
 0x603   :  { %v7018_v63 = vpop.f32.mrf.mxu0 }
 0x604   :  { %v7364_v24 = vpack.c.bf16 %v7300_v36, %v7296_v1  ;;  %v7019_v17 = vadd.f32 %v7018_v63, %v12370_v22  ;;  %v7177_v21 = vmax.f32 %v7017_v47, 0.0  ;;  %v12394_v36 = vpop.f32.mrf.mxu1 }
 0x605   :  { %v7020_v0 = vpop.f32.mrf.mxu0 }
 0x606   :  { %v7021_v2 = vadd.f32 %v7020_v0, %v12366_v8  ;;  %7782 = vmatprep.mubr.bf16.mxu0 %v7364_v24  ;;  %v7178_v57 = vmax.f32 %v7019_v17, 0.0  ;;  %v12396_v0 = vpop.f32.mrf.mxu1 }
 0x607   :  { %v7022_v37 = vpop.f32.mrf.mxu0  ;;  %7783 = vmatmul.mubr.bf16.gmra.mxu0 %v7363_v18 }
 0x608   :  { %v7023_v10 = vadd.f32 %v7022_v37, %v12370_v22  ;;  %v7181_v19 = vmax.f32 %v7021_v2, 0.0 }
 0x609   :  { %v7026_v48 = vpop.f32.mrf.mxu0 }
 0x60a   :  { %v7182_v41 = vmax.f32 %v7023_v10, 0.0  ;;  %v7305_v12 = vpack.c.bf16 %v7181_v19, %v7177_v21  ;;  %v7027_v61 = vadd.f32 %v7026_v48, %v12366_v8  ;;  %v7063_v19 = vadd.f32 %v12326_v56, %v12370_v22 }
 0x60b   :  { %v7028_v60 = vpop.f32.mrf.mxu0 }
 0x60c   :  { %v7306_v58 = vpack.c.bf16 %v7182_v41, %v7178_v57  ;;  %v7029_v28 = vadd.f32 %v7028_v60, %v12370_v22  ;;  %v7185_v52 = vmax.f32 %v7027_v61, 0.0  ;;  %v12402_v41 = vpop.f32.mrf.mxu1 }
 0x60d   :  { %v7030_v32 = vpop.f32.mrf.mxu0 }
 0x60e   :  { %v7031_v34 = vadd.f32 %v7030_v32, %v12366_v8  ;;  %7823 = vmatprep.mubr.bf16.mxu1 %v7306_v58  ;;  %v7186_v7 = vmax.f32 %v7029_v28, 0.0  ;;  %v7059_v58 = vadd.f32 %v12321_v35, %v12370_v22 }
 0x60f   :  { %v7032_v5 = vpop.f32.mrf.mxu0  ;;  %7824 = vmatmul.mubr.bf16.vlgmr.msra.gmra.mxu1 %v7305_v12 }
 0x610   :  { %v7033_v54 = vadd.f32 %v7032_v5, %v12370_v22  ;;  %v7189_v20 = vmax.f32 %v7031_v34, 0.0  ;;  %v7214_v34 = vmax.f32 %v7063_v19, 0.0  ;;  %v12408_v5 = vpop.f32.mrf.mxu1 }
 0x611   :  { %v7036_v42 = vpop.f32.mrf.mxu0 }
 0x612   :  { %v7190_v46 = vmax.f32 %v7033_v54, 0.0  ;;  %v7309_v16 = vpack.c.bf16 %v7189_v20, %v7185_v52  ;;  %v7037_v27 = vadd.f32 %v7036_v42, %v12366_v8  ;;  %v7210_v42 = vmax.f32 %v7059_v58, 0.0 }
 0x613   :  { %v7038_v14 = vpop.f32.mrf.mxu0  ;;  %v7061_v52 = vadd.f32 %v12324_v38, %v12366_v8 }
 0x614   :  { %v7310_v3 = vpack.c.bf16 %v7190_v46, %v7186_v7  ;;  %v7039_v43 = vadd.f32 %v7038_v14, %v12370_v22  ;;  %v7193_v17 = vmax.f32 %v7037_v27, 0.0  ;;  %v7069_v27 = vadd.f32 %v12330_v4, %v12370_v22 }
 0x615   :  { %v7040_v55 = vpop.f32.mrf.mxu0  ;;  %v7213_v38 = vmax.f32 %v7061_v52, 0.0  ;;  %v7083_v4 = vadd.f32 %v12342_v11, %v12370_v22  ;;  %v7089_v52 = vadd.f32 %v12346_v25, %v12370_v22 }
 0x616   :  { %v7041_v33 = vadd.f32 %v7040_v55, %v12366_v8  ;;  %7831 = vmatprep.mubr.bf16.mxu1 %v7310_v3  ;;  %v7194_v24 = vmax.f32 %v7039_v43, 0.0  ;;  %v7322_v3 = vpack.c.bf16 %v7214_v34, %v7210_v42  ;;  %v7057_v55 = vadd.f32 %v12318_v49, %v12366_v8  ;;  %v12418_v43 = vpop.f32.mrf.mxu1 }
 0x617   :  { %v7042_v31 = vpop.f32.mrf.mxu0  ;;  %7832 = vmatmul.mubr.bf16.gmra.mxu1 %v7309_v16  ;;  %v7073_v16 = vadd.f32 %v12334_v59, %v12370_v22  ;;  %v7230_v58 = vmax.f32 %v7083_v4, 0.0 }
 0x618   :  { %v7043_v1 = vadd.f32 %v7042_v31, %v12370_v22  ;;  %v7197_v39 = vmax.f32 %v7041_v33, 0.0 }
 0x619   :  { %v7046_v63 = vpop.f32.mrf.mxu0 }
 0x61a   :  { %v7198_v18 = vmax.f32 %v7043_v1, 0.0  ;;  %v7313_v37 = vpack.c.bf16 %v7197_v39, %v7193_v17  ;;  %v7047_v21 = vadd.f32 %v7046_v63, %v12366_v8  ;;  %v7222_v39 = vmax.f32 %v7073_v16, 0.0 }
 0x61b   :  { %v7048_v2 = vpop.f32.mrf.mxu0  ;;  %v7209_v63 = vmax.f32 %v7057_v55, 0.0 }
 0x61c   :  { %v7314_v47 = vpack.c.bf16 %v7198_v18, %v7194_v24  ;;  %v7049_v48 = vadd.f32 %v7048_v2, %v12370_v22  ;;  %v7201_v54 = vmax.f32 %v7047_v21, 0.0  ;;  %v12424_v24 = vpop.f32.mrf.mxu1  ;;  %v7218_v18 = vmax.f32 %v7069_v27, 0.0 }
 0x61d   :  { %v7050_v10 = vpop.f32.mrf.mxu0  ;;  %v7321_v49 = vpack.c.bf16 %v7213_v38, %v7209_v63  ;;  %v7071_v2 = vadd.f32 %v12332_v50, %v12366_v8  ;;  %v7091_v38 = vadd.f32 %v12348_v29, %v12366_v8  ;;  %v7103_v63 = vadd.f32 %v12378_v30, %v12370_v22 }
 0x61e   :  { %v7051_v57 = vadd.f32 %v7050_v10, %v12366_v8  ;;  %7839 = vmatprep.mubr.bf16.mxu1 %v7314_v47  ;;  %v7202_v56 = vmax.f32 %v7049_v48, 0.0  ;;  %v7067_v10 = vadd.f32 %v12328_v15, %v12366_v8  ;;  %v12434_v19 = vpop.f32.mrf.mxu1 }
 0x61f   :  { %v7052_v60 = vpop.f32.mrf.mxu0  ;;  %7840 = vmatmul.mubr.bf16.gmra.mxu1 %v7313_v37  ;;  %v7326_v37 = vpack.c.bf16 %v7222_v39, %v7218_v18  ;;  %v7246_v4 = vmax.f32 %v7103_v63, 0.0 }
 0x620   :  { %v7053_v12 = vadd.f32 %v7052_v60, %v12370_v22  ;;  %v7205_v32 = vmax.f32 %v7051_v57, 0.0  ;;  %v7079_v57 = vadd.f32 %v12338_v51, %v12370_v22  ;;  %v7221_v60 = vmax.f32 %v7071_v2, 0.0 }
 0x621   :  { %v8499_v28 = vpop.f32.mrf.mxu0  ;;  %v7093_v51 = vadd.f32 %v12354_v53, %v12370_v22 }
 0x622   :  { %v7206_v61 = vmax.f32 %v7053_v12, 0.0  ;;  %v7317_v14 = vpack.c.bf16 %v7205_v32, %v7201_v54  ;;  %v7217_v12 = vmax.f32 %v7067_v10, 0.0  ;;  %v12440_v32 = vpop.f32.mrf.mxu1 }
 0x623   :  { %v8500_v20 = vpop.f32.mrf.mxu0  ;;  %v7238_v16 = vmax.f32 %v7093_v51, 0.0 }
 0x624   :  { %v7318_v7 = vpack.c.bf16 %v7206_v61, %v7202_v56  ;;  %v12410_v46 = vadd.f32 %v8500_v20, %v8499_v28  ;;  %v7226_v28 = vmax.f32 %v7079_v57, 0.0  ;;  %v7325_v15 = vpack.c.bf16 %v7221_v60, %v7217_v12  ;;  %v12450_v42 = vpop.f32.mrf.mxu1 }
 0x625   :  { %v8502_v35 = vpop.f32.mrf.mxu0  ;;  %v7081_v56 = vadd.f32 %v12340_v62, %v12366_v8  ;;  %v7077_v20 = vadd.f32 %v12336_v6, %v12366_v8  ;;  %v7113_v12 = vadd.f32 %v12394_v36, %v12370_v22 }
 0x626   :  { %7847 = vmatprep.mubr.bf16.mxu1 %v7318_v7  ;;  %v7330_v54 = vpack.c.bf16 %v7230_v58, %v7226_v28  ;;  %v12456_v62 = vpop.f32.mrf.mxu1 }
 0x627   :  { %v8503_v33 = vpop.f32.mrf.mxu0  ;;  %7848 = vmatmul.mubr.bf16.gmra.mxu1 %v7317_v14  ;;  %v7225_v55 = vmax.f32 %v7077_v20, 0.0  ;;  %v7254_v51 = vmax.f32 %v7113_v12, 0.0 }
 0x628   :  { %v12422_v31 = vadd.f32 %v8503_v33, %v8502_v35  ;;  %7855 = vmatprep.mubr.bf16.mxu1 %v7322_v3  ;;  %v7229_v35 = vmax.f32 %v7081_v56, 0.0  ;;  %v7234_v33 = vmax.f32 %v7089_v52, 0.0 }
 0x629   :  { %v8505_v1 = vpop.f32.mrf.mxu0 }
 0x62a   :  { %v7329_v6 = vpack.c.bf16 %v7229_v35, %v7225_v55  ;;  %v7334_v39 = vpack.c.bf16 %v7238_v16, %v7234_v33  ;;  %v7123_v55 = vadd.f32 %v12418_v43, %v12370_v22 }
 0x62b   :  { %v8506_v59 = vpop.f32.mrf.mxu0 }
 0x62c   :  { %v12426_v17 = vadd.f32 %v8506_v59, %v8505_v1  ;;  %v12462_v1 = vpop.f32.mrf.mxu1  ;;  %v7087_v59 = vadd.f32 %v12344_v13, %v12366_v8  ;;  %v7101_v13 = vadd.f32 %v12372_v40, %v12366_v8  ;;  %v7262_v63 = vmax.f32 %v7123_v55, 0.0 }
 0x62d   :  { %v8508_v47 = vpop.f32.mrf.mxu0 }
 0x62e   :  { %v12472_v29 = vpop.f32.mrf.mxu1  ;;  %v7233_v10 = vmax.f32 %v7087_v59, 0.0 }
 0x62f   :  { %v8509_v48 = vpop.f32.mrf.mxu0  ;;  %7856 = vmatmul.mubr.bf16.gmra.mxu1 %v7321_v49  ;;  %v7099_v49 = vadd.f32 %v12362_v9, %v12370_v22 }
 0x630   :  { %v12438_v21 = vadd.f32 %v8509_v48, %v8508_v47  ;;  %7863 = vmatprep.mubr.bf16.mxu1 %v7326_v37  ;;  %v7237_v47 = vmax.f32 %v7091_v38, 0.0 }
 0x631   :  { %v8511_v50 = vpop.f32.mrf.mxu0  ;;  %v7242_v57 = vmax.f32 %v7099_v49, 0.0 }
 0x632   :  { %v7333_v60 = vpack.c.bf16 %v7237_v47, %v7233_v10 }
 0x633   :  { %v8512_v11 = vpop.f32.mrf.mxu0  ;;  %v7338_v58 = vpack.c.bf16 %v7246_v4, %v7242_v57 }
 0x634   :  { %v12442_v34 = vadd.f32 %v8512_v11, %v8511_v50  ;;  %v12478_v50 = vpop.f32.mrf.mxu1  ;;  %v7097_v11 = vadd.f32 %v12356_v26, %v12366_v8  ;;  %v7111_v26 = vadd.f32 %v12388_v45, %v12366_v8 }
 0x635   :  { %v8514_v61 = vpop.f32.mrf.mxu0 }
 0x636   :  { %v12488_v40 = vpop.f32.mrf.mxu1  ;;  %v7241_v20 = vmax.f32 %v7097_v11, 0.0 }
 0x637   :  { %v8515_v7 = vpop.f32.mrf.mxu0  ;;  %7864 = vmatmul.mubr.bf16.gmra.mxu1 %v7325_v15  ;;  %v7109_v15 = vadd.f32 %v12386_v23, %v12370_v22 }
 0x638   :  { %v12454_v14 = vadd.f32 %v8515_v7, %v8514_v61  ;;  %7871 = vmatprep.mubr.bf16.mxu1 %v7330_v54  ;;  %v7245_v61 = vmax.f32 %v7101_v13, 0.0  ;;  %v7129_v13 = vadd.f32 %v12434_v19, %v12370_v22  ;;  %v7143_v19 = vadd.f32 %v12478_v50, %v12370_v22 }
 0x639   :  { %v8517_v3 = vpop.f32.mrf.mxu0  ;;  %v7250_v52 = vmax.f32 %v7109_v15, 0.0  ;;  %v7141_v50 = vadd.f32 %v12472_v29, %v12366_v8 }
 0x63a   :  { %v7337_v35 = vpack.c.bf16 %v7245_v61, %v7241_v20  ;;  %v7278_v55 = vmax.f32 %v7143_v19, 0.0 }
 0x63b   :  { %v8518_v53 = vpop.f32.mrf.mxu0  ;;  %v7342_v16 = vpack.c.bf16 %v7254_v51, %v7250_v52 }
 0x63c   :  { %v12458_v27 = vadd.f32 %v8518_v53, %v8517_v3  ;;  %v12494_v3 = vpop.f32.mrf.mxu1  ;;  %v7107_v53 = vadd.f32 %v12380_v44, %v12366_v8  ;;  %v7121_v44 = vadd.f32 %v12408_v5, %v12366_v8 }
 0x63d   :  { %v8520_v25 = vpop.f32.mrf.mxu0 }
 0x63e   :  { %v7150_v45 = vpop.f32.mrf.mxu1  ;;  %v7249_v59 = vmax.f32 %v7107_v53, 0.0  ;;  %v7261_v5 = vmax.f32 %v7121_v44, 0.0 }
 0x63f   :  { %v8521_v18 = vpop.f32.mrf.mxu0  ;;  %7872 = vmatmul.mubr.bf16.gmra.mxu1 %v7329_v6  ;;  %v7119_v6 = vadd.f32 %v12402_v41, %v12370_v22  ;;  %v7133_v41 = vadd.f32 %v12450_v42, %v12370_v22  ;;  %v7266_v42 = vmax.f32 %v7129_v13, 0.0  ;;  %v7151_v29 = vadd.f32 %v7150_v45, %v12366_v8 }
 0x640   :  { %v12470_v2 = vadd.f32 %v8521_v18, %v8520_v25  ;;  %7879 = vmatprep.mubr.bf16.mxu1 %v7334_v39  ;;  %v7253_v25 = vmax.f32 %v7111_v26, 0.0  ;;  %v7139_v26 = vadd.f32 %v12462_v1, %v12370_v22  ;;  %v7149_v1 = vadd.f32 %v12494_v3, %v12370_v22 }
 0x641   :  { %v8523_v37 = vpop.f32.mrf.mxu0  ;;  %v7258_v49 = vmax.f32 %v7119_v6, 0.0  ;;  %v7270_v12 = vmax.f32 %v7133_v41, 0.0  ;;  %v7285_v3 = vmax.f32 %v7151_v29, 0.0 }
 0x642   :  { %v7341_v43 = vpack.c.bf16 %v7253_v25, %v7249_v59  ;;  %v7277_v59 = vmax.f32 %v7141_v50, 0.0  ;;  %v7282_v44 = vmax.f32 %v7149_v1, 0.0 }
 0x643   :  { %v8524_v48 = vpop.f32.mrf.mxu0  ;;  %v7346_v10 = vpack.c.bf16 %v7262_v63, %v7258_v49  ;;  %v7350_v20 = vpack.c.bf16 %v7270_v12, %v7266_v42 }
 0x644   :  { %v12474_v30 = vadd.f32 %v8524_v48, %v8523_v37  ;;  %v7152_v37 = vpop.f32.mrf.mxu1  ;;  %v7117_v48 = vadd.f32 %v12396_v0, %v12366_v8 }
 0x645   :  { %v8526_v9 = vpop.f32.mrf.mxu0 }
 0x646   :  { %v12512_v57 = vpop.f32.mrf.mxu1  ;;  %v7257_v11 = vmax.f32 %v7117_v48, 0.0 }
 0x647   :  { %v8527_v28 = vpop.f32.mrf.mxu0  ;;  %7880 = vmatmul.mubr.bf16.gmra.mxu1 %v7333_v60  ;;  %v7157_v42 = vadd.f32 %v12512_v57, %v12366_v8 }
 0x648   :  { %v12486_v56 = vadd.f32 %v8527_v28, %v8526_v9  ;;  %7887 = vmatprep.mubr.bf16.mxu1 %v7338_v58  ;;  %v7158_v28 = vpop.f32.mrf.mxu1  ;;  %v7345_v0 = vpack.c.bf16 %v7261_v5, %v7257_v11 }
 0x649   :  { %v8529_v54 = vpop.f32.mrf.mxu0  ;;  %v7159_v48 = vadd.f32 %v7158_v28, %v12370_v22 }
 0x64a   :  { %v7160_v52 = vpop.f32.mrf.mxu1 }
 0x64b   :  { %v8530_v7 = vpop.f32.mrf.mxu0  ;;  %v7161_v11 = vadd.f32 %v7160_v52, %v12366_v8 }
 0x64c   :  { %v12490_v36 = vadd.f32 %v8530_v7, %v8529_v54  ;;  %v7131_v54 = vadd.f32 %v12440_v32, %v12366_v8  ;;  %v7127_v7 = vadd.f32 %v12424_v24, %v12366_v8  ;;  %v7162_v53 = vpop.f32.mrf.mxu1  ;;  %v7153_v24 = vadd.f32 %v7152_v37, %v12370_v22 }
 0x64d   :  { %v8532_v23 = vpop.f32.mrf.mxu0  ;;  %v7163_v37 = vadd.f32 %v7162_v53, %v12370_v22  ;;  %v7293_v28 = vmax.f32 %v7161_v11, 0.0 }
 0x64e   :  { %v7265_v32 = vmax.f32 %v7127_v7, 0.0  ;;  %v7166_v63 = vpop.f32.mrf.mxu1 }
 0x64f   :  { %v8533_v33 = vpop.f32.mrf.mxu0  ;;  %7888 = vmatmul.mubr.bf16.gmra.mxu1 %v7337_v35  ;;  %v7167_v52 = vadd.f32 %v7166_v63, %v12366_v8 }
 0x650   :  { %v12502_v38 = vadd.f32 %v8533_v33, %v8532_v23  ;;  %7895 = vmatprep.mubr.bf16.mxu1 %v7342_v16  ;;  %v7269_v16 = vmax.f32 %v7131_v54, 0.0  ;;  %v7274_v33 = vmax.f32 %v7139_v26, 0.0  ;;  %v7289_v54 = vmax.f32 %v7157_v42, 0.0 }
 0x651   :  { %v8535_v39 = vpop.f32.mrf.mxu0  ;;  %v7297_v26 = vmax.f32 %v7167_v52, 0.0 }
 0x652   :  { %v7349_v6 = vpack.c.bf16 %v7269_v16, %v7265_v32  ;;  %v7354_v25 = vpack.c.bf16 %v7278_v55, %v7274_v33 }
 0x653   :  { %v8536_v18 = vpop.f32.mrf.mxu0 }
 0x654   :  { %v12504_v47 = vadd.f32 %v8536_v18, %v8535_v39  ;;  %v7137_v39 = vadd.f32 %v12456_v62, %v12366_v8  ;;  %v7286_v18 = vmax.f32 %v7153_v24, 0.0  ;;  %v7147_v62 = vadd.f32 %v12488_v40, %v12366_v8 }
 0x655   :  { %v8538_v4 = vpop.f32.mrf.mxu0 }
 0x656   :  { %v7273_v49 = vmax.f32 %v7137_v39, 0.0  ;;  %v7281_v13 = vmax.f32 %v7147_v62, 0.0 }
 0x657   :  { %v8539_v60 = vpop.f32.mrf.mxu0  ;;  %7896 = vmatmul.mubr.bf16.gmra.mxu1 %v7341_v43  ;;  %v7168_v43 = vpop.f32.mrf.mxu1 }
 0x658   :  { %v12516_v9 = vadd.f32 %v8539_v60, %v8538_v4  ;;  %7903 = vmatprep.mubr.bf16.mxu1 %v7346_v10  ;;  %v7353_v4 = vpack.c.bf16 %v7277_v59, %v7273_v49  ;;  %v7358_v10 = vpack.c.bf16 %v7286_v18, %v7282_v44  ;;  %v7294_v60 = vmax.f32 %v7163_v37, 0.0 }
 0x659   :  { %v8541_v58 = vpop.f32.mrf.mxu0  ;;  %v7170_v41 = vpop.f32.mrf.mxu1  ;;  %v7357_v12 = vpack.c.bf16 %v7285_v3, %v7281_v13  ;;  %v7169_v40 = vadd.f32 %v7168_v43, %v12370_v22 }
 0x65a   :  { %v7171_v19 = vadd.f32 %v7170_v41, %v12366_v8 }
 0x65b   :  { %v8542_v15 = vpop.f32.mrf.mxu0  ;;  %v7172_v5 = vpop.f32.mrf.mxu1 }
 0x65c   :  { %v12518_v61 = vadd.f32 %v8542_v15, %v8541_v58  ;;  %v7290_v58 = vmax.f32 %v7159_v48, 0.0  ;;  %v7173_v15 = vadd.f32 %v7172_v5, %v12370_v22  ;;  %v12554_v22 = vld [vmem:[%s12735_s7] ss:$0 sm:$0xff]  ;;  %s9059_s7 = smov [#allocation8]  }
 0x65d   :  { %v8544_v51 = vpop.f32.mrf.mxu0  ;;  %v7665_v8 = vadd.f32 %v12410_v46, %v12554_v22  ;;  %v7668_v39 = vadd.f32 %v12422_v31, %v12554_v22  ;;  %v7673_v46 = vadd.f32 %v12426_v17, %v12554_v22  ;;  %v7676_v31 = vadd.f32 %v12438_v21, %v12554_v22  ;;  %s8069_s20 = sshll.u32 %s9059_s7, 4  ;;  %s8070_s20 = int_to_ptr.vmem [resolvable:$true] %s8069_s20 }
 0x65e   :  { %v7362_v45 = vpack.c.bf16 %v7294_v60, %v7290_v58  ;;  %v7681_v17 = vadd.f32 %v12442_v34, %v12554_v22  ;;  %v7684_v21 = vadd.f32 %v12454_v14, %v12554_v22  ;;  %v7689_v34 = vadd.f32 %v12458_v27, %v12554_v22  ;;  %s9022_s2 = scalar_lea.vmem %s8070_s20, 2048  ;;  %p9027_p2 = scmp.lt.s32.totalorder %s8070_s20, %s8070_s20 }
 0x65f   :  { %v8545_v35 = vpop.f32.mrf.mxu0  ;;  %7904 = vmatmul.mubr.bf16.gmra.mxu1 %v7345_v0  ;;  %v7302_v0 = vmax.f32 %v7173_v15, 0.0  ;;  %v7692_v14 = vadd.f32 %v12470_v2, %v12554_v22  ;;  %v7697_v27 = vadd.f32 %v12474_v30, %v12554_v22  ;;  %v7700_v2 = vadd.f32 %v12486_v56, %v12554_v22  ;;  %p9023_p1 = scmp.ne.s32.totalorder %s8070_s20, %s9022_s2  ;;  %p9028_p3 = scmp.lt.s32.totalorder %s9022_s2, %s9022_s2 }
 0x660   :  { %v12528_v23 = vadd.f32 %v8545_v35, %v8544_v51  ;;  %7911 = vmatprep.mubr.bf16.mxu1 %v7350_v20  ;;  %v7298_v51 = vmax.f32 %v7169_v40, 0.0  ;;  %v7361_v20 = vpack.c.bf16 %v7293_v28, %v7289_v54  ;;  %v7301_v35 = vmax.f32 %v7171_v19, 0.0 }
 0x661   :  { %v12549_v57 = vpop.f32.mrf.mxu0  ;;  %v7705_v30 = vadd.f32 %v12490_v36, %v12554_v22  ;;  %v7708_v56 = vadd.f32 %v12502_v38, %v12554_v22  ;;  %v7713_v36 = vadd.f32 %v12504_v47, %v12554_v22  ;;  %v7716_v38 = vadd.f32 %v12516_v9, %v12554_v22  ;;  %p9029_p4 = por %p9028_p3, %p9027_p2 }
 0x662   :  { %v7366_v7 = vpack.c.bf16 %v7302_v0, %v7298_v51  ;;  %v7365_v16 = vpack.c.bf16 %v7301_v35, %v7297_v26  ;;  %v7721_v47 = vadd.f32 %v12518_v61, %v12554_v22  ;;  %v7724_v9 = vadd.f32 %v12528_v23, %v12554_v22 }
 0x663   :  { %v12556_v32 = vpop.f32.mrf.mxu0  ;;  %p9030_p5 = pnand %p9029_p4, %p9023_p1 }
 0x665   :  { %v12560_v50 = vpop.f32.mrf.mxu0 }
 0x667   :  { %7912 = vmatmul.mubr.bf16.gmra.mxu1 %v7349_v6  ;;  %v12566_v59 = vpop.f32.mrf.mxu0 }
 0x668   :  { %7919 = vmatprep.mubr.bf16.mxu1 %v7354_v25 }
 0x66f   :  { %7920 = vmatmul.mubr.bf16.gmra.mxu1 %v7353_v4  ;;  %v12572_v4 = vpop.f32.mrf.mxu0 }
 0x670   :  { %7927 = vmatprep.mubr.bf16.mxu1 %v7358_v10 }
 0x671   :  { %v12578_v41 = vpop.f32.mrf.mxu0 }
 0x673   :  { %v12584_v5 = vpop.f32.mrf.mxu0 }
 0x675   :  { %v12590_v15 = vpop.f32.mrf.mxu0 }
 0x677   :  { %7928 = vmatmul.mubr.bf16.gmra.mxu1 %v7357_v12  ;;  %v12596_v54 = vpop.f32.mrf.mxu0 }
 0x678   :  { %7935 = vmatprep.mubr.bf16.mxu1 %v7362_v45 }
 0x679   :  { %v12602_v52 = vpop.f32.mrf.mxu0 }
 0x67f   :  { %7936 = vmatmul.mubr.bf16.gmra.mxu1 %v7361_v20 }
 0x680   :  { %7943 = vmatprep.mubr.bf16.mxu1 %v7366_v7 }
 0x687   :  { %7944 = vmatmul.mubr.bf16.gmra.mxu1 %v7365_v16 }
 0x6cf   :  { %v8611_v55 = vpop.f32.mrf.mxu1 }
 0x6d1   :  { %v8612_v53 = vpop.f32.mrf.mxu1 }
 0x6d2   :  { %v8613_v33 = vadd.f32 %v8612_v53, %v8611_v55  ;;  %v12608_v53 = vpop.f32.mrf.mxu0 }
 0x6d3   :  { %v8614_v6 = vpop.f32.mrf.mxu1 }
 0x6d4   :  { %v12562_v25 = vadd.f32 %v8613_v33, %v7665_v8 }
 0x6d5   :  { %v8615_v24 = vpop.f32.mrf.mxu1 }
 0x6d6   :  { %v8616_v63 = vadd.f32 %v8615_v24, %v8614_v6 }
 0x6d7   :  { %v8617_v1 = vpop.f32.mrf.mxu1 }
 0x6d8   :  { %v12568_v18 = vadd.f32 %v8616_v63, %v7668_v39  ;;  %v12614_v39 = vpop.f32.mrf.mxu0 }
 0x6d9   :  { %v8618_v49 = vpop.f32.mrf.mxu1 }
 0x6da   :  { %v8619_v43 = vadd.f32 %v8618_v49, %v8617_v1 }
 0x6db   :  { %v8620_v44 = vpop.f32.mrf.mxu1 }
 0x6dc   :  { %v12574_v29 = vadd.f32 %v8619_v43, %v7673_v46  ;;  %v12620_v43 = vpop.f32.mrf.mxu0 }
 0x6dd   :  { %v8621_v10 = vpop.f32.mrf.mxu1 }
 0x6de   :  { %v8622_v37 = vadd.f32 %v8621_v10, %v8620_v44 }
 0x6df   :  { %v8623_v62 = vpop.f32.mrf.mxu1 }
 0x6e0   :  { %v12580_v48 = vadd.f32 %v8622_v37, %v7676_v31 }
 0x6e1   :  { %v8624_v3 = vpop.f32.mrf.mxu1 }
 0x6e2   :  { %v8625_v60 = vadd.f32 %v8624_v3, %v8623_v62  ;;  %v12626_v62 = vpop.f32.mrf.mxu0 }
 0x6e3   :  { %v8626_v13 = vpop.f32.mrf.mxu1 }
 0x6e4   :  { %v12586_v58 = vadd.f32 %v8625_v60, %v7681_v17 }
 0x6e5   :  { %v8627_v12 = vpop.f32.mrf.mxu1 }
 0x6e6   :  { %v8628_v11 = vadd.f32 %v8627_v12, %v8626_v13  ;;  %v12632_v12 = vpop.f32.mrf.mxu0 }
 0x6e7   :  { %v8629_v45 = vpop.f32.mrf.mxu1 }
 0x6e8   :  { %v12592_v42 = vadd.f32 %v8628_v11, %v7684_v21 }
 0x6e9   :  { %v8630_v40 = vpop.f32.mrf.mxu1 }
 0x6ea   :  { %v8631_v28 = vadd.f32 %v8630_v40, %v8629_v45 }
 0x6eb   :  { %v8632_v0 = vpop.f32.mrf.mxu1 }
 0x6ec   :  { %v12598_v51 = vadd.f32 %v8631_v28, %v7689_v34  ;;  %v12638_v34 = vpop.f32.mrf.mxu0 }
 0x6ed   :  { %v8633_v20 = vpop.f32.mrf.mxu1 }
 0x6ee   :  { %v8634_v19 = vadd.f32 %v8633_v20, %v8632_v0 }
 0x6ef   :  { %v8635_v7 = vpop.f32.mrf.mxu1 }
 0x6f0   :  { %v12604_v35 = vadd.f32 %v8634_v19, %v7692_v14  ;;  %v12644_v19 = vpop.f32.mrf.mxu0 }
 0x6f1   :  { %v8636_v26 = vpop.f32.mrf.mxu1 }
 0x6f2   :  { %v8637_v16 = vadd.f32 %v8636_v26, %v8635_v7 }
 0x6f3   :  { %v8638_v55 = vpop.f32.mrf.mxu1 }
 0x6f4   :  { %v12610_v8 = vadd.f32 %v8637_v16, %v7697_v27  ;;  %v8549_v27 = vadd.f32 %v12556_v32, %v12549_v57  ;;  %v8555_v57 = vadd.f32 %v12578_v41, %v12572_v4 }
 0x6f5   :  { %v8639_v33 = vpop.f32.mrf.mxu1 }
 0x6f6   :  { %v8640_v6 = vadd.f32 %v8639_v33, %v8638_v55  ;;  %v12652_v33 = vpop.f32.mrf.mxu0 }
 0x6f7   :  { %v8641_v24 = vpop.f32.mrf.mxu1 }
 0x6f8   :  { %v12616_v63 = vadd.f32 %v8640_v6, %v7700_v2  ;;  %v7729_v6 = vadd.f32 %v8549_v27, %v12554_v22 }
 0x6f9   :  { %v8642_v1 = vpop.f32.mrf.mxu1 }
 0x6fa   :  { %v8643_v49 = vadd.f32 %v8642_v1, %v8641_v24  ;;  %v8552_v24 = vadd.f32 %v12566_v59, %v12560_v50  ;;  %v7737_v59 = vadd.f32 %v8555_v57, %v12554_v22 }
 0x6fb   :  { %v8644_v46 = vpop.f32.mrf.mxu1 }
 0x6fc   :  { %v12622_v44 = vadd.f32 %v8643_v49, %v7705_v30  ;;  %v12659_v49 = vpop.f32.mrf.mxu0 }
 0x6fd   :  { %v8645_v10 = vpop.f32.mrf.mxu1 }
 0x6fe   :  { %v8646_v31 = vadd.f32 %v8645_v10, %v8644_v46  ;;  %v7732_v46 = vadd.f32 %v8552_v24, %v12554_v22  ;;  %v7952_v10 = vmax.f32 %v12562_v25, 0.0 }
 0x6ff   :  { %v8647_v37 = vpop.f32.mrf.mxu1 }
 0x700   :  { %v12628_v3 = vadd.f32 %v8646_v31, %v7708_v56 }
 0x701   :  { %v8648_v17 = vpop.f32.mrf.mxu1 }
 0x702   :  { %v8649_v60 = vadd.f32 %v8648_v17, %v8647_v37  ;;  %v12665_v17 = vpop.f32.mrf.mxu0 }
 0x703   :  { %v8650_v13 = vpop.f32.mrf.mxu1 }
 0x704   :  { %v12634_v21 = vadd.f32 %v8649_v60, %v7713_v36  ;;  %v8558_v60 = vadd.f32 %v12590_v15, %v12584_v5  ;;  %v7954_v5 = vmax.f32 %v12574_v29, 0.0 }
 0x705   :  { %v8651_v11 = vpop.f32.mrf.mxu1 }
 0x706   :  { %v8652_v45 = vadd.f32 %v8651_v11, %v8650_v13  ;;  %v7953_v13 = vmax.f32 %v12568_v18, 0.0 }
 0x707   :  { %v8653_v40 = vpop.f32.mrf.mxu1 }
 0x708   :  { %v12640_v28 = vadd.f32 %v8652_v45, %v7716_v38 }
 0x709   :  { %v8654_v0 = vpop.f32.mrf.mxu1 }
 0x70a   :  { %v8655_v20 = vadd.f32 %v8654_v0, %v8653_v40  ;;  %v12671_v40 = vpop.f32.mrf.mxu0 }
 0x70b   :  { %v8656_v14 = vpop.f32.mrf.mxu1 }
 0x70c   :  { %v12646_v7 = vadd.f32 %v8655_v20, %v7721_v47 }
 0x70d   :  { %v8657_v26 = vpop.f32.mrf.mxu1 }
 0x70e   :  { %v8658_v16 = vadd.f32 %v8657_v26, %v8656_v14  ;;  %v7740_v14 = vadd.f32 %v8558_v60, %v12554_v22  ;;  %v8561_v26 = vadd.f32 %v12602_v52, %v12596_v54  ;;  %v7955_v54 = vmax.f32 %v12580_v48, 0.0 }
 0x70f   :  { %v8659_v55 = vpop.f32.mrf.mxu1 }
 0x710   :  { %v12654_v2 = vadd.f32 %v8658_v16, %v7724_v9 }
 0x711   :  { %v8660_v61 = vpop.f32.mrf.mxu1 }
 0x712   :  { %v8661_v1 = vadd.f32 %v8660_v61, %v8659_v55  ;;  %v12677_v61 = vpop.f32.mrf.mxu0 }
 0x713   :  { %v8662_v30 = vpop.f32.mrf.mxu1 }
 0x714   :  { %v7890_v23 = vadd.f32 %v8661_v1, %v7729_v6 }
 0x715   :  { %v8663_v32 = vpop.f32.mrf.mxu1 }
 0x716   :  { %v7968_v56 = vmax.f32 %v7890_v23, 0.0  ;;  %v8664_v31 = vadd.f32 %v8663_v32, %v8662_v30  ;;  %v7745_v30 = vadd.f32 %v8561_v26, %v12554_v22  ;;  %v8564_v23 = vadd.f32 %v12614_v39, %v12608_v53 }
 0x717   :  { %v8665_v37 = vpop.f32.mrf.mxu1  ;;  %v7956_v53 = vmax.f32 %v12586_v58, 0.0 }
 0x718   :  { %v7984_v36 = vsub.f32 %v7952_v10, %v7968_v56  ;;  %v7893_v50 = vadd.f32 %v8664_v31, %v7732_v46  ;;  %v8016_v11 = vmul.f32 %v7968_v56, %v7952_v10  ;;  %v12683_v56 = vpop.f32.mrf.mxu0 }
 0x719   :  { %v8666_v4 = vpop.f32.mrf.mxu1 }
 0x71a   :  { %v8000_v41 = vand.u32 2147483647, %v7984_v36  ;;  %v7969_v38 = vmax.f32 %v7893_v50, 0.0  ;;  %v8667_v45 = vadd.f32 %v8666_v4, %v8665_v37  ;;  %v7748_v50 = vadd.f32 %v8564_v23, %v12554_v22 }
 0x71b   :  { %v8668_v25 = vpop.f32.mrf.mxu1 }
 0x71c   :  { %v8032_v0 = vadd.f32 %v8016_v11, %v8000_v41  ;;  %v7985_v47 = vsub.f32 %v7953_v13, %v7969_v38  ;;  %v7898_v20 = vadd.f32 %v8667_v45, %v7737_v59  ;;  %v8017_v9 = vmul.f32 %v7969_v38, %v7953_v13  ;;  %v8581_v11 = vpop.f32.mrf.mxu0 }
 0x71d   :  { %v8669_v15 = vpop.f32.mrf.mxu1  ;;  %v8567_v59 = vadd.f32 %v12626_v62, %v12620_v43  ;;  %v7957_v43 = vmax.f32 %v12592_v42, 0.0 }
 0x71e   :  { %8048 = vst [vmem:[#allocation8] sm:$0xff] %v8032_v0  ;;  %v8001_v18 = vand.u32 2147483647, %v7985_v47  ;;  %v7970_v27 = vmax.f32 %v7898_v20, 0.0  ;;  %v8670_v16 = vadd.f32 %v8669_v15, %v8668_v25  ;;  %v8570_v47 = vadd.f32 %v12638_v34, %v12632_v12  ;;  %v12693_v58 = vpop.f32.mrf.mxu0 }
 0x71f   :  { %v8671_v55 = vpop.f32.mrf.mxu1  ;;  %v7753_v0 = vadd.f32 %v8567_v59, %v12554_v22  ;;  %v7958_v12 = vmax.f32 %v12598_v51, 0.0 }
 0x720   :  { %v8033_v6 = vadd.f32 %v8017_v9, %v8001_v18  ;;  %v7986_v24 = vsub.f32 %v7954_v5, %v7970_v27  ;;  %v7901_v1 = vadd.f32 %v8670_v16, %v7740_v14  ;;  %v8018_v57 = vmul.f32 %v7970_v27, %v7954_v5  ;;  %v8584_v34 = vpop.f32.mrf.mxu0 }
 0x721   :  { %v8672_v29 = vpop.f32.mrf.mxu1  ;;  %v7756_v16 = vadd.f32 %v8570_v47, %v12554_v22 }
 0x722   :  { %8049 = vst [vmem:[#allocation8 + $0x8] sm:$0xff] %v8033_v6  ;;  %v8002_v52 = vand.u32 2147483647, %v7986_v24  ;;  %v7971_v32 = vmax.f32 %v7901_v1, 0.0  ;;  %v8673_v46 = vadd.f32 %v8672_v29, %v8671_v55  ;;  %v8573_v55 = vadd.f32 %v12652_v33, %v12644_v19  ;;  %v8586_v51 = vpop.f32.mrf.mxu0 }
 0x723   :  { %v8674_v10 = vpop.f32.mrf.mxu1  ;;  %v7959_v19 = vmax.f32 %v12604_v35, 0.0 }
 0x724   :  { %v8034_v31 = vadd.f32 %v8018_v57, %v8002_v52  ;;  %v7987_v37 = vsub.f32 %v7955_v54, %v7971_v32  ;;  %v7906_v36 = vadd.f32 %v8673_v46, %v7745_v30  ;;  %v8019_v60 = vmul.f32 %v7971_v32, %v7955_v54  ;;  %v8587_v35 = vpop.f32.mrf.mxu0 }
 0x725   :  { %v8675_v48 = vpop.f32.mrf.mxu1  ;;  %v7761_v57 = vadd.f32 %v8573_v55, %v12554_v22  ;;  %v8576_v32 = vadd.f32 %v12665_v17, %v12659_v49  ;;  %v7960_v49 = vmax.f32 %v12610_v8, 0.0  ;;  %v7962_v55 = vmax.f32 %v12622_v44, 0.0 }
 0x726   :  { %8050 = vst [vmem:[#allocation8 + $0x10] sm:$0xff] %v8034_v31  ;;  %v8003_v39 = vand.u32 2147483647, %v7987_v37  ;;  %v7972_v13 = vmax.f32 %v7906_v36, 0.0  ;;  %v8676_v4 = vadd.f32 %v8675_v48, %v8674_v10 }
 0x727   :  { %v8677_v41 = vpop.f32.mrf.mxu1  ;;  %v7764_v48 = vadd.f32 %v8576_v32, %v12554_v22 }
 0x728   :  { %v8035_v38 = vadd.f32 %v8019_v60, %v8003_v39  ;;  %v7988_v45 = vsub.f32 %v7956_v53, %v7972_v13  ;;  %v7909_v25 = vadd.f32 %v8676_v4, %v7748_v50  ;;  %v8020_v14 = vmul.f32 %v7972_v13, %v7956_v53 }
 0x729   :  { %v8678_v62 = vpop.f32.mrf.mxu1  ;;  %v8579_v39 = vadd.f32 %v12677_v61, %v12671_v40  ;;  %v8589_v61 = vpop.f32.mrf.mxu0 }
 0x72a   :  { %8051 = vst [vmem:[#allocation8 + $0x18] sm:$0xff] %v8035_v38  ;;  %v8004_v20 = vand.u32 2147483647, %v7988_v45  ;;  %v7973_v26 = vmax.f32 %v7909_v25, 0.0  ;;  %v8679_v5 = vadd.f32 %v8678_v62, %v8677_v41  ;;  %v7961_v62 = vmax.f32 %v12616_v63, 0.0 }
 0x72b   :  { %v8680_v15 = vpop.f32.mrf.mxu1  ;;  %v7769_v47 = vadd.f32 %v8579_v39, %v12554_v22 }
 0x72c   :  { %v8036_v18 = vadd.f32 %v8020_v14, %v8004_v20  ;;  %v7989_v9 = vsub.f32 %v7957_v43, %v7973_v26  ;;  %v7914_v27 = vadd.f32 %v8679_v5, %v7753_v0  ;;  %v8021_v24 = vmul.f32 %v7973_v26, %v7957_v43 }
 0x72d   :  { %v8681_v42 = vpop.f32.mrf.mxu1  ;;  %v8582_v43 = vadd.f32 %v8581_v11, %v12683_v56  ;;  %v8590_v11 = vpop.f32.mrf.mxu0 }
 0x72e   :  { %8052 = vst [vmem:[#allocation8 + $0x20] sm:$0xff] %v8036_v18  ;;  %v8005_v6 = vand.u32 2147483647, %v7989_v9  ;;  %v7974_v1 = vmax.f32 %v7914_v27, 0.0  ;;  %v8682_v30 = vadd.f32 %v8681_v42, %v8680_v15 }
 0x72f   :  { %v8683_v23 = vpop.f32.mrf.mxu1  ;;  %v7772_v27 = vadd.f32 %v8582_v43, %v12554_v22 }
 0x730   :  { %v8037_v54 = vadd.f32 %v8021_v24, %v8005_v6  ;;  %v7990_v29 = vsub.f32 %v7958_v12, %v7974_v1  ;;  %v7917_v52 = vadd.f32 %v8682_v30, %v7756_v16  ;;  %v8022_v10 = vmul.f32 %v7974_v1, %v7958_v12 }
 0x731   :  { %v8684_v33 = vpop.f32.mrf.mxu1  ;;  %v8585_v16 = vadd.f32 %v8584_v34, %v12693_v58  ;;  %v8592_v58 = vpop.f32.mrf.mxu0 }
 0x732   :  { %8053 = vst [vmem:[#allocation8 + $0x28] sm:$0xff] %v8037_v54  ;;  %v8006_v46 = vand.u32 2147483647, %v7990_v29  ;;  %v7975_v31 = vmax.f32 %v7917_v52, 0.0  ;;  %v8685_v37 = vadd.f32 %v8684_v33, %v8683_v23  ;;  %v8588_v29 = vadd.f32 %v8587_v35, %v8586_v51 }
 0x733   :  { %v8686_v36 = vpop.f32.mrf.mxu1  ;;  %v7777_v54 = vadd.f32 %v8585_v16, %v12554_v22  ;;  %v7963_v52 = vmax.f32 %v12628_v3, 0.0  ;;  %v8593_v51 = vpop.f32.mrf.mxu0 }
 0x734   :  { %v8038_v50 = vadd.f32 %v8022_v10, %v8006_v46  ;;  %v7991_v59 = vsub.f32 %v7959_v19, %v7975_v31  ;;  %v7922_v53 = vadd.f32 %v8685_v37, %v7761_v57  ;;  %v8023_v13 = vmul.f32 %v7975_v31, %v7959_v19 }
 0x735   :  { %v8687_v17 = vpop.f32.mrf.mxu1  ;;  %v7780_v37 = vadd.f32 %v8588_v29, %v12554_v22 }
 0x736   :  { %8054 = vst [vmem:[#allocation8 + $0x30] sm:$0xff] %v8038_v50  ;;  %v8007_v60 = vand.u32 2147483647, %v7991_v59  ;;  %v7976_v4 = vmax.f32 %v7922_v53, 0.0  ;;  %v8688_v41 = vadd.f32 %v8687_v17, %v8686_v36  ;;  %v8591_v36 = vadd.f32 %v8590_v11, %v8589_v61 }
 0x737   :  { %v8689_v38 = vpop.f32.mrf.mxu1  ;;  %v7964_v50 = vmax.f32 %v12634_v21, 0.0 }
 0x738   :  { %v8039_v45 = vadd.f32 %v8023_v13, %v8007_v60  ;;  %v7992_v25 = vsub.f32 %v7960_v49, %v7976_v4  ;;  %v7925_v0 = vadd.f32 %v8688_v41, %v7764_v48  ;;  %v8024_v20 = vmul.f32 %v7976_v4, %v7960_v49 }
 0x739   :  { %v8690_v40 = vpop.f32.mrf.mxu1  ;;  %v7785_v13 = vadd.f32 %v8591_v36, %v12554_v22  ;;  %v8594_v4 = vadd.f32 %v8593_v51, %v8592_v58  ;;  %v7965_v41 = vmax.f32 %v12640_v28, 0.0 }
 0x73a   :  { %8055 = vst [vmem:[#allocation8 + $0x38] sm:$0xff] %v8039_v45  ;;  %v8008_v8 = vand.u32 2147483647, %v7992_v25  ;;  %v7977_v14 = vmax.f32 %v7925_v0, 0.0  ;;  %v8691_v26 = vadd.f32 %v8690_v40, %v8689_v38 }
 0x73b   :  { %v8692_v5 = vpop.f32.mrf.mxu1  ;;  %v7788_v61 = vadd.f32 %v8594_v4, %v12554_v22 }
 0x73c   :  { %v8040_v15 = vadd.f32 %v8024_v20, %v8008_v8  ;;  %v7993_v18 = vsub.f32 %v7961_v62, %v7977_v14  ;;  %v7930_v9 = vadd.f32 %v8691_v26, %v7769_v47  ;;  %v8025_v12 = vmul.f32 %v7977_v14, %v7961_v62 }
 0x73d   :  { %v8693_v56 = vpop.f32.mrf.mxu1  ;;  %v7966_v8 = vmax.f32 %v12646_v7, 0.0 }
 0x73e   :  { %8056 = vst [vmem:[#allocation8 + $0x40] sm:$0xff] %v8040_v15  ;;  %v8009_v63 = vand.u32 2147483647, %v7993_v18  ;;  %v7978_v42 = vmax.f32 %v7930_v9, 0.0  ;;  %v8694_v6 = vadd.f32 %v8693_v56, %v8692_v5 }
 0x73f   :  { %v8695_v24 = vpop.f32.mrf.mxu1 }
 0x740   :  { %v8041_v1 = vadd.f32 %v8025_v12, %v8009_v63  ;;  %v7994_v30 = vsub.f32 %v7962_v55, %v7978_v42  ;;  %v7933_v23 = vadd.f32 %v8694_v6, %v7772_v27  ;;  %v8026_v34 = vmul.f32 %v7978_v42, %v7962_v55 }
 0x741   :  { %v8696_v57 = vpop.f32.mrf.mxu1  ;;  %v7967_v27 = vmax.f32 %v12654_v2, 0.0 }
 0x742   :  { %8057 = vst [vmem:[#allocation8 + $0x48] sm:$0xff] %v8041_v1  ;;  %v8010_v44 = vand.u32 2147483647, %v7994_v30  ;;  %v7979_v32 = vmax.f32 %v7933_v23, 0.0  ;;  %v8697_v19 = vadd.f32 %v8696_v57, %v8695_v24 }
 0x743   :  { %v8698_v33 = vpop.f32.mrf.mxu1 }
 0x744   :  { %v8042_v46 = vadd.f32 %v8026_v34, %v8010_v44  ;;  %v7995_v10 = vsub.f32 %v7963_v52, %v7979_v32  ;;  %v7938_v31 = vadd.f32 %v8697_v19, %v7777_v54  ;;  %v8027_v53 = vmul.f32 %v7979_v32, %v7963_v52 }
 0x745   :  { %v8699_v59 = vpop.f32.mrf.mxu1 }
 0x746   :  { %8058 = vst [vmem:[#allocation8 + $0x50] sm:$0xff] %v8042_v46  ;;  %v8011_v3 = vand.u32 2147483647, %v7995_v10  ;;  %v7980_v48 = vmax.f32 %v7938_v31, 0.0  ;;  %v8700_v39 = vadd.f32 %v8699_v59, %v8698_v33 }
 0x747   :  { %v8701_v49 = vpop.f32.mrf.mxu1 }
 0x748   :  { %v8043_v17 = vadd.f32 %v8027_v53, %v8011_v3  ;;  %v7996_v35 = vsub.f32 %v7964_v50, %v7980_v48  ;;  %v7941_v60 = vadd.f32 %v8700_v39, %v7780_v37  ;;  %v8028_v21 = vmul.f32 %v7980_v48, %v7964_v50 }
 0x749   :  { %v8702_v38 = vpop.f32.mrf.mxu1 }
 0x74a   :  { %8059 = vst [vmem:[#allocation8 + $0x58] sm:$0xff] %v8043_v17  ;;  %v8012_v45 = vand.u32 2147483647, %v7996_v35  ;;  %v7981_v25 = vmax.f32 %v7941_v60, 0.0  ;;  %v8703_v0 = vadd.f32 %v8702_v38, %v8701_v49 }
 0x74b   :  { %v8704_v47 = vpop.f32.mrf.mxu1 }
 0x74c   :  { %v8044_v43 = vadd.f32 %v8028_v21, %v8012_v45  ;;  %v7997_v62 = vsub.f32 %v7965_v41, %v7981_v25  ;;  %v7946_v40 = vadd.f32 %v8703_v0, %v7785_v13  ;;  %v8029_v26 = vmul.f32 %v7981_v25, %v7965_v41 }
 0x74d   :  { %v8705_v20 = vpop.f32.mrf.mxu1 }
 0x74e   :  { %8060 = vst [vmem:[#allocation8 + $0x60] sm:$0xff] %v8044_v43  ;;  %v8013_v14 = vand.u32 2147483647, %v7997_v62  ;;  %v7982_v5 = vmax.f32 %v7946_v40, 0.0  ;;  %v8706_v28 = vadd.f32 %v8705_v20, %v8704_v47 }
 0x750   :  { %v8045_v15 = vadd.f32 %v8029_v26, %v8013_v14  ;;  %v7998_v18 = vsub.f32 %v7966_v8, %v7982_v5  ;;  %v7949_v9 = vadd.f32 %v8706_v28, %v7788_v61  ;;  %v8030_v55 = vmul.f32 %v7982_v5, %v7966_v8 }
 0x752   :  { %8061 = vst [vmem:[#allocation8 + $0x68] sm:$0xff] %v8045_v15  ;;  %v8014_v16 = vand.u32 2147483647, %v7998_v18  ;;  %v7983_v56 = vmax.f32 %v7949_v9, 0.0 }
 0x754   :  { %v8046_v11 = vadd.f32 %v8030_v55, %v8014_v16  ;;  %v7999_v63 = vsub.f32 %v7967_v27, %v7983_v56  ;;  %v8031_v7 = vmul.f32 %v7983_v56, %v7967_v27 }
 0x756   :  { %8062 = vst [vmem:[#allocation8 + $0x70] sm:$0xff] %v8046_v11  ;;  %v8015_v22 = vand.u32 2147483647, %v7999_v63 }
 0x758   :  { %v8047_v12 = vadd.f32 %v8031_v7, %v8015_v22 }
 0x75a   :  { %8063 = vst [vmem:[#allocation8 + $0x78] sm:$0xff] %v8047_v12 }
 0x75b   :  { %9033 = shalt.err (!%p9030_p5)
}
 0x75c   :  { %8075 = dma.vmem_to_hbm [thread:$0]  %s8070_s20, 2048, %s12736_s8, [#allocation4], %s9049_s30, %s9049_s30, %s9050_s9  }
 0x75d   :  { %9046 = dma.done.wait [#allocation4], 2048  }
 0x75e   :  { %9047 = vsyncadd [#allocation4], 4294965248 }
 0x75f   :  { %8079 = vsyncpa [#allocation3], 1 }
 0x760   :  { %8080 = vsyncpa [#allocation6], 1 }
 0x761   :  { %8081 = vsyncpa [#allocation4], 1 }

</bundles_post_ra>
